<compile_context>
chip_gen: v6e
topology: v6e:2x2x1
jax: 0.10.0
libtpu: 0.0.40
codegen_flags: <defaults>
</compile_context>

<pallas_src>
import math

import jax
import jax.numpy as jnp
from jax.experimental import pallas as pl
from jax.experimental.pallas import tpu as pltpu

_LN_EPS = 1e-5                       # torch.nn.LayerNorm default
_SQRT_2_OVER_PI = math.sqrt(2.0 / math.pi)
_PALLAS_MIN_ROWS = 64                # below this, Pallas launch overhead dominates
_MAX_TM = 512                        # row-tile cap (512 rows ~ 85% of mem-bound roofline)


def _round_up(x, m):
    return ((x + m - 1) // m) * m


# --------------------------------------------------------------------------- #
# Math shared by the Pallas kernels and the pure-JAX fallback path
# --------------------------------------------------------------------------- #
def _gelu(y):
    # tanh-approximation GELU. Differs from torch.nn.GELU()'s exact erf form by
    # < ~1e-3 absolute; the tanh goes to the EUP slot, roughly halving the VALU
    # epilogue work versus a polynomial erf.
    return 0.5 * y * (1.0 + jnp.tanh(_SQRT_2_OVER_PI * (y + 0.044715 * y * y * y)))


def _layernorm(y, gamma, beta):
    # LayerNorm over the (true, unpadded) channel dim, f32 math.
    mean = jnp.mean(y, axis=-1, keepdims=True)
    c = y - mean
    var = jnp.mean(c * c, axis=-1, keepdims=True)
    return c * jax.lax.rsqrt(var + _LN_EPS) * gamma + beta


def _two_stage_epilogue(y_f32, aux1, w2, aux2):
    """(pre-bias conv1 output) -> +b1 -> GELU -> LN -> conv2(1x1x1) -> +b2 -> GELU -> LN.

    aux rows: 0 = conv bias, 1 = LN gamma, 2 = LN beta. Used identically inside
    the Pallas kernels and on the pure-JAX fallback path (tiny blocks)."""
    y = _gelu(y_f32 + aux1[0:1, :])
    y = _layernorm(y, aux1[1:2, :], aux1[2:3, :])
    z = jnp.dot(y, w2, preferred_element_type=jnp.float32)     # f32 matmul, operand is in-kernel
    z = _gelu(z + aux2[0:1, :])
    z = _layernorm(z, aux2[1:2, :], aux2[2:3, :])
    return z


# --------------------------------------------------------------------------- #
# Pallas kernels
# --------------------------------------------------------------------------- #
def _fused_block_kernel(x_ref, w1_ref, aux1_ref, w2_ref, aux2_ref, o_ref):
    # conv1 as im2col matmul (bf16 operands, f32 accumulate) + fused epilogue.
    y = jnp.dot(x_ref[...], w1_ref[...], preferred_element_type=jnp.float32)
    o_ref[...] = _two_stage_epilogue(
        y, aux1_ref[...], w2_ref[...], aux2_ref[...]).astype(o_ref.dtype)


def _epilogue_block_kernel(y_ref, aux1_ref, w2_ref, aux2_ref, o_ref):
    # conv1 already computed by XLA's native conv (block 0); fuse everything after.
    o_ref[...] = _two_stage_epilogue(
        y_ref[...].astype(jnp.float32),
        aux1_ref[...], w2_ref[...], aux2_ref[...]).astype(o_ref.dtype)


# --------------------------------------------------------------------------- #
# Pallas wrapper
# --------------------------------------------------------------------------- #
def _choose_tm(m):
    """Row tile: one grid step for small/medium M (the grid is a serial loop on
    v5e/v6e, extra steps are pure overhead); 512-row tiles for large M (>= 2
    steps here, many at realistic volume sizes -> megacore sharding on v7x)."""
    if m <= _MAX_TM:
        return _round_up(m, 16)          # 16: bf16 sublane packing
    return _MAX_TM


def _pallas_block_call(kernel, streamed, resident, out_chns):
    """Run `kernel` over row tiles of the streamed (M, K) bf16 matrix with the
    small `resident` operands (weights / packed aux) held in VMEM every step."""
    m, k = streamed.shape
    tm = _choose_tm(m)
    m_pad = _round_up(m, tm)
    if m_pad != m:
        streamed = jnp.pad(streamed, ((0, m_pad - m), (0, 0)))   # zero rows, sliced off below

    res_specs = [pl.BlockSpec(r.shape, lambda i: (0, 0)) for r in resident]
    out = pl.pallas_call(
        kernel,
        out_shape=jax.ShapeDtypeStruct((m_pad, out_chns), jnp.float32),
        grid_spec=pltpu.PrefetchScalarGridSpec(
            num_scalar_prefetch=0,
            grid=(m_pad // tm,),
            in_specs=[pl.BlockSpec((tm, k), lambda i: (i, 0))] + res_specs,
            out_specs=pl.BlockSpec((tm, out_chns), lambda i: (i, 0)),
        ),
        compiler_params=pltpu.CompilerParams(dimension_semantics=("parallel",)),
    )(streamed, *resident)
    return out[:m]


# --------------------------------------------------------------------------- #
# im2col (stride == kernel blocks) — pure reshape/transpose, no patch expansion
# --------------------------------------------------------------------------- #
def _im2col_nonoverlap(x_cl, k):
    """x_cl: (B, D, H, W, C) bf16, stride == kernel, padding == 0.
    Row feature order is (kd, kh, kw, Cin)-major."""
    b, d, h, w, c = x_cl.shape
    do, ho, wo = d // k, h // k, w // k
    x = x_cl.reshape(b, do, k, ho, k, wo, k, c)
    x = jnp.transpose(x, (0, 1, 3, 5, 2, 4, 6, 7))   # (B, Do, Ho, Wo, kd, kh, kw, C)
    rows = x.reshape(b * do * ho * wo, k * k * k * c)
    return rows, (do, ho, wo)


# --------------------------------------------------------------------------- #
# EmbeddingBlock / Encoder forward
# --------------------------------------------------------------------------- #
def embedding_block(x_cl, p, use_pallas=True):
    """Conv3d -> GELU -> LN -> Conv3d(1x1x1) -> GELU -> LN. Channels-last in/out."""
    b = x_cl.shape[0]
    k, stride, pad = p["k"], p["stride"], p["pad"]

    if stride == k and pad == 0:
        rows, (do, ho, wo) = _im2col_nonoverlap(x_cl, k)          # bf16 rows
        if use_pallas and rows.shape[0] >= _PALLAS_MIN_ROWS:
            out = _pallas_block_call(
                _fused_block_kernel, rows,
                (p["w1"], p["aux1"], p["w2"], p["aux2"]), p["out"])
        else:
            # Tiny blocks: a pallas_call is dominated by launch/padding/DMA fixed
            # costs, so run the identical math as plain XLA ops.
            y = jnp.dot(rows, p["w1"], preferred_element_type=jnp.float32)
            out = _two_stage_epilogue(y, p["aux1"], p["w2"], p["aux2"])
    else:
        # Overlapping conv (block 0: 3x3x3, stride 1, pad 1). Use XLA's native
        # conv for conv1 (no 27x-expanded im2col patch matrix in HBM), then one
        # fused Pallas kernel for bias -> GELU -> LN -> 1x1x1 conv -> GELU -> LN.
        # TODO(synk): fold conv1 into the Pallas kernel with a halo'd spatial
        # BlockSpec (sum of 27 shifted matmuls) to also remove the (M, mid)
        # intermediate HBM round trip.
        y = jax.lax.conv_general_dilated(
            x_cl, p["w1_dhwio"],
            window_strides=(stride,) * 3,
            padding=[(pad, pad)] * 3,
            dimension_numbers=("NDHWC", "DHWIO", "NDHWC"),
            preferred_element_type=jnp.float32)
        do, ho, wo = y.shape[1:4]
        rows = y.reshape(b * do * ho * wo, p["mid"]).astype(jnp.bfloat16)
        if use_pallas and rows.shape[0] >= _PALLAS_MIN_ROWS:
            out = _pallas_block_call(
                _epilogue_block_kernel, rows,
                (p["aux1"], p["w2"], p["aux2"]), p["out"])
        else:
            out = _two_stage_epilogue(
                rows.astype(jnp.float32), p["aux1"], p["w2"], p["aux2"])

    return out.reshape(b, do, ho, wo, p["out"])


def _pack_aux(bias):
    """Pack conv bias + LN gamma/beta into one (8, N) f32 tile so each stage's
    per-channel vectors arrive in a single aligned 8-sublane DMA."""
    n = bias.shape[0]
    aux = jnp.zeros((8, n), jnp.float32)
    aux = aux.at[0].set(bias.astype(jnp.float32))        # conv bias
    aux = aux.at[1].set(jnp.ones((n,), jnp.float32))     # LN gamma
    # row 2 = LN beta (zeros); rows 3..7 are sublane padding
    return aux


def init_embedding_block(key, in_chns, out_chns, k, pad, stride):
    mid = out_chns // 2
    kdim = in_chns * k ** 3
    ks = jax.random.split(key, 4)
    lim1 = 1.0 / math.sqrt(kdim)
    lim2 = 1.0 / math.sqrt(mid)
    # Same init distribution as torch Conv3d defaults (uniform +-1/sqrt(fan_in)).
    w1 = jax.random.uniform(ks[0], (kdim, mid), jnp.float32, -lim1, lim1)
    b1 = jax.random.uniform(ks[1], (mid,), jnp.float32, -lim1, lim1)
    w2 = jax.random.uniform(ks[2], (mid, out_chns), jnp.float32, -lim2, lim2)
    b2 = jax.random.uniform(ks[3], (out_chns,), jnp.float32, -lim2, lim2)

    p = dict(k=k, pad=pad, stride=stride, mid=mid, out=out_chns,
             aux1=_pack_aux(b1), aux2=_pack_aux(b2),
             w2=w2)                                      # f32: kernel-internal matmul
    if stride == k and pad == 0:
        # Flattened (kd, kh, kw, Cin)-major, matching _im2col_nonoverlap row order.
        # (Torch weights would need a (Cout,Cin,kd,kh,kw) -> ((kd,kh,kw,Cin),Cout)
        # permutation when porting.)
        p["w1"] = w1.astype(jnp.bfloat16)
    else:
        p["w1_dhwio"] = w1.reshape(k, k, k, in_chns, mid).astype(jnp.bfloat16)
    return p


def init_encoder(key, in_chns, ft_chns):
    assert len(ft_chns) == 4
    ks = jax.random.split(key, 4)
    cfg = [(3, 1, 1), (2, 0, 2), (4, 0, 4), (8, 0, 8)]   # (kernel, pad, stride)
    return [init_embedding_block(ks[i], in_chns, ft_chns[i], *cfg[i]) for i in range(4)]


def medformer_va1_forward(x_ncdhw, encoder_params, use_pallas=True, channels_last=False):
    """Encoder forward. Input is PyTorch-layout NCDHW f32; internally everything
    runs channels-last in bf16 (one transpose of the raw input). Outputs match
    the PyTorch module layout (NCDHW f32) unless channels_last=True, which skips
    the per-feature transpose (one HBM round trip per feature map)."""
    x_cl = jnp.transpose(x_ncdhw, (0, 2, 3, 4, 1)).astype(jnp.bfloat16)
    feats = [embedding_block(x_cl, p, use_pallas=use_pallas) for p in encoder_params]
    if not channels_last:
        feats = [jnp.transpose(f, (0, 4, 1, 2, 3)) for f in feats]
    # TODO(synk): the Decoder class is not defined in the reference source, so the
    # forward returns the encoder feature pyramid (MedFormerVA1 minus the decoder).
    return feats


if __name__ == "__main__":
    key = jax.random.PRNGKey(0)
    k_param, k_x = jax.random.split(key)

    B, Cin, D, H, W = 2, 2, 8, 8, 8
    ft_chns = [16, 32, 64, 128]

    enc_params = init_encoder(k_param, Cin, ft_chns)
    x = jax.random.normal(k_x, (B, Cin, D, H, W), jnp.float32)

    fwd = jax.jit(lambda xx: medformer_va1_forward(xx, enc_params))
    feats = jax.block_until_ready(fwd(x))

    expected = [(B, 16, 8, 8, 8), (B, 32, 4, 4, 4), (B, 64, 2, 2, 2), (B, 128, 1, 1, 1)]
    for f, es in zip(feats, expected):
        assert f.shape == es, (f.shape, es)
        assert bool(jnp.all(jnp.isfinite(f))), "non-finite feature values"

    # Cross-check the Pallas path against the identical pure-JAX math path.
    ref = jax.block_until_ready(
        jax.jit(lambda xx: medformer_va1_forward(xx, enc_params, use_pallas=False))(x))
    for f, fr in zip(feats, ref):
        err = float(jnp.max(jnp.abs(f - fr)))
        assert err < 3e-2, f"pallas vs reference mismatch: {err}"

    print("KERNEL_OK")
</pallas_src>

<mosaic_0001>
module attributes {stable_mosaic.version = 11 : i64} {
  func.func @_fused_block_kernel(%arg0: i32, %arg1: memref<128x16xbf16, #tpu.memory_space<vmem>>, %arg2: memref<16x16xbf16, #tpu.memory_space<vmem>>, %arg3: memref<8x16xf32, #tpu.memory_space<vmem>>, %arg4: memref<16x32xf32, #tpu.memory_space<vmem>>, %arg5: memref<8x32xf32, #tpu.memory_space<vmem>>, %arg6: memref<128x32xf32, #tpu.memory_space<vmem>>) attributes {dimension_semantics = [#tpu.dimension_semantics<parallel>], iteration_bounds = array<i64: 1>, scalar_prefetch = 0 : i64, scratch_operands = 0 : i64, tpu.core_type = #tpu.core_type<tc>, window_params = [{transform_indices = @transform_0, window_bounds = array<i64: 128, 16>}, {pipeline_mode = #tpu.pipeline_mode<synchronous>, transform_indices = @transform_1, window_bounds = array<i64: 16, 16>}, {pipeline_mode = #tpu.pipeline_mode<synchronous>, transform_indices = @transform_2, window_bounds = array<i64: 8, 16>}, {pipeline_mode = #tpu.pipeline_mode<synchronous>, transform_indices = @transform_3, window_bounds = array<i64: 16, 32>}, {pipeline_mode = #tpu.pipeline_mode<synchronous>, transform_indices = @transform_4, window_bounds = array<i64: 8, 32>}, {transform_indices = @transform_5, window_bounds = array<i64: 128, 32>}]} {
    %c0 = arith.constant 0 : index
    %c0_0 = arith.constant 0 : index
    %0 = vector.load %arg1[%c0, %c0_0] : memref<128x16xbf16, #tpu.memory_space<vmem>>, vector<128x16xbf16>
    %c0_1 = arith.constant 0 : index
    %c0_2 = arith.constant 0 : index
    %1 = vector.load %arg2[%c0_1, %c0_2] : memref<16x16xbf16, #tpu.memory_space<vmem>>, vector<16x16xbf16>
    %cst = arith.constant dense<0.000000e+00> : vector<128x16xf32>
    %2 = tpu.matmul %0, %1, %cst {dimension_numbers = #tpu.dot_dimension_numbers<[1], [0], [0], [1], [0, 0, 1, 1], [], []>} : vector<128x16xbf16>, vector<16x16xbf16>, vector<128x16xf32> -> vector<128x16xf32>
    %c0_3 = arith.constant 0 : index
    %c0_4 = arith.constant 0 : index
    %3 = vector.load %arg3[%c0_3, %c0_4] : memref<8x16xf32, #tpu.memory_space<vmem>>, vector<8x16xf32>
    %c0_5 = arith.constant 0 : index
    %c0_6 = arith.constant 0 : index
    %4 = vector.load %arg4[%c0_5, %c0_6] : memref<16x32xf32, #tpu.memory_space<vmem>>, vector<16x32xf32>
    %c0_7 = arith.constant 0 : index
    %c0_8 = arith.constant 0 : index
    %5 = vector.load %arg5[%c0_7, %c0_8] : memref<8x32xf32, #tpu.memory_space<vmem>>, vector<8x32xf32>
    %6 = vector.extract_strided_slice %3 {offsets = [0, 0], sizes = [1, 16], strides = [1, 1]} : vector<8x16xf32> to vector<1x16xf32>
    %7 = vector.broadcast %6 : vector<1x16xf32> to vector<128x16xf32>
    %8 = arith.addf %2, %7 : vector<128x16xf32>
    %cst_9 = arith.constant 5.000000e-01 : f32
    %9 = vector.broadcast %cst_9 : f32 to vector<128x16xf32>
    %10 = arith.mulf %9, %8 : vector<128x16xf32>
    %cst_10 = arith.constant 4.471500e-02 : f32
    %11 = vector.broadcast %cst_10 : f32 to vector<128x16xf32>
    %12 = arith.mulf %11, %8 : vector<128x16xf32>
    %13 = arith.mulf %12, %8 : vector<128x16xf32>
    %14 = arith.mulf %13, %8 : vector<128x16xf32>
    %15 = arith.addf %8, %14 : vector<128x16xf32>
    %cst_11 = arith.constant 0.797884583 : f32
    %16 = vector.broadcast %cst_11 : f32 to vector<128x16xf32>
    %17 = arith.mulf %16, %15 : vector<128x16xf32>
    %18 = math.tanh %17 : vector<128x16xf32>
    %cst_12 = arith.constant 1.000000e+00 : f32
    %19 = vector.broadcast %cst_12 : f32 to vector<128x16xf32>
    %20 = arith.addf %19, %18 : vector<128x16xf32>
    %21 = arith.mulf %10, %20 : vector<128x16xf32>
    %22 = vector.extract_strided_slice %3 {offsets = [1, 0], sizes = [1, 16], strides = [1, 1]} : vector<8x16xf32> to vector<1x16xf32>
    %23 = vector.extract_strided_slice %3 {offsets = [2, 0], sizes = [1, 16], strides = [1, 1]} : vector<8x16xf32> to vector<1x16xf32>
    %cst_13 = arith.constant dense<0.000000e+00> : vector<128xf32>
    %24 = vector.multi_reduction <add>, %21, %cst_13 [1] : vector<128x16xf32> to vector<128xf32>
    %25 = vector.shape_cast %24 : vector<128xf32> to vector<128x1xf32>
    %cst_14 = arith.constant 1.600000e+01 : f32
    %26 = vector.broadcast %cst_14 : f32 to vector<128x1xf32>
    %27 = arith.divf %25, %26 : vector<128x1xf32>
    %28 = vector.broadcast %27 : vector<128x1xf32> to vector<128x16xf32>
    %29 = arith.subf %21, %28 : vector<128x16xf32>
    %30 = arith.mulf %29, %29 : vector<128x16xf32>
    %cst_15 = arith.constant dense<0.000000e+00> : vector<128xf32>
    %31 = vector.multi_reduction <add>, %30, %cst_15 [1] : vector<128x16xf32> to vector<128xf32>
    %32 = vector.shape_cast %31 : vector<128xf32> to vector<128x1xf32>
    %cst_16 = arith.constant 1.600000e+01 : f32
    %33 = vector.broadcast %cst_16 : f32 to vector<128x1xf32>
    %34 = arith.divf %32, %33 : vector<128x1xf32>
    %cst_17 = arith.constant 9.99999974E-6 : f32
    %35 = vector.broadcast %cst_17 : f32 to vector<128x1xf32>
    %36 = arith.addf %34, %35 : vector<128x1xf32>
    %37 = math.rsqrt %36 : vector<128x1xf32>
    %38 = vector.broadcast %37 : vector<128x1xf32> to vector<128x16xf32>
    %39 = arith.mulf %29, %38 : vector<128x16xf32>
    %40 = vector.broadcast %22 : vector<1x16xf32> to vector<128x16xf32>
    %41 = arith.mulf %39, %40 : vector<128x16xf32>
    %42 = vector.broadcast %23 : vector<1x16xf32> to vector<128x16xf32>
    %43 = arith.addf %41, %42 : vector<128x16xf32>
    %cst_18 = arith.constant dense<0.000000e+00> : vector<128x32xf32>
    %44 = tpu.matmul %43, %4, %cst_18 {dimension_numbers = #tpu.dot_dimension_numbers<[1], [0], [0], [1], [0, 0, 1, 1], [], []>} : vector<128x16xf32>, vector<16x32xf32>, vector<128x32xf32> -> vector<128x32xf32>
    %45 = vector.extract_strided_slice %5 {offsets = [0, 0], sizes = [1, 32], strides = [1, 1]} : vector<8x32xf32> to vector<1x32xf32>
    %46 = vector.broadcast %45 : vector<1x32xf32> to vector<128x32xf32>
    %47 = arith.addf %44, %46 : vector<128x32xf32>
    %cst_19 = arith.constant 5.000000e-01 : f32
    %48 = vector.broadcast %cst_19 : f32 to vector<128x32xf32>
    %49 = arith.mulf %48, %47 : vector<128x32xf32>
    %cst_20 = arith.constant 4.471500e-02 : f32
    %50 = vector.broadcast %cst_20 : f32 to vector<128x32xf32>
    %51 = arith.mulf %50, %47 : vector<128x32xf32>
    %52 = arith.mulf %51, %47 : vector<128x32xf32>
    %53 = arith.mulf %52, %47 : vector<128x32xf32>
    %54 = arith.addf %47, %53 : vector<128x32xf32>
    %cst_21 = arith.constant 0.797884583 : f32
    %55 = vector.broadcast %cst_21 : f32 to vector<128x32xf32>
    %56 = arith.mulf %55, %54 : vector<128x32xf32>
    %57 = math.tanh %56 : vector<128x32xf32>
    %cst_22 = arith.constant 1.000000e+00 : f32
    %58 = vector.broadcast %cst_22 : f32 to vector<128x32xf32>
    %59 = arith.addf %58, %57 : vector<128x32xf32>
    %60 = arith.mulf %49, %59 : vector<128x32xf32>
    %61 = vector.extract_strided_slice %5 {offsets = [1, 0], sizes = [1, 32], strides = [1, 1]} : vector<8x32xf32> to vector<1x32xf32>
    %62 = vector.extract_strided_slice %5 {offsets = [2, 0], sizes = [1, 32], strides = [1, 1]} : vector<8x32xf32> to vector<1x32xf32>
    %cst_23 = arith.constant dense<0.000000e+00> : vector<128xf32>
    %63 = vector.multi_reduction <add>, %60, %cst_23 [1] : vector<128x32xf32> to vector<128xf32>
    %64 = vector.shape_cast %63 : vector<128xf32> to vector<128x1xf32>
    %cst_24 = arith.constant 3.200000e+01 : f32
    %65 = vector.broadcast %cst_24 : f32 to vector<128x1xf32>
    %66 = arith.divf %64, %65 : vector<128x1xf32>
    %67 = vector.broadcast %66 : vector<128x1xf32> to vector<128x32xf32>
    %68 = arith.subf %60, %67 : vector<128x32xf32>
    %69 = arith.mulf %68, %68 : vector<128x32xf32>
    %cst_25 = arith.constant dense<0.000000e+00> : vector<128xf32>
    %70 = vector.multi_reduction <add>, %69, %cst_25 [1] : vector<128x32xf32> to vector<128xf32>
    %71 = vector.shape_cast %70 : vector<128xf32> to vector<128x1xf32>
    %cst_26 = arith.constant 3.200000e+01 : f32
    %72 = vector.broadcast %cst_26 : f32 to vector<128x1xf32>
    %73 = arith.divf %71, %72 : vector<128x1xf32>
    %cst_27 = arith.constant 9.99999974E-6 : f32
    %74 = vector.broadcast %cst_27 : f32 to vector<128x1xf32>
    %75 = arith.addf %73, %74 : vector<128x1xf32>
    %76 = math.rsqrt %75 : vector<128x1xf32>
    %77 = vector.broadcast %76 : vector<128x1xf32> to vector<128x32xf32>
    %78 = arith.mulf %68, %77 : vector<128x32xf32>
    %79 = vector.broadcast %61 : vector<1x32xf32> to vector<128x32xf32>
    %80 = arith.mulf %78, %79 : vector<128x32xf32>
    %81 = vector.broadcast %62 : vector<1x32xf32> to vector<128x32xf32>
    %82 = arith.addf %80, %81 : vector<128x32xf32>
    %c0_28 = arith.constant 0 : index
    %c0_29 = arith.constant 0 : index
    %83 = vector.load %arg6[%c0_28, %c0_29] : memref<128x32xf32, #tpu.memory_space<vmem>>, vector<128x32xf32>
    tpu.vector_store %arg6[%c0_28, %c0_29], %82 {strides = array<i32>} : memref<128x32xf32, #tpu.memory_space<vmem>>, vector<128x32xf32>,
    return
  }
  func.func @transform_0(%arg0: i32) -> (i32, i32) {
    %c0_i32 = arith.constant 0 : i32
    %c0_i32_0 = arith.constant 0 : i32
    return %arg0, %c0_i32 : i32, i32
  }
  func.func @transform_1(%arg0: i32) -> (i32, i32) {
    %c0_i32 = arith.constant 0 : i32
    %c0_i32_0 = arith.constant 0 : i32
    %c0_i32_1 = arith.constant 0 : i32
    return %c0_i32, %c0_i32_0 : i32, i32
  }
  func.func @transform_2(%arg0: i32) -> (i32, i32) {
    %c0_i32 = arith.constant 0 : i32
    %c0_i32_0 = arith.constant 0 : i32
    %c0_i32_1 = arith.constant 0 : i32
    return %c0_i32, %c0_i32_0 : i32, i32
  }
  func.func @transform_3(%arg0: i32) -> (i32, i32) {
    %c0_i32 = arith.constant 0 : i32
    %c0_i32_0 = arith.constant 0 : i32
    %c0_i32_1 = arith.constant 0 : i32
    return %c0_i32, %c0_i32_0 : i32, i32
  }
  func.func @transform_4(%arg0: i32) -> (i32, i32) {
    %c0_i32 = arith.constant 0 : i32
    %c0_i32_0 = arith.constant 0 : i32
    %c0_i32_1 = arith.constant 0 : i32
    return %c0_i32, %c0_i32_0 : i32, i32
  }
  func.func @transform_5(%arg0: i32) -> (i32, i32) {
    %c0_i32 = arith.constant 0 : i32
    %c0_i32_0 = arith.constant 0 : i32
    return %arg0, %c0_i32 : i32, i32
  }
}

module attributes {stable_mosaic.version = 11 : i64} {
  func.func @_epilogue_block_kernel(%arg0: i32, %arg1: memref<512x8xbf16, #tpu.memory_space<vmem>>, %arg2: memref<8x8xf32, #tpu.memory_space<vmem>>, %arg3: memref<8x16xf32, #tpu.memory_space<vmem>>, %arg4: memref<8x16xf32, #tpu.memory_space<vmem>>, %arg5: memref<512x16xf32, #tpu.memory_space<vmem>>) attributes {dimension_semantics = [#tpu.dimension_semantics<parallel>], iteration_bounds = array<i64: 2>, scalar_prefetch = 0 : i64, scratch_operands = 0 : i64, tpu.core_type = #tpu.core_type<tc>, window_params = [{transform_indices = @transform_0, window_bounds = array<i64: 512, 8>}, {pipeline_mode = #tpu.pipeline_mode<synchronous>, transform_indices = @transform_1, window_bounds = array<i64: 8, 8>}, {pipeline_mode = #tpu.pipeline_mode<synchronous>, transform_indices = @transform_2, window_bounds = array<i64: 8, 16>}, {pipeline_mode = #tpu.pipeline_mode<synchronous>, transform_indices = @transform_3, window_bounds = array<i64: 8, 16>}, {transform_indices = @transform_4, window_bounds = array<i64: 512, 16>}]} {
    %c0 = arith.constant 0 : index
    %c0_0 = arith.constant 0 : index
    %0 = vector.load %arg1[%c0, %c0_0] : memref<512x8xbf16, #tpu.memory_space<vmem>>, vector<512x8xbf16>
    %1 = arith.extf %0 : vector<512x8xbf16> to vector<512x8xf32>
    %c0_1 = arith.constant 0 : index
    %c0_2 = arith.constant 0 : index
    %2 = vector.load %arg2[%c0_1, %c0_2] : memref<8x8xf32, #tpu.memory_space<vmem>>, vector<8x8xf32>
    %c0_3 = arith.constant 0 : index
    %c0_4 = arith.constant 0 : index
    %3 = vector.load %arg3[%c0_3, %c0_4] : memref<8x16xf32, #tpu.memory_space<vmem>>, vector<8x16xf32>
    %c0_5 = arith.constant 0 : index
    %c0_6 = arith.constant 0 : index
    %4 = vector.load %arg4[%c0_5, %c0_6] : memref<8x16xf32, #tpu.memory_space<vmem>>, vector<8x16xf32>
    %5 = vector.extract_strided_slice %2 {offsets = [0, 0], sizes = [1, 8], strides = [1, 1]} : vector<8x8xf32> to vector<1x8xf32>
    %6 = vector.broadcast %5 : vector<1x8xf32> to vector<512x8xf32>
    %7 = arith.addf %1, %6 : vector<512x8xf32>
    %cst = arith.constant 5.000000e-01 : f32
    %8 = vector.broadcast %cst : f32 to vector<512x8xf32>
    %9 = arith.mulf %8, %7 : vector<512x8xf32>
    %cst_7 = arith.constant 4.471500e-02 : f32
    %10 = vector.broadcast %cst_7 : f32 to vector<512x8xf32>
    %11 = arith.mulf %10, %7 : vector<512x8xf32>
    %12 = arith.mulf %11, %7 : vector<512x8xf32>
    %13 = arith.mulf %12, %7 : vector<512x8xf32>
    %14 = arith.addf %7, %13 : vector<512x8xf32>
    %cst_8 = arith.constant 0.797884583 : f32
    %15 = vector.broadcast %cst_8 : f32 to vector<512x8xf32>
    %16 = arith.mulf %15, %14 : vector<512x8xf32>
    %17 = math.tanh %16 : vector<512x8xf32>
    %cst_9 = arith.constant 1.000000e+00 : f32
    %18 = vector.broadcast %cst_9 : f32 to vector<512x8xf32>
    %19 = arith.addf %18, %17 : vector<512x8xf32>
    %20 = arith.mulf %9, %19 : vector<512x8xf32>
    %21 = vector.extract_strided_slice %2 {offsets = [1, 0], sizes = [1, 8], strides = [1, 1]} : vector<8x8xf32> to vector<1x8xf32>
    %22 = vector.extract_strided_slice %2 {offsets = [2, 0], sizes = [1, 8], strides = [1, 1]} : vector<8x8xf32> to vector<1x8xf32>
    %cst_10 = arith.constant dense<0.000000e+00> : vector<512xf32>
    %23 = vector.multi_reduction <add>, %20, %cst_10 [1] : vector<512x8xf32> to vector<512xf32>
    %24 = vector.shape_cast %23 : vector<512xf32> to vector<512x1xf32>
    %cst_11 = arith.constant 8.000000e+00 : f32
    %25 = vector.broadcast %cst_11 : f32 to vector<512x1xf32>
    %26 = arith.divf %24, %25 : vector<512x1xf32>
    %27 = vector.broadcast %26 : vector<512x1xf32> to vector<512x8xf32>
    %28 = arith.subf %20, %27 : vector<512x8xf32>
    %29 = arith.mulf %28, %28 : vector<512x8xf32>
    %cst_12 = arith.constant dense<0.000000e+00> : vector<512xf32>
    %30 = vector.multi_reduction <add>, %29, %cst_12 [1] : vector<512x8xf32> to vector<512xf32>
    %31 = vector.shape_cast %30 : vector<512xf32> to vector<512x1xf32>
    %cst_13 = arith.constant 8.000000e+00 : f32
    %32 = vector.broadcast %cst_13 : f32 to vector<512x1xf32>
    %33 = arith.divf %31, %32 : vector<512x1xf32>
    %cst_14 = arith.constant 9.99999974E-6 : f32
    %34 = vector.broadcast %cst_14 : f32 to vector<512x1xf32>
    %35 = arith.addf %33, %34 : vector<512x1xf32>
    %36 = math.rsqrt %35 : vector<512x1xf32>
    %37 = vector.broadcast %36 : vector<512x1xf32> to vector<512x8xf32>
    %38 = arith.mulf %28, %37 : vector<512x8xf32>
    %39 = vector.broadcast %21 : vector<1x8xf32> to vector<512x8xf32>
    %40 = arith.mulf %38, %39 : vector<512x8xf32>
    %41 = vector.broadcast %22 : vector<1x8xf32> to vector<512x8xf32>
    %42 = arith.addf %40, %41 : vector<512x8xf32>
    %cst_15 = arith.constant dense<0.000000e+00> : vector<512x16xf32>
    %43 = tpu.matmul %42, %3, %cst_15 {dimension_numbers = #tpu.dot_dimension_numbers<[1], [0], [0], [1], [0, 0, 1, 1], [], []>} : vector<512x8xf32>, vector<8x16xf32>, vector<512x16xf32> -> vector<512x16xf32>
    %44 = vector.extract_strided_slice %4 {offsets = [0, 0], sizes = [1, 16], strides = [1, 1]} : vector<8x16xf32> to vector<1x16xf32>
    %45 = vector.broadcast %44 : vector<1x16xf32> to vector<512x16xf32>
    %46 = arith.addf %43, %45 : vector<512x16xf32>
    %cst_16 = arith.constant 5.000000e-01 : f32
    %47 = vector.broadcast %cst_16 : f32 to vector<512x16xf32>
    %48 = arith.mulf %47, %46 : vector<512x16xf32>
    %cst_17 = arith.constant 4.471500e-02 : f32
    %49 = vector.broadcast %cst_17 : f32 to vector<512x16xf32>
    %50 = arith.mulf %49, %46 : vector<512x16xf32>
    %51 = arith.mulf %50, %46 : vector<512x16xf32>
    %52 = arith.mulf %51, %46 : vector<512x16xf32>
    %53 = arith.addf %46, %52 : vector<512x16xf32>
    %cst_18 = arith.constant 0.797884583 : f32
    %54 = vector.broadcast %cst_18 : f32 to vector<512x16xf32>
    %55 = arith.mulf %54, %53 : vector<512x16xf32>
    %56 = math.tanh %55 : vector<512x16xf32>
    %cst_19 = arith.constant 1.000000e+00 : f32
    %57 = vector.broadcast %cst_19 : f32 to vector<512x16xf32>
    %58 = arith.addf %57, %56 : vector<512x16xf32>
    %59 = arith.mulf %48, %58 : vector<512x16xf32>
    %60 = vector.extract_strided_slice %4 {offsets = [1, 0], sizes = [1, 16], strides = [1, 1]} : vector<8x16xf32> to vector<1x16xf32>
    %61 = vector.extract_strided_slice %4 {offsets = [2, 0], sizes = [1, 16], strides = [1, 1]} : vector<8x16xf32> to vector<1x16xf32>
    %cst_20 = arith.constant dense<0.000000e+00> : vector<512xf32>
    %62 = vector.multi_reduction <add>, %59, %cst_20 [1] : vector<512x16xf32> to vector<512xf32>
    %63 = vector.shape_cast %62 : vector<512xf32> to vector<512x1xf32>
    %cst_21 = arith.constant 1.600000e+01 : f32
    %64 = vector.broadcast %cst_21 : f32 to vector<512x1xf32>
    %65 = arith.divf %63, %64 : vector<512x1xf32>
    %66 = vector.broadcast %65 : vector<512x1xf32> to vector<512x16xf32>
    %67 = arith.subf %59, %66 : vector<512x16xf32>
    %68 = arith.mulf %67, %67 : vector<512x16xf32>
    %cst_22 = arith.constant dense<0.000000e+00> : vector<512xf32>
    %69 = vector.multi_reduction <add>, %68, %cst_22 [1] : vector<512x16xf32> to vector<512xf32>
    %70 = vector.shape_cast %69 : vector<512xf32> to vector<512x1xf32>
    %cst_23 = arith.constant 1.600000e+01 : f32
    %71 = vector.broadcast %cst_23 : f32 to vector<512x1xf32>
    %72 = arith.divf %70, %71 : vector<512x1xf32>
    %cst_24 = arith.constant 9.99999974E-6 : f32
    %73 = vector.broadcast %cst_24 : f32 to vector<512x1xf32>
    %74 = arith.addf %72, %73 : vector<512x1xf32>
    %75 = math.rsqrt %74 : vector<512x1xf32>
    %76 = vector.broadcast %75 : vector<512x1xf32> to vector<512x16xf32>
    %77 = arith.mulf %67, %76 : vector<512x16xf32>
    %78 = vector.broadcast %60 : vector<1x16xf32> to vector<512x16xf32>
    %79 = arith.mulf %77, %78 : vector<512x16xf32>
    %80 = vector.broadcast %61 : vector<1x16xf32> to vector<512x16xf32>
    %81 = arith.addf %79, %80 : vector<512x16xf32>
    %c0_25 = arith.constant 0 : index
    %c0_26 = arith.constant 0 : index
    %82 = vector.load %arg5[%c0_25, %c0_26] : memref<512x16xf32, #tpu.memory_space<vmem>>, vector<512x16xf32>
    tpu.vector_store %arg5[%c0_25, %c0_26], %81 {strides = array<i32>} : memref<512x16xf32, #tpu.memory_space<vmem>>, vector<512x16xf32>,
    return
  }
  func.func @transform_0(%arg0: i32) -> (i32, i32) {
    %c0_i32 = arith.constant 0 : i32
    %c0_i32_0 = arith.constant 0 : i32
    return %arg0, %c0_i32 : i32, i32
  }
  func.func @transform_1(%arg0: i32) -> (i32, i32) {
    %c0_i32 = arith.constant 0 : i32
    %c0_i32_0 = arith.constant 0 : i32
    %c0_i32_1 = arith.constant 0 : i32
    return %c0_i32, %c0_i32_0 : i32, i32
  }
  func.func @transform_2(%arg0: i32) -> (i32, i32) {
    %c0_i32 = arith.constant 0 : i32
    %c0_i32_0 = arith.constant 0 : i32
    %c0_i32_1 = arith.constant 0 : i32
    return %c0_i32, %c0_i32_0 : i32, i32
  }
  func.func @transform_3(%arg0: i32) -> (i32, i32) {
    %c0_i32 = arith.constant 0 : i32
    %c0_i32_0 = arith.constant 0 : i32
    %c0_i32_1 = arith.constant 0 : i32
    return %c0_i32, %c0_i32_0 : i32, i32
  }
  func.func @transform_4(%arg0: i32) -> (i32, i32) {
    %c0_i32 = arith.constant 0 : i32
    %c0_i32_0 = arith.constant 0 : i32
    return %arg0, %c0_i32 : i32, i32
  }
}

</mosaic_0001>

<bundles_post_ra>
// kernel: _lambda_.3
= control target key start
LH: loop header
LB: loop body
LE: loop exit
PB: predicated region body
PF: predicated region fallthrough
CT: control target
= control target key end

     0   :  { %vm94_vm0 = vcmask 130048   ;;  %s2326_s0 = inlined_call_operand.vmem [shape: bf16[128,16], index: 0, kind: input, shape index: {}]   ;;  %s2327_s1 = inlined_call_operand.vmem [shape: bf16[16,16], index: 1, kind: input, shape index: {}]   ;;  %s2328_s2 = inlined_call_operand.vmem [shape: f32[8,16], index: 2, kind: input, shape index: {}]   ;;  %s2329_s3 = inlined_call_operand.vmem [shape: f32[16,32], index: 3, kind: input, shape index: {}]   ;;  %s2330_s4 = inlined_call_operand.vmem [shape: f32[8,32], index: 4, kind: input, shape index: {}]   ;;  %s2331_s5 = inlined_call_operand.hbm [shape: f32[128,32], index: 5, kind: output, shape index: {}]  }
   0x1   :  { %v1341_v0 = vld [vmem:[%s2327_s1] sm:$0xff]   ;;  %v1343_v2 = vld [vmem:[%s2326_s0 + $0x8] sm:$0xff]   ;;  %v1344_v3 = vld [vmem:[%s2326_s0 + $0x10] sm:$0xff]  }
   0x2   :  { %v1342_v1 = vld [vmem:[%s2326_s0] sm:$0xff]   ;;  %1292 = vmatprep.subr.bf16.mxu0 %v1341_v0 }
   0x3   :  { %1293 = vmatpush3.bf16.msra.mxu0 %v1341_v0  ;;  %1294 = vmatprep.mubr.msk.bf16.mxu0 %vm94_vm0, %v1342_v1 }
   0x6   :  { %1295 = vmatmul.mubr.msk.bf16.vlgmr.msra.gmra.mxu0 %vm94_vm0, %v1343_v2 }
   0x7   :  { %1298 = vmatprep.mubr.msk.bf16.mxu0 %vm94_vm0, %v1344_v3 }
   0x8   :  { %10 = vsyncpa [#allocation3], 0  ;;  %v1345_v4 = vld [vmem:[%s2326_s0 + $0x18] sm:$0xff]   ;;  %v1346_v5 = vld [vmem:[%s2326_s0 + $0x20] sm:$0xff]   ;;  %v44_v9 = vlaneseq  ;;  %vm950_vm1 = vcmask 261120  }
   0x9   :  { %v1347_v6 = vld [vmem:[%s2326_s0 + $0x28] sm:$0xff]   ;;  %v1348_v7 = vld [vmem:[%s2326_s0 + $0x30] sm:$0xff]   ;;  %v1349_v8 = vld [vmem:[%s2326_s0 + $0x38] sm:$0xff]  }
   0xa   :  { %v1568_v10 = vshrl.u32 %v44_v9, 7  ;;  %v1574_v12 = vld [vmem:[%s2328_s2] sm:$0xff] }
   0xc   :  { %v46_v11 = vsub.s32 0, %v1568_v10 }
   0xe   :  { %1299 = vmatmul.mubr.msk.bf16.gmra.mxu0 %vm94_vm0, %v1345_v4  ;;  %v1579_v13 = vrot.slane %v1574_v12, %v46_v11 }
   0xf   :  { %1302 = vmatprep.mubr.msk.bf16.mxu0 %vm94_vm0, %v1346_v5 }
  0x16   :  { %1303 = vmatmul.mubr.msk.bf16.gmra.mxu0 %vm94_vm0, %v1347_v6 }
  0x17   :  { %1306 = vmatprep.mubr.msk.bf16.mxu0 %vm94_vm0, %v1348_v7 }
  0x1e   :  { %1307 = vmatmul.mubr.msk.bf16.gmra.mxu0 %vm94_vm0, %v1349_v8 }
  0xc6   :  { %v1296_v14 = vpop.f32.mrf.mxu0 }
  0xc7   :  { %v1582_v15 = vadd.f32 %v1296_v14, %v1579_v13 }
  0xc8   :  { %v153_v16 = vpop.f32.mrf.mxu0 }
  0xc9   :  { %v234_v17 = vmul.f32 0.044715, %v1582_v15  ;;  %v1586_v18 = vadd.f32 %v153_v16, %v1579_v13  ;;  %v218_v16 = vmul.f32 0.5, %v1582_v15 }
  0xca   :  { %v1297_v19 = vpop.f32.mrf.mxu0 }
  0xcb   :  { %v232_v20 = vmul.f32 0.044715, %v1586_v18  ;;  %v1590_v21 = vadd.f32 %v1297_v19, %v1579_v13  ;;  %v250_v22 = vmul.f32 %v234_v17, %v1582_v15 }
  0xcc   :  { %v156_v23 = vpop.f32.mrf.mxu0 }
  0xcd   :  { %v235_v24 = vmul.f32 0.044715, %v1590_v21  ;;  %v1595_v25 = vadd.f32 %v156_v23, %v1579_v13  ;;  %v266_v26 = vmul.f32 %v250_v22, %v1582_v15  ;;  %v248_v27 = vmul.f32 %v232_v20, %v1586_v18 }
  0xce   :  { %v1300_v28 = vpop.f32.mrf.mxu0 }
  0xcf   :  { %v233_v29 = vmul.f32 0.044715, %v1595_v25  ;;  %v1601_v30 = vadd.f32 %v1300_v28, %v1579_v13  ;;  %v282_v31 = vadd.f32 %v266_v26, %v1582_v15  ;;  %v264_v32 = vmul.f32 %v248_v27, %v1586_v18 }
  0xd0   :  { %v169_v33 = vpop.f32.mrf.mxu0  ;;  %v251_v34 = vmul.f32 %v235_v24, %v1590_v21  ;;  %v216_v26 = vmul.f32 0.5, %v1586_v18 }
  0xd1   :  { %v238_v35 = vmul.f32 0.044715, %v1601_v30  ;;  %v1608_v36 = vadd.f32 %v169_v33, %v1579_v13  ;;  %v298_v37 = vmul.f32 0.7978846, %v282_v31  ;;  %v280_v38 = vadd.f32 %v264_v32, %v1586_v18 }
  0xd2   :  { %v1301_v39 = vpop.f32.mrf.mxu0  ;;  %v267_v40 = vmul.f32 %v251_v34, %v1590_v21  ;;  %v249_v41 = vmul.f32 %v233_v29, %v1595_v25  ;;  %v219_v31 = vmul.f32 0.5, %v1590_v21  ;;  %v217_v32 = vmul.f32 0.5, %v1595_v25 }
  0xd3   :  { %v236_v42 = vmul.f32 0.044715, %v1608_v36  ;;  %v1615_v43 = vadd.f32 %v1301_v39, %v1579_v13  ;;  %1350 = vtanh.f32 %v298_v37  ;;  %v296_v44 = vmul.f32 0.7978846, %v280_v38 }
  0xd4   :  { %v172_v45 = vpop.f32.mrf.mxu0  ;;  %v283_v46 = vadd.f32 %v267_v40, %v1590_v21  ;;  %v265_v47 = vmul.f32 %v249_v41, %v1595_v25  ;;  %v254_v48 = vmul.f32 %v238_v35, %v1601_v30 }
  0xd5   :  { %v239_v49 = vmul.f32 0.044715, %v1615_v43  ;;  %v1622_v50 = vadd.f32 %v172_v45, %v1579_v13  ;;  %1352 = vtanh.f32 %v296_v44  ;;  %v252_v51 = vmul.f32 %v236_v42, %v1608_v36 }
  0xd6   :  { %v1304_v52 = vpop.f32.mrf.mxu0  ;;  %v299_v53 = vmul.f32 0.7978846, %v283_v46  ;;  %v281_v54 = vadd.f32 %v265_v47, %v1595_v25  ;;  %v270_v55 = vmul.f32 %v254_v48, %v1601_v30 }
  0xd7   :  { %v237_v56 = vmul.f32 0.044715, %v1622_v50  ;;  %v1629_v57 = vadd.f32 %v1304_v52, %v1579_v13  ;;  %v268_v58 = vmul.f32 %v252_v51, %v1608_v36  ;;  %v255_v62 = vmul.f32 %v239_v49, %v1615_v43 }
  0xd8   :  { %v185_v59 = vpop.f32.mrf.mxu0  ;;  %1354 = vtanh.f32 %v299_v53  ;;  %v297_v60 = vmul.f32 0.7978846, %v281_v54  ;;  %v286_v61 = vadd.f32 %v270_v55, %v1601_v30 }
  0xd9   :  { %v242_v63 = vmul.f32 0.044715, %v1629_v57  ;;  %v1636_v0 = vadd.f32 %v185_v59, %v1579_v13  ;;  %v284_v1 = vadd.f32 %v268_v58, %v1608_v36  ;;  %v253_v2 = vmul.f32 %v237_v56, %v1622_v50 }
  0xda   :  { %v1305_v3 = vpop.f32.mrf.mxu0  ;;  %1356 = vtanh.f32 %v297_v60  ;;  %v302_v4 = vmul.f32 0.7978846, %v286_v61  ;;  %v271_v5 = vmul.f32 %v255_v62, %v1615_v43 }
  0xdb   :  { %v240_v6 = vmul.f32 0.044715, %v1636_v0  ;;  %v1643_v7 = vadd.f32 %v1305_v3, %v1579_v13  ;;  %v300_v8 = vmul.f32 0.7978846, %v284_v1  ;;  %v269_v9 = vmul.f32 %v253_v2, %v1622_v50 }
  0xdc   :  { %v188_v14 = vpop.f32.mrf.mxu0  ;;  %1358 = vtanh.f32 %v302_v4  ;;  %v287_v17 = vadd.f32 %v271_v5, %v1615_v43  ;;  %v258_v19 = vmul.f32 %v242_v63, %v1629_v57 }
  0xdd   :  { %v243_v20 = vmul.f32 0.044715, %v1643_v7  ;;  %v1651_v22 = vadd.f32 %v188_v14, %v1579_v13  ;;  %1360 = vtanh.f32 %v300_v8  ;;  %v285_v23 = vadd.f32 %v269_v9, %v1622_v50 }
  0xde   :  { %v1308_v24 = vpop.f32.mrf.mxu0  ;;  %v303_v27 = vmul.f32 0.7978846, %v287_v17  ;;  %v256_v28 = vmul.f32 %v240_v6, %v1636_v0  ;;  %v274_v15 = vmul.f32 %v258_v19, %v1629_v57 }
  0xdf   :  { %v241_v29 = vmul.f32 0.044715, %v1651_v22  ;;  %v301_v33 = vmul.f32 0.7978846, %v285_v23  ;;  %v259_v18 = vmul.f32 %v243_v20, %v1643_v7  ;;  %v1664_v39 = vadd.f32 %v1308_v24, %v1579_v13 }
  0xe0   :  { %v1351_v34 = vpop.eup %1350  ;;  %v201_v35 = vpop.f32.mrf.mxu0  ;;  %1362 = vtanh.f32 %v303_v27  ;;  %v272_v37 = vmul.f32 %v256_v28, %v1636_v0  ;;  %v290_v38 = vadd.f32 %v274_v15, %v1629_v57  ;;  %v220_v24 = vmul.f32 0.5, %v1608_v36 }
  0xe1   :  { %v1667_v40 = vadd.f32 %v201_v35, %v1579_v13  ;;  %v330_v41 = vadd.f32 1.0, %v1351_v34  ;;  %1364 = vtanh.f32 %v301_v33  ;;  %v257_v44 = vmul.f32 %v241_v29, %v1651_v22 }
  0xe2   :  { %v1353_v21 = vpop.eup %1352  ;;  %v1309_v25 = vpop.f32.mrf.mxu0  ;;  %v288_v42 = vadd.f32 %v272_v37, %v1636_v0  ;;  %v306_v45 = vmul.f32 0.7978846, %v290_v38  ;;  %v275_v46 = vmul.f32 %v259_v18, %v1643_v7  ;;  %v246_v58 = vmul.f32 0.044715, %v1664_v39 }
  0xe3   :  { %v244_v47 = vmul.f32 0.044715, %v1667_v40  ;;  %v1674_v48 = vadd.f32 %v1309_v25, %v1579_v13  ;;  %v1676_v49 = vmul.f32 %v330_v41, %v218_v16  ;;  %v328_v51 = vadd.f32 1.0, %v1353_v21 }
  0xe4   :  { %v204_v52 = vpop.f32.mrf.mxu0  ;;  %v304_v53 = vmul.f32 0.7978846, %v288_v42  ;;  %v273_v54 = vmul.f32 %v257_v44, %v1651_v22  ;;  %1366 = vtanh.f32 %v306_v45  ;;  %v291_v55 = vadd.f32 %v275_v46, %v1643_v7 }
  0xe5   :  { %v1355_v56 = vpop.eup %1354  ;;  %v1682_v59 = vadd.f32 %v204_v52, %v1579_v13  ;;  %v366_v60 = vsel %vm94_vm0, %v1676_v49, 0.0  ;;  %v1686_v61 = vmul.f32 %v328_v51, %v216_v26  ;;  %v247_v3 = vmul.f32 0.044715, %v1674_v48 }
  0xe6   :  { %367 = vadd.xlane.f32.xlu1 %v366_v60  ;;  %v331_v62 = vadd.f32 1.0, %v1355_v56  ;;  %1368 = vtanh.f32 %v304_v53  ;;  %v289_v63 = vadd.f32 %v273_v54, %v1651_v22  ;;  %v307_v1 = vmul.f32 0.7978846, %v291_v55 }
  0xe7   :  { %v1357_v2 = vpop.eup %1356  ;;  %v245_v4 = vmul.f32 0.044715, %v1682_v59  ;;  %v360_v13 = vsel %vm94_vm0, %v1686_v61, 0.0  ;;  %v260_v5 = vmul.f32 %v244_v47, %v1667_v40  ;;  %v262_v15 = vmul.f32 %v246_v58, %v1664_v39 }
  0xe8   :  { %361 = vadd.xlane.f32.xlu0 %v360_v13  ;;  %v1694_v6 = vmul.f32 %v331_v62, %v219_v31  ;;  %v329_v8 = vadd.f32 1.0, %v1357_v2  ;;  %v305_v9 = vmul.f32 0.7978846, %v289_v63  ;;  %1370 = vtanh.f32 %v307_v1 }
  0xe9   :  { %v1359_v14 = vpop.eup %1358  ;;  %v276_v16 = vmul.f32 %v260_v5, %v1667_v40  ;;  %v261_v17 = vmul.f32 %v245_v4, %v1682_v59  ;;  %v263_v33 = vmul.f32 %v247_v3, %v1674_v48  ;;  %v278_v37 = vmul.f32 %v262_v15, %v1664_v39 }
  0xea   :  { %v1361_v19 = vpop.eup %1360  ;;  %v369_v20 = vsel %vm94_vm0, %v1694_v6, 0.0  ;;  %v1700_v23 = vmul.f32 %v329_v8, %v217_v32  ;;  %1372 = vtanh.f32 %v305_v9  ;;  %v334_v31 = vadd.f32 1.0, %v1359_v14 }
  0xeb   :  { %370 = vadd.xlane.f32.xlu1 %v369_v20  ;;  %v332_v26 = vadd.f32 1.0, %v1361_v19  ;;  %v292_v27 = vadd.f32 %v276_v16, %v1667_v40  ;;  %v277_v28 = vmul.f32 %v261_v17, %v1682_v59  ;;  %v221_v18 = vmul.f32 0.5, %v1622_v50 }
  0xec   :  { %v363_v29 = vsel %vm94_vm0, %v1700_v23, 0.0  ;;  %v222_v41 = vmul.f32 0.5, %v1601_v30  ;;  %v279_v25 = vmul.f32 %v263_v33, %v1674_v48  ;;  %v294_v47 = vadd.f32 %v278_v37, %v1664_v39 }
  0xed   :  { %v1363_v34 = vpop.eup %1362  ;;  %364 = vadd.xlane.f32.xlu0 %v363_v29  ;;  %v1709_v32 = vmul.f32 %v332_v26, %v220_v24  ;;  %v308_v36 = vmul.f32 0.7978846, %v292_v27  ;;  %v293_v35 = vadd.f32 %v277_v28, %v1682_v59  ;;  %v223_v30 = vmul.f32 0.5, %v1615_v43 }
  0xee   :  { %v1365_v38 = vpop.eup %1364  ;;  %v335_v21 = vadd.f32 1.0, %v1363_v34  ;;  %v1718_v46 = vmul.f32 %v334_v31, %v222_v41  ;;  %v295_v51 = vadd.f32 %v279_v25, %v1674_v48  ;;  %v310_v53 = vmul.f32 0.7978846, %v294_v47 }
  0xef   :  { %v372_v42 = vsel %vm94_vm0, %v1709_v32, 0.0  ;;  %v333_v44 = vadd.f32 1.0, %v1365_v38  ;;  %1374 = vtanh.f32 %v308_v36  ;;  %v309_v45 = vmul.f32 0.7978846, %v293_v35 }
  0xf0   :  { %v311_v54 = vmul.f32 0.7978846, %v295_v51  ;;  %v1727_v58 = vmul.f32 %v335_v21, %v223_v30  ;;  %v224_v60 = vmul.f32 0.5, %v1636_v0  ;;  %v378_v62 = vsel %vm94_vm0, %v1718_v46, 0.0 }
  0xf1   :  { %v1367_v52 = vpop.eup %1366  ;;  %373 = vadd.xlane.f32.xlu0 %v372_v42  ;;  %v1722_v50 = vmul.f32 %v333_v44, %v221_v18  ;;  %1376 = vtanh.f32 %v309_v45  ;;  %v226_v3 = vmul.f32 0.5, %v1629_v57  ;;  %v225_v0 = vmul.f32 0.5, %v1651_v22 }
  0xf2   :  { %v338_v1 = vadd.f32 1.0, %v1367_v52  ;;  %1378 = vtanh.f32 %v310_v53  ;;  %v381_v13 = vsel %vm94_vm0, %v1727_v58, 0.0  ;;  %v227_v17 = vmul.f32 0.5, %v1643_v7 }
  0xf3   :  { %v1369_v55 = vpop.eup %1368  ;;  %v375_v56 = vsel %vm94_vm0, %v1722_v50, 0.0  ;;  %1380 = vtanh.f32 %v311_v54  ;;  %v228_v24 = vmul.f32 0.5, %v1667_v40  ;;  %v229_v15 = vmul.f32 0.5, %v1682_v59 }
  0xf4   :  { %376 = vadd.xlane.f32.xlu1 %v375_v56  ;;  %v336_v63 = vadd.f32 1.0, %v1369_v55  ;;  %v1740_v9 = vmul.f32 %v338_v1, %v226_v3  ;;  %v230_v40 = vmul.f32 0.5, %v1664_v39  ;;  %v231_v59 = vmul.f32 0.5, %v1674_v48 }
  0xf5   :  { %v1371_v2 = vpop.eup %1370  ;;  %379 = vadd.xlane.f32.xlu0 %v378_v62 }
  0xf6   :  { %v1732_v43 = vmul.f32 %v336_v63, %v224_v60  ;;  %v339_v14 = vadd.f32 1.0, %v1371_v2  ;;  %v390_v22 = vsel %vm94_vm0, %v1740_v9, 0.0 }
  0xf7   :  { %v1373_v4 = vpop.eup %1372 }
  0xf8   :  { %382 = vadd.xlane.f32.xlu1 %v381_v13  ;;  %v384_v5 = vsel %vm94_vm0, %v1732_v43, 0.0  ;;  %v337_v8 = vadd.f32 1.0, %v1373_v4  ;;  %v1749_v20 = vmul.f32 %v339_v14, %v227_v17 }
  0xf9   :  { %385 = vadd.xlane.f32.xlu0 %v384_v5 }
  0xfa   :  { %v1742_v16 = vmul.f32 %v337_v8, %v225_v0  ;;  %v393_v29 = vsel %vm94_vm0, %v1749_v20, 0.0 }
  0xfc   :  { %v1375_v57 = vpop.eup %1374  ;;  %v387_v19 = vsel %vm94_vm0, %v1742_v16, 0.0 }
  0xfd   :  { %388 = vadd.xlane.f32.xlu1 %v387_v19  ;;  %391 = vadd.xlane.f32.xlu0 %v390_v22  ;;  %v340_v26 = vadd.f32 1.0, %v1375_v57 }
  0xfe   :  { %v1377_v27 = vpop.eup %1376 }
  0xff   :  { %v1752_v28 = vmul.f32 %v340_v26, %v228_v24  ;;  %v341_v7 = vadd.f32 1.0, %v1377_v27  ;;  %v1379_v31 = vpop.eup %1378 }
 0x100   :  { %v1381_v36 = vpop.eup %1380  ;;  %v342_v35 = vadd.f32 1.0, %v1379_v31 }
 0x101   :  { %394 = vadd.xlane.f32.xlu1 %v393_v29  ;;  %v396_v33 = vsel %vm94_vm0, %v1752_v28, 0.0  ;;  %v1759_v34 = vmul.f32 %v341_v7, %v229_v15  ;;  %v343_v38 = vadd.f32 1.0, %v1381_v36 }
 0x102   :  { %397 = vadd.xlane.f32.xlu0 %v396_v33  ;;  %v1765_v18 = vmul.f32 %v342_v35, %v230_v40 }
 0x103   :  { %v399_v37 = vsel %vm94_vm0, %v1759_v34, 0.0  ;;  %v1767_v41 = vmul.f32 %v343_v38, %v231_v59 }
 0x104   :  { %v402_v21 = vsel %vm94_vm0, %v1765_v18, 0.0 }
 0x105   :  { %400 = vadd.xlane.f32.xlu1 %v399_v37  ;;  %v405_v25 = vsel %vm94_vm0, %v1767_v41, 0.0 }
 0x106   :  { %403 = vadd.xlane.f32.xlu0 %v402_v21 }
 0x109   :  { %406 = vadd.xlane.f32.xlu1 %v405_v25 }
 0x16f   :  { %v368_v39 = vpop.xlane.xlu1 %367 }
 0x170   :  { %v411_v42 = vmul.f32 0.0625, %v368_v39 }
 0x171   :  { %v362_v44 = vpop.xlane.xlu0 %361 }
 0x172   :  { %v409_v45 = vmul.f32 0.0625, %v362_v44  ;;  %v1774_v48 = vsub.f32 %v1676_v49, %v411_v42 }
 0x174   :  { %v1777_v47 = vsub.f32 %v1686_v61, %v409_v45  ;;  %v371_v51 = vpop.xlane.xlu1 %370  ;;  %v443_v56 = vmul.f32 %v1774_v48, %v1774_v48 }
 0x175   :  { %v412_v52 = vmul.f32 0.0625, %v371_v51 }
 0x176   :  { %v365_v30 = vpop.xlane.xlu0 %364  ;;  %v441_v53 = vmul.f32 %v1777_v47, %v1777_v47  ;;  %v463_v1 = vsel %vm94_vm0, %v443_v56, 0.0 }
 0x177   :  { %v410_v54 = vmul.f32 0.0625, %v365_v30  ;;  %v1785_v60 = vsub.f32 %v1694_v6, %v412_v52 }
 0x178   :  { %v457_v55 = vsel %vm94_vm0, %v441_v53, 0.0 }
 0x179   :  { %v1788_v49 = vsub.f32 %v1700_v23, %v410_v54  ;;  %458 = vadd.xlane.f32.xlu0 %v457_v55  ;;  %v444_v6 = vmul.f32 %v1785_v60, %v1785_v60 }
 0x17a   :  { %v374_v61 = vpop.xlane.xlu0 %373 }
 0x17b   :  { %v413_v62 = vmul.f32 0.0625, %v374_v61  ;;  %v442_v63 = vmul.f32 %v1788_v49, %v1788_v49  ;;  %v466_v17 = vsel %vm94_vm0, %v444_v6, 0.0 }
 0x17d   :  { %v1794_v2 = vsub.f32 %v1709_v32, %v413_v62  ;;  %v377_v3 = vpop.xlane.xlu1 %376  ;;  %464 = vadd.xlane.f32.xlu0 %v463_v1  ;;  %v460_v4 = vsel %vm94_vm0, %v442_v63, 0.0 }
 0x17e   :  { %v414_v23 = vmul.f32 0.0625, %v377_v3  ;;  %461 = vadd.xlane.f32.xlu1 %v460_v4  ;;  %v380_v13 = vpop.xlane.xlu0 %379 }
 0x17f   :  { %v415_v0 = vmul.f32 0.0625, %v380_v13  ;;  %v445_v5 = vmul.f32 %v1794_v2, %v1794_v2 }
 0x180   :  { %v1802_v8 = vsub.f32 %v1722_v50, %v414_v23 }
 0x181   :  { %v1805_v32 = vsub.f32 %v1718_v46, %v415_v0  ;;  %v383_v14 = vpop.xlane.xlu1 %382  ;;  %v469_v57 = vsel %vm94_vm0, %v445_v5, 0.0  ;;  %v41_v0 = vld [vmem:[%s2329_s3] sm:$0xff] }
 0x182   :  { %v416_v19 = vmul.f32 0.0625, %v383_v14  ;;  %467 = vadd.xlane.f32.xlu1 %v466_v17  ;;  %470 = vadd.xlane.f32.xlu0 %v469_v57  ;;  %v386_v22 = vpop.xlane.xlu0 %385  ;;  %v446_v24 = vmul.f32 %v1802_v8, %v1802_v8 }
 0x183   :  { %v417_v26 = vmul.f32 0.0625, %v386_v22  ;;  %v447_v50 = vmul.f32 %v1805_v32, %v1805_v32 }
 0x184   :  { %v1814_v27 = vsub.f32 %v1727_v58, %v416_v19  ;;  %v472_v46 = vsel %vm94_vm0, %v446_v24, 0.0 }
 0x185   :  { %v1818_v15 = vsub.f32 %v1732_v43, %v417_v26  ;;  %v475_v7 = vsel %vm94_vm0, %v447_v50, 0.0 }
 0x186   :  { %v389_v29 = vpop.xlane.xlu1 %388  ;;  %473 = vadd.xlane.f32.xlu1 %v472_v46  ;;  %476 = vadd.xlane.f32.xlu0 %v475_v7  ;;  %v392_v31 = vpop.xlane.xlu0 %391  ;;  %v448_v33 = vmul.f32 %v1814_v27, %v1814_v27 }
 0x187   :  { %v418_v36 = vmul.f32 0.0625, %v389_v29  ;;  %v419_v40 = vmul.f32 0.0625, %v392_v31  ;;  %v449_v58 = vmul.f32 %v1818_v15, %v1818_v15 }
 0x188   :  { %v478_v35 = vsel %vm94_vm0, %v448_v33, 0.0 }
 0x189   :  { %v1827_v37 = vsub.f32 %v1742_v16, %v418_v36  ;;  %v1830_v43 = vsub.f32 %v1740_v9, %v419_v40  ;;  %v481_v59 = vsel %vm94_vm0, %v449_v58, 0.0 }
 0x18a   :  { %v395_v38 = vpop.xlane.xlu1 %394  ;;  %479 = vadd.xlane.f32.xlu1 %v478_v35  ;;  %482 = vadd.xlane.f32.xlu0 %v481_v59  ;;  %v571_v35 = vsub.s32 1, %v1568_v10 }
 0x18b   :  { %v420_v21 = vmul.f32 0.0625, %v395_v38  ;;  %v398_v25 = vpop.xlane.xlu0 %397  ;;  %v450_v39 = vmul.f32 %v1827_v37, %v1827_v37  ;;  %v451_v42 = vmul.f32 %v1830_v43, %v1830_v43 }
 0x18c   :  { %v421_v44 = vmul.f32 0.0625, %v398_v25 }
 0x18d   :  { %v1838_v16 = vsub.f32 %v1749_v20, %v420_v21  ;;  %v484_v9 = vsel %vm94_vm0, %v450_v39, 0.0  ;;  %v487_v45 = vsel %vm94_vm0, %v451_v42, 0.0  ;;  %v591_v21 = vsub.s32 2, %v1568_v10 }
 0x18e   :  { %v1843_v51 = vsub.f32 %v1752_v28, %v421_v44  ;;  %v401_v52 = vpop.xlane.xlu1 %400  ;;  %485 = vadd.xlane.f32.xlu1 %v484_v9  ;;  %488 = vadd.xlane.f32.xlu0 %v487_v45  ;;  %v1880_v9 = vrot.slane %v1574_v12, %v571_v35 }
 0x18f   :  { %v422_v30 = vmul.f32 0.0625, %v401_v52  ;;  %v452_v53 = vmul.f32 %v1838_v16, %v1838_v16  ;;  %v404_v54 = vpop.xlane.xlu0 %403 }
 0x190   :  { %v453_v55 = vmul.f32 %v1843_v51, %v1843_v51  ;;  %v423_v56 = vmul.f32 0.0625, %v404_v54  ;;  %v1886_v54 = vrot.slane %v1574_v12, %v591_v21 }
 0x191   :  { %v1850_v20 = vsub.f32 %v1759_v34, %v422_v30  ;;  %v490_v61 = vsel %vm94_vm0, %v452_v53, 0.0 }
 0x192   :  { %v407_v62 = vpop.xlane.xlu1 %406  ;;  %491 = vadd.xlane.f32.xlu1 %v490_v61  ;;  %v493_v28 = vsel %vm94_vm0, %v453_v55, 0.0  ;;  %v1855_v63 = vsub.f32 %v1765_v18, %v423_v56 }
 0x193   :  { %v424_v1 = vmul.f32 0.0625, %v407_v62  ;;  %494 = vadd.xlane.f32.xlu0 %v493_v28  ;;  %v454_v3 = vmul.f32 %v1850_v20, %v1850_v20 }
 0x194   :  { %v455_v6 = vmul.f32 %v1855_v63, %v1855_v63 }
 0x195   :  { %v1860_v4 = vsub.f32 %v1767_v41, %v424_v1  ;;  %v496_v34 = vsel %vm94_vm0, %v454_v3, 0.0  ;;  %v42_v41 = vld [vmem:[%s2329_s3 + $0x8] sm:$0xff] }
 0x196   :  { %497 = vadd.xlane.f32.xlu1 %v496_v34  ;;  %v499_v23 = vsel %vm94_vm0, %v455_v6, 0.0  ;;  %1310 = vmatprep.subr.mxu1 %v42_v41 }
 0x197   :  { %v456_v18 = vmul.f32 %v1860_v4, %v1860_v4  ;;  %500 = vadd.xlane.f32.xlu0 %v499_v23  ;;  %1311 = vmatpush3.msra.mxu1 %v42_v41 }
 0x198   :  { %1312 = vmatprep.subr.mxu1 %v41_v0 }
 0x199   :  { %v502_v13 = vsel %vm94_vm0, %v456_v18, 0.0  ;;  %1313 = vmatpush3.msra.mxu1 %v41_v0 }
 0x19a   :  { %503 = vadd.xlane.f32.xlu1 %v502_v13 }
 0x202   :  { %v459_v5 = vpop.xlane.xlu0 %458 }
 0x203   :  { %v505_v14 = vmul.f32 0.0625, %v459_v5 }
 0x205   :  { %v521_v17 = vadd.f32 1e-05, %v505_v14 }
 0x206   :  { %v465_v57 = vpop.xlane.xlu0 %464 }
 0x207   :  { %1382 = vrsqrt.f32 %v521_v17  ;;  %v462_v19 = vpop.xlane.xlu1 %461  ;;  %v507_v22 = vmul.f32 0.0625, %v465_v57 }
 0x208   :  { %v506_v24 = vmul.f32 0.0625, %v462_v19 }
 0x209   :  { %v523_v26 = vadd.f32 1e-05, %v507_v22 }
 0x20a   :  { %v522_v50 = vadd.f32 1e-05, %v506_v24 }
 0x20b   :  { %1384 = vrsqrt.f32 %v523_v26  ;;  %v468_v46 = vpop.xlane.xlu1 %467  ;;  %v471_v7 = vpop.xlane.xlu0 %470 }
 0x20c   :  { %1386 = vrsqrt.f32 %v522_v50  ;;  %v508_v29 = vmul.f32 0.0625, %v468_v46  ;;  %v509_v31 = vmul.f32 0.0625, %v471_v7 }
 0x20e   :  { %v524_v33 = vadd.f32 1e-05, %v508_v29  ;;  %v525_v36 = vadd.f32 1e-05, %v509_v31 }
 0x20f   :  { %v474_v40 = vpop.xlane.xlu1 %473  ;;  %v477_v58 = vpop.xlane.xlu0 %476 }
 0x210   :  { %1388 = vrsqrt.f32 %v524_v33  ;;  %v510_v59 = vmul.f32 0.0625, %v474_v40  ;;  %v511_v38 = vmul.f32 0.0625, %v477_v58 }
 0x211   :  { %1390 = vrsqrt.f32 %v525_v36 }
 0x212   :  { %v526_v25 = vadd.f32 1e-05, %v510_v59  ;;  %v527_v39 = vadd.f32 1e-05, %v511_v38 }
 0x213   :  { %v480_v42 = vpop.xlane.xlu1 %479  ;;  %v483_v44 = vpop.xlane.xlu0 %482 }
 0x214   :  { %v1383_v45 = vpop.eup %1382  ;;  %1392 = vrsqrt.f32 %v526_v25  ;;  %v512_v52 = vmul.f32 0.0625, %v480_v42  ;;  %v513_v30 = vmul.f32 0.0625, %v483_v44 }
 0x215   :  { %1394 = vrsqrt.f32 %v527_v39  ;;  %v553_v53 = vmul.f32 %v1383_v45, %v1777_v47 }
 0x216   :  { %v528_v55 = vadd.f32 1e-05, %v512_v52  ;;  %v529_v56 = vadd.f32 1e-05, %v513_v30 }
 0x217   :  { %v486_v61 = vpop.xlane.xlu1 %485  ;;  %v489_v62 = vpop.xlane.xlu0 %488  ;;  %v573_v28 = vmul.f32 %v1880_v9, %v553_v53 }
 0x218   :  { %v1385_v1 = vpop.eup %1384  ;;  %1396 = vrsqrt.f32 %v528_v55  ;;  %v514_v3 = vmul.f32 0.0625, %v486_v61  ;;  %v515_v34 = vmul.f32 0.0625, %v489_v62 }
 0x219   :  { %v1387_v6 = vpop.eup %1386  ;;  %1398 = vrsqrt.f32 %v529_v56  ;;  %v593_v23 = vadd.f32 %v1886_v54, %v573_v28  ;;  %v555_v47 = vmul.f32 %v1385_v1, %v1774_v48 }
 0x21a   :  { %v530_v18 = vadd.f32 1e-05, %v514_v3  ;;  %v531_v13 = vadd.f32 1e-05, %v515_v34  ;;  %v554_v12 = vmul.f32 %v1387_v6, %v1788_v49 }
 0x21b   :  { %v492_v41 = vpop.xlane.xlu1 %491  ;;  %1314 = vmatprep.mubr.msk.f32.mxu1 %vm94_vm0, %v593_v23  ;;  %v575_v0 = vmul.f32 %v1880_v9, %v555_v47 }
 0x21c   :  { %1400 = vrsqrt.f32 %v530_v18  ;;  %v516_v5 = vmul.f32 0.0625, %v492_v41  ;;  %v495_v14 = vpop.xlane.xlu0 %494  ;;  %v574_v17 = vmul.f32 %v1880_v9, %v554_v12 }
 0x21d   :  { %v1389_v57 = vpop.eup %1388  ;;  %1402 = vrsqrt.f32 %v531_v13  ;;  %v517_v19 = vmul.f32 0.0625, %v495_v14  ;;  %v595_v22 = vadd.f32 %v1886_v54, %v575_v0 }
 0x21e   :  { %v1391_v48 = vpop.eup %1390  ;;  %v532_v24 = vadd.f32 1e-05, %v516_v5  ;;  %v594_v26 = vadd.f32 %v1886_v54, %v574_v17  ;;  %v556_v49 = vmul.f32 %v1389_v57, %v1785_v60 }
 0x21f   :  { %v533_v50 = vadd.f32 1e-05, %v517_v19  ;;  %v498_v46 = vpop.xlane.xlu1 %497  ;;  %v557_v7 = vmul.f32 %v1391_v48, %v1794_v2 }
 0x220   :  { %1404 = vrsqrt.f32 %v532_v24  ;;  %v518_v29 = vmul.f32 0.0625, %v498_v46  ;;  %1315 = vmatmul.mubr.msk.f32.vlgmr.msra.gmra.mxu1 %vm94_vm0, %v594_v26  ;;  %v576_v31 = vmul.f32 %v1880_v9, %v556_v49  ;;  %v501_v36 = vpop.xlane.xlu0 %500 }
 0x221   :  { %v1393_v33 = vpop.eup %1392  ;;  %1406 = vrsqrt.f32 %v533_v50  ;;  %1317 = vmatprep.mubr.msk.f32.mxu1 %vm94_vm0, %v595_v22  ;;  %v577_v40 = vmul.f32 %v1880_v9, %v557_v7  ;;  %v519_v60 = vmul.f32 0.0625, %v501_v36 }
 0x222   :  { %v1395_v58 = vpop.eup %1394  ;;  %v534_v59 = vadd.f32 1e-05, %v518_v29  ;;  %v596_v38 = vadd.f32 %v1886_v54, %v576_v31  ;;  %v558_v2 = vmul.f32 %v1393_v33, %v1802_v8 }
 0x223   :  { %v504_v25 = vpop.xlane.xlu1 %503  ;;  %v597_v39 = vadd.f32 %v1886_v54, %v577_v40  ;;  %v559_v42 = vmul.f32 %v1395_v58, %v1805_v32  ;;  %v535_v44 = vadd.f32 1e-05, %v519_v60 }
 0x224   :  { %1408 = vrsqrt.f32 %v534_v59  ;;  %v520_v45 = vmul.f32 0.0625, %v504_v25  ;;  %1318 = vmatmul.mubr.msk.f32.gmra.mxu1 %vm94_vm0, %v596_v38  ;;  %v578_v52 = vmul.f32 %v1880_v9, %v558_v2 }
 0x225   :  { %v1397_v30 = vpop.eup %1396  ;;  %1320 = vmatprep.mubr.msk.f32.mxu1 %vm94_vm0, %v597_v39  ;;  %v579_v53 = vmul.f32 %v1880_v9, %v559_v42  ;;  %1410 = vrsqrt.f32 %v535_v44 }
 0x226   :  { %v1399_v55 = vpop.eup %1398  ;;  %v536_v8 = vadd.f32 1e-05, %v520_v45  ;;  %v598_v56 = vadd.f32 %v1886_v54, %v578_v52  ;;  %v560_v61 = vmul.f32 %v1397_v30, %v1814_v27 }
 0x227   :  { %v599_v32 = vadd.f32 %v1886_v54, %v579_v53  ;;  %v561_v62 = vmul.f32 %v1399_v55, %v1818_v15 }
 0x228   :  { %1412 = vrsqrt.f32 %v536_v8  ;;  %1321 = vmatmul.mubr.msk.f32.gmra.mxu1 %vm94_vm0, %v598_v56  ;;  %v580_v28 = vmul.f32 %v1880_v9, %v560_v61 }
 0x229   :  { %v1401_v1 = vpop.eup %1400  ;;  %1323 = vmatprep.mubr.msk.f32.mxu1 %vm94_vm0, %v599_v32  ;;  %v581_v3 = vmul.f32 %v1880_v9, %v561_v62 }
 0x22a   :  { %v1403_v34 = vpop.eup %1402  ;;  %v600_v6 = vadd.f32 %v1886_v54, %v580_v28  ;;  %v562_v23 = vmul.f32 %v1401_v1, %v1827_v37 }
 0x22b   :  { %v601_v27 = vadd.f32 %v1886_v54, %v581_v3  ;;  %v563_v47 = vmul.f32 %v1403_v34, %v1830_v43 }
 0x22c   :  { %1324 = vmatmul.mubr.msk.f32.gmra.mxu1 %vm94_vm0, %v600_v6  ;;  %v582_v15 = vmul.f32 %v1880_v9, %v562_v23 }
 0x22d   :  { %v1405_v18 = vpop.eup %1404  ;;  %1326 = vmatprep.mubr.msk.f32.mxu1 %vm94_vm0, %v601_v27  ;;  %v583_v13 = vmul.f32 %v1880_v9, %v563_v47 }
 0x22e   :  { %v1407_v12 = vpop.eup %1406  ;;  %v602_v41 = vadd.f32 %v1886_v54, %v582_v15  ;;  %v564_v0 = vmul.f32 %v1405_v18, %v1838_v16 }
 0x22f   :  { %v603_v37 = vadd.f32 %v1886_v54, %v583_v13  ;;  %v565_v5 = vmul.f32 %v1407_v12, %v1843_v51 }
 0x230   :  { %1327 = vmatmul.mubr.msk.f32.gmra.mxu1 %vm94_vm0, %v602_v41  ;;  %v584_v43 = vmul.f32 %v1880_v9, %v564_v0 }
 0x231   :  { %v1409_v14 = vpop.eup %1408  ;;  %1329 = vmatprep.mubr.msk.f32.mxu1 %vm94_vm0, %v603_v37  ;;  %v585_v17 = vmul.f32 %v1880_v9, %v565_v5 }
 0x232   :  { %v604_v57 = vadd.f32 %v1886_v54, %v584_v43  ;;  %v566_v19 = vmul.f32 %v1409_v14, %v1850_v20  ;;  %v1411_v22 = vpop.eup %1410 }
 0x233   :  { %v605_v16 = vadd.f32 %v1886_v54, %v585_v17  ;;  %v567_v48 = vmul.f32 %v1411_v22, %v1855_v63  ;;  %v1954_v63 = vld [vmem:[%s2330_s4] sm:$0xff]  ;;  %s1500_s4 = smov [#allocation2]  }
 0x234   :  { %1330 = vmatmul.mubr.msk.f32.gmra.mxu1 %vm94_vm0, %v604_v57  ;;  %v586_v51 = vmul.f32 %v1880_v9, %v566_v19  ;;  %s1221_s15 = sshll.u32 %s1500_s4, 4  ;;  %s1222_s15 = int_to_ptr.vmem [resolvable:$true] %s1221_s15 }
 0x235   :  { %v1413_v24 = vpop.eup %1412  ;;  %1332 = vmatprep.mubr.msk.f32.mxu1 %vm94_vm0, %v605_v16  ;;  %v587_v49 = vmul.f32 %v1880_v9, %v567_v48  ;;  %s1478_s16 = scalar_lea.vmem %s1222_s15, 2048  ;;  %p1483_p1 = scmp.lt.s32.totalorder %s1222_s15, %s1222_s15 }
 0x236   :  { %v606_v26 = vadd.f32 %v1886_v54, %v586_v51  ;;  %v568_v50 = vmul.f32 %v1413_v24, %v1860_v4  ;;  %v1959_v4 = vrot.slane %v1954_v63, %v46_v11  ;;  %p1479_p0 = scmp.ne.s32.totalorder %s1222_s15, %s1478_s16  ;;  %p1484_p2 = scmp.lt.s32.totalorder %s1478_s16, %s1478_s16 }
 0x237   :  { %v607_v20 = vadd.f32 %v1886_v54, %v587_v49 }
 0x238   :  { %1333 = vmatmul.mubr.msk.f32.gmra.mxu1 %vm94_vm0, %v606_v26  ;;  %v588_v46 = vmul.f32 %v1880_v9, %v568_v50  ;;  %p1485_p3 = por %p1484_p2, %p1483_p1 }
 0x239   :  { %1335 = vmatprep.mubr.msk.f32.mxu1 %vm94_vm0, %v607_v20 }
 0x23a   :  { %v608_v7 = vadd.f32 %v1886_v54, %v588_v46  ;;  %p1486_p4 = pnand %p1485_p3, %p1479_p0 }
 0x23c   :  { %1336 = vmatmul.mubr.msk.f32.gmra.mxu1 %vm94_vm0, %v608_v7 }
 0x2e0   :  { %v1316_v29 = vpop.f32.mrf.mxu1 }
 0x2e1   :  { %v1962_v31 = vadd.f32 %v1316_v29, %v1959_v4 }
 0x2e2   :  { %v727_v9 = vpop.f32.mrf.mxu1 }
 0x2e3   :  { %v823_v33 = vmul.f32 0.044715, %v1962_v31  ;;  %v1966_v54 = vadd.f32 %v727_v9, %v1959_v4 }
 0x2e4   :  { %v1319_v36 = vpop.f32.mrf.mxu1 }
 0x2e5   :  { %v822_v40 = vmul.f32 0.044715, %v1966_v54  ;;  %v1970_v58 = vadd.f32 %v1319_v36, %v1959_v4  ;;  %v839_v59 = vmul.f32 %v823_v33, %v1962_v31  ;;  %v807_v33 = vmul.f32 0.5, %v1962_v31 }
 0x2e6   :  { %v737_v11 = vpop.f32.mrf.mxu1 }
 0x2e7   :  { %v825_v60 = vmul.f32 0.044715, %v1970_v58  ;;  %v1975_v38 = vadd.f32 %v737_v11, %v1959_v4  ;;  %v855_v2 = vmul.f32 %v839_v59, %v1962_v31  ;;  %v838_v25 = vmul.f32 %v822_v40, %v1966_v54 }
 0x2e8   :  { %v1322_v39 = vpop.f32.mrf.mxu1 }
 0x2e9   :  { %v824_v42 = vmul.f32 0.044715, %v1975_v38  ;;  %v1981_v44 = vadd.f32 %v1322_v39, %v1959_v4  ;;  %v871_v45 = vadd.f32 %v855_v2, %v1962_v31  ;;  %v854_v52 = vmul.f32 %v838_v25, %v1966_v54 }
 0x2ea   :  { %v747_v30 = vpop.f32.mrf.mxu1  ;;  %v841_v53 = vmul.f32 %v825_v60, %v1970_v58  ;;  %v806_v25 = vmul.f32 0.5, %v1966_v54 }
 0x2eb   :  { %v827_v55 = vmul.f32 0.044715, %v1981_v44  ;;  %v1988_v8 = vadd.f32 %v747_v30, %v1959_v4  ;;  %v887_v56 = vmul.f32 0.7978846, %v871_v45  ;;  %v870_v61 = vadd.f32 %v854_v52, %v1966_v54 }
 0x2ec   :  { %v1325_v32 = vpop.f32.mrf.mxu1  ;;  %v857_v62 = vmul.f32 %v841_v53, %v1970_v58  ;;  %v840_v28 = vmul.f32 %v824_v42, %v1975_v38 }
 0x2ed   :  { %v826_v1 = vmul.f32 0.044715, %v1988_v8  ;;  %v1995_v3 = vadd.f32 %v1325_v32, %v1959_v4  ;;  %1414 = vtanh.f32 %v887_v56  ;;  %v886_v34 = vmul.f32 0.7978846, %v870_v61 }
 0x2ee   :  { %v757_v6 = vpop.f32.mrf.mxu1  ;;  %v873_v23 = vadd.f32 %v857_v62, %v1970_v58  ;;  %v856_v27 = vmul.f32 %v840_v28, %v1975_v38  ;;  %v843_v47 = vmul.f32 %v827_v55, %v1981_v44  ;;  %v809_v56 = vmul.f32 0.5, %v1970_v58 }
 0x2ef   :  { %v829_v15 = vmul.f32 0.044715, %v1995_v3  ;;  %v2002_v18 = vadd.f32 %v757_v6, %v1959_v4  ;;  %1416 = vtanh.f32 %v886_v34  ;;  %v842_v13 = vmul.f32 %v826_v1, %v1988_v8 }
 0x2f0   :  { %v1328_v12 = vpop.f32.mrf.mxu1  ;;  %v889_v41 = vmul.f32 0.7978846, %v873_v23  ;;  %v872_v0 = vadd.f32 %v856_v27, %v1975_v38  ;;  %v859_v37 = vmul.f32 %v843_v47, %v1981_v44  ;;  %v808_v1 = vmul.f32 0.5, %v1975_v38 }
 0x2f1   :  { %v828_v5 = vmul.f32 0.044715, %v2002_v18  ;;  %v2009_v43 = vadd.f32 %v1328_v12, %v1959_v4  ;;  %v858_v14 = vmul.f32 %v842_v13, %v1988_v8  ;;  %v845_v17 = vmul.f32 %v829_v15, %v1995_v3 }
 0x2f2   :  { %v767_v57 = vpop.f32.mrf.mxu1  ;;  %1418 = vtanh.f32 %v889_v41  ;;  %v888_v19 = vmul.f32 0.7978846, %v872_v0  ;;  %v875_v22 = vadd.f32 %v859_v37, %v1981_v44 }
 0x2f3   :  { %v831_v16 = vmul.f32 0.044715, %v2009_v43  ;;  %v2016_v51 = vadd.f32 %v767_v57, %v1959_v4  ;;  %v874_v48 = vadd.f32 %v858_v14, %v1988_v8  ;;  %v861_v24 = vmul.f32 %v845_v17, %v1995_v3 }
 0x2f4   :  { %v1331_v26 = vpop.f32.mrf.mxu1  ;;  %1420 = vtanh.f32 %v888_v19  ;;  %v891_v49 = vmul.f32 0.7978846, %v875_v22  ;;  %v844_v50 = vmul.f32 %v828_v5, %v2002_v18 }
 0x2f5   :  { %v830_v20 = vmul.f32 0.044715, %v2016_v51  ;;  %v2023_v46 = vadd.f32 %v1331_v26, %v1959_v4  ;;  %v890_v7 = vmul.f32 0.7978846, %v874_v48  ;;  %v877_v29 = vadd.f32 %v861_v24, %v1995_v3 }
 0x2f6   :  { %v777_v9 = vpop.f32.mrf.mxu1  ;;  %1422 = vtanh.f32 %v891_v49  ;;  %v860_v36 = vmul.f32 %v844_v50, %v2002_v18  ;;  %v847_v40 = vmul.f32 %v831_v16, %v2009_v43 }
 0x2f7   :  { %v833_v59 = vmul.f32 0.044715, %v2023_v46  ;;  %v2031_v11 = vadd.f32 %v777_v9, %v1959_v4  ;;  %1424 = vtanh.f32 %v890_v7  ;;  %v893_v60 = vmul.f32 0.7978846, %v877_v29 }
 0x2f8   :  { %v1334_v2 = vpop.f32.mrf.mxu1  ;;  %v876_v39 = vadd.f32 %v860_v36, %v2002_v18  ;;  %v863_v42 = vmul.f32 %v847_v40, %v2009_v43  ;;  %v846_v31 = vmul.f32 %v830_v20, %v2016_v51  ;;  %v811_v36 = vmul.f32 0.5, %v1981_v44 }
 0x2f9   :  { %v832_v45 = vmul.f32 0.044715, %v2031_v11  ;;  %v2039_v52 = vadd.f32 %v1334_v2, %v1959_v4  ;;  %1426 = vtanh.f32 %v893_v60  ;;  %v849_v30 = vmul.f32 %v833_v59, %v2023_v46 }
 0x2fa   :  { %v1415_v53 = vpop.eup %1414  ;;  %v787_v55 = vpop.f32.mrf.mxu1  ;;  %v892_v61 = vmul.f32 0.7978846, %v876_v39  ;;  %v879_v54 = vadd.f32 %v863_v42, %v2009_v43  ;;  %v862_v32 = vmul.f32 %v846_v31, %v2016_v51  ;;  %v810_v40 = vmul.f32 0.5, %v1988_v8 }
 0x2fb   :  { %v2046_v62 = vadd.f32 %v787_v55, %v1959_v4  ;;  %v919_v28 = vadd.f32 1.0, %v1415_v53  ;;  %v865_v34 = vmul.f32 %v849_v30, %v2023_v46  ;;  %v848_v58 = vmul.f32 %v832_v45, %v2031_v11 }
 0x2fc   :  { %v1417_v6 = vpop.eup %1416  ;;  %v1337_v23 = vpop.f32.mrf.mxu1  ;;  %1428 = vtanh.f32 %v892_v61  ;;  %v895_v27 = vmul.f32 0.7978846, %v879_v54  ;;  %v878_v47 = vadd.f32 %v862_v32, %v2016_v51  ;;  %v835_v15 = vmul.f32 0.044715, %v2039_v52 }
 0x2fd   :  { %v2054_v13 = vadd.f32 %v1337_v23, %v1959_v4  ;;  %v2056_v12 = vmul.f32 %v919_v28, %v807_v33  ;;  %v918_v41 = vadd.f32 1.0, %v1417_v6  ;;  %v881_v37 = vadd.f32 %v865_v34, %v2023_v46 }
 0x2fe   :  { %v797_v0 = vpop.f32.mrf.mxu1  ;;  %1430 = vtanh.f32 %v895_v27  ;;  %v894_v38 = vmul.f32 0.7978846, %v878_v47  ;;  %v864_v5 = vmul.f32 %v848_v58, %v2031_v11  ;;  %v834_v17 = vmul.f32 0.044715, %v2046_v62 }
 0x2ff   :  { %v1419_v14 = vpop.eup %1418  ;;  %v2062_v57 = vadd.f32 %v797_v0, %v1959_v4  ;;  %v954_v19 = vsel %vm950_vm1, %v2056_v12, 0.0  ;;  %v2066_v22 = vmul.f32 %v918_v41, %v806_v25  ;;  %v897_v48 = vmul.f32 0.7978846, %v881_v37 }
 0x300   :  { %955 = vadd.xlane.f32.xlu1 %v954_v19  ;;  %v921_v16 = vadd.f32 1.0, %v1419_v14  ;;  %1432 = vtanh.f32 %v894_v38  ;;  %v880_v24 = vadd.f32 %v864_v5, %v2031_v11  ;;  %v837_v49 = vmul.f32 0.044715, %v2054_v13 }
 0x301   :  { %v1421_v26 = vpop.eup %1420  ;;  %v836_v50 = vmul.f32 0.044715, %v2062_v57  ;;  %v951_v4 = vsel %vm950_vm1, %v2066_v22, 0.0  ;;  %v851_v20 = vmul.f32 %v835_v15, %v2039_v52  ;;  %1434 = vtanh.f32 %v897_v48 }
 0x302   :  { %952 = vadd.xlane.f32.xlu0 %v951_v4  ;;  %v2074_v7 = vmul.f32 %v921_v16, %v809_v56  ;;  %v920_v29 = vadd.f32 1.0, %v1421_v26  ;;  %v896_v9 = vmul.f32 0.7978846, %v880_v24  ;;  %v850_v60 = vmul.f32 %v834_v17, %v2046_v62 }
 0x303   :  { %v1423_v33 = vpop.eup %1422  ;;  %v867_v59 = vmul.f32 %v851_v20, %v2039_v52  ;;  %v853_v8 = vmul.f32 %v837_v49, %v2054_v13  ;;  %v813_v56 = vmul.f32 0.5, %v1995_v3  ;;  %v852_v61 = vmul.f32 %v836_v50, %v2062_v57 }
 0x304   :  { %v1425_v2 = vpop.eup %1424  ;;  %v960_v25 = vsel %vm950_vm1, %v2074_v7, 0.0  ;;  %v2082_v39 = vmul.f32 %v920_v29, %v808_v1  ;;  %v923_v42 = vadd.f32 1.0, %v1423_v33  ;;  %1436 = vtanh.f32 %v896_v9 }
 0x305   :  { %961 = vadd.xlane.f32.xlu1 %v960_v25  ;;  %v922_v31 = vadd.f32 1.0, %v1425_v2  ;;  %v883_v45 = vadd.f32 %v867_v59, %v2039_v52  ;;  %v866_v44 = vmul.f32 %v850_v60, %v2046_v62  ;;  %v869_v6 = vmul.f32 %v853_v8, %v2054_v13 }
 0x306   :  { %v1427_v30 = vpop.eup %1426  ;;  %v957_v53 = vsel %vm950_vm1, %v2082_v39, 0.0  ;;  %v2089_v55 = vmul.f32 %v923_v42, %v811_v36  ;;  %v868_v23 = vmul.f32 %v852_v61, %v2062_v57  ;;  %v812_v15 = vmul.f32 0.5, %v2002_v18 }
 0x307   :  { %958 = vadd.xlane.f32.xlu0 %v957_v53  ;;  %v2093_v54 = vmul.f32 %v922_v31, %v810_v40  ;;  %v925_v32 = vadd.f32 1.0, %v1427_v30  ;;  %v899_v28 = vmul.f32 0.7978846, %v883_v45  ;;  %v882_v1 = vadd.f32 %v866_v44, %v2046_v62 }
 0x308   :  { %v966_v34 = vsel %vm950_vm1, %v2089_v55, 0.0  ;;  %v885_v0 = vadd.f32 %v869_v6, %v2054_v13  ;;  %v884_v38 = vadd.f32 %v868_v23, %v2062_v57  ;;  %v815_v14 = vmul.f32 0.5, %v2009_v43 }
 0x309   :  { %v1429_v27 = vpop.eup %1428  ;;  %967 = vadd.xlane.f32.xlu1 %v966_v34  ;;  %v963_v3 = vsel %vm950_vm1, %v2093_v54, 0.0  ;;  %v2102_v47 = vmul.f32 %v925_v32, %v813_v56  ;;  %1438 = vtanh.f32 %v899_v28  ;;  %v898_v58 = vmul.f32 0.7978846, %v882_v1 }
 0x30a   :  { %v924_v41 = vadd.f32 1.0, %v1429_v27  ;;  %v901_v16 = vmul.f32 0.7978846, %v885_v0  ;;  %v900_v48 = vmul.f32 0.7978846, %v884_v38  ;;  %v814_v18 = vmul.f32 0.5, %v2016_v51 }
 0x30b   :  { %v1431_v37 = vpop.eup %1430  ;;  %964 = vadd.xlane.f32.xlu0 %v963_v3  ;;  %v972_v5 = vsel %vm950_vm1, %v2102_v47, 0.0  ;;  %1440 = vtanh.f32 %v898_v58  ;;  %v817_v29 = vmul.f32 0.5, %v2023_v46  ;;  %v816_v40 = vmul.f32 0.5, %v2031_v11 }
 0x30c   :  { %v2110_v17 = vmul.f32 %v924_v41, %v812_v15  ;;  %v927_v19 = vadd.f32 1.0, %v1431_v37  ;;  %1442 = vtanh.f32 %v901_v16  ;;  %v819_v42 = vmul.f32 0.5, %v2039_v52 }
 0x30d   :  { %v1433_v24 = vpop.eup %1432  ;;  %973 = vadd.xlane.f32.xlu1 %v972_v5  ;;  %1444 = vtanh.f32 %v900_v48  ;;  %v818_v11 = vmul.f32 0.5, %v2046_v62  ;;  %v821_v32 = vmul.f32 0.5, %v2054_v13  ;;  %v820_v1 = vmul.f32 0.5, %v2062_v57 }
 0x30e   :  { %v969_v26 = vsel %vm950_vm1, %v2110_v17, 0.0  ;;  %v2115_v49 = vmul.f32 %v927_v19, %v815_v14  ;;  %v926_v50 = vadd.f32 1.0, %v1433_v24  ;;  %v1435_v4 = vpop.eup %1434 }
 0x30f   :  { %970 = vadd.xlane.f32.xlu0 %v969_v26  ;;  %v929_v9 = vadd.f32 1.0, %v1435_v4 }
 0x310   :  { %v978_v43 = vsel %vm950_vm1, %v2115_v49, 0.0  ;;  %v2119_v20 = vmul.f32 %v926_v50, %v814_v18 }
 0x311   :  { %v1437_v33 = vpop.eup %1436  ;;  %979 = vadd.xlane.f32.xlu1 %v978_v43  ;;  %v2124_v36 = vmul.f32 %v929_v9, %v817_v29 }
 0x312   :  { %v975_v51 = vsel %vm950_vm1, %v2119_v20, 0.0  ;;  %v928_v59 = vadd.f32 1.0, %v1437_v33 }
 0x313   :  { %976 = vadd.xlane.f32.xlu0 %v975_v51  ;;  %v984_v60 = vsel %vm950_vm1, %v2124_v36, 0.0 }
 0x314   :  { %v2129_v2 = vmul.f32 %v928_v59, %v816_v40 }
 0x315   :  { %985 = vadd.xlane.f32.xlu1 %v984_v60 }
 0x316   :  { %v1439_v25 = vpop.eup %1438  ;;  %v981_v46 = vsel %vm950_vm1, %v2129_v2, 0.0 }
 0x317   :  { %982 = vadd.xlane.f32.xlu0 %v981_v46  ;;  %v931_v31 = vadd.f32 1.0, %v1439_v25 }
 0x318   :  { %v1441_v45 = vpop.eup %1440 }
 0x319   :  { %v2134_v44 = vmul.f32 %v931_v31, %v819_v42  ;;  %v930_v8 = vadd.f32 1.0, %v1441_v45  ;;  %v1443_v30 = vpop.eup %1442 }
 0x31a   :  { %v1445_v61 = vpop.eup %1444  ;;  %v933_v28 = vadd.f32 1.0, %v1443_v30 }
 0x31b   :  { %v990_v53 = vsel %vm950_vm1, %v2134_v44, 0.0  ;;  %v2139_v56 = vmul.f32 %v930_v8, %v818_v11  ;;  %v932_v34 = vadd.f32 1.0, %v1445_v61 }
 0x31c   :  { %991 = vadd.xlane.f32.xlu1 %v990_v53  ;;  %v2145_v62 = vmul.f32 %v933_v28, %v821_v32 }
 0x31d   :  { %v987_v52 = vsel %vm950_vm1, %v2139_v56, 0.0  ;;  %v2147_v6 = vmul.f32 %v932_v34, %v820_v1 }
 0x31e   :  { %988 = vadd.xlane.f32.xlu0 %v987_v52  ;;  %v996_v23 = vsel %vm950_vm1, %v2145_v62, 0.0 }
 0x31f   :  { %v993_v27 = vsel %vm950_vm1, %v2147_v6, 0.0 }
 0x320   :  { %997 = vadd.xlane.f32.xlu1 %v996_v23 }
 0x322   :  { %994 = vadd.xlane.f32.xlu0 %v993_v27 }
 0x389   :  { %v956_v13 = vpop.xlane.xlu1 %955 }
 0x38a   :  { %v1001_v3 = vmul.f32 0.03125, %v956_v13 }
 0x38b   :  { %v953_v58 = vpop.xlane.xlu0 %952 }
 0x38c   :  { %v2154_v15 = vsub.f32 %v2056_v12, %v1001_v3  ;;  %v1000_v57 = vmul.f32 0.03125, %v953_v58 }
 0x38e   :  { %v2157_v41 = vsub.f32 %v2066_v22, %v1000_v57  ;;  %v962_v0 = vpop.xlane.xlu1 %961  ;;  %v1033_v38 = vmul.f32 %v2154_v15, %v2154_v15 }
 0x38f   :  { %v1003_v37 = vmul.f32 0.03125, %v962_v0 }
 0x390   :  { %v959_v5 = vpop.xlane.xlu0 %958  ;;  %v1051_v14 = vsel %vm950_vm1, %v1033_v38, 0.0  ;;  %v1032_v19 = vmul.f32 %v2157_v41, %v2157_v41 }
 0x391   :  { %v2165_v16 = vsub.f32 %v2074_v7, %v1003_v37  ;;  %v1002_v12 = vmul.f32 0.03125, %v959_v5  ;;  %1052 = vadd.xlane.f32.xlu1 %v1051_v14 }
 0x392   :  { %v968_v48 = vpop.xlane.xlu1 %967  ;;  %v1048_v22 = vsel %vm950_vm1, %v1032_v19, 0.0 }
 0x393   :  { %v2169_v24 = vsub.f32 %v2082_v39, %v1002_v12  ;;  %v1005_v18 = vmul.f32 0.03125, %v968_v48  ;;  %1049 = vadd.xlane.f32.xlu0 %v1048_v22  ;;  %v1035_v26 = vmul.f32 %v2165_v16, %v2165_v16 }
 0x394   :  { %v965_v50 = vpop.xlane.xlu0 %964 }
 0x395   :  { %v2174_v4 = vsub.f32 %v2089_v55, %v1005_v18  ;;  %v1004_v43 = vmul.f32 0.03125, %v965_v50  ;;  %v1057_v7 = vsel %vm950_vm1, %v1035_v26, 0.0  ;;  %v1034_v29 = vmul.f32 %v2169_v24, %v2169_v24 }
 0x396   :  { %v974_v9 = vpop.xlane.xlu1 %973  ;;  %1058 = vadd.xlane.f32.xlu1 %v1057_v7 }
 0x397   :  { %v2180_v39 = vsub.f32 %v2093_v54, %v1004_v43  ;;  %v1007_v33 = vmul.f32 0.03125, %v974_v9  ;;  %v1054_v51 = vsel %vm950_vm1, %v1034_v29, 0.0  ;;  %v1037_v40 = vmul.f32 %v2174_v4, %v2174_v4 }
 0x398   :  { %1055 = vadd.xlane.f32.xlu0 %v1054_v51  ;;  %v971_v55 = vpop.xlane.xlu0 %970 }
 0x399   :  { %v2186_v59 = vsub.f32 %v2102_v47, %v1007_v33  ;;  %v1006_v60 = vmul.f32 0.03125, %v971_v55  ;;  %v1063_v25 = vsel %vm950_vm1, %v1037_v40, 0.0  ;;  %v1036_v46 = vmul.f32 %v2180_v39, %v2180_v39 }
 0x39a   :  { %v980_v42 = vpop.xlane.xlu1 %979  ;;  %1064 = vadd.xlane.f32.xlu1 %v1063_v25 }
 0x39b   :  { %v2192_v54 = vsub.f32 %v2110_v17, %v1006_v60  ;;  %v1009_v31 = vmul.f32 0.03125, %v980_v42  ;;  %v1060_v45 = vsel %vm950_vm1, %v1036_v46, 0.0  ;;  %v1039_v11 = vmul.f32 %v2186_v59, %v2186_v59 }
 0x39c   :  { %1061 = vadd.xlane.f32.xlu0 %v1060_v45  ;;  %v977_v47 = vpop.xlane.xlu0 %976 }
 0x39d   :  { %v2198_v8 = vsub.f32 %v2115_v49, %v1009_v31  ;;  %v1008_v30 = vmul.f32 0.03125, %v977_v47  ;;  %v1069_v53 = vsel %vm950_vm1, %v1039_v11, 0.0  ;;  %v1038_v61 = vmul.f32 %v2192_v54, %v2192_v54 }
 0x39e   :  { %v986_v32 = vpop.xlane.xlu1 %985  ;;  %1070 = vadd.xlane.f32.xlu1 %v1069_v53 }
 0x39f   :  { %v2204_v17 = vsub.f32 %v2119_v20, %v1008_v30  ;;  %v1011_v28 = vmul.f32 0.03125, %v986_v32  ;;  %v1066_v52 = vsel %vm950_vm1, %v1038_v61, 0.0  ;;  %v1041_v1 = vmul.f32 %v2198_v8, %v2198_v8 }
 0x3a0   :  { %1067 = vadd.xlane.f32.xlu0 %v1066_v52  ;;  %v983_v49 = vpop.xlane.xlu0 %982 }
 0x3a1   :  { %v2210_v34 = vsub.f32 %v2124_v36, %v1011_v28  ;;  %v1010_v23 = vmul.f32 0.03125, %v983_v49  ;;  %v1075_v27 = vsel %vm950_vm1, %v1041_v1, 0.0  ;;  %v1040_v13 = vmul.f32 %v2204_v17, %v2204_v17 }
 0x3a2   :  { %1076 = vadd.xlane.f32.xlu1 %v1075_v27 }
 0x3a3   :  { %v2216_v20 = vsub.f32 %v2129_v2, %v1010_v23  ;;  %v1072_v3 = vsel %vm950_vm1, %v1040_v13, 0.0  ;;  %v1043_v58 = vmul.f32 %v2210_v34, %v2210_v34 }
 0x3a4   :  { %1073 = vadd.xlane.f32.xlu0 %v1072_v3  ;;  %v2252_v3 = vrot.slane %v1954_v63, %v571_v35 }
 0x3a5   :  { %v992_v57 = vpop.xlane.xlu1 %991  ;;  %v1081_v36 = vsel %vm950_vm1, %v1043_v58, 0.0  ;;  %v1042_v0 = vmul.f32 %v2216_v20, %v2216_v20 }
 0x3a6   :  { %v1013_v38 = vmul.f32 0.03125, %v992_v57  ;;  %1082 = vadd.xlane.f32.xlu1 %v1081_v36 }
 0x3a7   :  { %v989_v37 = vpop.xlane.xlu0 %988  ;;  %v1078_v5 = vsel %vm950_vm1, %v1042_v0, 0.0 }
 0x3a8   :  { %v2226_v2 = vsub.f32 %v2134_v44, %v1013_v38  ;;  %v1012_v14 = vmul.f32 0.03125, %v989_v37  ;;  %1079 = vadd.xlane.f32.xlu0 %v1078_v5  ;;  %v2257_v38 = vrot.slane %v1954_v63, %v591_v21 }
 0x3a9   :  { %v998_v12 = vpop.xlane.xlu1 %997 }
 0x3aa   :  { %v2229_v19 = vsub.f32 %v2139_v56, %v1012_v14  ;;  %v1045_v48 = vmul.f32 %v2226_v2, %v2226_v2  ;;  %v1015_v22 = vmul.f32 0.03125, %v998_v12 }
 0x3ab   :  { %v995_v18 = vpop.xlane.xlu0 %994 }
 0x3ac   :  { %v1014_v26 = vmul.f32 0.03125, %v995_v18  ;;  %v1087_v50 = vsel %vm950_vm1, %v1045_v48, 0.0  ;;  %v1044_v43 = vmul.f32 %v2229_v19, %v2229_v19  ;;  %v2237_v44 = vsub.f32 %v2145_v62, %v1015_v22 }
 0x3ad   :  { %1088 = vadd.xlane.f32.xlu1 %v1087_v50 }
 0x3ae   :  { %v2240_v7 = vsub.f32 %v2147_v6, %v1014_v26  ;;  %v1084_v56 = vsel %vm950_vm1, %v1044_v43, 0.0  ;;  %v1047_v29 = vmul.f32 %v2237_v44, %v2237_v44 }
 0x3af   :  { %1085 = vadd.xlane.f32.xlu0 %v1084_v56 }
 0x3b0   :  { %v1046_v9 = vmul.f32 %v2240_v7, %v2240_v7  ;;  %v1093_v33 = vsel %vm950_vm1, %v1047_v29, 0.0 }
 0x3b1   :  { %1094 = vadd.xlane.f32.xlu1 %v1093_v33 }
 0x3b2   :  { %v1090_v51 = vsel %vm950_vm1, %v1046_v9, 0.0 }
 0x3b3   :  { %1091 = vadd.xlane.f32.xlu0 %v1090_v51 }
 0x41a   :  { %v1053_v62 = vpop.xlane.xlu1 %1052 }
 0x41b   :  { %v1097_v40 = vmul.f32 0.03125, %v1053_v62 }
 0x41c   :  { %v1050_v55 = vpop.xlane.xlu0 %1049 }
 0x41d   :  { %v1113_v6 = vadd.f32 1e-05, %v1097_v40  ;;  %v1096_v60 = vmul.f32 0.03125, %v1050_v55 }
 0x41f   :  { %1446 = vrsqrt.f32 %v1113_v6  ;;  %v1112_v25 = vadd.f32 1e-05, %v1096_v60  ;;  %v1059_v46 = vpop.xlane.xlu1 %1058 }
 0x420   :  { %v1099_v42 = vmul.f32 0.03125, %v1059_v46 }
 0x421   :  { %1448 = vrsqrt.f32 %v1112_v25  ;;  %v1056_v31 = vpop.xlane.xlu0 %1055 }
 0x422   :  { %v1115_v45 = vadd.f32 1e-05, %v1099_v42  ;;  %v1098_v11 = vmul.f32 0.03125, %v1056_v31 }
 0x423   :  { %v1065_v47 = vpop.xlane.xlu1 %1064 }
 0x424   :  { %1450 = vrsqrt.f32 %v1115_v45  ;;  %v1114_v30 = vadd.f32 1e-05, %v1098_v11  ;;  %v1101_v53 = vmul.f32 0.03125, %v1065_v47 }
 0x425   :  { %v1062_v61 = vpop.xlane.xlu0 %1061 }
 0x426   :  { %1452 = vrsqrt.f32 %v1114_v30  ;;  %v1117_v32 = vadd.f32 1e-05, %v1101_v53  ;;  %v1100_v28 = vmul.f32 0.03125, %v1062_v61 }
 0x427   :  { %v1071_v52 = vpop.xlane.xlu1 %1070 }
 0x428   :  { %1454 = vrsqrt.f32 %v1117_v32  ;;  %v1116_v1 = vadd.f32 1e-05, %v1100_v28  ;;  %v1103_v49 = vmul.f32 0.03125, %v1071_v52 }
 0x429   :  { %v1068_v23 = vpop.xlane.xlu0 %1067 }
 0x42a   :  { %1456 = vrsqrt.f32 %v1116_v1  ;;  %v1119_v27 = vadd.f32 1e-05, %v1103_v49  ;;  %v1102_v13 = vmul.f32 0.03125, %v1068_v23 }
 0x42b   :  { %v1077_v58 = vpop.xlane.xlu1 %1076 }
 0x42c   :  { %v1447_v57 = vpop.eup %1446  ;;  %1458 = vrsqrt.f32 %v1119_v27  ;;  %v1118_v36 = vadd.f32 1e-05, %v1102_v13  ;;  %v1105_v0 = vmul.f32 0.03125, %v1077_v58 }
 0x42d   :  { %v1145_v37 = vmul.f32 %v1447_v57, %v2154_v15  ;;  %v1074_v5 = vpop.xlane.xlu0 %1073 }
 0x42e   :  { %v1449_v14 = vpop.eup %1448  ;;  %1460 = vrsqrt.f32 %v1118_v36  ;;  %v1121_v12 = vadd.f32 1e-05, %v1105_v0  ;;  %v1104_v48 = vmul.f32 0.03125, %v1074_v5 }
 0x42f   :  { %v1165_v35 = vmul.f32 %v2252_v3, %v1145_v37  ;;  %v1144_v22 = vmul.f32 %v1449_v14, %v2157_v41  ;;  %v1083_v18 = vpop.xlane.xlu1 %1082 }
 0x430   :  { %1462 = vrsqrt.f32 %v1121_v12  ;;  %v1120_v26 = vadd.f32 1e-05, %v1104_v48  ;;  %v1107_v50 = vmul.f32 0.03125, %v1083_v18 }
 0x431   :  { %v1451_v43 = vpop.eup %1450  ;;  %v1185_v10 = vadd.f32 %v2257_v38, %v1165_v35  ;;  %v1164_v21 = vmul.f32 %v2252_v3, %v1144_v22  ;;  %v1080_v63 = vpop.xlane.xlu0 %1079 }
 0x432   :  { %v1147_v15 = vmul.f32 %v1451_v43, %v2165_v16  ;;  %1464 = vrsqrt.f32 %v1120_v26  ;;  %v1123_v56 = vadd.f32 1e-05, %v1107_v50  ;;  %v1106_v29 = vmul.f32 0.03125, %v1080_v63 }
 0x433   :  { %v1453_v9 = vpop.eup %1452  ;;  %1201 = vst.msk [vmem:[#allocation2 + $0x8] sm:$0xff] %vm950_vm1, %v1185_v10  ;;  %v1184_v41 = vadd.f32 %v2257_v38, %v1164_v21 }
 0x434   :  { %v1167_v33 = vmul.f32 %v2252_v3, %v1147_v15  ;;  %v1146_v51 = vmul.f32 %v1453_v9, %v2169_v24  ;;  %1466 = vrsqrt.f32 %v1123_v56  ;;  %v1122_v62 = vadd.f32 1e-05, %v1106_v29 }
 0x435   :  { %v1455_v40 = vpop.eup %1454  ;;  %1200 = vst.msk [vmem:[#allocation2] sm:$0xff] %vm950_vm1, %v1184_v41 }
 0x436   :  { %v1187_v55 = vadd.f32 %v2257_v38, %v1167_v33  ;;  %v1166_v16 = vmul.f32 %v2252_v3, %v1146_v51  ;;  %v1149_v6 = vmul.f32 %v1455_v40, %v2174_v4  ;;  %1468 = vrsqrt.f32 %v1122_v62  ;;  %v1089_v60 = vpop.xlane.xlu1 %1088 }
 0x437   :  { %v1457_v25 = vpop.eup %1456  ;;  %v1109_v46 = vmul.f32 0.03125, %v1089_v60 }
 0x438   :  { %1203 = vst.msk [vmem:[#allocation2 + $0x18] sm:$0xff] %vm950_vm1, %v1187_v55  ;;  %v1186_v42 = vadd.f32 %v2257_v38, %v1166_v16  ;;  %v1169_v24 = vmul.f32 %v2252_v3, %v1149_v6  ;;  %v1148_v31 = vmul.f32 %v1457_v25, %v2180_v39  ;;  %v1086_v45 = vpop.xlane.xlu0 %1085 }
 0x439   :  { %v1459_v11 = vpop.eup %1458  ;;  %v1125_v47 = vadd.f32 1e-05, %v1109_v46  ;;  %v1108_v30 = vmul.f32 0.03125, %v1086_v45 }
 0x43a   :  { %1202 = vst.msk [vmem:[#allocation2 + $0x10] sm:$0xff] %vm950_vm1, %v1186_v42  ;;  %v1189_v4 = vadd.f32 %v2257_v38, %v1169_v24  ;;  %v1168_v53 = vmul.f32 %v2252_v3, %v1148_v31  ;;  %v1151_v61 = vmul.f32 %v1459_v11, %v2186_v59  ;;  %v1095_v52 = vpop.xlane.xlu1 %1094 }
 0x43b   :  { %v1461_v32 = vpop.eup %1460  ;;  %1470 = vrsqrt.f32 %v1125_v47  ;;  %v1124_v28 = vadd.f32 1e-05, %v1108_v30  ;;  %v1111_v23 = vmul.f32 0.03125, %v1095_v52 }
 0x43c   :  { %1205 = vst.msk [vmem:[#allocation2 + $0x28] sm:$0xff] %vm950_vm1, %v1189_v4  ;;  %v1188_v39 = vadd.f32 %v2257_v38, %v1168_v53  ;;  %v1171_v1 = vmul.f32 %v2252_v3, %v1151_v61  ;;  %v1150_v49 = vmul.f32 %v1461_v32, %v2192_v54  ;;  %v1092_v27 = vpop.xlane.xlu0 %1091 }
 0x43d   :  { %v1463_v13 = vpop.eup %1462  ;;  %1472 = vrsqrt.f32 %v1124_v28  ;;  %v1110_v58 = vmul.f32 0.03125, %v1092_v27  ;;  %v1127_v0 = vadd.f32 1e-05, %v1111_v23 }
 0x43e   :  { %1204 = vst.msk [vmem:[#allocation2 + $0x20] sm:$0xff] %vm950_vm1, %v1188_v39  ;;  %v1191_v59 = vadd.f32 %v2257_v38, %v1171_v1  ;;  %v1170_v57 = vmul.f32 %v2252_v3, %v1150_v49  ;;  %v1153_v36 = vmul.f32 %v1463_v13, %v2198_v8 }
 0x43f   :  { %v1465_v37 = vpop.eup %1464  ;;  %v1126_v5 = vadd.f32 1e-05, %v1110_v58  ;;  %1474 = vrsqrt.f32 %v1127_v0 }
 0x440   :  { %1207 = vst.msk [vmem:[#allocation2 + $0x38] sm:$0xff] %vm950_vm1, %v1191_v59  ;;  %v1190_v54 = vadd.f32 %v2257_v38, %v1170_v57  ;;  %v1173_v14 = vmul.f32 %v2252_v3, %v1153_v36  ;;  %v1152_v12 = vmul.f32 %v1465_v37, %v2204_v17 }
 0x441   :  { %v1467_v48 = vpop.eup %1466  ;;  %1476 = vrsqrt.f32 %v1126_v5 }
 0x442   :  { %1206 = vst.msk [vmem:[#allocation2 + $0x30] sm:$0xff] %vm950_vm1, %v1190_v54  ;;  %v1193_v35 = vadd.f32 %v2257_v38, %v1173_v14  ;;  %v1172_v8 = vmul.f32 %v2252_v3, %v1152_v12  ;;  %v1155_v22 = vmul.f32 %v1467_v48, %v2210_v34 }
 0x443   :  { %v1469_v18 = vpop.eup %1468 }
 0x444   :  { %1209 = vst.msk [vmem:[#allocation2 + $0x48] sm:$0xff] %vm950_vm1, %v1193_v35  ;;  %v1192_v26 = vadd.f32 %v2257_v38, %v1172_v8  ;;  %v1175_v50 = vmul.f32 %v2252_v3, %v1155_v22  ;;  %v1154_v17 = vmul.f32 %v1469_v18, %v2216_v20 }
 0x446   :  { %1208 = vst.msk [vmem:[#allocation2 + $0x40] sm:$0xff] %vm950_vm1, %v1192_v26  ;;  %v1195_v43 = vadd.f32 %v2257_v38, %v1175_v50  ;;  %v1174_v10 = vmul.f32 %v2252_v3, %v1154_v17 }
 0x448   :  { %v1471_v21 = vpop.eup %1470  ;;  %1211 = vst.msk [vmem:[#allocation2 + $0x58] sm:$0xff] %vm950_vm1, %v1195_v43  ;;  %v1194_v34 = vadd.f32 %v2257_v38, %v1174_v10 }
 0x449   :  { %v1157_v63 = vmul.f32 %v1471_v21, %v2226_v2 }
 0x44a   :  { %v1473_v15 = vpop.eup %1472  ;;  %1210 = vst.msk [vmem:[#allocation2 + $0x50] sm:$0xff] %vm950_vm1, %v1194_v34 }
 0x44b   :  { %v1177_v56 = vmul.f32 %v2252_v3, %v1157_v63  ;;  %v1156_v20 = vmul.f32 %v1473_v15, %v2229_v19 }
 0x44c   :  { %v1475_v29 = vpop.eup %1474 }
 0x44d   :  { %v1197_v9 = vadd.f32 %v2257_v38, %v1177_v56  ;;  %v1176_v41 = vmul.f32 %v2252_v3, %v1156_v20  ;;  %v1159_v51 = vmul.f32 %v1475_v29, %v2237_v44 }
 0x44e   :  { %v1477_v33 = vpop.eup %1476 }
 0x44f   :  { %1213 = vst.msk [vmem:[#allocation2 + $0x68] sm:$0xff] %vm950_vm1, %v1197_v9  ;;  %v1196_v62 = vadd.f32 %v2257_v38, %v1176_v41  ;;  %v1158_v2 = vmul.f32 %v1477_v33, %v2240_v7  ;;  %v1179_v40 = vmul.f32 %v2252_v3, %v1159_v51 }
 0x451   :  { %1212 = vst.msk [vmem:[#allocation2 + $0x60] sm:$0xff] %vm950_vm1, %v1196_v62  ;;  %v1178_v19 = vmul.f32 %v2252_v3, %v1158_v2  ;;  %v1199_v55 = vadd.f32 %v2257_v38, %v1179_v40 }
 0x453   :  { %v1198_v16 = vadd.f32 %v2257_v38, %v1178_v19  ;;  %1215 = vst.msk [vmem:[#allocation2 + $0x78] sm:$0xff] %vm950_vm1, %v1199_v55 }
 0x455   :  { %1214 = vst.msk [vmem:[#allocation2 + $0x70] sm:$0xff] %vm950_vm1, %v1198_v16 }
 0x456   :  { %1489 = shalt.err (!%p1486_p4)
}
 0x457   :  { %s1501_s17 = smov 128   ;;  %s1502_s18 = smov 8  }
 0x458   :  { %1227 = dma.vmem_to_hbm [thread:$0]  %s1222_s15, 2048, %s2331_s5, [#allocation3], %s1501_s17, %s1501_s17, %s1502_s18  }
 0x459   :  { %1498 = dma.done.wait [#allocation3], 2048  }
 0x45a   :  { %1499 = vsyncadd [#allocation3], 4294965248 }
 0x45b   :  { %1231 = vsyncpa [#allocation3], 1 }

// kernel: _lambda_.2
= control target key start
LH: loop header
LB: loop body
LE: loop exit
PB: predicated region body
PF: predicated region fallthrough
CT: control target
= control target key end

     0   :  { %9 = vsyncpa [#allocation3], 0  ;;  %s8633_s0 = inlined_call_operand.vmem [shape: bf16[1024,8], index: 0, kind: input, shape index: {}]   ;;  %s8634_s1 = inlined_call_operand.vmem [shape: f32[8,8], index: 1, kind: input, shape index: {}]   ;;  %s8635_s2 = inlined_call_operand.vmem [shape: f32[8,16], index: 2, kind: input, shape index: {}]   ;;  %s8636_s3 = inlined_call_operand.vmem [shape: f32[8,16], index: 3, kind: input, shape index: {}]   ;;  %s8637_s4 = inlined_call_operand.hbm [shape: f32[1024,16], index: 4, kind: output, shape index: {}]  }
   0x1   :  { %11 = vsyncpa [#allocation3 + $0x1], 0  ;;  %s5257_s15 = smov 0   ;;  %s5259_s16 = smov 0  }
   0x2   :  { %s5261_s17 = smov 0   ;;  %s5263_s18 = smov 0  }
   0x3 LB: > { %s5278_s19 = sadd.s32 4294967295, %s5227_s18   ;;  %s4211_s20 = sadd.s32 4294967294, %s5227_s18   ;;  %s5227_s18 = sphi %s5263_s18, %s8928_s18   ;;  %s5223_s17 = sphi %s5261_s17, %s8927_s17   ;;  %s5219_s16 = sphi %s5259_s16, %s8926_s16   ;;  %s5215_s15 = sphi %s5257_s15, %s8925_s15  }
   0x4   : > { %s5282_s21 = sadd.s32 1, %s5227_s18   ;;  %s113_s22 = sadd.s32 1, %s5223_s17 }
   0x5   : > { %s110_s23 = ssub.s32 %s5227_s18, %s5282_s21  ;;  %p123_p0 = scmp.ne.s32.totalorder %s5223_s17, %s5219_s16 }
   0x6   : > { %p111_p1 = scmp.eq.s32.totalorder %s110_s23, 0  ;;  %p124_p2 = scmp.eq.s32.totalorder %s5278_s19, 1 }
   0x7   : > { %p129_p3 = scmp.ne.s32.totalorder %s5219_s16, %s5215_s15  ;;  %p130_p4 = scmp.eq.s32.totalorder %s4211_s20, 1 }
   0x8   : > { %s5293_s24 = scalar_select %p111_p1, %s5223_s17, %s113_s22  }
   0x9   : > { %p5295_p5 = por %p124_p2, %p123_p0  ;;  %p5299_p6 = por %p130_p4, %p129_p3 }
   0xa   : > { %p4214_p7 = scmp.ge.s32.totalorder %s5227_s18, 1  ;;  %p166_p8 = scmp.lt.s32.totalorder %s5227_s18, 3 }
   0xc   : > { %p167_p9 = pnand %p4214_p7, %p166_p8 }
   0xe   : > { %170 = sbr.rel (%p167_p9) target bundleno = 1113 (0x459), region = 36 }
  0x13   : > { %s4216_s27 = sshll.u32 %s5278_s19, 6  ;;  %v330_v0 = vlaneseq  ;;  %v327_v2 = vld [vmem:[%s8634_s1] sm:$0xff]  ;;  %vm974_vm0 = vcmask 64512   ;;  %vm3101_vm1 = vcmask 130048   ;;  %s189_s14 = sand.u32 1, %s5219_s16  }
  0x14   : > { %p193_p10 = scmp.lt.s32.totalorder %s4216_s27, 127  ;;  %s4215_s23 = sshll.u32 %s189_s14, 9 }
  0x15   : > { %v5306_v1 = vshrl.u32 %v330_v0, 7  ;;  %s4287_s28 = sshll.u32 %s5278_s19, 13  ;;  %s8593_s19 = scalar_lea.sflag [#allocation3], %s189_s14 }
  0x16   : > { %s8930_s27 = smov (!%p193_p10, %s4216_s27), 127  ;;  %s8584_s6 = scalar_lea.hbm %s8637_s4, %s4287_s28 }
  0x17   : > { %8737 = vst [vmem:[#allocation5_spill] sm:$0xff] %v5306_v1  ;;  %v8638_v3 = vsub.s32 0, %v5306_v1  ;;  %s4217_s30 = sshll.u32 %s8930_s27, 2  ;;  %s8266_s27 = scalar_lea.vmem [#allocation2], %s4215_s23 }
  0x18   : > { %s5315_s7 = scalar_lea.vmem %s8633_s0, %s4217_s30  ;;  %s4149_s29 = sshll.u32 %s8266_s27, 4  ;;  %s8586_s29 = int_to_ptr.vmem [resolvable:$true] %s4149_s29 }
  0x19   : > { %v5319_v4 = vrot.slane %v327_v2, %v8638_v3  ;;  %v4289_v5 = vld [vmem:[%s5315_s7] sm:$0xff]   ;;  %v4416_v7 = vld [vmem:[%s5315_s7 + $0x8] sm:$0xff]   ;;  %v4417_v51 = vld [vmem:[%s5315_s7 + $0x10] sm:$0xff]   ;;  %s5229_s8 = smov [#allocation2]  }
  0x1a   : > { %v4431_v6 = vld [vmem:[%s5315_s7 + $0x80] sm:$0xff]   ;;  %v4290_v8 = vunpack.c.l.bf16 %v4289_v5  ;;  %v4291_v9 = vunpack.c.h.bf16 %v4289_v5  ;;  %v4432_v12 = vld [vmem:[%s5315_s7 + $0x88] sm:$0xff]   ;;  %v4294_v13 = vunpack.c.l.bf16 %v4416_v7  ;;  %v4295_v15 = vunpack.c.h.bf16 %v4416_v7  ;;  %v4433_v52 = vld [vmem:[%s5315_s7 + $0x90] sm:$0xff]   ;;  %s5171_s9 = sshll.u32 %s5229_s8, 4  ;;  %s5172_s9 = int_to_ptr.vmem [resolvable:$false] %s5171_s9 }
  0x1b   : > { %v4354_v10 = vunpack.c.l.bf16 %v4431_v6  ;;  %v4355_v11 = vunpack.c.h.bf16 %v4431_v6  ;;  %v4358_v14 = vunpack.c.l.bf16 %v4432_v12  ;;  %v4359_v22 = vunpack.c.h.bf16 %v4432_v12  ;;  %s5173_s10 = scalar_lea.vmem %s5172_s9, 16384  ;;  %p5174_p0 = scmp.lt.s32.totalorder %s8586_s29, %s5172_s9 }
  0x1c   : > { %v334_v16 = vadd.f32 %v4290_v8, %v5319_v4  ;;  %v335_v17 = vadd.f32 %v4291_v9, %v5319_v4  ;;  %v5330_v20 = vadd.f32 %v4294_v13, %v5319_v4  ;;  %v5336_v27 = vadd.f32 %v4295_v15, %v5319_v4  ;;  %v4418_v15 = vld [vmem:[%s5315_s7 + $0x18] sm:$0xff]  }
  0x1d   : > { %v366_v18 = vadd.f32 %v4354_v10, %v5319_v4  ;;  %v367_v19 = vadd.f32 %v4355_v11, %v5319_v4  ;;  %v5333_v21 = vadd.f32 %v4358_v14, %v5319_v4  ;;  %v5341_v34 = vadd.f32 %v4359_v22, %v5319_v4 }
  0x1e   : > { %v462_v23 = vmul.f32 0.044715, %v334_v16  ;;  %v463_v24 = vmul.f32 0.044715, %v335_v17  ;;  %v464_v30 = vmul.f32 0.044715, %v5330_v20  ;;  %v4298_v63 = vunpack.c.l.bf16 %v4417_v51 }
  0x1f   : > { %v494_v25 = vmul.f32 0.044715, %v366_v18  ;;  %v495_v26 = vmul.f32 0.044715, %v367_v19  ;;  %v496_v33 = vmul.f32 0.044715, %v5333_v21  ;;  %v4362_v5 = vunpack.c.l.bf16 %v4433_v52 }
  0x20   : > { %v526_v28 = vmul.f32 %v462_v23, %v334_v16  ;;  %v527_v29 = vmul.f32 %v463_v24, %v335_v17  ;;  %v5343_v35 = vmul.f32 0.5, %v334_v16  ;;  %v528_v38 = vmul.f32 %v464_v30, %v5330_v20 }
  0x21   : > { %v558_v31 = vmul.f32 %v494_v25, %v366_v18  ;;  %v559_v32 = vmul.f32 %v495_v26, %v367_v19  ;;  %v560_v41 = vmul.f32 %v496_v33, %v5333_v21  ;;  %v465_v42 = vmul.f32 0.044715, %v5336_v27  ;;  %v4434_v25 = vld [vmem:[%s5315_s7 + $0x98] sm:$0xff]  }
  0x22   : > { %v590_v36 = vmul.f32 %v526_v28, %v334_v16  ;;  %v591_v37 = vmul.f32 %v527_v29, %v335_v17  ;;  %v5348_v44 = vmul.f32 0.5, %v335_v17  ;;  %v592_v46 = vmul.f32 %v528_v38, %v5330_v20 }
  0x23   : > { %v622_v39 = vmul.f32 %v558_v31, %v366_v18  ;;  %v623_v40 = vmul.f32 %v559_v32, %v367_v19  ;;  %v624_v49 = vmul.f32 %v560_v41, %v5333_v21  ;;  %v529_v50 = vmul.f32 %v465_v42, %v5336_v27 }
  0x24   : > { %v654_v43 = vadd.f32 %v590_v36, %v334_v16  ;;  %v655_v45 = vadd.f32 %v591_v37, %v335_v17  ;;  %v656_v55 = vadd.f32 %v592_v46, %v5330_v20  ;;  %v497_v56 = vmul.f32 0.044715, %v5341_v34 }
  0x25   : > { %v686_v47 = vadd.f32 %v622_v39, %v366_v18  ;;  %v687_v48 = vadd.f32 %v623_v40, %v367_v19  ;;  %v688_v59 = vadd.f32 %v624_v49, %v5333_v21  ;;  %v593_v60 = vmul.f32 %v529_v50, %v5336_v27 }
  0x26   : > { %v718_v53 = vmul.f32 0.7978846, %v654_v43  ;;  %v719_v54 = vmul.f32 0.7978846, %v655_v45  ;;  %v720_v61 = vmul.f32 0.7978846, %v656_v55  ;;  %v561_v62 = vmul.f32 %v497_v56, %v5341_v34 }
  0x27   : > { %v750_v57 = vmul.f32 0.7978846, %v686_v47  ;;  %v751_v58 = vmul.f32 0.7978846, %v687_v48  ;;  %v752_v0 = vmul.f32 0.7978846, %v688_v59  ;;  %v657_v2 = vadd.f32 %v593_v60, %v5336_v27 }
  0x28   : > { %4653 = vtanh.f32 %v718_v53  ;;  %v625_v6 = vmul.f32 %v561_v62, %v5341_v34  ;;  %v5363_v7 = vadd.f32 %v4298_v63, %v5319_v4  ;;  %v4299_v8 = vunpack.c.h.bf16 %v4417_v51 }
  0x29   : > { %4655 = vtanh.f32 %v719_v54  ;;  %v721_v9 = vmul.f32 0.7978846, %v657_v2  ;;  %v5366_v10 = vadd.f32 %v4362_v5, %v5319_v4  ;;  %v4363_v11 = vunpack.c.h.bf16 %v4433_v52 }
  0x2a   : > { %4657 = vtanh.f32 %v750_v57  ;;  %v5368_v12 = vmul.f32 0.5, %v366_v18  ;;  %v689_v13 = vadd.f32 %v625_v6, %v5341_v34  ;;  %v466_v14 = vmul.f32 0.044715, %v5363_v7 }
  0x2b   : > { %4659 = vtanh.f32 %v751_v58  ;;  %v5373_v16 = vmul.f32 0.5, %v367_v19  ;;  %v498_v17 = vmul.f32 0.044715, %v5366_v10  ;;  %v5377_v22 = vadd.f32 %v4299_v8, %v5319_v4 }
  0x2c   : > { %4661 = vtanh.f32 %v720_v61  ;;  %v753_v23 = vmul.f32 0.7978846, %v689_v13  ;;  %v530_v24 = vmul.f32 %v466_v14, %v5363_v7  ;;  %v5381_v18 = vadd.f32 %v4363_v11, %v5319_v4 }
  0x2d   : > { %4663 = vtanh.f32 %v752_v0  ;;  %v400_v26 = vmul.f32 0.5, %v5330_v20  ;;  %v562_v19 = vmul.f32 %v498_v17, %v5366_v10  ;;  %v467_v28 = vmul.f32 0.044715, %v5377_v22 }
  0x2e   : > { %4665 = vtanh.f32 %v721_v9  ;;  %v4302_v29 = vunpack.c.l.bf16 %v4418_v15  ;;  %v5388_v30 = vmul.f32 0.5, %v5333_v21  ;;  %v594_v31 = vmul.f32 %v530_v24, %v5363_v7 }
  0x2f   : > { %4667 = vtanh.f32 %v753_v23  ;;  %v499_v32 = vmul.f32 0.044715, %v5381_v18  ;;  %v626_v33 = vmul.f32 %v562_v19, %v5366_v10  ;;  %v531_v36 = vmul.f32 %v467_v28, %v5377_v22 }
  0x30   : > { %v5395_v37 = vadd.f32 %v4302_v29, %v5319_v4  ;;  %v4366_v20 = vunpack.c.l.bf16 %v4434_v25  ;;  %v658_v38 = vadd.f32 %v594_v31, %v5363_v7  ;;  %v4303_v40 = vunpack.c.h.bf16 %v4418_v15 }
  0x31   : > { %v563_v39 = vmul.f32 %v499_v32, %v5381_v18  ;;  %v4367_v21 = vunpack.c.h.bf16 %v4434_v25  ;;  %v401_v41 = vmul.f32 0.5, %v5336_v27  ;;  %v690_v42 = vadd.f32 %v626_v33, %v5366_v10  ;;  %v4419_v33 = vld [vmem:[%s5315_s7 + $0x20] sm:$0xff]  }
  0x32   : > { %v595_v43 = vmul.f32 %v531_v36, %v5377_v22  ;;  %v468_v45 = vmul.f32 0.044715, %v5395_v37  ;;  %v5404_v46 = vmul.f32 0.5, %v5341_v34  ;;  %v722_v47 = vmul.f32 0.7978846, %v658_v38 }
  0x33   : > { %v627_v48 = vmul.f32 %v563_v39, %v5381_v18  ;;  %v5408_v49 = vadd.f32 %v4366_v20, %v5319_v4  ;;  %v754_v51 = vmul.f32 0.7978846, %v690_v42  ;;  %v5413_v53 = vadd.f32 %v4303_v40, %v5319_v4  ;;  %v5454_v39 = vld [vmem:[%s5315_s7 + $0xa0] sm:$0xff]  }
  0x34   : > { %v659_v52 = vadd.f32 %v595_v43, %v5377_v22  ;;  %v532_v27 = vmul.f32 %v468_v45, %v5395_v37  ;;  %4669 = vtanh.f32 %v722_v47  ;;  %v5417_v56 = vadd.f32 %v4367_v21, %v5319_v4 }
  0x35   : > { %v4654_v50 = vpop.eup %4653  ;;  %v691_v34 = vadd.f32 %v627_v48, %v5381_v18  ;;  %4671 = vtanh.f32 %v754_v51  ;;  %v500_v2 = vmul.f32 0.044715, %v5408_v49  ;;  %v434_v20 = vmul.f32 0.5, %v5366_v10 }
  0x36   : > { %v4656_v54 = vpop.eup %4655  ;;  %v846_v55 = vadd.f32 1.0, %v4654_v50  ;;  %v723_v59 = vmul.f32 0.7978846, %v659_v52  ;;  %v596_v60 = vmul.f32 %v532_v27, %v5395_v37  ;;  %v4306_v43 = vunpack.c.l.bf16 %v4419_v33 }
  0x37   : > { %v4658_v57 = vpop.eup %4657  ;;  %v847_v58 = vadd.f32 1.0, %v4656_v54  ;;  %v755_v0 = vmul.f32 0.7978846, %v691_v34  ;;  %v564_v28 = vmul.f32 %v500_v2, %v5408_v49  ;;  %v4307_v48 = vunpack.c.h.bf16 %v4419_v33  ;;  %v4420_v33 = vld [vmem:[%s5315_s7 + $0x28] sm:$0xff]  }
  0x38   : > { %v4660_v61 = vpop.eup %4659  ;;  %v5421_v62 = vmul.f32 %v846_v55, %v5343_v35  ;;  %v878_v63 = vadd.f32 1.0, %v4658_v57  ;;  %4673 = vtanh.f32 %v723_v59  ;;  %v660_v9 = vadd.f32 %v596_v60, %v5395_v37 }
  0x39   : > { %v4662_v5 = vpop.eup %4661  ;;  %v5425_v6 = vmul.f32 %v847_v58, %v5348_v44  ;;  %v879_v8 = vadd.f32 1.0, %v4660_v61  ;;  %4675 = vtanh.f32 %v755_v0  ;;  %v628_v38 = vmul.f32 %v564_v28, %v5408_v49 }
  0x3a   : > { %v4664_v11 = vpop.eup %4663  ;;  %v975_v13 = vsel %vm974_vm0, %v5421_v62, 0.0  ;;  %v5431_v14 = vmul.f32 %v878_v63, %v5368_v12  ;;  %v848_v35 = vadd.f32 1.0, %v4662_v5  ;;  %v724_v24 = vmul.f32 0.7978846, %v660_v9 }
  0x3b   : > { %v4666_v15 = vpop.eup %4665  ;;  %976 = vadd.xlane.f32.xlu0 %v975_v13  ;;  %v978_v44 = vsel %vm974_vm0, %v5425_v6, 0.0  ;;  %v5436_v17 = vmul.f32 %v879_v8, %v5373_v16  ;;  %v880_v23 = vadd.f32 1.0, %v4664_v11  ;;  %v402_v16 = vmul.f32 0.5, %v5363_v7 }
  0x3c   : > { %979 = vadd.xlane.f32.xlu1 %v978_v44  ;;  %v1071_v25 = vsel %vm974_vm0, %v5431_v14, 0.0  ;;  %v5440_v12 = vmul.f32 %v848_v35, %v400_v26  ;;  %v849_v19 = vadd.f32 1.0, %v4666_v15  ;;  %v4668_v29 = vpop.eup %4667  ;;  %4677 = vtanh.f32 %v724_v24 }
  0x3d   : > { %v1074_v31 = vsel %vm974_vm0, %v5436_v17, 0.0  ;;  %v5446_v32 = vmul.f32 %v880_v23, %v5388_v30  ;;  %v881_v36 = vadd.f32 1.0, %v4668_v29  ;;  %v403_v26 = vmul.f32 0.5, %v5377_v22 }
  0x3e   : > { %v981_v40 = vsel %vm974_vm0, %v5440_v12, 0.0  ;;  %v5458_v21 = vmul.f32 %v849_v19, %v401_v41  ;;  %v469_v30 = vmul.f32 0.044715, %v5413_v53  ;;  %v501_v7 = vmul.f32 0.044715, %v5417_v56 }
  0x3f   : > { %1072 = vadd.xlane.f32.xlu0 %v1071_v25  ;;  %v1077_v10 = vsel %vm974_vm0, %v5446_v32, 0.0  ;;  %v5465_v22 = vmul.f32 %v881_v36, %v5404_v46  ;;  %v692_v42 = vadd.f32 %v628_v38, %v5408_v49  ;;  %v4370_v41 = vunpack.c.l.bf16 %v5454_v39 }
  0x40   : > { %1075 = vadd.xlane.f32.xlu1 %v1074_v31  ;;  %v533_v45 = vmul.f32 %v469_v30, %v5413_v53  ;;  %v565_v47 = vmul.f32 %v501_v7, %v5417_v56  ;;  %v435_v50 = vmul.f32 0.5, %v5381_v18  ;;  %v404_v51 = vmul.f32 0.5, %v5395_v37 }
  0x41   : > { %v756_v52 = vmul.f32 0.7978846, %v692_v42  ;;  %v5474_v27 = vadd.f32 %v4306_v43, %v5319_v4  ;;  %v4670_v46 = vpop.eup %4669  ;;  %v984_v54 = vsel %vm974_vm0, %v5458_v21, 0.0  ;;  %v5481_v57 = vadd.f32 %v4370_v41, %v5319_v4 }
  0x42   : > { %v597_v55 = vmul.f32 %v533_v45, %v5413_v53  ;;  %v629_v34 = vmul.f32 %v565_v47, %v5417_v56  ;;  %v4672_v58 = vpop.eup %4671  ;;  %v1080_v18 = vsel %vm974_vm0, %v5465_v22, 0.0  ;;  %v850_v37 = vadd.f32 1.0, %v4670_v46 }
  0x43   : > { %982 = vadd.xlane.f32.xlu0 %v981_v40  ;;  %4679 = vtanh.f32 %v756_v52  ;;  %v470_v59 = vmul.f32 0.044715, %v5474_v27  ;;  %v882_v60 = vadd.f32 1.0, %v4672_v58  ;;  %v5489_v0 = vadd.f32 %v4307_v48, %v5319_v4 }
  0x44   : > { %1078 = vadd.xlane.f32.xlu1 %v1077_v10  ;;  %v661_v61 = vadd.f32 %v597_v55, %v5413_v53  ;;  %v693_v63 = vadd.f32 %v629_v34, %v5417_v56  ;;  %v5491_v5 = vmul.f32 %v850_v37, %v402_v16  ;;  %v502_v9 = vmul.f32 0.044715, %v5481_v57  ;;  %v4436_v10 = vld [vmem:[%s5315_s7 + $0xa8] sm:$0xff]  }
  0x45   : > { %v4674_v2 = vpop.eup %4673  ;;  %v534_v8 = vmul.f32 %v470_v59, %v5474_v27  ;;  %v4371_v11 = vunpack.c.h.bf16 %v5454_v39  ;;  %v5496_v35 = vmul.f32 %v882_v60, %v434_v20  ;;  %v471_v16 = vmul.f32 0.044715, %v5489_v0 }
  0x46   : > { %v4676_v13 = vpop.eup %4675  ;;  %v851_v15 = vadd.f32 1.0, %v4674_v2  ;;  %v725_v44 = vmul.f32 0.7978846, %v661_v61  ;;  %v757_v23 = vmul.f32 0.7978846, %v693_v63  ;;  %v987_v24 = vsel %vm974_vm0, %v5491_v5, 0.0 }
  0x47   : > { %985 = vadd.xlane.f32.xlu0 %v984_v54  ;;  %v883_v25 = vadd.f32 1.0, %v4676_v13  ;;  %v598_v19 = vmul.f32 %v534_v8, %v5474_v27  ;;  %v566_v28 = vmul.f32 %v502_v9, %v5481_v57  ;;  %v1083_v29 = vsel %vm974_vm0, %v5496_v35, 0.0 }
  0x48   : > { %1081 = vadd.xlane.f32.xlu1 %v1080_v18  ;;  %v5504_v31 = vmul.f32 %v851_v15, %v403_v26  ;;  %4681 = vtanh.f32 %v725_v44  ;;  %v436_v30 = vmul.f32 0.5, %v5408_v49  ;;  %v535_v7 = vmul.f32 %v471_v16, %v5489_v0  ;;  %v5547_v15 = vld [vmem:[%s5315_s7 + $0x30] sm:$0xff]  }
  0x49   : > { %v4678_v36 = vpop.eup %4677  ;;  %v5508_v20 = vmul.f32 %v883_v25, %v435_v50  ;;  %4683 = vtanh.f32 %v757_v23  ;;  %v662_v38 = vadd.f32 %v598_v19, %v5474_v27  ;;  %v630_v39 = vmul.f32 %v566_v28, %v5481_v57  ;;  %v5550_v44 = vld [vmem:[%s5315_s7 + $0xb0] sm:$0xff]  }
  0x4a   : > { %v852_v40 = vadd.f32 1.0, %v4678_v36  ;;  %v5515_v26 = vadd.f32 %v4371_v11, %v5319_v4  ;;  %v990_v42 = vsel %vm974_vm0, %v5504_v31, 0.0  ;;  %v4310_v47 = vunpack.c.l.bf16 %v4420_v33 }
  0x4b   : > { %988 = vadd.xlane.f32.xlu0 %v987_v24  ;;  %v726_v43 = vmul.f32 0.7978846, %v662_v38  ;;  %v694_v45 = vadd.f32 %v630_v39, %v5481_v57  ;;  %v1086_v41 = vsel %vm974_vm0, %v5508_v20, 0.0  ;;  %v599_v49 = vmul.f32 %v535_v7, %v5489_v0 }
  0x4c   : > { %1084 = vadd.xlane.f32.xlu1 %v1083_v29  ;;  %v5523_v48 = vmul.f32 %v852_v40, %v404_v51  ;;  %v503_v50 = vmul.f32 0.044715, %v5515_v26  ;;  %v5528_v46 = vadd.f32 %v4310_v47, %v5319_v4  ;;  %v4374_v54 = vunpack.c.l.bf16 %v4436_v10 }
  0x4d   : > { %4685 = vtanh.f32 %v726_v43  ;;  %v758_v52 = vmul.f32 0.7978846, %v694_v45  ;;  %v405_v55 = vmul.f32 0.5, %v5413_v53  ;;  %v663_v34 = vadd.f32 %v599_v49, %v5489_v0 }
  0x4e   : > { %v567_v58 = vmul.f32 %v503_v50, %v5515_v26  ;;  %v4311_v51 = vunpack.c.h.bf16 %v4420_v33  ;;  %v993_v18 = vsel %vm974_vm0, %v5523_v48, 0.0  ;;  %v472_v37 = vmul.f32 0.044715, %v5528_v46 }
  0x4f   : > { %991 = vadd.xlane.f32.xlu0 %v990_v42  ;;  %4687 = vtanh.f32 %v758_v52  ;;  %v5537_v59 = vadd.f32 %v4374_v54, %v5319_v4  ;;  %v727_v61 = vmul.f32 0.7978846, %v663_v34  ;;  %v4375_v2 = vunpack.c.h.bf16 %v4436_v10 }
  0x50   : > { %1087 = vadd.xlane.f32.xlu1 %v1086_v41  ;;  %v4680_v60 = vpop.eup %4679  ;;  %v631_v53 = vmul.f32 %v567_v58, %v5515_v26  ;;  %v5541_v63 = vadd.f32 %v4311_v51, %v5319_v4  ;;  %v437_v9 = vmul.f32 0.5, %v5417_v56  ;;  %v536_v11 = vmul.f32 %v472_v37, %v5528_v46 }
  0x51   : > { %v884_v8 = vadd.f32 1.0, %v4680_v60  ;;  %v504_v13 = vmul.f32 0.044715, %v5537_v59  ;;  %v406_v23 = vmul.f32 0.5, %v5474_v27  ;;  %4689 = vtanh.f32 %v727_v61 }
  0x52   : > { %v695_v24 = vadd.f32 %v631_v53, %v5515_v26  ;;  %v473_v25 = vmul.f32 0.044715, %v5541_v63  ;;  %v600_v56 = vmul.f32 %v536_v11, %v5528_v46  ;;  %v5560_v29 = vadd.f32 %v4375_v2, %v5319_v4 }
  0x53   : > { %994 = vadd.xlane.f32.xlu0 %v993_v18  ;;  %v5555_v19 = vmul.f32 %v884_v8, %v436_v30  ;;  %v568_v28 = vmul.f32 %v504_v13, %v5537_v59  ;;  %v4314_v36 = vunpack.c.l.bf16 %v5547_v15  ;;  %v4378_v27 = vunpack.c.l.bf16 %v5550_v44 }
  0x54   : > { %v759_v16 = vmul.f32 0.7978846, %v695_v24  ;;  %v537_v33 = vmul.f32 %v473_v25, %v5541_v63  ;;  %v438_v40 = vmul.f32 0.5, %v5481_v57  ;;  %v664_v30 = vadd.f32 %v600_v56, %v5528_v46 }
  0x55   : > { %v4682_v38 = vpop.eup %4681  ;;  %v1089_v39 = vsel %vm974_vm0, %v5555_v19, 0.0  ;;  %v632_v7 = vmul.f32 %v568_v28, %v5537_v59  ;;  %v505_v45 = vmul.f32 0.044715, %v5560_v29  ;;  %v5574_v50 = vadd.f32 %v4314_v36, %v5319_v4 }
  0x56   : > { %v4684_v10 = vpop.eup %4683  ;;  %1090 = vadd.xlane.f32.xlu1 %v1089_v39  ;;  %v853_v42 = vadd.f32 1.0, %v4682_v38  ;;  %4691 = vtanh.f32 %v759_v16  ;;  %v601_v43 = vmul.f32 %v537_v33, %v5541_v63  ;;  %v728_v41 = vmul.f32 0.7978846, %v664_v30 }
  0x57   : > { %v885_v47 = vadd.f32 1.0, %v4684_v10  ;;  %v696_v49 = vadd.f32 %v632_v7, %v5537_v59  ;;  %v569_v54 = vmul.f32 %v505_v45, %v5560_v29  ;;  %v5581_v34 = vadd.f32 %v4378_v27, %v5319_v4 }
  0x58   : > { %v5576_v57 = vmul.f32 %v853_v42, %v405_v55  ;;  %v665_v52 = vadd.f32 %v601_v43, %v5541_v63  ;;  %v407_v51 = vmul.f32 0.5, %v5489_v0  ;;  %4693 = vtanh.f32 %v728_v41  ;;  %v4422_v0 = vld [vmem:[%s5315_s7 + $0x38] sm:$0xff]  }
  0x59   : > { %v5583_v58 = vmul.f32 %v885_v47, %v437_v9  ;;  %v760_v18 = vmul.f32 0.7978846, %v696_v49  ;;  %v633_v61 = vmul.f32 %v569_v54, %v5560_v29  ;;  %v474_v53 = vmul.f32 0.044715, %v5574_v50  ;;  %v5616_v43 = vld [vmem:[%s5315_s7 + $0xb8] sm:$0xff]  }
  0x5a   : > { %v4686_v37 = vpop.eup %4685  ;;  %v996_v60 = vsel %vm974_vm0, %v5576_v57, 0.0  ;;  %v729_v55 = vmul.f32 0.7978846, %v665_v52  ;;  %v439_v9 = vmul.f32 0.5, %v5515_v26  ;;  %v506_v25 = vmul.f32 0.044715, %v5581_v34 }
  0x5b   : > { %997 = vadd.xlane.f32.xlu0 %v996_v60  ;;  %v1092_v2 = vsel %vm974_vm0, %v5583_v58, 0.0  ;;  %v854_v8 = vadd.f32 1.0, %v4686_v37  ;;  %4695 = vtanh.f32 %v760_v18  ;;  %v697_v13 = vadd.f32 %v633_v61, %v5560_v29 }
  0x5c   : > { %v4688_v11 = vpop.eup %4687  ;;  %1093 = vadd.xlane.f32.xlu1 %v1092_v2  ;;  %4697 = vtanh.f32 %v729_v55  ;;  %v538_v24 = vmul.f32 %v474_v53, %v5574_v50  ;;  %v4315_v16 = vunpack.c.h.bf16 %v5547_v15  ;;  %v4379_v33 = vunpack.c.h.bf16 %v5550_v44 }
  0x5d   : > { %v5597_v56 = vmul.f32 %v854_v8, %v406_v23  ;;  %v886_v28 = vadd.f32 1.0, %v4688_v11  ;;  %v761_v26 = vmul.f32 0.7978846, %v697_v13  ;;  %v570_v27 = vmul.f32 %v506_v25, %v5581_v34 }
  0x5e   : > { %v602_v36 = vmul.f32 %v538_v24, %v5574_v50  ;;  %v4318_v38 = vunpack.c.l.bf16 %v4422_v0  ;;  %v4690_v39 = vpop.eup %4689  ;;  %v5608_v23 = vadd.f32 %v4315_v16, %v5319_v4  ;;  %v5611_v15 = vadd.f32 %v4379_v33, %v5319_v4 }
  0x5f   : > { %v999_v30 = vsel %vm974_vm0, %v5597_v56, 0.0  ;;  %v5605_v7 = vmul.f32 %v886_v28, %v438_v40  ;;  %v855_v44 = vadd.f32 1.0, %v4690_v39  ;;  %4699 = vtanh.f32 %v761_v26 }
  0x60   : > { %1000 = vadd.xlane.f32.xlu0 %v999_v30  ;;  %v666_v10 = vadd.f32 %v602_v36, %v5574_v50  ;;  %v634_v42 = vmul.f32 %v570_v27, %v5581_v34  ;;  %v408_v40 = vmul.f32 0.5, %v5528_v46  ;;  %v440_v47 = vmul.f32 0.5, %v5537_v59 }
  0x61   : > { %v1095_v45 = vsel %vm974_vm0, %v5605_v7, 0.0  ;;  %v475_v41 = vmul.f32 0.044715, %v5608_v23  ;;  %v5623_v49 = vmul.f32 %v855_v44, %v407_v51  ;;  %v507_v18 = vmul.f32 0.044715, %v5611_v15 }
  0x62   : > { %1096 = vadd.xlane.f32.xlu1 %v1095_v45  ;;  %v730_v52 = vmul.f32 0.7978846, %v666_v10  ;;  %v698_v54 = vadd.f32 %v634_v42, %v5581_v34  ;;  %v5629_v55 = vadd.f32 %v4318_v38, %v5319_v4  ;;  %v4382_v46 = vunpack.c.l.bf16 %v5616_v43 }
  0x63   : > { %v4692_v37 = vpop.eup %4691  ;;  %v539_v60 = vmul.f32 %v475_v41, %v5608_v23  ;;  %v4319_v61 = vunpack.c.h.bf16 %v4422_v0  ;;  %v1002_v59 = vsel %vm974_vm0, %v5623_v49, 0.0  ;;  %v409_v2 = vmul.f32 0.5, %v5541_v63 }
  0x64   : > { %v887_v53 = vadd.f32 1.0, %v4692_v37  ;;  %4701 = vtanh.f32 %v730_v52  ;;  %v762_v51 = vmul.f32 0.7978846, %v698_v54  ;;  %1003 = vadd.xlane.f32.xlu0 %v1002_v59  ;;  %v571_v11 = vmul.f32 %v507_v18, %v5611_v15  ;;  %v4423_v18 = vld [vmem:[%s5315_s7 + $0x40] sm:$0xff]  }
  0x65   : > { %v603_v8 = vmul.f32 %v539_v60, %v5608_v23  ;;  %v476_v13 = vmul.f32 0.044715, %v5629_v55  ;;  %v4694_v24 = vpop.eup %4693  ;;  %v5641_v0 = vadd.f32 %v4382_v46, %v5319_v4  ;;  %v5644_v28 = vadd.f32 %v4319_v61, %v5319_v4 }
  0x66   : > { %v5638_v25 = vmul.f32 %v887_v53, %v439_v9  ;;  %4703 = vtanh.f32 %v762_v51  ;;  %v856_v16 = vadd.f32 1.0, %v4694_v24  ;;  %v635_v63 = vmul.f32 %v571_v11, %v5611_v15  ;;  %v4439_v53 = vld [vmem:[%s5315_s7 + $0xc0] sm:$0xff]  }
  0x67   : > { %v667_v33 = vadd.f32 %v603_v8, %v5608_v23  ;;  %v540_v26 = vmul.f32 %v476_v13, %v5629_v55  ;;  %v441_v27 = vmul.f32 0.5, %v5560_v29  ;;  %v410_v38 = vmul.f32 0.5, %v5574_v50 }
  0x68   : > { %v4696_v36 = vpop.eup %4695  ;;  %v1098_v9 = vsel %vm974_vm0, %v5638_v25, 0.0  ;;  %v508_v39 = vmul.f32 0.044715, %v5641_v0  ;;  %v5654_v44 = vmul.f32 %v856_v16, %v408_v40  ;;  %v699_v45 = vadd.f32 %v635_v63, %v5611_v15 }
  0x69   : > { %v4698_v30 = vpop.eup %4697  ;;  %1099 = vadd.xlane.f32.xlu1 %v1098_v9  ;;  %v888_v10 = vadd.f32 1.0, %v4696_v36  ;;  %v731_v42 = vmul.f32 0.7978846, %v667_v33  ;;  %v604_v52 = vmul.f32 %v540_v26, %v5629_v55  ;;  %v477_v29 = vmul.f32 0.044715, %v5644_v28 }
  0x6a   : > { %v857_v41 = vadd.f32 1.0, %v4698_v30  ;;  %v572_v54 = vmul.f32 %v508_v39, %v5641_v0  ;;  %v1005_v50 = vsel %vm974_vm0, %v5654_v44, 0.0  ;;  %v763_v40 = vmul.f32 0.7978846, %v699_v45 }
  0x6b   : > { %v5663_v37 = vmul.f32 %v888_v10, %v440_v47  ;;  %4705 = vtanh.f32 %v731_v42  ;;  %1006 = vadd.xlane.f32.xlu0 %v1005_v50  ;;  %v668_v46 = vadd.f32 %v604_v52, %v5629_v55  ;;  %v541_v59 = vmul.f32 %v477_v29, %v5644_v28 }
  0x6c   : > { %v5665_v60 = vmul.f32 %v857_v41, %v409_v2  ;;  %v636_v61 = vmul.f32 %v572_v54, %v5641_v0  ;;  %v4700_v51 = vpop.eup %4699  ;;  %4707 = vtanh.f32 %v763_v40  ;;  %v4383_v47 = vunpack.c.h.bf16 %v5616_v43 }
  0x6d   : > { %v1101_v8 = vsel %vm974_vm0, %v5663_v37, 0.0  ;;  %v4322_v11 = vunpack.c.l.bf16 %v4423_v18  ;;  %v889_v13 = vadd.f32 1.0, %v4700_v51  ;;  %v732_v24 = vmul.f32 0.7978846, %v668_v46 }
  0x6e   : > { %1102 = vadd.xlane.f32.xlu1 %v1101_v8  ;;  %v1008_v2 = vsel %vm974_vm0, %v5665_v60, 0.0  ;;  %v700_v16 = vadd.f32 %v636_v61, %v5641_v0  ;;  %v605_v33 = vmul.f32 %v541_v59, %v5644_v28  ;;  %v5679_v63 = vadd.f32 %v4383_v47, %v5319_v4 }
  0x6f   : > { %v5682_v26 = vadd.f32 %v4322_v11, %v5319_v4  ;;  %v4386_v36 = vunpack.c.l.bf16 %v4439_v53  ;;  %1009 = vadd.xlane.f32.xlu0 %v1008_v2  ;;  %v5684_v43 = vmul.f32 %v889_v13, %v441_v27  ;;  %4709 = vtanh.f32 %v732_v24  ;;  %v4424_v11 = vld [vmem:[%s5315_s7 + $0x48] sm:$0xff]  }
  0x70   : > { %v764_v9 = vmul.f32 0.7978846, %v700_v16  ;;  %v4323_v39 = vunpack.c.h.bf16 %v4423_v18  ;;  %v442_v10 = vmul.f32 0.5, %v5581_v34  ;;  %v411_v42 = vmul.f32 0.5, %v5608_v23 }
  0x71   : > { %v4702_v30 = vpop.eup %4701  ;;  %v669_v45 = vadd.f32 %v605_v33, %v5644_v28  ;;  %v509_v41 = vmul.f32 0.044715, %v5679_v63  ;;  %v1104_v52 = vsel %vm974_vm0, %v5684_v43, 0.0  ;;  %v478_v27 = vmul.f32 0.044715, %v5682_v26 }
  0x72   : > { %v858_v54 = vadd.f32 1.0, %v4702_v30  ;;  %4711 = vtanh.f32 %v764_v9  ;;  %1105 = vadd.xlane.f32.xlu1 %v1104_v52  ;;  %v5695_v34 = vadd.f32 %v4386_v36, %v5319_v4  ;;  %v5698_v23 = vadd.f32 %v4323_v39, %v5319_v4  ;;  %v5720_v36 = vld [vmem:[%s5315_s7 + $0xc8] sm:$0xff]  }
  0x73   : > { %v4704_v29 = vpop.eup %4703  ;;  %v733_v18 = vmul.f32 0.7978846, %v669_v45  ;;  %v573_v50 = vmul.f32 %v509_v41, %v5679_v63  ;;  %v542_v61 = vmul.f32 %v478_v27, %v5682_v26  ;;  %v4387_v59 = vunpack.c.h.bf16 %v4439_v53 }
  0x74   : > { %v5700_v40 = vmul.f32 %v858_v54, %v410_v38  ;;  %v890_v46 = vadd.f32 1.0, %v4704_v29  ;;  %v443_v51 = vmul.f32 0.5, %v5611_v15  ;;  %v510_v47 = vmul.f32 0.044715, %v5695_v34 }
  0x75   : > { %4713 = vtanh.f32 %v733_v18  ;;  %v637_v8 = vmul.f32 %v573_v50, %v5679_v63  ;;  %v412_v38 = vmul.f32 0.5, %v5629_v55  ;;  %v606_v24 = vmul.f32 %v542_v61, %v5682_v26 }
  0x76   : > { %v1011_v2 = vsel %vm974_vm0, %v5700_v40, 0.0  ;;  %v5709_v13 = vmul.f32 %v890_v46, %v442_v10  ;;  %v574_v15 = vmul.f32 %v510_v47, %v5695_v34  ;;  %v479_v16 = vmul.f32 0.044715, %v5698_v23 }
  0x77   : > { %1012 = vadd.xlane.f32.xlu0 %v1011_v2  ;;  %v701_v53 = vadd.f32 %v637_v8, %v5679_v63  ;;  %v5717_v33 = vadd.f32 %v4387_v59, %v5319_v4  ;;  %v444_v55 = vmul.f32 0.5, %v5641_v0  ;;  %v670_v30 = vadd.f32 %v606_v24, %v5682_v26 }
  0x78   : > { %v4706_v9 = vpop.eup %4705  ;;  %v1107_v39 = vsel %vm974_vm0, %v5709_v13, 0.0  ;;  %v4326_v10 = vunpack.c.l.bf16 %v4424_v11  ;;  %v638_v52 = vmul.f32 %v574_v15, %v5695_v34  ;;  %v543_v54 = vmul.f32 %v479_v16, %v5698_v23 }
  0x79   : > { %1108 = vadd.xlane.f32.xlu1 %v1107_v39  ;;  %v859_v45 = vadd.f32 1.0, %v4706_v9  ;;  %v765_v41 = vmul.f32 0.7978846, %v701_v53  ;;  %v4708_v27 = vpop.eup %4707  ;;  %v734_v29 = vmul.f32 0.7978846, %v670_v30  ;;  %v4390_v46 = vunpack.c.l.bf16 %v5720_v36 }
  0x7a   : > { %v511_v18 = vmul.f32 0.044715, %v5717_v33  ;;  %v5730_v50 = vadd.f32 %v4326_v10, %v5319_v4  ;;  %v891_v61 = vadd.f32 1.0, %v4708_v27  ;;  %v702_v59 = vadd.f32 %v638_v52, %v5695_v34 }
  0x7b   : > { %v5733_v0 = vmul.f32 %v859_v45, %v411_v42  ;;  %4715 = vtanh.f32 %v765_v41  ;;  %v413_v8 = vmul.f32 0.5, %v5644_v28  ;;  %v607_v47 = vmul.f32 %v543_v54, %v5698_v23 }
  0x7c   : > { %4717 = vtanh.f32 %v734_v29  ;;  %v575_v2 = vmul.f32 %v511_v18, %v5717_v33  ;;  %v4710_v24 = vpop.eup %4709  ;;  %v5741_v15 = vmul.f32 %v891_v61, %v443_v51  ;;  %v766_v16 = vmul.f32 0.7978846, %v702_v59 }
  0x7d   : > { %v1014_v53 = vsel %vm974_vm0, %v5733_v0, 0.0  ;;  %v480_v42 = vmul.f32 0.044715, %v5730_v50  ;;  %v860_v9 = vadd.f32 1.0, %v4710_v24  ;;  %v671_v39 = vadd.f32 %v607_v47, %v5698_v23  ;;  %v4425_v24 = vld [vmem:[%s5315_s7 + $0x50] sm:$0xff]  }
  0x7e   : > { %1015 = vadd.xlane.f32.xlu0 %v1014_v53  ;;  %v639_v28 = vmul.f32 %v575_v2, %v5717_v33  ;;  %v5747_v30 = vadd.f32 %v4390_v46, %v5319_v4  ;;  %v1110_v45 = vsel %vm974_vm0, %v5741_v15, 0.0  ;;  %4719 = vtanh.f32 %v766_v16 }
  0x7f   : > { %v4712_v10 = vpop.eup %4711  ;;  %v544_v51 = vmul.f32 %v480_v42, %v5730_v50  ;;  %v4327_v41 = vunpack.c.h.bf16 %v4424_v11  ;;  %1111 = vadd.xlane.f32.xlu1 %v1110_v45  ;;  %v5752_v52 = vmul.f32 %v860_v9, %v412_v38  ;;  %v735_v27 = vmul.f32 0.7978846, %v671_v39  ;;  %v5770_v9 = vld [vmem:[%s5315_s7 + $0xd0] sm:$0xff]  }
  0x80   : > { %v892_v54 = vadd.f32 1.0, %v4712_v10  ;;  %v703_v29 = vadd.f32 %v639_v28, %v5717_v33  ;;  %v445_v18 = vmul.f32 0.5, %v5679_v63  ;;  %v512_v61 = vmul.f32 0.044715, %v5747_v30 }
  0x81   : > { %v608_v46 = vmul.f32 %v544_v51, %v5730_v50  ;;  %v5759_v59 = vadd.f32 %v4327_v41, %v5319_v4  ;;  %v1017_v11 = vsel %vm974_vm0, %v5752_v52, 0.0  ;;  %4721 = vtanh.f32 %v735_v27 }
  0x82   : > { %v4714_v47 = vpop.eup %4713  ;;  %v5763_v38 = vmul.f32 %v892_v54, %v444_v55  ;;  %v767_v2 = vmul.f32 0.7978846, %v703_v29  ;;  %1018 = vadd.xlane.f32.xlu0 %v1017_v11  ;;  %v414_v63 = vmul.f32 0.5, %v5682_v26  ;;  %v576_v42 = vmul.f32 %v512_v61, %v5747_v30 }
  0x83   : > { %v861_v53 = vadd.f32 1.0, %v4714_v47  ;;  %v672_v16 = vadd.f32 %v608_v46, %v5730_v50  ;;  %v481_v55 = vmul.f32 0.044715, %v5759_v59  ;;  %v4391_v28 = vunpack.c.h.bf16 %v5720_v36 }
  0x84   : > { %v1113_v39 = vsel %vm974_vm0, %v5763_v38, 0.0  ;;  %4723 = vtanh.f32 %v767_v2  ;;  %v640_v26 = vmul.f32 %v576_v42, %v5747_v30  ;;  %v4330_v51 = vunpack.c.l.bf16 %v4425_v24 }
  0x85   : > { %1114 = vadd.xlane.f32.xlu1 %v1113_v39  ;;  %v5776_v10 = vmul.f32 %v861_v53, %v413_v8  ;;  %v736_v45 = vmul.f32 0.7978846, %v672_v16  ;;  %v446_v41 = vmul.f32 0.5, %v5695_v34  ;;  %v545_v54 = vmul.f32 %v481_v55, %v5759_v59 }
  0x86   : > { %v5782_v27 = vadd.f32 %v4391_v28, %v5319_v4  ;;  %v4394_v29 = vunpack.c.l.bf16 %v5770_v9  ;;  %v704_v36 = vadd.f32 %v640_v26, %v5747_v30  ;;  %v5789_v8 = vadd.f32 %v4330_v51, %v5319_v4 }
  0x87   : > { %8738 = vst [vmem:[#allocation6_spill] sm:$0xff] %v5776_v10  ;;  %v1020_v46 = vsel %vm974_vm0, %v5776_v10, 0.0  ;;  %4725 = vtanh.f32 %v736_v45  ;;  %v609_v34 = vmul.f32 %v545_v54, %v5759_v59  ;;  %v4331_v2 = vunpack.c.h.bf16 %v4425_v24 }
  0x88   : > { %v4716_v61 = vpop.eup %4715  ;;  %1021 = vadd.xlane.f32.xlu0 %v1020_v46  ;;  %v513_v47 = vmul.f32 0.044715, %v5782_v27  ;;  %v5794_v11 = vadd.f32 %v4394_v29, %v5319_v4  ;;  %v415_v42 = vmul.f32 0.5, %v5698_v23  ;;  %v768_v39 = vmul.f32 0.7978846, %v704_v36 }
  0x89   : > { %v4718_v53 = vpop.eup %4717  ;;  %v893_v16 = vadd.f32 1.0, %v4716_v61  ;;  %v482_v55 = vmul.f32 0.044715, %v5789_v8  ;;  %v447_v45 = vmul.f32 0.5, %v5717_v33  ;;  %v673_v26 = vadd.f32 %v609_v34, %v5759_v59 }
  0x8a   : > { %v862_v28 = vadd.f32 1.0, %v4718_v53  ;;  %v577_v51 = vmul.f32 %v513_v47, %v5782_v27  ;;  %4727 = vtanh.f32 %v768_v39  ;;  %v514_v29 = vmul.f32 0.044715, %v5794_v11 }
  0x8b   : > { %v5801_v54 = vmul.f32 %v893_v16, %v445_v18  ;;  %v546_v24 = vmul.f32 %v482_v55, %v5789_v8  ;;  %v4720_v46 = vpop.eup %4719  ;;  %v737_v36 = vmul.f32 0.7978846, %v673_v26  ;;  %v5809_v33 = vadd.f32 %v4331_v2, %v5319_v4  ;;  %v4426_v16 = vld [vmem:[%s5315_s7 + $0x58] sm:$0xff]  }
  0x8c   : > { %v5805_v23 = vmul.f32 %v862_v28, %v414_v63  ;;  %v641_v61 = vmul.f32 %v577_v51, %v5782_v27  ;;  %v894_v47 = vadd.f32 1.0, %v4720_v46  ;;  %v578_v53 = vmul.f32 %v514_v29, %v5794_v11 }
  0x8d   : > { %8739 = vst [vmem:[#allocation7_spill] sm:$0xff] %v5801_v54  ;;  %v1116_v34 = vsel %vm974_vm0, %v5801_v54, 0.0  ;;  %v610_v18 = vmul.f32 %v546_v24, %v5789_v8  ;;  %v416_v39 = vmul.f32 0.5, %v5730_v50  ;;  %4729 = vtanh.f32 %v737_v36 }
  0x8e   : > { %8740 = vst [vmem:[#allocation8_spill] sm:$0xff] %v5805_v23  ;;  %1117 = vadd.xlane.f32.xlu1 %v1116_v34  ;;  %v1023_v63 = vsel %vm974_vm0, %v5805_v23, 0.0  ;;  %v705_v55 = vadd.f32 %v641_v61, %v5782_v27  ;;  %v4722_v2 = vpop.eup %4721  ;;  %v5820_v28 = vmul.f32 %v894_v47, %v446_v41  ;;  %v642_v51 = vmul.f32 %v578_v53, %v5794_v11 }
  0x8f   : > { %1024 = vadd.xlane.f32.xlu0 %v1023_v63  ;;  %v674_v26 = vadd.f32 %v610_v18, %v5789_v8  ;;  %v483_v24 = vmul.f32 0.044715, %v5809_v33  ;;  %v863_v29 = vadd.f32 1.0, %v4722_v2  ;;  %v4395_v34 = vunpack.c.h.bf16 %v5770_v9 }
  0x90   : > { %8741 = vst [vmem:[#allocation9_spill] sm:$0xff] %v5820_v28  ;;  %v769_v46 = vmul.f32 0.7978846, %v705_v55  ;;  %v4334_v3 = vunpack.c.l.bf16 %v4426_v16  ;;  %v1119_v36 = vsel %vm974_vm0, %v5820_v28, 0.0  ;;  %v706_v41 = vadd.f32 %v642_v51, %v5794_v11 }
  0x91   : > { %v4724_v50 = vpop.eup %4723  ;;  %v738_v61 = vmul.f32 0.7978846, %v674_v26  ;;  %v547_v47 = vmul.f32 %v483_v24, %v5809_v33  ;;  %v5830_v18 = vmul.f32 %v863_v29, %v415_v42  ;;  %v5833_v63 = vadd.f32 %v4395_v34, %v5319_v4  ;;  %v4442_v26 = vld [vmem:[%s5315_s7 + $0xd8] sm:$0xff]  }
  0x92   : > { %1120 = vadd.xlane.f32.xlu1 %v1119_v36  ;;  %v895_v53 = vadd.f32 1.0, %v4724_v50  ;;  %4731 = vtanh.f32 %v769_v46  ;;  %v770_v9 = vmul.f32 0.7978846, %v706_v41  ;;  %v5837_v2 = vadd.f32 %v4334_v3, %v5319_v4 }
  0x93   : > { %8742 = vst [vmem:[#allocation10_spill] sm:$0xff] %v5830_v18  ;;  %4733 = vtanh.f32 %v738_v61  ;;  %v611_v55 = vmul.f32 %v547_v47, %v5809_v33  ;;  %v1026_v51 = vsel %vm974_vm0, %v5830_v18, 0.0  ;;  %v515_v42 = vmul.f32 0.044715, %v5833_v63 }
  0x94   : > { %v4726_v1 = vpop.eup %4725  ;;  %v5842_v24 = vmul.f32 %v895_v53, %v447_v45  ;;  %1027 = vadd.xlane.f32.xlu0 %v1026_v51  ;;  %v448_v46 = vmul.f32 0.5, %v5747_v30  ;;  %4735 = vtanh.f32 %v770_v9  ;;  %v484_v36 = vmul.f32 0.044715, %v5837_v2 }
  0x95   : > { %v864_v29 = vadd.f32 1.0, %v4726_v1  ;;  %v675_v34 = vadd.f32 %v611_v55, %v5809_v33  ;;  %v579_v50 = vmul.f32 %v515_v42, %v5833_v63  ;;  %v4398_v61 = vunpack.c.l.bf16 %v4442_v26  ;;  %v5860_v42 = vld [vmem:[%s5315_s7 + $0x60] sm:$0xff]  }
  0x96   : > { %8743 = vst [vmem:[#allocation11_spill] sm:$0xff] %v5842_v24  ;;  %v1122_v3 = vsel %vm974_vm0, %v5842_v24, 0.0  ;;  %v4335_v47 = vunpack.c.h.bf16 %v4426_v16  ;;  %v4399_v1 = vunpack.c.h.bf16 %v4442_v26  ;;  %v417_v30 = vmul.f32 0.5, %v5759_v59 }
  0x97   : > { %1123 = vadd.xlane.f32.xlu1 %v1122_v3  ;;  %v5851_v45 = vmul.f32 %v864_v29, %v416_v39  ;;  %v739_v41 = vmul.f32 0.7978846, %v675_v34  ;;  %v4728_v53 = vpop.eup %4727  ;;  %v643_v9 = vmul.f32 %v579_v50, %v5833_v63  ;;  %v548_v55 = vmul.f32 %v484_v36, %v5837_v2 }
  0x98   : > { %v5857_v51 = vadd.f32 %v4398_v61, %v5319_v4  ;;  %v896_v39 = vadd.f32 1.0, %v4728_v53  ;;  %v5865_v16 = vadd.f32 %v4335_v47, %v5319_v4  ;;  %v449_v59 = vmul.f32 0.5, %v5782_v27 }
  0x99   : > { %8744 = vst [vmem:[#allocation12_spill] sm:$0xff] %v5851_v45  ;;  %v1029_v3 = vsel %vm974_vm0, %v5851_v45, 0.0  ;;  %4737 = vtanh.f32 %v739_v41  ;;  %v707_v26 = vadd.f32 %v643_v9, %v5833_v63  ;;  %v612_v29 = vmul.f32 %v548_v55, %v5837_v2  ;;  %v4443_v45 = vld [vmem:[%s5315_s7 + $0xe0] sm:$0xff]  }
  0x9a   : > { %1030 = vadd.xlane.f32.xlu0 %v1029_v3  ;;  %v516_v34 = vmul.f32 0.044715, %v5857_v51  ;;  %v4730_v50 = vpop.eup %4729  ;;  %v5871_v36 = vmul.f32 %v896_v39, %v448_v46  ;;  %v485_v61 = vmul.f32 0.044715, %v5865_v16  ;;  %v5875_v41 = vadd.f32 %v4399_v1, %v5319_v4 }
  0x9b   : > { %v4338_v47 = vunpack.c.l.bf16 %v5860_v42  ;;  %v865_v53 = vadd.f32 1.0, %v4730_v50  ;;  %v771_v3 = vmul.f32 0.7978846, %v707_v26  ;;  %v676_v27 = vadd.f32 %v612_v29, %v5837_v2 }
  0x9c   : > { %8745 = vst [vmem:[#allocation13_spill] sm:$0xff] %v5871_v36  ;;  %v580_v9 = vmul.f32 %v516_v34, %v5857_v51  ;;  %v1125_v55 = vsel %vm974_vm0, %v5871_v36, 0.0  ;;  %v418_v46 = vmul.f32 0.5, %v5789_v8  ;;  %v549_v39 = vmul.f32 %v485_v61, %v5865_v16 }
  0x9d   : > { %v517_v24 = vmul.f32 0.044715, %v5875_v41  ;;  %1126 = vadd.xlane.f32.xlu1 %v1125_v55  ;;  %v5886_v1 = vmul.f32 %v865_v53, %v417_v30  ;;  %4739 = vtanh.f32 %v771_v3  ;;  %v740_v50 = vmul.f32 0.7978846, %v676_v27 }
  0x9e   : > { %v644_v26 = vmul.f32 %v580_v9, %v5857_v51  ;;  %v613_v34 = vmul.f32 %v549_v39, %v5865_v16  ;;  %v5892_v36 = vadd.f32 %v4338_v47, %v5319_v4  ;;  %v4402_v8 = vunpack.c.l.bf16 %v4443_v45 }
  0x9f   : > { %8746 = vst [vmem:[#allocation14_spill] sm:$0xff] %v5886_v1  ;;  %v4732_v29 = vpop.eup %4731  ;;  %v581_v18 = vmul.f32 %v517_v24, %v5875_v41  ;;  %v1032_v61 = vsel %vm974_vm0, %v5886_v1, 0.0  ;;  %4741 = vtanh.f32 %v740_v50  ;;  %v450_v3 = vmul.f32 0.5, %v5794_v11 }
  0xa0   : > { %v4734_v28 = vpop.eup %4733  ;;  %v897_v55 = vadd.f32 1.0, %v4732_v29  ;;  %v708_v30 = vadd.f32 %v644_v26, %v5857_v51  ;;  %1033 = vadd.xlane.f32.xlu0 %v1032_v61  ;;  %v677_v27 = vadd.f32 %v613_v34, %v5865_v16  ;;  %v486_v23 = vmul.f32 0.044715, %v5892_v36  ;;  %v4428_v61 = vld [vmem:[%s5315_s7 + $0x68] sm:$0xff]  }
  0xa1   : > { %v866_v53 = vadd.f32 1.0, %v4734_v28  ;;  %v645_v24 = vmul.f32 %v581_v18, %v5875_v41  ;;  %v4736_v47 = vpop.eup %4735  ;;  %v5904_v29 = vadd.f32 %v4402_v8, %v5319_v4  ;;  %v419_v18 = vmul.f32 0.5, %v5809_v33 }
  0xa2   : > { %v5900_v9 = vmul.f32 %v897_v55, %v449_v59  ;;  %v772_v39 = vmul.f32 0.7978846, %v708_v30  ;;  %v898_v26 = vadd.f32 1.0, %v4736_v47  ;;  %v741_v28 = vmul.f32 0.7978846, %v677_v27  ;;  %v5922_v47 = vld [vmem:[%s5315_s7 + $0xe8] sm:$0xff]  }
  0xa3   : > { %v5906_v50 = vmul.f32 %v866_v53, %v418_v46  ;;  %v709_v11 = vadd.f32 %v645_v24, %v5875_v41  ;;  %v550_v59 = vmul.f32 %v486_v23, %v5892_v36  ;;  %v518_v27 = vmul.f32 0.044715, %v5904_v29 }
  0xa4   : > { %8747 = vst [vmem:[#allocation15_spill] sm:$0xff] %v5900_v9  ;;  %v1128_v34 = vsel %vm974_vm0, %v5900_v9, 0.0  ;;  %4743 = vtanh.f32 %v772_v39  ;;  %v5916_v46 = vmul.f32 %v898_v26, %v450_v3  ;;  %v4339_v33 = vunpack.c.h.bf16 %v5860_v42 }
  0xa5   : > { %8748 = vst [vmem:[#allocation16_spill] sm:$0xff] %v5906_v50  ;;  %1129 = vadd.xlane.f32.xlu1 %v1128_v34  ;;  %v1035_v8 = vsel %vm974_vm0, %v5906_v50, 0.0  ;;  %4745 = vtanh.f32 %v741_v28  ;;  %v773_v55 = vmul.f32 0.7978846, %v709_v11  ;;  %v614_v53 = vmul.f32 %v550_v59, %v5892_v36 }
  0xa6   : > { %8749 = vst [vmem:[#allocation17_spill] sm:$0xff] %v5916_v46  ;;  %v4738_v30 = vpop.eup %4737  ;;  %1036 = vadd.xlane.f32.xlu0 %v1035_v8  ;;  %v4403_v24 = vunpack.c.h.bf16 %v4443_v45  ;;  %v1131_v23 = vsel %vm974_vm0, %v5916_v46, 0.0  ;;  %v4342_v3 = vunpack.c.l.bf16 %v4428_v61  ;;  %v582_v28 = vmul.f32 %v518_v27, %v5904_v29 }
  0xa7   : > { %v867_v39 = vadd.f32 1.0, %v4738_v30  ;;  %4747 = vtanh.f32 %v773_v55  ;;  %v678_v26 = vadd.f32 %v614_v53, %v5892_v36  ;;  %v5929_v11 = vadd.f32 %v4339_v33, %v5319_v4 }
  0xa8   : > { %v5932_v34 = vadd.f32 %v4403_v24, %v5319_v4  ;;  %v5937_v42 = vadd.f32 %v4342_v3, %v5319_v4  ;;  %v4406_v59 = vunpack.c.l.bf16 %v5922_v47  ;;  %v4343_v8 = vunpack.c.h.bf16 %v4428_v61 }
  0xa9   : > { %1132 = vadd.xlane.f32.xlu1 %v1131_v23  ;;  %v5934_v45 = vmul.f32 %v867_v39, %v419_v18  ;;  %v451_v55 = vmul.f32 0.5, %v5833_v63  ;;  %v742_v30 = vmul.f32 0.7978846, %v678_v26  ;;  %v646_v53 = vmul.f32 %v582_v28, %v5904_v29 }
  0xaa   : > { %v487_v27 = vmul.f32 0.044715, %v5929_v11  ;;  %v4740_v33 = vpop.eup %4739  ;;  %v420_v18 = vmul.f32 0.5, %v5837_v2  ;;  %v452_v23 = vmul.f32 0.5, %v5857_v51  ;;  %v519_v39 = vmul.f32 0.044715, %v5932_v34 }
  0xab   : > { %8750 = vst [vmem:[#allocation18_spill] sm:$0xff] %v5934_v45  ;;  %v1038_v24 = vsel %vm974_vm0, %v5934_v45, 0.0  ;;  %v899_v3 = vadd.f32 1.0, %v4740_v33  ;;  %4749 = vtanh.f32 %v742_v30  ;;  %v710_v63 = vadd.f32 %v646_v53, %v5904_v29 }
  0xac   : > { %1039 = vadd.xlane.f32.xlu0 %v1038_v24  ;;  %v551_v61 = vmul.f32 %v487_v27, %v5929_v11  ;;  %v4742_v26 = vpop.eup %4741  ;;  %v583_v28 = vmul.f32 %v519_v39, %v5932_v34  ;;  %v488_v46 = vmul.f32 0.044715, %v5937_v42  ;;  %v5953_v45 = vadd.f32 %v4406_v59, %v5319_v4 }
  0xad   : > { %v5956_v2 = vadd.f32 %v4343_v8, %v5319_v4  ;;  %v5958_v51 = vmul.f32 %v899_v3, %v451_v55  ;;  %v868_v24 = vadd.f32 1.0, %v4742_v26  ;;  %v774_v33 = vmul.f32 0.7978846, %v710_v63 }
  0xae   : > { %v615_v30 = vmul.f32 %v551_v61, %v5929_v11  ;;  %v421_v53 = vmul.f32 0.5, %v5865_v16  ;;  %v647_v27 = vmul.f32 %v583_v28, %v5932_v34  ;;  %v552_v39 = vmul.f32 %v488_v46, %v5937_v42 }
  0xaf   : > { %8751 = vst [vmem:[#allocation19_spill] sm:$0xff] %v5958_v51  ;;  %v520_v50 = vmul.f32 0.044715, %v5953_v45  ;;  %v1134_v59 = vsel %vm974_vm0, %v5958_v51, 0.0  ;;  %v5967_v9 = vmul.f32 %v868_v24, %v420_v18  ;;  %4751 = vtanh.f32 %v774_v33 }
  0xb0   : > { %v679_v8 = vadd.f32 %v615_v30, %v5929_v11  ;;  %1135 = vadd.xlane.f32.xlu1 %v1134_v59  ;;  %v453_v3 = vmul.f32 0.5, %v5875_v41  ;;  %v711_v16 = vadd.f32 %v647_v27, %v5932_v34  ;;  %v616_v63 = vmul.f32 %v552_v39, %v5937_v42 }
  0xb1   : > { %8752 = vst [vmem:[#allocation20_spill] sm:$0xff] %v5967_v9  ;;  %v4744_v55 = vpop.eup %4743  ;;  %v584_v46 = vmul.f32 %v520_v50, %v5953_v45  ;;  %v1041_v26 = vsel %vm974_vm0, %v5967_v9, 0.0  ;;  %v489_v24 = vmul.f32 0.044715, %v5956_v2  ;;  %v4407_v9 = vunpack.c.h.bf16 %v5922_v47 }
  0xb2   : > { %v4746_v61 = vpop.eup %4745  ;;  %v900_v18 = vadd.f32 1.0, %v4744_v55  ;;  %v743_v28 = vmul.f32 0.7978846, %v679_v8  ;;  %1042 = vadd.xlane.f32.xlu0 %v1041_v26  ;;  %v775_v30 = vmul.f32 0.7978846, %v711_v16  ;;  %v680_v41 = vadd.f32 %v616_v63, %v5937_v42  ;;  %v4429_v55 = vld [vmem:[%s5315_s7 + $0x70] sm:$0xff]  }
  0xb3   : > { %v869_v33 = vadd.f32 1.0, %v4746_v61  ;;  %v648_v27 = vmul.f32 %v584_v46, %v5953_v45  ;;  %v553_v50 = vmul.f32 %v489_v24, %v5956_v2  ;;  %v4445_v26 = vld [vmem:[%s5315_s7 + $0xf0] sm:$0xff]  }
  0xb4   : > { %v4748_v39 = vpop.eup %4747  ;;  %v5979_v59 = vmul.f32 %v900_v18, %v452_v23  ;;  %4753 = vtanh.f32 %v743_v28  ;;  %v744_v61 = vmul.f32 0.7978846, %v680_v41  ;;  %v5991_v23 = vadd.f32 %v4407_v9, %v5319_v4 }
  0xb5   : > { %v5984_v8 = vmul.f32 %v869_v33, %v421_v53  ;;  %v901_v51 = vadd.f32 1.0, %v4748_v39  ;;  %4755 = vtanh.f32 %v775_v30  ;;  %v712_v63 = vadd.f32 %v648_v27, %v5953_v45 }
  0xb6   : > { %8753 = vst [vmem:[#allocation21_spill] sm:$0xff] %v5979_v59  ;;  %v1137_v16 = vsel %vm974_vm0, %v5979_v59, 0.0  ;;  %v617_v46 = vmul.f32 %v553_v50, %v5956_v2  ;;  %4757 = vtanh.f32 %v744_v61  ;;  %v4346_v18 = vunpack.c.l.bf16 %v4429_v55 }
  0xb7   : > { %8754 = vst [vmem:[#allocation22_spill] sm:$0xff] %v5984_v8  ;;  %1138 = vadd.xlane.f32.xlu1 %v1137_v16  ;;  %v1044_v47 = vsel %vm974_vm0, %v5984_v8, 0.0  ;;  %v5996_v53 = vmul.f32 %v901_v51, %v453_v3  ;;  %v422_v28 = vmul.f32 0.5, %v5892_v36  ;;  %v776_v24 = vmul.f32 0.7978846, %v712_v63 }
  0xb8   : > { %1045 = vadd.xlane.f32.xlu0 %v1044_v47  ;;  %v681_v33 = vadd.f32 %v617_v46, %v5956_v2  ;;  %v521_v30 = vmul.f32 0.044715, %v5991_v23  ;;  %v4750_v41 = vpop.eup %4749  ;;  %v6004_v27 = vadd.f32 %v4346_v18, %v5319_v4  ;;  %v4410_v51 = vunpack.c.l.bf16 %v4445_v26 }
  0xb9   : > { %8755 = vst [vmem:[#allocation23_spill] sm:$0xff] %v5996_v53  ;;  %v1140_v9 = vsel %vm974_vm0, %v5996_v53, 0.0  ;;  %v4347_v3 = vunpack.c.h.bf16 %v4429_v55  ;;  %v870_v39 = vadd.f32 1.0, %v4750_v41  ;;  %4759 = vtanh.f32 %v776_v24  ;;  %v6019_v24 = vld [vmem:[%s5315_s7 + $0x78] sm:$0xff]  }
  0xba   : > { %v745_v50 = vmul.f32 0.7978846, %v681_v33  ;;  %v585_v36 = vmul.f32 %v521_v30, %v5991_v23  ;;  %v454_v61 = vmul.f32 0.5, %v5904_v29  ;;  %v490_v16 = vmul.f32 0.044715, %v6004_v27 }
  0xbb   : > { %1141 = vadd.xlane.f32.xlu1 %v1140_v9  ;;  %v6010_v63 = vadd.f32 %v4410_v51, %v5319_v4  ;;  %v6013_v46 = vadd.f32 %v4347_v3, %v5319_v4  ;;  %v6015_v47 = vmul.f32 %v870_v39, %v422_v28  ;;  %v4411_v18 = vunpack.c.h.bf16 %v4445_v26  ;;  %v6026_v51 = vld [vmem:[%s5315_s7 + $0xf8] sm:$0xff]   ;;  %s5167_s7 = scalar_lea.vmem %s8586_s29, 8192 }
  0xbc   : > { %4761 = vtanh.f32 %v745_v50  ;;  %v649_v55 = vmul.f32 %v585_v36, %v5991_v23  ;;  %v4752_v33 = vpop.eup %4751  ;;  %v423_v30 = vmul.f32 0.5, %v5929_v11  ;;  %v455_v29 = vmul.f32 0.5, %v5932_v34  ;;  %p5168_p11 = scmp.ne.s32.totalorder %s8586_s29, %s5167_s7  ;;  %p5175_p1 = scmp.lt.s32.totalorder %s5173_s10, %s5167_s7 }
  0xbd   : > { %8756 = vst [vmem:[#allocation24_spill] sm:$0xff] %v6015_v47  ;;  %v554_v41 = vmul.f32 %v490_v16, %v6004_v27  ;;  %v522_v9 = vmul.f32 0.044715, %v6010_v63  ;;  %v1047_v28 = vsel %vm974_vm0, %v6015_v47, 0.0  ;;  %v902_v3 = vadd.f32 1.0, %v4752_v33 }
  0xbe   : > { %v713_v39 = vadd.f32 %v649_v55, %v5991_v23  ;;  %v491_v26 = vmul.f32 0.044715, %v6013_v46  ;;  %1048 = vadd.xlane.f32.xlu0 %v1047_v28  ;;  %v6035_v34 = vadd.f32 %v4411_v18, %v5319_v4  ;;  %v4350_v36 = vunpack.c.l.bf16 %v6019_v24  ;;  %p5169_p12 = pnand %p5168_p11, %p5295_p5  ;;  %p5176_p2 = por %p5175_p1, %p5174_p0 }
  0xbf   : > { %v618_v50 = vmul.f32 %v554_v41, %v6004_v27  ;;  %v586_v11 = vmul.f32 %v522_v9, %v6010_v63  ;;  %v6038_v16 = vmul.f32 %v902_v3, %v454_v61  ;;  %v4414_v33 = vunpack.c.l.bf16 %v6026_v51 }
  0xc0   : > { %v777_v53 = vmul.f32 0.7978846, %v713_v39  ;;  %v555_v47 = vmul.f32 %v491_v26, %v6013_v46  ;;  %v424_v8 = vmul.f32 0.5, %v5937_v42  ;;  %v523_v9 = vmul.f32 0.044715, %v6035_v34  ;;  %p5170_p13 = pneg %p5169_p12 }
  0xc1   : > { %8757 = vst [vmem:[#allocation25_spill] sm:$0xff] %v6038_v16  ;;  %v4754_v55 = vpop.eup %4753  ;;  %v682_v28 = vadd.f32 %v618_v50, %v6004_v27  ;;  %v650_v41 = vmul.f32 %v586_v11, %v6010_v63  ;;  %v1143_v59 = vsel %vm974_vm0, %v6038_v16, 0.0  ;;  %v6057_v16 = vadd.f32 %v4350_v36, %v5319_v4 }
  0xc2   : > { %v4756_v18 = vpop.eup %4755  ;;  %v871_v61 = vadd.f32 1.0, %v4754_v55  ;;  %4763 = vtanh.f32 %v777_v53  ;;  %v619_v3 = vmul.f32 %v555_v47, %v6013_v46  ;;  %1144 = vadd.xlane.f32.xlu1 %v1143_v59  ;;  %v587_v42 = vmul.f32 %v523_v9, %v6035_v34  ;;  %p5177_p3 = pnand %p5176_p2, %p5170_p13 }
  0xc3   : > { %v903_v39 = vadd.f32 1.0, %v4756_v18  ;;  %v746_v26 = vmul.f32 0.7978846, %v682_v28  ;;  %v714_v1 = vadd.f32 %v650_v41, %v6010_v63  ;;  %v4758_v11 = vpop.eup %4757  ;;  %v6060_v53 = vadd.f32 %v4414_v33, %v5319_v4 }
  0xc4   : > { %v6051_v50 = vpop.xlane.xlu0 %976  ;;  %v6053_v54 = vmul.f32 %v871_v61, %v423_v30  ;;  %v683_v10 = vadd.f32 %v619_v3, %v6013_v46  ;;  %v872_v55 = vadd.f32 1.0, %v4758_v11  ;;  %v456_v30 = vmul.f32 0.5, %v5953_v45 }
  0xc5   : > { %v6062_v59 = vpop.xlane.xlu1 %979  ;;  %v6064_v47 = vmul.f32 %v903_v39, %v455_v29  ;;  %4765 = vtanh.f32 %v746_v26  ;;  %v778_v28 = vmul.f32 0.7978846, %v714_v1  ;;  %v651_v18 = vmul.f32 %v587_v42, %v6035_v34 }
  0xc6   : > { %8758 = vst [vmem:[#allocation26_spill] sm:$0xff] %v6053_v54  ;;  %v1050_v41 = vsel %vm974_vm0, %v6053_v54, 0.0  ;;  %v747_v9 = vmul.f32 0.7978846, %v683_v10  ;;  %v4760_v36 = vpop.eup %4759  ;;  %v6072_v61 = vmul.f32 %v872_v55, %v424_v8  ;;  %v492_v29 = vmul.f32 0.044715, %v6057_v16 }
  0xc7   : > { %8759 = vst [vmem:[#allocation27_spill] sm:$0xff] %v6064_v47  ;;  %1051 = vadd.xlane.f32.xlu0 %v1050_v41  ;;  %v1146_v33 = vsel %vm974_vm0, %v6064_v47, 0.0  ;;  %4767 = vtanh.f32 %v778_v28  ;;  %v904_v1 = vadd.f32 1.0, %v4760_v36  ;;  %v425_v39 = vmul.f32 0.5, %v5956_v2 }
  0xc8   : > { %8760 = vst [vmem:[#allocation28_spill] sm:$0xff] %v6072_v61  ;;  %v6075_v3 = vpop.xlane.xlu0 %1072  ;;  %1147 = vadd.xlane.f32.xlu1 %v1146_v33  ;;  %4769 = vtanh.f32 %v747_v9  ;;  %v715_v10 = vadd.f32 %v651_v18, %v6035_v34  ;;  %v1053_v42 = vsel %vm974_vm0, %v6072_v61, 0.0  ;;  %v556_v8 = vmul.f32 %v492_v29, %v6057_v16 }
  0xc9   : > { %v6079_v45 = vpop.xlane.xlu1 %1075  ;;  %v4762_v26 = vpop.eup %4761  ;;  %v524_v11 = vmul.f32 0.044715, %v6060_v53  ;;  %v4351_v55 = vunpack.c.h.bf16 %v6019_v24  ;;  %v6086_v28 = vmul.f32 %v904_v1, %v456_v30  ;;  %v4415_v2 = vunpack.c.h.bf16 %v6026_v51 }
  0xca   : > { %v873_v41 = vadd.f32 1.0, %v4762_v26  ;;  %v779_v36 = vmul.f32 0.7978846, %v715_v10  ;;  %v620_v9 = vmul.f32 %v556_v8, %v6057_v16  ;;  %v457_v8 = vmul.f32 0.5, %v5991_v23 }
  0xcb   : > { %8761 = vst [vmem:[#allocation29_spill] sm:$0xff] %v6086_v28  ;;  %1054 = vadd.xlane.f32.xlu0 %v1053_v42  ;;  %v588_v18 = vmul.f32 %v524_v11, %v6060_v53  ;;  %v6092_v33 = vadd.f32 %v4351_v55, %v5319_v4  ;;  %v1149_v29 = vsel %vm974_vm0, %v6086_v28, 0.0  ;;  %v6101_v30 = vadd.f32 %v4415_v2, %v5319_v4 }
  0xcc   : > { %v6094_v61 = vpop.xlane.xlu0 %982  ;;  %v6098_v24 = vmul.f32 %v873_v41, %v425_v39  ;;  %4771 = vtanh.f32 %v779_v36  ;;  %1150 = vadd.xlane.f32.xlu1 %v1149_v29  ;;  %v684_v1 = vadd.f32 %v620_v9, %v6057_v16  ;;  %v426_v29 = vmul.f32 0.5, %v6004_v27 }
  0xcd   : > { %v6103_v51 = vpop.xlane.xlu1 %1078  ;;  %v652_v10 = vmul.f32 %v588_v18, %v6060_v53  ;;  %v493_v26 = vmul.f32 0.044715, %v6092_v33  ;;  %v525_v39 = vmul.f32 0.044715, %v6101_v30 }
  0xce   : > { %8762 = vst [vmem:[#allocation30_spill] sm:$0xff] %v6098_v24  ;;  %v1056_v42 = vsel %vm974_vm0, %v6098_v24, 0.0  ;;  %v748_v4 = vmul.f32 0.7978846, %v684_v1 }
  0xcf   : > { %v4764_v11 = vpop.eup %4763  ;;  %1057 = vadd.xlane.f32.xlu0 %v1056_v42  ;;  %v716_v55 = vadd.f32 %v652_v10, %v6060_v53  ;;  %v557_v41 = vmul.f32 %v493_v26, %v6092_v33  ;;  %v589_v9 = vmul.f32 %v525_v39, %v6101_v30  ;;  %v458_v26 = vmul.f32 0.5, %v6010_v63 }
  0xd0   : > { %v6114_v36 = vpop.xlane.xlu0 %985  ;;  %v905_v2 = vadd.f32 1.0, %v4764_v11  ;;  %4773 = vtanh.f32 %v748_v4  ;;  %v427_v4 = vmul.f32 0.5, %v6013_v46 }
  0xd1   : > { %v6117_v18 = vpop.xlane.xlu1 %1081  ;;  %v780_v23 = vmul.f32 0.7978846, %v716_v55  ;;  %v621_v24 = vmul.f32 %v557_v41, %v6092_v33  ;;  %v653_v1 = vmul.f32 %v589_v9, %v6101_v30 }
  0xd2   : > { %v4766_v28 = vpop.eup %4765  ;;  %v6121_v42 = vmul.f32 %v905_v2, %v457_v8 }
  0xd3   : > { %v874_v10 = vadd.f32 1.0, %v4766_v28  ;;  %4775 = vtanh.f32 %v780_v23  ;;  %v685_v11 = vadd.f32 %v621_v24, %v6092_v33  ;;  %v717_v55 = vadd.f32 %v653_v1, %v6101_v30 }
  0xd4   : > { %v6126_v39 = vpop.xlane.xlu0 %988  ;;  %v4768_v47 = vpop.eup %4767  ;;  %v1152_v27 = vsel %vm974_vm0, %v6121_v42, 0.0  ;;  %v459_v1 = vmul.f32 0.5, %v6035_v34 }
  0xd5   : > { %v4770_v8 = vpop.eup %4769  ;;  %1153 = vadd.xlane.f32.xlu1 %v1152_v27  ;;  %v6132_v41 = vmul.f32 %v874_v10, %v426_v29  ;;  %v906_v28 = vadd.f32 1.0, %v4768_v47  ;;  %v749_v2 = vmul.f32 0.7978846, %v685_v11  ;;  %v6134_v63 = vpop.xlane.xlu1 %1084  ;;  %v781_v24 = vmul.f32 0.7978846, %v717_v55 }
  0xd6   : > { %v875_v9 = vadd.f32 1.0, %v4770_v8 }
  0xd7   : > { %v1059_v23 = vsel %vm974_vm0, %v6132_v41, 0.0  ;;  %v6138_v54 = vmul.f32 %v906_v28, %v458_v26  ;;  %4777 = vtanh.f32 %v749_v2 }
  0xd8   : > { %1060 = vadd.xlane.f32.xlu0 %v1059_v23  ;;  %v6140_v46 = vmul.f32 %v875_v9, %v427_v4  ;;  %4779 = vtanh.f32 %v781_v24  ;;  %v6143_v29 = vpop.xlane.xlu0 %991  ;;  %v428_v4 = vmul.f32 0.5, %v6057_v16  ;;  %v460_v9 = vmul.f32 0.5, %v6060_v53 }
  0xd9   : > { %v4772_v47 = vpop.eup %4771  ;;  %v1155_v10 = vsel %vm974_vm0, %v6138_v54, 0.0  ;;  %v6149_v26 = vpop.xlane.xlu1 %1087  ;;  %v1168_v24 = vmul.f32 0.125, %v6051_v50  ;;  %v429_v16 = vmul.f32 0.5, %v6092_v33  ;;  %v1169_v50 = vmul.f32 0.125, %v6062_v59 }
  0xda   : > { %1156 = vadd.xlane.f32.xlu1 %v1155_v10  ;;  %v1062_v11 = vsel %vm974_vm0, %v6140_v46, 0.0  ;;  %v907_v27 = vadd.f32 1.0, %v4772_v47  ;;  %v1200_v47 = vmul.f32 0.125, %v6075_v3  ;;  %v461_v3 = vmul.f32 0.5, %v6101_v30 }
  0xdb   : > { %v6186_v59 = vsub.f32 %v5425_v6, %v1169_v50  ;;  %v1170_v30 = vmul.f32 0.125, %v6094_v61 }
  0xdc   : > { %1063 = vadd.xlane.f32.xlu0 %v1062_v11  ;;  %v6151_v55 = vmul.f32 %v907_v27, %v459_v1  ;;  %v6156_v28 = vpop.xlane.xlu0 %994 }
  0xdd   : > { %v4774_v34 = vpop.eup %4773 }
  0xde   : > { %8763 = vst [vmem:[#allocation31_spill] sm:$0xff] %v6151_v55  ;;  %v1158_v8 = vsel %vm974_vm0, %v6151_v55, 0.0  ;;  %v876_v2 = vadd.f32 1.0, %v4774_v34  ;;  %v6171_v34 = vsub.f32 %v5421_v62, %v1168_v24 }
  0xdf   : > { %1159 = vadd.xlane.f32.xlu1 %v1158_v8  ;;  %v6163_v11 = vpop.xlane.xlu1 %1090  ;;  %v1201_v8 = vmul.f32 0.125, %v6079_v45 }
  0xe0   : > { %v4776_v23 = vpop.eup %4775  ;;  %v6161_v10 = vmul.f32 %v876_v2, %v428_v4  ;;  %v6176_v4 = vsub.f32 %v5431_v14, %v1200_v47  ;;  %v1296_v14 = vmul.f32 %v6171_v34, %v6171_v34 }
  0xe1   : > { %v908_v1 = vadd.f32 1.0, %v4776_v23 }
  0xe2   : > { %v1065_v27 = vsel %vm974_vm0, %v6161_v10, 0.0 }
  0xe3   : > { %v6168_v55 = vmul.f32 %v908_v1, %v460_v9  ;;  %1066 = vadd.xlane.f32.xlu0 %v1065_v27  ;;  %v6194_v1 = vsub.f32 %v5436_v17, %v1201_v8  ;;  %v1202_v27 = vmul.f32 0.125, %v6103_v51  ;;  %v6207_v17 = vsub.f32 %v5440_v12, %v1170_v30 }
  0xe4   : > { %v4778_v53 = vpop.eup %4777  ;;  %v6179_v33 = vpop.xlane.xlu0 %997  ;;  %v1297_v51 = vmul.f32 %v6186_v59, %v6186_v59 }
  0xe5   : > { %v4780_v2 = vpop.eup %4779  ;;  %v1161_v9 = vsel %vm974_vm0, %v6168_v55, 0.0  ;;  %v877_v23 = vadd.f32 1.0, %v4778_v53  ;;  %v1094_v45 = vpop.xlane.xlu1 %1093  ;;  %v1360_v53 = vsel %vm974_vm0, %v1296_v14, 0.0  ;;  %v6213_v8 = vsub.f32 %v5446_v32, %v1202_v27 }
  0xe6   : > { %1162 = vadd.xlane.f32.xlu1 %v1161_v9  ;;  %v909_v62 = vadd.f32 1.0, %v4780_v2  ;;  %v1203_v9 = vmul.f32 0.125, %v6117_v18  ;;  %v1363_v12 = vsel %vm974_vm0, %v1297_v51, 0.0  ;;  %v1172_v32 = vmul.f32 0.125, %v6126_v39 }
  0xe7   : > { %v6183_v24 = vmul.f32 %v877_v23, %v429_v16  ;;  %v1328_v16 = vmul.f32 %v6176_v4, %v6176_v4  ;;  %v1329_v23 = vmul.f32 %v6194_v1, %v6194_v1 }
  0xe8   : > { %v6191_v47 = vmul.f32 %v909_v62, %v461_v3  ;;  %v1171_v3 = vmul.f32 0.125, %v6114_v36  ;;  %v1298_v36 = vmul.f32 %v6207_v17, %v6207_v17  ;;  %v6227_v27 = vsub.f32 %v5465_v22, %v1203_v9 }
  0xe9   : > { %v1068_v6 = vsel %vm974_vm0, %v6183_v24, 0.0  ;;  %v6201_v50 = vpop.xlane.xlu0 %1000  ;;  %v1456_v2 = vsel %vm974_vm0, %v1328_v16, 0.0  ;;  %v1459_v18 = vsel %vm974_vm0, %v1329_v23, 0.0  ;;  %v1204_v16 = vmul.f32 0.125, %v6134_v63 }
  0xea   : > { %1069 = vadd.xlane.f32.xlu0 %v1068_v6  ;;  %v1164_v61 = vsel %vm974_vm0, %v6191_v47, 0.0  ;;  %v6221_v14 = vsub.f32 %v5458_v21, %v1171_v3  ;;  %v1330_v6 = vmul.f32 %v6213_v8, %v6213_v8  ;;  %v1366_v21 = vsel %vm974_vm0, %v1298_v36, 0.0 }
  0xeb   : > { %1165 = vadd.xlane.f32.xlu1 %v1164_v61  ;;  %v1097_v62 = vpop.xlane.xlu1 %1096  ;;  %v6235_v61 = vsub.f32 %v5491_v5, %v1172_v32  ;;  %v1173_v22 = vmul.f32 0.125, %v6143_v29  ;;  %v6241_v51 = vsub.f32 %v5496_v35, %v1204_v16  ;;  %v1205_v3 = vmul.f32 0.125, %v6149_v26 }
  0xec   : > { %v1299_v39 = vmul.f32 %v6221_v14, %v6221_v14  ;;  %v1462_v63 = vsel %vm974_vm0, %v1330_v6, 0.0  ;;  %v1174_v35 = vmul.f32 0.125, %v6156_v28  ;;  %v1206_v36 = vmul.f32 0.125, %v6163_v11 }
  0xed   : > { %v1004_v30 = vpop.xlane.xlu0 %1003  ;;  %v6249_v23 = vsub.f32 %v5504_v31, %v1173_v22  ;;  %v1300_v29 = vmul.f32 %v6235_v61, %v6235_v61  ;;  %v1332_v32 = vmul.f32 %v6241_v51, %v6241_v51 }
  0xee   : > { %1361 = vadd.xlane.f32.xlu0 %v1360_v53  ;;  %v1369_v5 = vsel %vm974_vm0, %v1299_v39, 0.0  ;;  %v6263_v16 = vsub.f32 %v5523_v48, %v1174_v35  ;;  %v1207_v39 = vmul.f32 0.125, %v1094_v45 }
  0xef   : > { %1457 = vadd.xlane.f32.xlu1 %v1456_v2  ;;  %v1331_v2 = vmul.f32 %v6227_v27, %v6227_v27  ;;  %v1372_v31 = vsel %vm974_vm0, %v1300_v29, 0.0  ;;  %v1301_v28 = vmul.f32 %v6249_v23, %v6249_v23  ;;  %v1468_v11 = vsel %vm974_vm0, %v1332_v32, 0.0 }
  0xf1   : > { %v1465_v26 = vsel %vm974_vm0, %v1331_v2, 0.0  ;;  %v1375_v48 = vsel %vm974_vm0, %v1301_v28, 0.0  ;;  %v6282_v2 = vsub.f32 %v5583_v58, %v1207_v39 }
  0xf2   : > { %1364 = vadd.xlane.f32.xlu0 %v1363_v12  ;;  %v1100_v53 = vpop.xlane.xlu1 %1099  ;;  %v6255_v12 = vsub.f32 %v5508_v20, %v1205_v3  ;;  %v1175_v20 = vmul.f32 0.125, %v6179_v33  ;;  %v1302_v33 = vmul.f32 %v6263_v16, %v6263_v16  ;;  %v1176_v3 = vmul.f32 0.125, %v6201_v50 }
  0xf3   : > { %1460 = vadd.xlane.f32.xlu1 %v1459_v18  ;;  %v1209_v32 = vmul.f32 0.125, %v1100_v53 }
  0xf4   : > { %v1007_v9 = vpop.xlane.xlu0 %1006  ;;  %v1333_v22 = vmul.f32 %v6255_v12, %v6255_v12 }
  0xf5   : > { %v6306_v39 = vsub.f32 %v5638_v25, %v1209_v32 }
  0xf6   : > { %1367 = vadd.xlane.f32.xlu0 %v1366_v21  ;;  %v6269_v21 = vsub.f32 %v5555_v19, %v1206_v36  ;;  %v1471_v45 = vsel %vm974_vm0, %v1333_v22, 0.0  ;;  %v1177_v36 = vmul.f32 0.125, %v1004_v30 }
  0xf7   : > { %1463 = vadd.xlane.f32.xlu1 %v1462_v63  ;;  %v1103_v18 = vpop.xlane.xlu1 %1102  ;;  %v6276_v63 = vsub.f32 %v5576_v57, %v1175_v20  ;;  %v1378_v57 = vsel %vm974_vm0, %v1302_v33, 0.0 }
  0xf8   : > { %v1010_v6 = vpop.xlane.xlu0 %1009  ;;  %v1334_v29 = vmul.f32 %v6269_v21, %v6269_v21  ;;  %v1210_v22 = vmul.f32 0.125, %v1103_v18 }
  0xf9   : > { %v1303_v50 = vmul.f32 %v6276_v63, %v6276_v63 }
  0xfa   : > { %1370 = vadd.xlane.f32.xlu0 %v1369_v5  ;;  %v1208_v5 = vmul.f32 0.125, %v1097_v62  ;;  %v1474_v62 = vsel %vm974_vm0, %v1334_v29, 0.0  ;;  %v6318_v25 = vsub.f32 %v5663_v37, %v1210_v22  ;;  %v1337_v29 = vmul.f32 %v6306_v39, %v6306_v39 }
  0xfb   : > { %1466 = vadd.xlane.f32.xlu1 %v1465_v26  ;;  %v1106_v19 = vpop.xlane.xlu1 %1105  ;;  %v6289_v26 = vsub.f32 %v5597_v56, %v1176_v3  ;;  %v1381_v20 = vsel %vm974_vm0, %v1303_v50, 0.0  ;;  %v6301_v56 = vsub.f32 %v5623_v49, %v1177_v36  ;;  %v1179_v3 = vmul.f32 0.125, %v1010_v6 }
  0xfc   : > { %v6294_v58 = vsub.f32 %v5605_v7, %v1208_v5  ;;  %v1211_v5 = vmul.f32 0.125, %v1106_v19  ;;  %v1483_v19 = vsel %vm974_vm0, %v1337_v29, 0.0  ;;  %v1338_v32 = vmul.f32 %v6318_v25, %v6318_v25 }
  0xfd   : > { %v1304_v30 = vmul.f32 %v6289_v26, %v6289_v26  ;;  %v6325_v50 = vsub.f32 %v5665_v60, %v1179_v3 }
  0xfe   : > { %1373 = vadd.xlane.f32.xlu0 %v1372_v31  ;;  %v1335_v31 = vmul.f32 %v6282_v2, %v6282_v2  ;;  %v6330_v37 = vsub.f32 %v5684_v43, %v1211_v5 }
  0xff   : > { %1469 = vadd.xlane.f32.xlu1 %v1468_v11  ;;  %v1178_v11 = vmul.f32 0.125, %v1007_v9  ;;  %v1384_v33 = vsel %vm974_vm0, %v1304_v30, 0.0  ;;  %v1305_v9 = vmul.f32 %v6301_v56, %v6301_v56 }
 0x100   : > { %v1013_v35 = vpop.xlane.xlu0 %1012  ;;  %v1477_v53 = vsel %vm974_vm0, %v1335_v31, 0.0  ;;  %v1339_v22 = vmul.f32 %v6330_v37, %v6330_v37 }
 0x101   : > { %v6313_v49 = vsub.f32 %v5654_v44, %v1178_v11  ;;  %v1387_v44 = vsel %vm974_vm0, %v1305_v9, 0.0  ;;  %v1180_v36 = vmul.f32 0.125, %v1013_v35  ;;  %v1307_v35 = vmul.f32 %v6325_v50, %v6325_v50 }
 0x102   : > { %1376 = vadd.xlane.f32.xlu0 %v1375_v48  ;;  %v1109_v28 = vpop.xlane.xlu1 %1108  ;;  %v1336_v48 = vmul.f32 %v6294_v58, %v6294_v58 }
 0x103   : > { %1472 = vadd.xlane.f32.xlu1 %v1471_v45  ;;  %v1306_v6 = vmul.f32 %v6313_v49, %v6313_v49  ;;  %v6337_v30 = vsub.f32 %v5700_v40, %v1180_v36  ;;  %v1393_v40 = vsel %vm974_vm0, %v1307_v35, 0.0 }
 0x104   : > { %v1480_v18 = vsel %vm974_vm0, %v1336_v48, 0.0  ;;  %v328_v48 = vld [vmem:[%s8635_s2] sm:$0xff] }
 0x105   : > { %v1390_v60 = vsel %vm974_vm0, %v1306_v6, 0.0  ;;  %4512 = vmatprep.subr.mxu0 %v328_v48  ;;  %4610 = vmatprep.subr.mxu1 %v328_v48 }
 0x106   : > { %1379 = vadd.xlane.f32.xlu0 %v1378_v57  ;;  %4513 = vmatpush3.msra.mxu0 %v328_v48 }
 0x107   : > { %1475 = vadd.xlane.f32.xlu1 %v1474_v62  ;;  %v1016_v7 = vpop.xlane.xlu0 %1015  ;;  %v1212_v62 = vmul.f32 0.125, %v1109_v28  ;;  %v1486_v28 = vsel %vm974_vm0, %v1338_v32, 0.0  ;;  %4611 = vmatpush3.msra.mxu1 %v328_v48 }
 0x108   : > { %v1112_v45 = vpop.xlane.xlu1 %1111  ;;  %v1181_v43 = vmul.f32 0.125, %v1016_v7 }
 0x109   : > { %v6342_v11 = vsub.f32 %v5709_v13, %v1212_v62  ;;  %v1308_v13 = vmul.f32 %v6337_v30, %v6337_v30 }
 0x10a   : > { %1382 = vadd.xlane.f32.xlu0 %v1381_v20  ;;  %v6352_v7 = vsub.f32 %v5733_v0, %v1181_v43 }
 0x10b   : > { %1478 = vadd.xlane.f32.xlu1 %v1477_v53  ;;  %v1019_v57 = vpop.xlane.xlu0 %1018  ;;  %v1213_v53 = vmul.f32 0.125, %v1112_v45  ;;  %v1489_v45 = vsel %vm974_vm0, %v1339_v22, 0.0  ;;  %v1340_v5 = vmul.f32 %v6342_v11, %v6342_v11  ;;  %v1396_v0 = vsel %vm974_vm0, %v1308_v13, 0.0 }
 0x10d   : > { %v6357_v3 = vsub.f32 %v5741_v15, %v1213_v53 }
 0x10e   : > { %1385 = vadd.xlane.f32.xlu0 %v1384_v33  ;;  %v1115_v31 = vpop.xlane.xlu1 %1114  ;;  %v1182_v33 = vmul.f32 0.125, %v1019_v57  ;;  %v1309_v57 = vmul.f32 %v6352_v7, %v6352_v7 }
 0x10f   : > { %1481 = vadd.xlane.f32.xlu1 %v1480_v18  ;;  %v1214_v18 = vmul.f32 0.125, %v1115_v31  ;;  %v1341_v32 = vmul.f32 %v6357_v3, %v6357_v3 }
 0x111   : > { %v1022_v20 = vpop.xlane.xlu0 %1021  ;;  %v6369_v36 = vsub.f32 %v5763_v38, %v1214_v18  ;;  %v8765_v38 = vld [vmem:[#allocation7_spill] sm:$0xff]  ;;  %v1495_v53 = vsel %vm974_vm0, %v1341_v32, 0.0 }
 0x112   : > { %1388 = vadd.xlane.f32.xlu0 %v1387_v44  ;;  %v6364_v44 = vsub.f32 %v5752_v52, %v1182_v33  ;;  %v1183_v15 = vmul.f32 0.125, %v1022_v20  ;;  %v1399_v52 = vsel %vm974_vm0, %v1309_v57, 0.0  ;;  %v8766_v33 = vld [vmem:[#allocation8_spill] sm:$0xff] }
 0x113   : > { %1484 = vadd.xlane.f32.xlu1 %v1483_v19  ;;  %v1492_v19 = vsel %vm974_vm0, %v1340_v5, 0.0  ;;  %v1342_v48 = vmul.f32 %v6369_v36, %v6369_v36  ;;  %v8767_v5 = vld [vmem:[#allocation9_spill] sm:$0xff] }
 0x114   : > { %v1310_v20 = vmul.f32 %v6364_v44, %v6364_v44 }
 0x116   : > { %1391 = vadd.xlane.f32.xlu0 %v1390_v60  ;;  %v8764_v60 = vld [vmem:[#allocation6_spill] sm:$0xff]  ;;  %v1402_v13 = vsel %vm974_vm0, %v1310_v20, 0.0  ;;  %v8769_v20 = vld [vmem:[#allocation11_spill] sm:$0xff] }
 0x117   : > { %1487 = vadd.xlane.f32.xlu1 %v1486_v28  ;;  %v1118_v9 = vpop.xlane.xlu1 %1117  ;;  %v6376_v35 = vsub.f32 %v8764_v60, %v1183_v15 }
 0x118   : > { %v1025_v29 = vpop.xlane.xlu0 %1024  ;;  %v1215_v62 = vmul.f32 0.125, %v1118_v9 }
 0x119   : > { %v1184_v43 = vmul.f32 0.125, %v1025_v29 }
 0x11a   : > { %1394 = vadd.xlane.f32.xlu0 %v1393_v40  ;;  %v6381_v28 = vsub.f32 %v8765_v38, %v1215_v62  ;;  %v8768_v62 = vld [vmem:[#allocation10_spill] sm:$0xff] }
 0x11b   : > { %1490 = vadd.xlane.f32.xlu1 %v1489_v45  ;;  %v1121_v6 = vpop.xlane.xlu1 %1120  ;;  %v6388_v9 = vsub.f32 %v8766_v33, %v1184_v43  ;;  %v1311_v45 = vmul.f32 %v6376_v35, %v6376_v35 }
 0x11c   : > { %v1216_v22 = vmul.f32 0.125, %v1121_v6  ;;  %v1343_v15 = vmul.f32 %v6381_v28, %v6381_v28 }
 0x11d   : > { %v1028_v31 = vpop.xlane.xlu0 %1027 }
 0x11e   : > { %1397 = vadd.xlane.f32.xlu0 %v1396_v0  ;;  %v1185_v18 = vmul.f32 0.125, %v1028_v31  ;;  %v6393_v29 = vsub.f32 %v8767_v5, %v1216_v22  ;;  %v1498_v0 = vsel %vm974_vm0, %v1342_v48, 0.0  ;;  %v1312_v31 = vmul.f32 %v6388_v9, %v6388_v9  ;;  %v8771_v5 = vld [vmem:[#allocation13_spill] sm:$0xff] }
 0x11f   : > { %1493 = vadd.xlane.f32.xlu1 %v1492_v19  ;;  %v1405_v19 = vsel %vm974_vm0, %v1311_v45, 0.0  ;;  %v1501_v38 = vsel %vm974_vm0, %v1343_v15, 0.0 }
 0x120   : > { %v1124_v40 = vpop.xlane.xlu1 %1123  ;;  %v6400_v32 = vsub.f32 %v8768_v62, %v1185_v18  ;;  %v1344_v22 = vmul.f32 %v6393_v29, %v6393_v29  ;;  %v8772_v62 = vld [vmem:[#allocation14_spill] sm:$0xff] }
 0x121   : > { %v1217_v57 = vmul.f32 0.125, %v1124_v40  ;;  %v1408_v40 = vsel %vm974_vm0, %v1312_v31, 0.0 }
 0x122   : > { %1400 = vadd.xlane.f32.xlu0 %v1399_v52  ;;  %v1313_v45 = vmul.f32 %v6400_v32, %v6400_v32 }
 0x123   : > { %1496 = vadd.xlane.f32.xlu1 %v1495_v53  ;;  %v1031_v6 = vpop.xlane.xlu0 %1030  ;;  %v6405_v43 = vsub.f32 %v8769_v20, %v1217_v57  ;;  %v1504_v57 = vsel %vm974_vm0, %v1344_v22, 0.0 }
 0x124   : > { %v1186_v52 = vmul.f32 0.125, %v1031_v6 }
 0x125   : > { %v1345_v15 = vmul.f32 %v6405_v43, %v6405_v43 }
 0x126   : > { %1403 = vadd.xlane.f32.xlu0 %v1402_v13  ;;  %v1127_v60 = vpop.xlane.xlu1 %1126  ;;  %v8770_v13 = vld [vmem:[#allocation12_spill] sm:$0xff] }
 0x127   : > { %1499 = vadd.xlane.f32.xlu1 %v1498_v0  ;;  %v1218_v53 = vmul.f32 0.125, %v1127_v60  ;;  %v6412_v33 = vsub.f32 %v8770_v13, %v1186_v52 }
 0x129   : > { %v1034_v48 = vpop.xlane.xlu0 %1033  ;;  %v6417_v0 = vsub.f32 %v8771_v5, %v1218_v53  ;;  %v1314_v60 = vmul.f32 %v6412_v33, %v6412_v33 }
 0x12a   : > { %1406 = vadd.xlane.f32.xlu0 %v1405_v19  ;;  %v1187_v18 = vmul.f32 0.125, %v1034_v48  ;;  %v1411_v19 = vsel %vm974_vm0, %v1313_v45, 0.0  ;;  %v8773_v48 = vld [vmem:[#allocation15_spill] sm:$0xff] }
 0x12b   : > { %1502 = vadd.xlane.f32.xlu1 %v1501_v38  ;;  %v1507_v38 = vsel %vm974_vm0, %v1345_v15, 0.0  ;;  %v1346_v22 = vmul.f32 %v6417_v0, %v6417_v0  ;;  %v1414_v45 = vsel %vm974_vm0, %v1314_v60, 0.0 }
 0x12c   : > { %v6424_v31 = vsub.f32 %v8772_v62, %v1187_v18  ;;  %v8775_v18 = vld [vmem:[#allocation16_spill] sm:$0xff] }
 0x12d   : > { %v1510_v15 = vsel %vm974_vm0, %v1346_v22, 0.0 }
 0x12e   : > { %1409 = vadd.xlane.f32.xlu0 %v1408_v40  ;;  %v1130_v6 = vpop.xlane.xlu1 %1129 }
 0x12f   : > { %1505 = vadd.xlane.f32.xlu1 %v1504_v57  ;;  %v1219_v52 = vmul.f32 0.125, %v1130_v6  ;;  %v1037_v20 = vpop.xlane.xlu0 %1036  ;;  %v1315_v6 = vmul.f32 %v6424_v31, %v6424_v31 }
 0x130   : > { %v1188_v53 = vmul.f32 0.125, %v1037_v20  ;;  %v8777_v20 = vld [vmem:[#allocation17_spill] sm:$0xff] }
 0x131   : > { %v6432_v40 = vsub.f32 %v8773_v48, %v1219_v52  ;;  %v1417_v60 = vsel %vm974_vm0, %v1315_v6, 0.0  ;;  %v8779_v48 = vld [vmem:[#allocation18_spill] sm:$0xff] }
 0x132   : > { %1412 = vadd.xlane.f32.xlu0 %v1411_v19  ;;  %v1133_v13 = vpop.xlane.xlu1 %1132  ;;  %v6436_v5 = vsub.f32 %v8775_v18, %v1188_v53 }
 0x133   : > { %8774 = vst [vmem:[#allocation6_spill] sm:$0xff] %v6432_v40  ;;  %1508 = vadd.xlane.f32.xlu1 %v1507_v38  ;;  %v1220_v57 = vmul.f32 0.125, %v1133_v13  ;;  %v1347_v62 = vmul.f32 %v6432_v40, %v6432_v40 }
 0x134   : > { %8776 = vst [vmem:[#allocation7_spill] sm:$0xff] %v6436_v5  ;;  %v1316_v53 = vmul.f32 %v6436_v5, %v6436_v5  ;;  %v8781_v5 = vld [vmem:[#allocation19_spill] sm:$0xff] }
 0x135   : > { %v6444_v52 = vsub.f32 %v8777_v20, %v1220_v57  ;;  %v1040_v19 = vpop.xlane.xlu0 %1039  ;;  %v1513_v22 = vsel %vm974_vm0, %v1347_v62, 0.0  ;;  %v8782_v62 = vld [vmem:[#allocation20_spill] sm:$0xff] }
 0x136   : > { %1415 = vadd.xlane.f32.xlu0 %v1414_v45  ;;  %v1189_v38 = vmul.f32 0.125, %v1040_v19  ;;  %v1420_v45 = vsel %vm974_vm0, %v1316_v53, 0.0 }
 0x137   : > { %8778 = vst [vmem:[#allocation8_spill] sm:$0xff] %v6444_v52  ;;  %1511 = vadd.xlane.f32.xlu1 %v1510_v15  ;;  %v1348_v18 = vmul.f32 %v6444_v52, %v6444_v52 }
 0x138   : > { %v6450_v13 = vsub.f32 %v8779_v48, %v1189_v38 }
 0x139   : > { %v1136_v57 = vpop.xlane.xlu1 %1135  ;;  %v1516_v19 = vsel %vm974_vm0, %v1348_v18, 0.0 }
 0x13a   : > { %8780 = vst [vmem:[#allocation9_spill] sm:$0xff] %v6450_v13  ;;  %1418 = vadd.xlane.f32.xlu0 %v1417_v60  ;;  %v1221_v20 = vmul.f32 0.125, %v1136_v57  ;;  %v1317_v6 = vmul.f32 %v6450_v13, %v6450_v13 }
 0x13b   : > { %1514 = vadd.xlane.f32.xlu1 %v1513_v22  ;;  %v1043_v15 = vpop.xlane.xlu0 %1042 }
 0x13c   : > { %v6460_v38 = vsub.f32 %v8781_v5, %v1221_v20  ;;  %v1190_v48 = vmul.f32 0.125, %v1043_v15  ;;  %v1423_v60 = vsel %vm974_vm0, %v1317_v6, 0.0  ;;  %v8784_v20 = vld [vmem:[#allocation21_spill] sm:$0xff]  ;;  %v8786_v6 = vld [vmem:[#allocation22_spill] sm:$0xff] }
 0x13e   : > { %1421 = vadd.xlane.f32.xlu0 %v1420_v45  ;;  %v6463_v40 = vsub.f32 %v8782_v62, %v1190_v48  ;;  %v1349_v53 = vmul.f32 %v6460_v38, %v6460_v38 }
 0x13f   : > { %1517 = vadd.xlane.f32.xlu1 %v1516_v19 }
 0x140   : > { %8783 = vst [vmem:[#allocation10_spill] sm:$0xff] %v6463_v40  ;;  %v1139_v22 = vpop.xlane.xlu1 %1138  ;;  %v1519_v52 = vsel %vm974_vm0, %v1349_v53, 0.0  ;;  %v1318_v5 = vmul.f32 %v6463_v40, %v6463_v40  ;;  %v8800_v40 = vld [vmem:[#allocation30_spill] sm:$0xff] }
 0x141   : > { %v1222_v57 = vmul.f32 0.125, %v1139_v22  ;;  %v1046_v13 = vpop.xlane.xlu0 %1045 }
 0x142   : > { %1424 = vadd.xlane.f32.xlu0 %v1423_v60  ;;  %v1191_v18 = vmul.f32 0.125, %v1046_v13  ;;  %v1426_v15 = vsel %vm974_vm0, %v1318_v5, 0.0  ;;  %v8788_v60 = vld [vmem:[#allocation23_spill] sm:$0xff] }
 0x143   : > { %v6472_v45 = vsub.f32 %v8784_v20, %v1222_v57  ;;  %1520 = vadd.xlane.f32.xlu1 %v1519_v52 }
 0x144   : > { %v6476_v19 = vsub.f32 %v8786_v6, %v1191_v18  ;;  %v1142_v48 = vpop.xlane.xlu1 %1141  ;;  %v8790_v6 = vld [vmem:[#allocation24_spill] sm:$0xff] }
 0x145   : > { %8785 = vst [vmem:[#allocation11_spill] sm:$0xff] %v6472_v45  ;;  %v1223_v62 = vmul.f32 0.125, %v1142_v48  ;;  %v1350_v22 = vmul.f32 %v6472_v45, %v6472_v45 }
 0x146   : > { %8787 = vst [vmem:[#allocation12_spill] sm:$0xff] %v6476_v19  ;;  %1427 = vadd.xlane.f32.xlu0 %v1426_v15  ;;  %v1319_v53 = vmul.f32 %v6476_v19, %v6476_v19 }
 0x147   : > { %v6483_v13 = vsub.f32 %v8788_v60, %v1223_v62  ;;  %v1522_v57 = vsel %vm974_vm0, %v1350_v22, 0.0  ;;  %v1049_v52 = vpop.xlane.xlu0 %1048  ;;  %v8792_v60 = vld [vmem:[#allocation25_spill] sm:$0xff] }
 0x148   : > { %1523 = vadd.xlane.f32.xlu1 %v1522_v57  ;;  %v1429_v5 = vsel %vm974_vm0, %v1319_v53, 0.0  ;;  %v1192_v18 = vmul.f32 0.125, %v1049_v52 }
 0x149   : > { %8789 = vst [vmem:[#allocation13_spill] sm:$0xff] %v6483_v13  ;;  %v1351_v20 = vmul.f32 %v6483_v13, %v6483_v13 }
 0x14a   : > { %1430 = vadd.xlane.f32.xlu0 %v1429_v5  ;;  %v6490_v48 = vsub.f32 %v8790_v6, %v1192_v18 }
 0x14b   : > { %v1525_v15 = vsel %vm974_vm0, %v1351_v20, 0.0  ;;  %v1145_v19 = vpop.xlane.xlu1 %1144  ;;  %v8794_v20 = vld [vmem:[#allocation26_spill] sm:$0xff] }
 0x14c   : > { %8791 = vst [vmem:[#allocation14_spill] sm:$0xff] %v6490_v48  ;;  %1526 = vadd.xlane.f32.xlu1 %v1525_v15  ;;  %v1224_v62 = vmul.f32 0.125, %v1145_v19  ;;  %v1320_v22 = vmul.f32 %v6490_v48, %v6490_v48  ;;  %v8796_v15 = vld [vmem:[#allocation27_spill] sm:$0xff] }
 0x14e   : > { %v6496_v57 = vsub.f32 %v8792_v60, %v1224_v62  ;;  %v1432_v53 = vsel %vm974_vm0, %v1320_v22, 0.0 }
 0x14f   : > { %1433 = vadd.xlane.f32.xlu0 %v1432_v53 }
 0x150   : > { %8793 = vst [vmem:[#allocation15_spill] sm:$0xff] %v6496_v57  ;;  %v1052_v52 = vpop.xlane.xlu0 %1051  ;;  %v1352_v18 = vmul.f32 %v6496_v57, %v6496_v57  ;;  %v8798_v57 = vld [vmem:[#allocation28_spill] sm:$0xff] }
 0x151   : > { %v1193_v13 = vmul.f32 0.125, %v1052_v52  ;;  %v1148_v5 = vpop.xlane.xlu1 %1147 }
 0x152   : > { %v1225_v6 = vmul.f32 0.125, %v1148_v5  ;;  %v1528_v19 = vsel %vm974_vm0, %v1352_v18, 0.0 }
 0x153   : > { %v6502_v45 = vsub.f32 %v8794_v20, %v1193_v13  ;;  %1529 = vadd.xlane.f32.xlu1 %v1528_v19 }
 0x154   : > { %v6506_v48 = vsub.f32 %v8796_v15, %v1225_v6  ;;  %v1055_v62 = vpop.xlane.xlu0 %1054  ;;  %v8799_v15 = vld [vmem:[#allocation29_spill] sm:$0xff] }
 0x155   : > { %8795 = vst [vmem:[#allocation16_spill] sm:$0xff] %v6502_v45  ;;  %v1194_v60 = vmul.f32 0.125, %v1055_v62  ;;  %v1321_v22 = vmul.f32 %v6502_v45, %v6502_v45  ;;  %v1151_v53 = vpop.xlane.xlu1 %1150 }
 0x156   : > { %8797 = vst [vmem:[#allocation17_spill] sm:$0xff] %v6506_v48  ;;  %v1353_v52 = vmul.f32 %v6506_v48, %v6506_v48  ;;  %v1226_v13 = vmul.f32 0.125, %v1151_v53 }
 0x157   : > { %v6513_v5 = vsub.f32 %v8798_v57, %v1194_v60  ;;  %v1435_v20 = vsel %vm974_vm0, %v1321_v22, 0.0 }
 0x158   : > { %1436 = vadd.xlane.f32.xlu0 %v1435_v20  ;;  %v1058_v18 = vpop.xlane.xlu0 %1057  ;;  %v1531_v6 = vsel %vm974_vm0, %v1353_v52, 0.0  ;;  %v6518_v19 = vsub.f32 %v8799_v15, %v1226_v13 }
 0x159   : > { %v1195_v62 = vmul.f32 0.125, %v1058_v18  ;;  %1532 = vadd.xlane.f32.xlu1 %v1531_v6  ;;  %v1322_v45 = vmul.f32 %v6513_v5, %v6513_v5 }
 0x15a   : > { %v1354_v60 = vmul.f32 %v6518_v19, %v6518_v19 }
 0x15b   : > { %v6523_v48 = vsub.f32 %v8800_v40, %v1195_v62  ;;  %v1438_v57 = vsel %vm974_vm0, %v1322_v45, 0.0 }
 0x15c   : > { %1439 = vadd.xlane.f32.xlu0 %v1438_v57  ;;  %v1534_v22 = vsel %vm974_vm0, %v1354_v60, 0.0 }
 0x15d   : > { %v1323_v53 = vmul.f32 %v6523_v48, %v6523_v48  ;;  %1535 = vadd.xlane.f32.xlu1 %v1534_v22 }
 0x15e   : > { %v1154_v52 = vpop.xlane.xlu1 %1153 }
 0x15f   : > { %v1227_v13 = vmul.f32 0.125, %v1154_v52  ;;  %v1441_v20 = vsel %vm974_vm0, %v1323_v53, 0.0 }
 0x160   : > { %1442 = vadd.xlane.f32.xlu0 %v1441_v20 }
 0x161   : > { %v6533_v40 = vsub.f32 %v6121_v42, %v1227_v13  ;;  %v1061_v18 = vpop.xlane.xlu0 %1060 }
 0x162   : > { %v1196_v45 = vmul.f32 0.125, %v1061_v18 }
 0x163   : > { %v1157_v6 = vpop.xlane.xlu1 %1156  ;;  %v1355_v15 = vmul.f32 %v6533_v40, %v6533_v40 }
 0x164   : > { %v6538_v62 = vsub.f32 %v6132_v41, %v1196_v45  ;;  %v1228_v57 = vmul.f32 0.125, %v1157_v6 }
 0x165   : > { %v1064_v60 = vpop.xlane.xlu0 %1063  ;;  %v1537_v22 = vsel %vm974_vm0, %v1355_v15, 0.0  ;;  %v8804_v15 = vld [vmem:[#allocation31_spill] sm:$0xff] }
 0x166   : > { %8801 = vst [vmem:[#allocation18_spill] sm:$0xff] %v6538_v62  ;;  %v6542_v52 = vsub.f32 %v6138_v54, %v1228_v57  ;;  %v1197_v53 = vmul.f32 0.125, %v1064_v60  ;;  %1538 = vadd.xlane.f32.xlu1 %v1537_v22  ;;  %v1324_v42 = vmul.f32 %v6538_v62, %v6538_v62 }
 0x168   : > { %8802 = vst [vmem:[#allocation19_spill] sm:$0xff] %v6542_v52  ;;  %v6547_v13 = vsub.f32 %v6140_v46, %v1197_v53  ;;  %v1160_v20 = vpop.xlane.xlu1 %1159  ;;  %v1444_v18 = vsel %vm974_vm0, %v1324_v42, 0.0  ;;  %v1356_v41 = vmul.f32 %v6542_v52, %v6542_v52 }
 0x169   : > { %v1229_v45 = vmul.f32 0.125, %v1160_v20  ;;  %1445 = vadd.xlane.f32.xlu0 %v1444_v18 }
 0x16a   : > { %8803 = vst [vmem:[#allocation20_spill] sm:$0xff] %v6547_v13  ;;  %v1540_v6 = vsel %vm974_vm0, %v1356_v41, 0.0  ;;  %v1325_v54 = vmul.f32 %v6547_v13, %v6547_v13 }
 0x16b   : > { %v6556_v57 = vsub.f32 %v8804_v15, %v1229_v45  ;;  %1541 = vadd.xlane.f32.xlu1 %v1540_v6 }
 0x16c   : > { %v1447_v46 = vsel %vm974_vm0, %v1325_v54, 0.0  ;;  %v1067_v60 = vpop.xlane.xlu0 %1066 }
 0x16d   : > { %8805 = vst [vmem:[#allocation21_spill] sm:$0xff] %v6556_v57  ;;  %1448 = vadd.xlane.f32.xlu0 %v1447_v46  ;;  %v1357_v22 = vmul.f32 %v6556_v57, %v6556_v57  ;;  %v1198_v53 = vmul.f32 0.125, %v1067_v60 }
 0x16f   : > { %v1163_v42 = vpop.xlane.xlu1 %1162  ;;  %v1543_v20 = vsel %vm974_vm0, %v1357_v22, 0.0  ;;  %v6563_v18 = vsub.f32 %v6161_v10, %v1198_v53 }
 0x170   : > { %v1230_v41 = vmul.f32 0.125, %v1163_v42  ;;  %1544 = vadd.xlane.f32.xlu1 %v1543_v20 }
 0x171   : > { %8806 = vst [vmem:[#allocation22_spill] sm:$0xff] %v6563_v18  ;;  %v1326_v6 = vmul.f32 %v6563_v18, %v6563_v18 }
 0x172   : > { %v6566_v45 = vsub.f32 %v6168_v55, %v1230_v41 }
 0x173   : > { %v1070_v54 = vpop.xlane.xlu0 %1069  ;;  %v1450_v57 = vsel %vm974_vm0, %v1326_v6, 0.0 }
 0x174   : > { %8807 = vst [vmem:[#allocation23_spill] sm:$0xff] %v6566_v45  ;;  %v1199_v15 = vmul.f32 0.125, %v1070_v54  ;;  %v1166_v46 = vpop.xlane.xlu1 %1165  ;;  %v1358_v60 = vmul.f32 %v6566_v45, %v6566_v45  ;;  %1451 = vadd.xlane.f32.xlu0 %v1450_v57 }
 0x175   : > { %v1231_v22 = vmul.f32 0.125, %v1166_v46 }
 0x176   : > { %v6574_v10 = vsub.f32 %v6183_v24, %v1199_v15  ;;  %v1546_v53 = vsel %vm974_vm0, %v1358_v60, 0.0 }
 0x177   : > { %v6578_v55 = vsub.f32 %v6191_v47, %v1231_v22  ;;  %1547 = vadd.xlane.f32.xlu1 %v1546_v53  ;;  %v1362_v42 = vpop.xlane.xlu0 %1361 }
 0x178   : > { %8808 = vst [vmem:[#allocation24_spill] sm:$0xff] %v6574_v10  ;;  %v1327_v20 = vmul.f32 %v6574_v10, %v6574_v10  ;;  %v1552_v41 = vmul.f32 0.125, %v1362_v42  ;;  %v1458_v6 = vpop.xlane.xlu1 %1457 }
 0x179   : > { %8809 = vst [vmem:[#allocation25_spill] sm:$0xff] %v6578_v55  ;;  %v1359_v54 = vmul.f32 %v6578_v55, %v6578_v55  ;;  %v1584_v46 = vmul.f32 0.125, %v1458_v6 }
 0x17a   : > { %v1453_v57 = vsel %vm974_vm0, %v1327_v20, 0.0  ;;  %v1616_v24 = vadd.f32 1e-05, %v1552_v41 }
 0x17b   : > { %1454 = vadd.xlane.f32.xlu0 %v1453_v57  ;;  %v1549_v15 = vsel %vm974_vm0, %v1359_v54, 0.0  ;;  %v1648_v60 = vadd.f32 1e-05, %v1584_v46  ;;  %v1365_v47 = vpop.xlane.xlu0 %1364 }
 0x17c   : > { %1550 = vadd.xlane.f32.xlu1 %v1549_v15  ;;  %4781 = vrsqrt.f32 %v1616_v24  ;;  %v1553_v22 = vmul.f32 0.125, %v1365_v47  ;;  %v1461_v53 = vpop.xlane.xlu1 %1460  ;;  %v8810_v15 = vld [vmem:[#allocation5_spill] sm:$0xff] }
 0x17d   : > { %4783 = vrsqrt.f32 %v1648_v60  ;;  %v1585_v10 = vmul.f32 0.125, %v1461_v53  ;;  %v8686_v24 = vsub.s32 1, %v8810_v15 }
 0x17e   : > { %v1617_v42 = vadd.f32 1e-05, %v1553_v22  ;;  %v8688_v22 = vsub.s32 2, %v8810_v15 }
 0x17f   : > { %v1649_v45 = vadd.f32 1e-05, %v1585_v10  ;;  %v1368_v18 = vpop.xlane.xlu0 %1367 }
 0x180   : > { %4785 = vrsqrt.f32 %v1617_v42  ;;  %v1554_v55 = vmul.f32 0.125, %v1368_v18  ;;  %v1464_v6 = vpop.xlane.xlu1 %1463 }
 0x181   : > { %4787 = vrsqrt.f32 %v1649_v45  ;;  %v1586_v20 = vmul.f32 0.125, %v1464_v6  ;;  %v5165_v45 = vld [vmem:[%s8634_s1] sm:$0xff] }
 0x182   : > { %v1618_v41 = vadd.f32 1e-05, %v1554_v55 }
 0x183   : > { %v1650_v57 = vadd.f32 1e-05, %v1586_v20  ;;  %v1371_v13 = vpop.xlane.xlu0 %1370 }
 0x184   : > { %4789 = vrsqrt.f32 %v1618_v41  ;;  %v1555_v54 = vmul.f32 0.125, %v1371_v13  ;;  %v1467_v46 = vpop.xlane.xlu1 %1466  ;;  %v6593_v13 = vrot.slane %v5165_v45, %v8686_v24 }
 0x185   : > { %4791 = vrsqrt.f32 %v1650_v57  ;;  %v1587_v47 = vmul.f32 0.125, %v1467_v46 }
 0x186   : > { %v1619_v60 = vadd.f32 1e-05, %v1555_v54  ;;  %v6598_v54 = vrot.slane %v5165_v45, %v8688_v22 }
 0x187   : > { %v1651_v10 = vadd.f32 1e-05, %v1587_v47  ;;  %v1374_v53 = vpop.xlane.xlu0 %1373 }
 0x188   : > { %4793 = vrsqrt.f32 %v1619_v60  ;;  %v1556_v18 = vmul.f32 0.125, %v1374_v53  ;;  %v1470_v42 = vpop.xlane.xlu1 %1469 }
 0x189   : > { %v4782_v55 = vpop.eup %4781  ;;  %4795 = vrsqrt.f32 %v1651_v10  ;;  %v1588_v6 = vmul.f32 0.125, %v1470_v42 }
 0x18a   : > { %v4784_v20 = vpop.eup %4783  ;;  %v1620_v41 = vadd.f32 1e-05, %v1556_v18  ;;  %v1744_v57 = vmul.f32 %v4782_v55, %v6171_v34 }
 0x18b   : > { %v1652_v46 = vadd.f32 1e-05, %v1588_v6  ;;  %v1377_v47 = vpop.xlane.xlu0 %1376  ;;  %v1776_v60 = vmul.f32 %v4784_v20, %v6176_v4 }
 0x18c   : > { %4797 = vrsqrt.f32 %v1620_v41  ;;  %v1557_v53 = vmul.f32 0.125, %v1377_v47  ;;  %v1473_v52 = vpop.xlane.xlu1 %1472  ;;  %v1812_v24 = vmul.f32 %v6593_v13, %v1744_v57 }
 0x18d   : > { %v4786_v62 = vpop.eup %4785  ;;  %4799 = vrsqrt.f32 %v1652_v46  ;;  %v1589_v10 = vmul.f32 0.125, %v1473_v52  ;;  %v1844_v18 = vmul.f32 %v6593_v13, %v1776_v60 }
 0x18e   : > { %v4788_v42 = vpop.eup %4787  ;;  %v1621_v34 = vadd.f32 1e-05, %v1557_v53  ;;  %v1880_v55 = vadd.f32 %v6598_v54, %v1812_v24  ;;  %v1745_v45 = vmul.f32 %v4786_v62, %v6186_v59 }
 0x18f   : > { %v1653_v6 = vadd.f32 1e-05, %v1589_v10  ;;  %v1380_v22 = vpop.xlane.xlu0 %1379  ;;  %v1912_v4 = vadd.f32 %v6598_v54, %v1844_v18  ;;  %v1777_v20 = vmul.f32 %v4788_v42, %v6194_v1 }
 0x190   : > { %4801 = vrsqrt.f32 %v1621_v34  ;;  %v1558_v41 = vmul.f32 0.125, %v1380_v22  ;;  %4514 = vmatprep.mubr.msk.f32.mxu0 %vm974_vm0, %v1880_v55  ;;  %v1476_v57 = vpop.xlane.xlu1 %1475  ;;  %v1813_v52 = vmul.f32 %v6593_v13, %v1745_v45 }
 0x191   : > { %v4790_v46 = vpop.eup %4789  ;;  %4803 = vrsqrt.f32 %v1653_v6  ;;  %v1590_v47 = vmul.f32 0.125, %v1476_v57  ;;  %4562 = vmatprep.mubr.msk.f32.mxu1 %vm974_vm0, %v1912_v4  ;;  %v1845_v59 = vmul.f32 %v6593_v13, %v1777_v20 }
 0x192   : > { %v4792_v62 = vpop.eup %4791  ;;  %v1622_v24 = vadd.f32 1e-05, %v1558_v41  ;;  %v1881_v60 = vadd.f32 %v6598_v54, %v1813_v52  ;;  %v1746_v1 = vmul.f32 %v4790_v46, %v6207_v17 }
 0x193   : > { %v1654_v53 = vadd.f32 1e-05, %v1590_v47  ;;  %v1383_v22 = vpop.xlane.xlu0 %1382  ;;  %v1913_v10 = vadd.f32 %v6598_v54, %v1845_v59  ;;  %v1778_v18 = vmul.f32 %v4792_v62, %v6213_v8 }
 0x194   : > { %4805 = vrsqrt.f32 %v1622_v24  ;;  %v1559_v42 = vmul.f32 0.125, %v1383_v22  ;;  %4515 = vmatmul.mubr.msk.f32.vlgmr.msra.gmra.mxu0 %vm974_vm0, %v1881_v60  ;;  %v1479_v34 = vpop.xlane.xlu1 %1478  ;;  %v1814_v55 = vmul.f32 %v6593_v13, %v1746_v1 }
 0x195   : > { %v4794_v45 = vpop.eup %4793  ;;  %4807 = vrsqrt.f32 %v1654_v53  ;;  %v1591_v6 = vmul.f32 0.125, %v1479_v34  ;;  %4563 = vmatmul.mubr.msk.f32.vlgmr.msra.gmra.mxu1 %vm974_vm0, %v1913_v10  ;;  %v1846_v17 = vmul.f32 %v6593_v13, %v1778_v18 }
 0x196   : > { %v4796_v4 = vpop.eup %4795  ;;  %v1623_v20 = vadd.f32 1e-05, %v1559_v42  ;;  %v1882_v41 = vadd.f32 %v6598_v54, %v1814_v55  ;;  %v1747_v8 = vmul.f32 %v4794_v45, %v6221_v14 }
 0x197   : > { %v1655_v57 = vadd.f32 1e-05, %v1591_v6  ;;  %v1386_v52 = vpop.xlane.xlu0 %1385  ;;  %v1914_v46 = vadd.f32 %v6598_v54, %v1846_v17  ;;  %v1779_v47 = vmul.f32 %v4796_v4, %v6227_v27 }
 0x198   : > { %4809 = vrsqrt.f32 %v1623_v20  ;;  %v1560_v59 = vmul.f32 0.125, %v1386_v52  ;;  %4517 = vmatprep.mubr.msk.f32.mxu0 %vm974_vm0, %v1882_v41  ;;  %v1482_v62 = vpop.xlane.xlu1 %1481  ;;  %v1815_v24 = vmul.f32 %v6593_v13, %v1747_v8 }
 0x199   : > { %v4798_v60 = vpop.eup %4797  ;;  %4811 = vrsqrt.f32 %v1655_v57  ;;  %v1592_v1 = vmul.f32 0.125, %v1482_v62  ;;  %4565 = vmatprep.mubr.msk.f32.mxu1 %vm974_vm0, %v1914_v46  ;;  %v1847_v14 = vmul.f32 %v6593_v13, %v1779_v47 }
 0x19a   : > { %v4800_v53 = vpop.eup %4799  ;;  %v1624_v22 = vadd.f32 1e-05, %v1560_v59  ;;  %v1883_v10 = vadd.f32 %v6598_v54, %v1815_v24  ;;  %v1748_v27 = vmul.f32 %v4798_v60, %v6235_v61 }
 0x19b   : > { %v1656_v18 = vadd.f32 1e-05, %v1592_v1  ;;  %v1389_v42 = vpop.xlane.xlu0 %1388  ;;  %v1915_v34 = vadd.f32 %v6598_v54, %v1847_v14  ;;  %v1780_v55 = vmul.f32 %v4800_v53, %v6241_v51 }
 0x19c   : > { %4813 = vrsqrt.f32 %v1624_v22  ;;  %v1561_v45 = vmul.f32 0.125, %v1389_v42  ;;  %4518 = vmatmul.mubr.msk.f32.gmra.mxu0 %vm974_vm0, %v1883_v10  ;;  %v1485_v6 = vpop.xlane.xlu1 %1484  ;;  %v1816_v17 = vmul.f32 %v6593_v13, %v1748_v27 }
 0x19d   : > { %v4802_v4 = vpop.eup %4801  ;;  %4815 = vrsqrt.f32 %v1656_v18  ;;  %v1593_v20 = vmul.f32 0.125, %v1485_v6  ;;  %4566 = vmatmul.mubr.msk.f32.gmra.mxu1 %vm974_vm0, %v1915_v34  ;;  %v1848_v61 = vmul.f32 %v6593_v13, %v1780_v55 }
 0x19e   : > { %v4804_v41 = vpop.eup %4803  ;;  %v1625_v8 = vadd.f32 1e-05, %v1561_v45  ;;  %v1884_v57 = vadd.f32 %v6598_v54, %v1816_v17  ;;  %v1749_v51 = vmul.f32 %v4802_v4, %v6249_v23 }
 0x19f   : > { %v1657_v52 = vadd.f32 1e-05, %v1593_v20  ;;  %v1392_v46 = vpop.xlane.xlu0 %1391  ;;  %v1916_v47 = vadd.f32 %v6598_v54, %v1848_v61  ;;  %v1781_v59 = vmul.f32 %v4804_v41, %v6255_v12 }
 0x1a0   : > { %4817 = vrsqrt.f32 %v1625_v8  ;;  %v1562_v62 = vmul.f32 0.125, %v1392_v46  ;;  %4520 = vmatprep.mubr.msk.f32.mxu0 %vm974_vm0, %v1884_v57  ;;  %v1488_v24 = vpop.xlane.xlu1 %1487  ;;  %v1817_v60 = vmul.f32 %v6593_v13, %v1749_v51 }
 0x1a1   : > { %v4806_v1 = vpop.eup %4805  ;;  %4819 = vrsqrt.f32 %v1657_v52  ;;  %v1594_v14 = vmul.f32 0.125, %v1488_v24  ;;  %4568 = vmatprep.mubr.msk.f32.mxu1 %vm974_vm0, %v1916_v47  ;;  %v1849_v23 = vmul.f32 %v6593_v13, %v1781_v59 }
 0x1a2   : > { %v4808_v53 = vpop.eup %4807  ;;  %v1626_v22 = vadd.f32 1e-05, %v1562_v62  ;;  %v1885_v10 = vadd.f32 %v6598_v54, %v1817_v60  ;;  %v1750_v12 = vmul.f32 %v4806_v1, %v6263_v16 }
 0x1a3   : > { %v1658_v27 = vadd.f32 1e-05, %v1594_v14  ;;  %v1395_v18 = vpop.xlane.xlu0 %1394  ;;  %v1917_v42 = vadd.f32 %v6598_v54, %v1849_v23  ;;  %v1782_v34 = vmul.f32 %v4808_v53, %v6269_v21 }
 0x1a4   : > { %4821 = vrsqrt.f32 %v1626_v22  ;;  %v1563_v55 = vmul.f32 0.125, %v1395_v18  ;;  %4521 = vmatmul.mubr.msk.f32.gmra.mxu0 %vm974_vm0, %v1885_v10  ;;  %v1491_v45 = vpop.xlane.xlu1 %1490  ;;  %v1818_v6 = vmul.f32 %v6593_v13, %v1750_v12 }
 0x1a5   : > { %v4810_v17 = vpop.eup %4809  ;;  %4823 = vrsqrt.f32 %v1658_v27  ;;  %v1595_v4 = vmul.f32 0.125, %v1491_v45  ;;  %4569 = vmatmul.mubr.msk.f32.gmra.mxu1 %vm974_vm0, %v1917_v42  ;;  %v1850_v16 = vmul.f32 %v6593_v13, %v1782_v34 }
 0x1a6   : > { %v4812_v20 = vpop.eup %4811  ;;  %v1627_v61 = vadd.f32 1e-05, %v1563_v55  ;;  %v1886_v41 = vadd.f32 %v6598_v54, %v1818_v6  ;;  %v1751_v21 = vmul.f32 %v4810_v17, %v6276_v63 }
 0x1a7   : > { %v1659_v8 = vadd.f32 1e-05, %v1595_v4  ;;  %v1398_v57 = vpop.xlane.xlu0 %1397  ;;  %v1918_v51 = vadd.f32 %v6598_v54, %v1850_v16  ;;  %v1783_v52 = vmul.f32 %v4812_v20, %v6282_v2 }
 0x1a8   : > { %4825 = vrsqrt.f32 %v1627_v61  ;;  %v1564_v46 = vmul.f32 0.125, %v1398_v57  ;;  %4523 = vmatprep.mubr.msk.f32.mxu0 %vm974_vm0, %v1886_v41  ;;  %v1494_v47 = vpop.xlane.xlu1 %1493  ;;  %v1819_v59 = vmul.f32 %v6593_v13, %v1751_v21 }
 0x1a9   : > { %v4814_v62 = vpop.eup %4813  ;;  %4827 = vrsqrt.f32 %v1659_v8  ;;  %v1596_v24 = vmul.f32 0.125, %v1494_v47  ;;  %4571 = vmatprep.mubr.msk.f32.mxu1 %vm974_vm0, %v1918_v51  ;;  %v1851_v63 = vmul.f32 %v6593_v13, %v1783_v52 }
 0x1aa   : > { %v4816_v60 = vpop.eup %4815  ;;  %v1628_v1 = vadd.f32 1e-05, %v1564_v46  ;;  %v1887_v14 = vadd.f32 %v6598_v54, %v1819_v59  ;;  %v1752_v2 = vmul.f32 %v4814_v62, %v6289_v26 }
 0x1ab   : > { %v1660_v23 = vadd.f32 1e-05, %v1596_v24  ;;  %v1401_v53 = vpop.xlane.xlu0 %1400  ;;  %v1919_v22 = vadd.f32 %v6598_v54, %v1851_v63  ;;  %v1784_v10 = vmul.f32 %v4816_v60, %v6294_v58 }
 0x1ac   : > { %4829 = vrsqrt.f32 %v1628_v1  ;;  %v1565_v12 = vmul.f32 0.125, %v1401_v53  ;;  %4524 = vmatmul.mubr.msk.f32.gmra.mxu0 %vm974_vm0, %v1887_v14  ;;  %v1497_v27 = vpop.xlane.xlu1 %1496  ;;  %v1820_v18 = vmul.f32 %v6593_v13, %v1752_v2 }
 0x1ad   : > { %v4818_v42 = vpop.eup %4817  ;;  %4831 = vrsqrt.f32 %v1660_v23  ;;  %v1597_v34 = vmul.f32 0.125, %v1497_v27  ;;  %4572 = vmatmul.mubr.msk.f32.gmra.mxu1 %vm974_vm0, %v1919_v22  ;;  %v1852_v26 = vmul.f32 %v6593_v13, %v1784_v10 }
 0x1ae   : > { %v4820_v55 = vpop.eup %4819  ;;  %v1629_v45 = vadd.f32 1e-05, %v1565_v12  ;;  %v1888_v6 = vadd.f32 %v6598_v54, %v1820_v18  ;;  %v1753_v58 = vmul.f32 %v4818_v42, %v6301_v56 }
 0x1af   : > { %v1661_v17 = vadd.f32 1e-05, %v1597_v34  ;;  %v1404_v4 = vpop.xlane.xlu0 %1403  ;;  %v1920_v16 = vadd.f32 %v6598_v54, %v1852_v26  ;;  %v1785_v20 = vmul.f32 %v4820_v55, %v6306_v39 }
 0x1b0   : > { %4833 = vrsqrt.f32 %v1629_v45  ;;  %v1566_v61 = vmul.f32 0.125, %v1404_v4  ;;  %4526 = vmatprep.mubr.msk.f32.mxu0 %vm974_vm0, %v1888_v6  ;;  %v1500_v41 = vpop.xlane.xlu1 %1499  ;;  %v1821_v21 = vmul.f32 %v6593_v13, %v1753_v58 }
 0x1b1   : > { %v4822_v8 = vpop.eup %4821  ;;  %4835 = vrsqrt.f32 %v1661_v17  ;;  %v1598_v57 = vmul.f32 0.125, %v1500_v41  ;;  %4574 = vmatprep.mubr.msk.f32.mxu1 %vm974_vm0, %v1920_v16  ;;  %v1853_v56 = vmul.f32 %v6593_v13, %v1785_v20 }
 0x1b2   : > { %v4824_v51 = vpop.eup %4823  ;;  %v1630_v52 = vadd.f32 1e-05, %v1566_v61  ;;  %v1889_v46 = vadd.f32 %v6598_v54, %v1821_v21  ;;  %v1754_v39 = vmul.f32 %v4822_v8, %v6313_v49 }
 0x1b3   : > { %v1662_v47 = vadd.f32 1e-05, %v1598_v57  ;;  %v1407_v59 = vpop.xlane.xlu0 %1406  ;;  %v1921_v62 = vadd.f32 %v6598_v54, %v1853_v56  ;;  %v1786_v24 = vmul.f32 %v4824_v51, %v6318_v25 }
 0x1b4   : > { %4837 = vrsqrt.f32 %v1630_v52  ;;  %v1567_v63 = vmul.f32 0.125, %v1407_v59  ;;  %4527 = vmatmul.mubr.msk.f32.gmra.mxu0 %vm974_vm0, %v1889_v46  ;;  %v1503_v60 = vpop.xlane.xlu1 %1502  ;;  %v1822_v1 = vmul.f32 %v6593_v13, %v1754_v39 }
 0x1b5   : > { %v4826_v14 = vpop.eup %4825  ;;  %4839 = vrsqrt.f32 %v1662_v47  ;;  %v1599_v2 = vmul.f32 0.125, %v1503_v60  ;;  %4575 = vmatmul.mubr.msk.f32.gmra.mxu1 %vm974_vm0, %v1921_v62  ;;  %v1854_v49 = vmul.f32 %v6593_v13, %v1786_v24 }
 0x1b6   : > { %v4828_v23 = vpop.eup %4827  ;;  %v1631_v53 = vadd.f32 1e-05, %v1567_v63  ;;  %v1890_v22 = vadd.f32 %v6598_v54, %v1822_v1  ;;  %v1755_v25 = vmul.f32 %v4826_v14, %v6325_v50 }
 0x1b7   : > { %v1663_v10 = vadd.f32 1e-05, %v1599_v2  ;;  %v1410_v12 = vpop.xlane.xlu0 %1409  ;;  %v1922_v27 = vadd.f32 %v6598_v54, %v1854_v49  ;;  %v1787_v18 = vmul.f32 %v4828_v23, %v6330_v37 }
 0x1b8   : > { %4841 = vrsqrt.f32 %v1631_v53  ;;  %v1568_v42 = vmul.f32 0.125, %v1410_v12  ;;  %4529 = vmatprep.mubr.msk.f32.mxu0 %vm974_vm0, %v1890_v22  ;;  %v1506_v34 = vpop.xlane.xlu1 %1505  ;;  %v1823_v26 = vmul.f32 %v6593_v13, %v1755_v25 }
 0x1b9   : > { %v4830_v55 = vpop.eup %4829  ;;  %4843 = vrsqrt.f32 %v1663_v10  ;;  %v1600_v45 = vmul.f32 0.125, %v1506_v34  ;;  %4577 = vmatprep.mubr.msk.f32.mxu1 %vm974_vm0, %v1922_v27  ;;  %v1855_v50 = vmul.f32 %v6593_v13, %v1787_v18 }
 0x1ba   : > { %v4832_v6 = vpop.eup %4831  ;;  %v1632_v58 = vadd.f32 1e-05, %v1568_v42  ;;  %v1891_v17 = vadd.f32 %v6598_v54, %v1823_v26  ;;  %v1756_v37 = vmul.f32 %v4830_v55, %v6337_v30 }
 0x1bb   : > { %v1664_v4 = vadd.f32 1e-05, %v1600_v45  ;;  %v1413_v16 = vpop.xlane.xlu0 %1412  ;;  %v1923_v20 = vadd.f32 %v6598_v54, %v1855_v50  ;;  %v1788_v61 = vmul.f32 %v4832_v6, %v6342_v11 }
 0x1bc   : > { %4845 = vrsqrt.f32 %v1632_v58  ;;  %v1569_v41 = vmul.f32 0.125, %v1413_v16  ;;  %4530 = vmatmul.mubr.msk.f32.gmra.mxu0 %vm974_vm0, %v1891_v17  ;;  %v1509_v21 = vpop.xlane.xlu1 %1508  ;;  %v1824_v8 = vmul.f32 %v6593_v13, %v1756_v37 }
 0x1bd   : > { %v4834_v57 = vpop.eup %4833  ;;  %4847 = vrsqrt.f32 %v1664_v4  ;;  %v1601_v56 = vmul.f32 0.125, %v1509_v21  ;;  %4578 = vmatmul.mubr.msk.f32.gmra.mxu1 %vm974_vm0, %v1923_v20  ;;  %v1856_v30 = vmul.f32 %v6593_v13, %v1788_v61 }
 0x1be   : > { %v4836_v51 = vpop.eup %4835  ;;  %v1633_v52 = vadd.f32 1e-05, %v1569_v41  ;;  %v1892_v46 = vadd.f32 %v6598_v54, %v1824_v8  ;;  %v1757_v11 = vmul.f32 %v4834_v57, %v6352_v7 }
 0x1bf   : > { %v1665_v39 = vadd.f32 1e-05, %v1601_v56  ;;  %v1416_v47 = vpop.xlane.xlu0 %1415  ;;  %v1924_v59 = vadd.f32 %v6598_v54, %v1856_v30  ;;  %v1789_v62 = vmul.f32 %v4836_v51, %v6357_v3 }
 0x1c0   : > { %4849 = vrsqrt.f32 %v1633_v52  ;;  %v1570_v24 = vmul.f32 0.125, %v1416_v47  ;;  %4532 = vmatprep.mubr.msk.f32.mxu0 %vm974_vm0, %v1892_v46  ;;  %v1512_v63 = vpop.xlane.xlu1 %1511  ;;  %v1825_v60 = vmul.f32 %v6593_v13, %v1757_v11 }
 0x1c1   : > { %v4838_v1 = vpop.eup %4837  ;;  %4851 = vrsqrt.f32 %v1665_v39  ;;  %v1602_v14 = vmul.f32 0.125, %v1512_v63  ;;  %4580 = vmatprep.mubr.msk.f32.mxu1 %vm974_vm0, %v1924_v59  ;;  %v1857_v7 = vmul.f32 %v6593_v13, %v1789_v62 }
 0x1c2   : > { %v4840_v2 = vpop.eup %4839  ;;  %v1634_v49 = vadd.f32 1e-05, %v1570_v24  ;;  %v1893_v23 = vadd.f32 %v6598_v54, %v1825_v60  ;;  %v1758_v3 = vmul.f32 %v4838_v1, %v6364_v44 }
 0x1c3   : > { %v1666_v53 = vadd.f32 1e-05, %v1602_v14  ;;  %v1419_v22 = vpop.xlane.xlu0 %1418  ;;  %v1925_v25 = vadd.f32 %v6598_v54, %v1857_v7  ;;  %v1790_v10 = vmul.f32 %v4840_v2, %v6369_v36 }
 0x1c4   : > { %4853 = vrsqrt.f32 %v1634_v49  ;;  %v1571_v12 = vmul.f32 0.125, %v1419_v22  ;;  %4533 = vmatmul.mubr.msk.f32.gmra.mxu0 %vm974_vm0, %v1893_v23  ;;  %v1515_v27 = vpop.xlane.xlu1 %1514  ;;  %v1826_v18 = vmul.f32 %v6593_v13, %v1758_v3 }
 0x1c5   : > { %v4842_v42 = vpop.eup %4841  ;;  %4855 = vrsqrt.f32 %v1666_v53  ;;  %v1603_v34 = vmul.f32 0.125, %v1515_v27  ;;  %4581 = vmatmul.mubr.msk.f32.gmra.mxu1 %vm974_vm0, %v1925_v25  ;;  %v1858_v44 = vmul.f32 %v6593_v13, %v1790_v10 }
 0x1c6   : > { %v4844_v26 = vpop.eup %4843  ;;  %v1635_v55 = vadd.f32 1e-05, %v1571_v12  ;;  %v1894_v45 = vadd.f32 %v6598_v54, %v1826_v18  ;;  %v1759_v36 = vmul.f32 %v4842_v42, %v6376_v35 }
 0x1c7   : > { %v1667_v50 = vadd.f32 1e-05, %v1603_v34  ;;  %v1422_v6 = vpop.xlane.xlu0 %1421  ;;  %v1926_v58 = vadd.f32 %v6598_v54, %v1858_v44  ;;  %v1791_v17 = vmul.f32 %v4844_v26, %v6381_v28 }
 0x1c8   : > { %4857 = vrsqrt.f32 %v1635_v55  ;;  %v1572_v37 = vmul.f32 0.125, %v1422_v6  ;;  %4535 = vmatprep.mubr.msk.f32.mxu0 %vm974_vm0, %v1894_v45  ;;  %v1518_v4 = vpop.xlane.xlu1 %1517  ;;  %v1827_v16 = vmul.f32 %v6593_v13, %v1759_v36 }
 0x1c9   : > { %v4846_v20 = vpop.eup %4845  ;;  %4859 = vrsqrt.f32 %v1667_v50  ;;  %v1604_v61 = vmul.f32 0.125, %v1518_v4  ;;  %4583 = vmatprep.mubr.msk.f32.mxu1 %vm974_vm0, %v1926_v58  ;;  %v1859_v35 = vmul.f32 %v6593_v13, %v1791_v17  ;;  %v8811_v58 = vld [vmem:[#allocation6_spill] sm:$0xff] }
 0x1ca   : > { %v4848_v41 = vpop.eup %4847  ;;  %v1636_v21 = vadd.f32 1e-05, %v1572_v37  ;;  %v1895_v8 = vadd.f32 %v6598_v54, %v1827_v16  ;;  %v1760_v28 = vmul.f32 %v4846_v20, %v6388_v9 }
 0x1cb   : > { %v1668_v57 = vadd.f32 1e-05, %v1604_v61  ;;  %v1425_v56 = vpop.xlane.xlu0 %1424  ;;  %v1927_v30 = vadd.f32 %v6598_v54, %v1859_v35  ;;  %v1792_v51 = vmul.f32 %v4848_v41, %v6393_v29 }
 0x1cc   : > { %4861 = vrsqrt.f32 %v1636_v21  ;;  %v1573_v52 = vmul.f32 0.125, %v1425_v56  ;;  %4536 = vmatmul.mubr.msk.f32.gmra.mxu0 %vm974_vm0, %v1895_v8  ;;  %v1521_v46 = vpop.xlane.xlu1 %1520  ;;  %v1828_v11 = vmul.f32 %v6593_v13, %v1760_v28 }
 0x1cd   : > { %v4850_v39 = vpop.eup %4849  ;;  %4863 = vrsqrt.f32 %v1668_v57  ;;  %v1605_v47 = vmul.f32 0.125, %v1521_v46  ;;  %4584 = vmatmul.mubr.msk.f32.gmra.mxu1 %vm974_vm0, %v1927_v30  ;;  %v1860_v9 = vmul.f32 %v6593_v13, %v1792_v51  ;;  %v8813_v57 = vld [vmem:[#allocation8_spill] sm:$0xff] }
 0x1ce   : > { %v4852_v59 = vpop.eup %4851  ;;  %v1637_v62 = vadd.f32 1e-05, %v1573_v52  ;;  %v1896_v24 = vadd.f32 %v6598_v54, %v1828_v11  ;;  %v1761_v29 = vmul.f32 %v4850_v39, %v6400_v32 }
 0x1cf   : > { %v1669_v63 = vadd.f32 1e-05, %v1605_v47  ;;  %v1428_v60 = vpop.xlane.xlu0 %1427  ;;  %v1928_v1 = vadd.f32 %v6598_v54, %v1860_v9  ;;  %v1793_v14 = vmul.f32 %v4852_v59, %v6405_v43  ;;  %v8814_v59 = vld [vmem:[#allocation9_spill] sm:$0xff] }
 0x1d0   : > { %4865 = vrsqrt.f32 %v1637_v62  ;;  %v1574_v7 = vmul.f32 0.125, %v1428_v60  ;;  %4538 = vmatprep.mubr.msk.f32.mxu0 %vm974_vm0, %v1896_v24  ;;  %v1829_v2 = vmul.f32 %v6593_v13, %v1761_v29 }
 0x1d1   : > { %v4854_v49 = vpop.eup %4853  ;;  %4867 = vrsqrt.f32 %v1669_v63  ;;  %v1524_v23 = vpop.xlane.xlu1 %1523  ;;  %4586 = vmatprep.mubr.msk.f32.mxu1 %vm974_vm0, %v1928_v1  ;;  %v1861_v3 = vmul.f32 %v6593_v13, %v1793_v14 }
 0x1d2   : > { %v4856_v32 = vpop.eup %4855  ;;  %v1638_v53 = vadd.f32 1e-05, %v1574_v7  ;;  %v1606_v22 = vmul.f32 0.125, %v1524_v23  ;;  %v1897_v25 = vadd.f32 %v6598_v54, %v1829_v2  ;;  %v1762_v43 = vmul.f32 %v4854_v49, %v6412_v33 }
 0x1d3   : > { %v1431_v10 = vpop.xlane.xlu0 %1430  ;;  %v1929_v12 = vadd.f32 %v6598_v54, %v1861_v3  ;;  %v1794_v27 = vmul.f32 %v4856_v32, %v6417_v0  ;;  %v8815_v3 = vld [vmem:[#allocation10_spill] sm:$0xff] }
 0x1d4   : > { %4869 = vrsqrt.f32 %v1638_v53  ;;  %v1670_v18 = vadd.f32 1e-05, %v1606_v22  ;;  %v1575_v42 = vmul.f32 0.125, %v1431_v10  ;;  %4539 = vmatmul.mubr.msk.f32.gmra.mxu0 %vm974_vm0, %v1897_v25  ;;  %v1830_v34 = vmul.f32 %v6593_v13, %v1762_v43  ;;  %v8816_v10 = vld [vmem:[#allocation11_spill] sm:$0xff] }
 0x1d5   : > { %v4858_v44 = vpop.eup %4857  ;;  %v1527_v26 = vpop.xlane.xlu1 %1526  ;;  %4587 = vmatmul.mubr.msk.f32.gmra.mxu1 %vm974_vm0, %v1929_v12  ;;  %v1862_v55 = vmul.f32 %v6593_v13, %v1794_v27 }
 0x1d6   : > { %v4860_v45 = vpop.eup %4859  ;;  %4871 = vrsqrt.f32 %v1670_v18  ;;  %v1639_v33 = vadd.f32 1e-05, %v1575_v42  ;;  %v1607_v36 = vmul.f32 0.125, %v1527_v26  ;;  %v1898_v50 = vadd.f32 %v6598_v54, %v1830_v34  ;;  %v8817_v26 = vld [vmem:[#allocation12_spill] sm:$0xff] }
 0x1d7   : > { %v1763_v0 = vmul.f32 %v4858_v44, %v6424_v31  ;;  %v1930_v6 = vadd.f32 %v6598_v54, %v1862_v55  ;;  %v1795_v17 = vmul.f32 %v4860_v45, %v8811_v58  ;;  %v8812_v31 = vld [vmem:[#allocation7_spill] sm:$0xff]  ;;  %v8818_v58 = vld [vmem:[#allocation13_spill] sm:$0xff] }
 0x1d8   : > { %4873 = vrsqrt.f32 %v1639_v33  ;;  %v1671_v37 = vadd.f32 1e-05, %v1607_v36  ;;  %4541 = vmatprep.mubr.msk.f32.mxu0 %vm974_vm0, %v1898_v50  ;;  %v1434_v16 = vpop.xlane.xlu0 %1433 }
 0x1d9   : > { %v4862_v4 = vpop.eup %4861  ;;  %v1831_v20 = vmul.f32 %v6593_v13, %v1763_v0  ;;  %4589 = vmatprep.mubr.msk.f32.mxu1 %vm974_vm0, %v1930_v6  ;;  %v1863_v61 = vmul.f32 %v6593_v13, %v1795_v17  ;;  %v1576_v41 = vmul.f32 0.125, %v1434_v16 }
 0x1da   : > { %v4864_v35 = vpop.eup %4863  ;;  %4875 = vrsqrt.f32 %v1671_v37  ;;  %v1764_v21 = vmul.f32 %v4862_v4, %v8812_v31 }
 0x1db   : > { %v1899_v8 = vadd.f32 %v6598_v54, %v1831_v20  ;;  %v1931_v28 = vadd.f32 %v6598_v54, %v1863_v61  ;;  %v1796_v56 = vmul.f32 %v4864_v35, %v8813_v57  ;;  %v1640_v30 = vadd.f32 1e-05, %v1576_v41 }
 0x1dc   : > { %v1832_v51 = vmul.f32 %v6593_v13, %v1764_v21  ;;  %v1530_v46 = vpop.xlane.xlu1 %1529  ;;  %v8819_v21 = vld [vmem:[#allocation14_spill] sm:$0xff] }
 0x1dd   : > { %v4866_v52 = vpop.eup %4865  ;;  %4542 = vmatmul.mubr.msk.f32.gmra.mxu0 %vm974_vm0, %v1899_v8  ;;  %4590 = vmatmul.mubr.msk.f32.gmra.mxu1 %vm974_vm0, %v1931_v28  ;;  %v1864_v11 = vmul.f32 %v6593_v13, %v1796_v56  ;;  %4877 = vrsqrt.f32 %v1640_v30  ;;  %v1608_v47 = vmul.f32 0.125, %v1530_v46  ;;  %v8820_v46 = vld [vmem:[#allocation15_spill] sm:$0xff] }
 0x1de   : > { %v4868_v39 = vpop.eup %4867  ;;  %v1900_v9 = vadd.f32 %v6598_v54, %v1832_v51  ;;  %v1765_v62 = vmul.f32 %v4866_v52, %v8814_v59 }
 0x1df   : > { %v1932_v24 = vadd.f32 %v6598_v54, %v1864_v11  ;;  %v1797_v29 = vmul.f32 %v4868_v39, %v6460_v38  ;;  %v1672_v63 = vadd.f32 1e-05, %v1608_v47 }
 0x1e0   : > { %4544 = vmatprep.mubr.msk.f32.mxu0 %vm974_vm0, %v1900_v9  ;;  %v1833_v60 = vmul.f32 %v6593_v13, %v1765_v62 }
 0x1e1   : > { %v4870_v1 = vpop.eup %4869  ;;  %v1437_v14 = vpop.xlane.xlu0 %1436  ;;  %4592 = vmatprep.mubr.msk.f32.mxu1 %vm974_vm0, %v1932_v24  ;;  %v1865_v7 = vmul.f32 %v6593_v13, %v1797_v29  ;;  %4879 = vrsqrt.f32 %v1672_v63  ;;  %v8821_v63 = vld [vmem:[#allocation16_spill] sm:$0xff] }
 0x1e2   : > { %v1577_v2 = vmul.f32 0.125, %v1437_v14  ;;  %v1533_v49 = vpop.xlane.xlu1 %1532  ;;  %v1901_v23 = vadd.f32 %v6598_v54, %v1833_v60  ;;  %v1766_v32 = vmul.f32 %v4870_v1, %v8815_v3 }
 0x1e3   : > { %v4872_v53 = vpop.eup %4871  ;;  %v1609_v38 = vmul.f32 0.125, %v1533_v49  ;;  %v1933_v22 = vadd.f32 %v6598_v54, %v1865_v7 }
 0x1e4   : > { %v1641_v25 = vadd.f32 1e-05, %v1577_v2  ;;  %4545 = vmatmul.mubr.msk.f32.gmra.mxu0 %vm974_vm0, %v1901_v23  ;;  %v1834_v43 = vmul.f32 %v6593_v13, %v1766_v32  ;;  %v1798_v12 = vmul.f32 %v4872_v53, %v8816_v10  ;;  %v8822_v2 = vld [vmem:[#allocation17_spill] sm:$0xff] }
 0x1e5   : > { %v4874_v27 = vpop.eup %4873  ;;  %v1673_v18 = vadd.f32 1e-05, %v1609_v38  ;;  %v1440_v42 = vpop.xlane.xlu0 %1439  ;;  %4593 = vmatmul.mubr.msk.f32.gmra.mxu1 %vm974_vm0, %v1933_v22 }
 0x1e6   : > { %4881 = vrsqrt.f32 %v1641_v25  ;;  %v1578_v34 = vmul.f32 0.125, %v1440_v42  ;;  %v1902_v44 = vadd.f32 %v6598_v54, %v1834_v43  ;;  %v1767_v55 = vmul.f32 %v4874_v27, %v8817_v26  ;;  %v1536_v33 = vpop.xlane.xlu1 %1535 }
 0x1e7   : > { %v4876_v45 = vpop.eup %4875  ;;  %4883 = vrsqrt.f32 %v1673_v18  ;;  %v1866_v36 = vmul.f32 %v6593_v13, %v1798_v12  ;;  %v1610_v0 = vmul.f32 0.125, %v1536_v33 }
 0x1e8   : > { %v1642_v50 = vadd.f32 1e-05, %v1578_v34  ;;  %4547 = vmatprep.mubr.msk.f32.mxu0 %vm974_vm0, %v1902_v44  ;;  %v1835_v6 = vmul.f32 %v6593_v13, %v1767_v55  ;;  %v1799_v17 = vmul.f32 %v4876_v45, %v8818_v58 }
 0x1e9   : > { %v1443_v37 = vpop.xlane.xlu0 %1442  ;;  %v1934_v4 = vadd.f32 %v6598_v54, %v1866_v36  ;;  %v1674_v16 = vadd.f32 1e-05, %v1610_v0 }
 0x1ea   : > { %4885 = vrsqrt.f32 %v1642_v50  ;;  %v1579_v20 = vmul.f32 0.125, %v1443_v37  ;;  %v1903_v61 = vadd.f32 %v6598_v54, %v1835_v6  ;;  %v4878_v35 = vpop.eup %4877  ;;  %v1867_v41 = vmul.f32 %v6593_v13, %v1799_v17 }
 0x1eb   : > { %4595 = vmatprep.mubr.msk.f32.mxu1 %vm974_vm0, %v1934_v4  ;;  %4887 = vrsqrt.f32 %v1674_v16  ;;  %v1768_v8 = vmul.f32 %v4878_v35, %v8819_v21  ;;  %v8823_v21 = vld [vmem:[#allocation18_spill] sm:$0xff] }
 0x1ec   : > { %v1643_v31 = vadd.f32 1e-05, %v1579_v20  ;;  %4548 = vmatmul.mubr.msk.f32.gmra.mxu0 %vm974_vm0, %v1903_v61  ;;  %v1935_v28 = vadd.f32 %v6598_v54, %v1867_v41 }
 0x1ed   : > { %v1836_v57 = vmul.f32 %v6593_v13, %v1768_v8 }
 0x1ee   : > { %4889 = vrsqrt.f32 %v1643_v31  ;;  %v4880_v56 = vpop.eup %4879  ;;  %4596 = vmatmul.mubr.msk.f32.gmra.mxu1 %vm974_vm0, %v1935_v28 }
 0x1ef   : > { %v1539_v30 = vpop.xlane.xlu1 %1538  ;;  %v1904_v52 = vadd.f32 %v6598_v54, %v1836_v57  ;;  %v1800_v11 = vmul.f32 %v4880_v56, %v8820_v46 }
 0x1f0   : > { %v1611_v51 = vmul.f32 0.125, %v1539_v30 }
 0x1f1   : > { %4550 = vmatprep.mubr.msk.f32.mxu0 %vm974_vm0, %v1904_v52  ;;  %v1868_v9 = vmul.f32 %v6593_v13, %v1800_v11  ;;  %v8824_v52 = vld [vmem:[#allocation19_spill] sm:$0xff] }
 0x1f2   : > { %v1675_v39 = vadd.f32 1e-05, %v1611_v51  ;;  %v1446_v47 = vpop.xlane.xlu0 %1445 }
 0x1f3   : > { %v4882_v59 = vpop.eup %4881  ;;  %v1580_v62 = vmul.f32 0.125, %v1446_v47  ;;  %v1936_v1 = vadd.f32 %v6598_v54, %v1868_v9  ;;  %v8825_v47 = vld [vmem:[#allocation20_spill] sm:$0xff] }
 0x1f4   : > { %v4884_v24 = vpop.eup %4883  ;;  %4891 = vrsqrt.f32 %v1675_v39  ;;  %v1542_v29 = vpop.xlane.xlu1 %1541  ;;  %v1769_v60 = vmul.f32 %v4882_v59, %v8821_v63  ;;  %v8826_v63 = vld [vmem:[#allocation21_spill] sm:$0xff] }
 0x1f5   : > { %v1644_v14 = vadd.f32 1e-05, %v1580_v62  ;;  %v1612_v7 = vmul.f32 0.125, %v1542_v29  ;;  %v1801_v49 = vmul.f32 %v4884_v24, %v8822_v2  ;;  %4598 = vmatprep.mubr.msk.f32.mxu1 %vm974_vm0, %v1936_v1 }
 0x1f6   : > { %v1449_v23 = vpop.xlane.xlu0 %1448  ;;  %v1837_v3 = vmul.f32 %v6593_v13, %v1769_v60 }
 0x1f7   : > { %v4886_v32 = vpop.eup %4885  ;;  %4893 = vrsqrt.f32 %v1644_v14  ;;  %v1676_v53 = vadd.f32 1e-05, %v1612_v7  ;;  %v1581_v38 = vmul.f32 0.125, %v1449_v23  ;;  %v1869_v22 = vmul.f32 %v6593_v13, %v1801_v49  ;;  %v8827_v49 = vld [vmem:[#allocation22_spill] sm:$0xff] }
 0x1f8   : > { %v1905_v25 = vadd.f32 %v6598_v54, %v1837_v3  ;;  %v1770_v43 = vmul.f32 %v4886_v32, %v6513_v5  ;;  %v4888_v10 = vpop.eup %4887 }
 0x1f9   : > { %4895 = vrsqrt.f32 %v1676_v53  ;;  %v1645_v12 = vadd.f32 1e-05, %v1581_v38  ;;  %v1545_v27 = vpop.xlane.xlu1 %1544  ;;  %v1937_v18 = vadd.f32 %v6598_v54, %v1869_v22  ;;  %v1802_v44 = vmul.f32 %v4888_v10, %v6518_v19  ;;  %v8828_v53 = vld [vmem:[#allocation23_spill] sm:$0xff] }
 0x1fa   : > { %v1613_v42 = vmul.f32 0.125, %v1545_v27  ;;  %4551 = vmatmul.mubr.msk.f32.gmra.mxu0 %vm974_vm0, %v1905_v25  ;;  %v1838_v34 = vmul.f32 %v6593_v13, %v1770_v43 }
 0x1fb   : > { %v4890_v26 = vpop.eup %4889  ;;  %4897 = vrsqrt.f32 %v1645_v12  ;;  %4599 = vmatmul.mubr.msk.f32.gmra.mxu1 %vm974_vm0, %v1937_v18  ;;  %v1870_v33 = vmul.f32 %v6593_v13, %v1802_v44  ;;  %v8829_v12 = vld [vmem:[#allocation24_spill] sm:$0xff] }
 0x1fc   : > { %v1677_v55 = vadd.f32 1e-05, %v1613_v42  ;;  %v1906_v5 = vadd.f32 %v6598_v54, %v1838_v34  ;;  %v1771_v45 = vmul.f32 %v4890_v26, %v6523_v48  ;;  %v8830_v42 = vld [vmem:[#allocation25_spill] sm:$0xff] }
 0x1fd   : > { %v1452_v36 = vpop.xlane.xlu0 %1451  ;;  %v1938_v0 = vadd.f32 %v6598_v54, %v1870_v33  ;;  %v8831_v33 = vsub.s32 0, %v8810_v15 }
 0x1fe   : > { %4899 = vrsqrt.f32 %v1677_v55  ;;  %4553 = vmatprep.mubr.msk.f32.mxu0 %vm974_vm0, %v1906_v5  ;;  %v1839_v50 = vmul.f32 %v6593_v13, %v1771_v45  ;;  %v1582_v19 = vmul.f32 0.125, %v1452_v36  ;;  %v329_v45 = vld [vmem:[%s8636_s3] sm:$0xff] }
 0x1ff   : > { %4601 = vmatprep.mubr.msk.f32.mxu1 %vm974_vm0, %v1938_v0  ;;  %v6860_v36 = vrot.slane %v329_v45, %v8831_v33 }
 0x200   : > { %v1548_v6 = vpop.xlane.xlu1 %1547  ;;  %v1907_v58 = vadd.f32 %v6598_v54, %v1839_v50  ;;  %v1646_v37 = vadd.f32 1e-05, %v1582_v19 }
 0x201   : > { %v4892_v17 = vpop.eup %4891  ;;  %v1614_v4 = vmul.f32 0.125, %v1548_v6 }
 0x202   : > { %4554 = vmatmul.mubr.msk.f32.gmra.mxu0 %vm974_vm0, %v1907_v58  ;;  %v1803_v48 = vmul.f32 %v4892_v17, %v6533_v40  ;;  %4901 = vrsqrt.f32 %v1646_v37 }
 0x203   : > { %v1678_v16 = vadd.f32 1e-05, %v1614_v4 }
 0x204   : > { %v4894_v20 = vpop.eup %4893  ;;  %v1455_v61 = vpop.xlane.xlu0 %1454  ;;  %v1871_v35 = vmul.f32 %v6593_v13, %v1803_v48 }
 0x205   : > { %4903 = vrsqrt.f32 %v1678_v16  ;;  %v1583_v41 = vmul.f32 0.125, %v1455_v61  ;;  %v1551_v31 = vpop.xlane.xlu1 %1550  ;;  %v1772_v8 = vmul.f32 %v4894_v20, %v8823_v21 }
 0x206   : > { %v4896_v28 = vpop.eup %4895  ;;  %v1615_v57 = vmul.f32 0.125, %v1551_v31  ;;  %v1939_v56 = vadd.f32 %v6598_v54, %v1871_v35 }
 0x207   : > { %v1647_v30 = vadd.f32 1e-05, %v1583_v41  ;;  %v1840_v51 = vmul.f32 %v6593_v13, %v1772_v8  ;;  %v1804_v40 = vmul.f32 %v4896_v28, %v8824_v52 }
 0x208   : > { %v4898_v46 = vpop.eup %4897  ;;  %v1679_v11 = vadd.f32 1e-05, %v1615_v57  ;;  %4602 = vmatmul.mubr.msk.f32.gmra.mxu1 %vm974_vm0, %v1939_v56 }
 0x209   : > { %4905 = vrsqrt.f32 %v1647_v30  ;;  %v1908_v39 = vadd.f32 %v6598_v54, %v1840_v51  ;;  %v1773_v9 = vmul.f32 %v4898_v46, %v8825_v47  ;;  %v1872_v59 = vmul.f32 %v6593_v13, %v1804_v40 }
 0x20a   : > { %4907 = vrsqrt.f32 %v1679_v11 }
 0x20b   : > { %v4900_v62 = vpop.eup %4899  ;;  %4556 = vmatprep.mubr.msk.f32.mxu0 %vm974_vm0, %v1908_v39  ;;  %v1841_v24 = vmul.f32 %v6593_v13, %v1773_v9  ;;  %v1940_v29 = vadd.f32 %v6598_v54, %v1872_v59 }
 0x20c   : > { %v1805_v60 = vmul.f32 %v4900_v62, %v8826_v63 }
 0x20d   : > { %v1909_v1 = vadd.f32 %v6598_v54, %v1841_v24  ;;  %4604 = vmatprep.mubr.msk.f32.mxu1 %vm974_vm0, %v1940_v29 }
 0x20e   : > { %v1873_v14 = vmul.f32 %v6593_v13, %v1805_v60 }
 0x20f   : > { %4557 = vmatmul.mubr.msk.f32.gmra.mxu0 %vm974_vm0, %v1909_v1  ;;  %v4902_v7 = vpop.eup %4901 }
 0x210   : > { %v1941_v2 = vadd.f32 %v6598_v54, %v1873_v14  ;;  %v1774_v23 = vmul.f32 %v4902_v7, %v8827_v49 }
 0x212   : > { %v4904_v3 = vpop.eup %4903  ;;  %4605 = vmatmul.mubr.msk.f32.gmra.mxu1 %vm974_vm0, %v1941_v2  ;;  %v1842_v32 = vmul.f32 %v6593_v13, %v1774_v23 }
 0x213   : > { %v1806_v38 = vmul.f32 %v4904_v3, %v8828_v53 }
 0x214   : > { %v1910_v22 = vadd.f32 %v6598_v54, %v1842_v32 }
 0x215   : > { %v1874_v25 = vmul.f32 %v6593_v13, %v1806_v38 }
 0x216   : > { %v4906_v43 = vpop.eup %4905  ;;  %4559 = vmatprep.mubr.msk.f32.mxu0 %vm974_vm0, %v1910_v22 }
 0x217   : > { %v4908_v10 = vpop.eup %4907  ;;  %v1775_v27 = vmul.f32 %v4906_v43, %v8829_v12  ;;  %v1942_v18 = vadd.f32 %v6598_v54, %v1874_v25 }
 0x218   : > { %v1807_v34 = vmul.f32 %v4908_v10, %v8830_v42 }
 0x219   : > { %v1843_v44 = vmul.f32 %v6593_v13, %v1775_v27  ;;  %4607 = vmatprep.mubr.msk.f32.mxu1 %vm974_vm0, %v1942_v18 }
 0x21a   : > { %v1875_v26 = vmul.f32 %v6593_v13, %v1807_v34 }
 0x21b   : > { %v1911_v55 = vadd.f32 %v6598_v54, %v1843_v44 }
 0x21c   : > { %v1943_v5 = vadd.f32 %v6598_v54, %v1875_v26 }
 0x21d   : > { %4560 = vmatmul.mubr.msk.f32.gmra.mxu0 %vm974_vm0, %v1911_v55 }
 0x21e   : > { %4608 = vmatmul.mubr.msk.f32.gmra.mxu1 %vm974_vm0, %v1943_v5 }
 0x254   : > { %v4516_v50 = vpop.f32.mrf.mxu0 }
 0x255   : > { %v6863_v0 = vadd.f32 %v4516_v50, %v6860_v36  ;;  %v4564_v13 = vpop.f32.mrf.mxu1 }
 0x256   : > { %v2206_v19 = vpop.f32.mrf.mxu0  ;;  %v6866_v54 = vadd.f32 %v4564_v13, %v6860_v36 }
 0x257   : > { %v2590_v6 = vmul.f32 0.044715, %v6863_v0  ;;  %v6870_v58 = vadd.f32 %v2206_v19, %v6860_v36  ;;  %v2366_v17 = vpop.f32.mrf.mxu1 }
 0x258   : > { %v2622_v37 = vmul.f32 0.044715, %v6866_v54  ;;  %v6874_v4 = vadd.f32 %v2366_v17, %v6860_v36 }
 0x259   : > { %v2654_v48 = vmul.f32 %v2590_v6, %v6863_v0  ;;  %v2589_v16 = vmul.f32 0.044715, %v6870_v58 }
 0x25a   : > { %v2686_v20 = vmul.f32 %v2622_v37, %v6866_v54  ;;  %v2621_v61 = vmul.f32 0.044715, %v6874_v4 }
 0x25b   : > { %v2653_v35 = vmul.f32 %v2589_v16, %v6870_v58  ;;  %v2718_v41 = vmul.f32 %v2654_v48, %v6863_v0 }
 0x25c   : > { %v2685_v31 = vmul.f32 %v2621_v61, %v6874_v4  ;;  %v4519_v21 = vpop.f32.mrf.mxu0  ;;  %v2750_v8 = vmul.f32 %v2686_v20, %v6866_v54  ;;  %v2526_v20 = vmul.f32 0.5, %v6863_v0 }
 0x25d   : > { %v6885_v28 = vadd.f32 %v4519_v21, %v6860_v36  ;;  %v4567_v57 = vpop.f32.mrf.mxu1  ;;  %v2782_v56 = vadd.f32 %v2718_v41, %v6863_v0  ;;  %v2717_v30 = vmul.f32 %v2653_v35, %v6870_v58  ;;  %v2558_v21 = vmul.f32 0.5, %v6866_v54 }
 0x25e   : > { %v2216_v51 = vpop.f32.mrf.mxu0  ;;  %v6890_v52 = vadd.f32 %v4567_v57, %v6860_v36  ;;  %v2814_v40 = vadd.f32 %v2750_v8, %v6866_v54  ;;  %v2749_v46 = vmul.f32 %v2685_v31, %v6874_v4  ;;  %v2525_v0 = vmul.f32 0.5, %v6870_v58 }
 0x25f   : > { %v2592_v11 = vmul.f32 0.044715, %v6885_v28  ;;  %v6896_v39 = vadd.f32 %v2216_v51, %v6860_v36  ;;  %v2376_v47 = vpop.f32.mrf.mxu1  ;;  %v2846_v9 = vmul.f32 0.7978846, %v2782_v56  ;;  %v2781_v59 = vadd.f32 %v2717_v30, %v6870_v58 }
 0x260   : > { %v2624_v62 = vmul.f32 0.044715, %v6890_v52  ;;  %v6901_v24 = vadd.f32 %v2376_v47, %v6860_v36  ;;  %v2878_v29 = vmul.f32 0.7978846, %v2814_v40  ;;  %v2813_v63 = vadd.f32 %v2749_v46, %v6874_v4 }
 0x261   : > { %v2656_v60 = vmul.f32 %v2592_v11, %v6885_v28  ;;  %v2591_v1 = vmul.f32 0.044715, %v6896_v39  ;;  %4909 = vtanh.f32 %v2846_v9  ;;  %v2845_v14 = vmul.f32 0.7978846, %v2781_v59 }
 0x262   : > { %v2688_v7 = vmul.f32 %v2624_v62, %v6890_v52  ;;  %v2623_v2 = vmul.f32 0.044715, %v6901_v24  ;;  %4911 = vtanh.f32 %v2878_v29  ;;  %v2877_v49 = vmul.f32 0.7978846, %v2813_v63 }
 0x263   : > { %v2655_v23 = vmul.f32 %v2591_v1, %v6896_v39  ;;  %4913 = vtanh.f32 %v2845_v14  ;;  %v2720_v3 = vmul.f32 %v2656_v60, %v6885_v28  ;;  %v2557_v40 = vmul.f32 0.5, %v6874_v4 }
 0x264   : > { %v2687_v32 = vmul.f32 %v2623_v2, %v6901_v24  ;;  %v4522_v53 = vpop.f32.mrf.mxu0  ;;  %4915 = vtanh.f32 %v2877_v49  ;;  %v2752_v10 = vmul.f32 %v2688_v7, %v6890_v52  ;;  %v2528_v46 = vmul.f32 0.5, %v6885_v28 }
 0x265   : > { %v2232_v38 = vadd.f32 %v4522_v53, %v6860_v36  ;;  %v4570_v22 = vpop.f32.mrf.mxu1  ;;  %v2784_v25 = vadd.f32 %v2720_v3, %v6885_v28  ;;  %v2719_v43 = vmul.f32 %v2655_v23, %v6896_v39  ;;  %v6939_v11 = vmul.f32 0.5, %v6896_v39 }
 0x266   : > { %v2226_v12 = vpop.f32.mrf.mxu0  ;;  %v6916_v27 = vadd.f32 %v4570_v22, %v6860_v36  ;;  %v2751_v18 = vmul.f32 %v2687_v32, %v6901_v24  ;;  %v2816_v33 = vadd.f32 %v2752_v10, %v6890_v52  ;;  %v6942_v59 = vmul.f32 0.5, %v6890_v52 }
 0x267   : > { %v2594_v42 = vmul.f32 0.044715, %v2232_v38  ;;  %v2227_v34 = vadd.f32 %v2226_v12, %v6860_v36  ;;  %v2386_v44 = vpop.f32.mrf.mxu1  ;;  %v2848_v26 = vmul.f32 0.7978846, %v2784_v25  ;;  %v2783_v55 = vadd.f32 %v2719_v43, %v6896_v39 }
 0x268   : > { %v2626_v5 = vmul.f32 0.044715, %v6916_v27  ;;  %v6923_v45 = vadd.f32 %v2386_v44, %v6860_v36  ;;  %v2815_v50 = vadd.f32 %v2751_v18, %v6901_v24  ;;  %v2880_v37 = vmul.f32 0.7978846, %v2816_v33 }
 0x269   : > { %v2658_v13 = vmul.f32 %v2594_v42, %v2232_v38  ;;  %v2593_v19 = vmul.f32 0.044715, %v2227_v34  ;;  %4917 = vtanh.f32 %v2848_v26  ;;  %v2847_v6 = vmul.f32 0.7978846, %v2783_v55 }
 0x26a   : > { %v2625_v17 = vmul.f32 0.044715, %v6923_v45  ;;  %v2879_v48 = vmul.f32 0.7978846, %v2815_v50  ;;  %v2690_v35 = vmul.f32 %v2626_v5, %v6916_v27  ;;  %v6945_v62 = vmul.f32 0.5, %v6901_v24 }
 0x26b   : > { %v2657_v16 = vmul.f32 %v2593_v19, %v2227_v34  ;;  %4919 = vtanh.f32 %v2847_v6  ;;  %v2722_v61 = vmul.f32 %v2658_v13, %v2232_v38  ;;  %v6960_v23 = vmul.f32 0.5, %v2232_v38 }
 0x26c   : > { %v2689_v41 = vmul.f32 %v2625_v17, %v6923_v45  ;;  %v4525_v31 = vpop.f32.mrf.mxu0  ;;  %4921 = vtanh.f32 %v2880_v37  ;;  %v2754_v7 = vmul.f32 %v2690_v35, %v6916_v27  ;;  %v6966_v22 = vmul.f32 0.5, %v2227_v34 }
 0x26d   : > { %v6933_v8 = vadd.f32 %v4525_v31, %v6860_v36  ;;  %v4573_v57 = vpop.f32.mrf.mxu1  ;;  %4923 = vtanh.f32 %v2879_v48  ;;  %v2786_v56 = vadd.f32 %v2722_v61, %v2232_v38  ;;  %v2721_v30 = vmul.f32 %v2657_v16, %v2227_v34 }
 0x26e   : > { %v4910_v51 = vpop.eup %4909  ;;  %v2236_v54 = vpop.f32.mrf.mxu0  ;;  %v6949_v4 = vadd.f32 %v4573_v57, %v6860_v36  ;;  %v2753_v52 = vmul.f32 %v2689_v41, %v6923_v45  ;;  %v2818_v26 = vadd.f32 %v2754_v7, %v6916_v27  ;;  %v6980_v50 = vmul.f32 0.5, %v6916_v27 }
 0x26f   : > { %v4912_v47 = vpop.eup %4911  ;;  %v2974_v9 = vadd.f32 1.0, %v4910_v51  ;;  %v2850_v29 = vmul.f32 0.7978846, %v2786_v56  ;;  %v2596_v58 = vmul.f32 0.044715, %v6933_v8  ;;  %v2785_v60 = vadd.f32 %v2721_v30, %v2227_v34  ;;  %v2396_v3 = vpop.f32.mrf.mxu1 }
 0x270   : > { %v4914_v63 = vpop.eup %4913  ;;  %v3006_v28 = vadd.f32 1.0, %v4912_v47  ;;  %v6956_v24 = vadd.f32 %v2236_v54, %v6860_v36  ;;  %v2628_v43 = vmul.f32 0.044715, %v6949_v4  ;;  %v2817_v34 = vadd.f32 %v2753_v52, %v6923_v45 }
 0x271   : > { %v4916_v39 = vpop.eup %4915  ;;  %v6951_v1 = vmul.f32 %v2974_v9, %v2526_v20  ;;  %v2973_v14 = vadd.f32 1.0, %v4914_v63  ;;  %4925 = vtanh.f32 %v2850_v29  ;;  %v2660_v25 = vmul.f32 %v2596_v58, %v6933_v8 }
 0x272   : > { %v6958_v2 = vmul.f32 %v3006_v28, %v2558_v21  ;;  %v3005_v49 = vadd.f32 1.0, %v4916_v39  ;;  %v2849_v18 = vmul.f32 0.7978846, %v2785_v60  ;;  %v2595_v5 = vmul.f32 0.044715, %v6956_v24 }
 0x273   : > { %v3105_v32 = vsel %vm3101_vm1, %v6951_v1, 0.0  ;;  %v6964_v53 = vmul.f32 %v2973_v14, %v2525_v0  ;;  %v6983_v13 = vmul.f32 0.5, %v6923_v45  ;;  %v6986_v19 = vadd.f32 %v2396_v3, %v6860_v36 }
 0x274   : > { %3106 = vadd.xlane.f32.xlu1 %v3105_v32  ;;  %v4528_v10 = vpop.f32.mrf.mxu0  ;;  %v6970_v12 = vmul.f32 %v3005_v49, %v2557_v40  ;;  %v3201_v44 = vsel %vm3101_vm1, %v6958_v2, 0.0  ;;  %4927 = vtanh.f32 %v2849_v18  ;;  %v2882_v48 = vmul.f32 0.7978846, %v2818_v26 }
 0x275   : > { %v3102_v38 = vsel %vm3101_vm1, %v6964_v53, 0.0  ;;  %v4576_v42 = vpop.f32.mrf.mxu1  ;;  %v2692_v20 = vmul.f32 %v2628_v43, %v6949_v4  ;;  %v6992_v61 = vadd.f32 %v4528_v10, %v6860_v36  ;;  %v2881_v27 = vmul.f32 0.7978846, %v2817_v34 }
 0x276   : > { %v4918_v55 = vpop.eup %4917  ;;  %3103 = vadd.xlane.f32.xlu0 %v3102_v38  ;;  %v2246_v33 = vpop.f32.mrf.mxu0  ;;  %v3198_v17 = vsel %vm3101_vm1, %v6970_v12, 0.0  ;;  %v2724_v45 = vmul.f32 %v2660_v25, %v6933_v8  ;;  %v6999_v31 = vadd.f32 %v4576_v42, %v6860_v36  ;;  %v2659_v30 = vmul.f32 %v2595_v5, %v6956_v24 }
 0x277   : > { %v2406_v6 = vpop.f32.mrf.mxu1  ;;  %v2976_v37 = vadd.f32 1.0, %v4918_v55  ;;  %v6996_v41 = vadd.f32 %v2246_v33, %v6860_v36  ;;  %4929 = vtanh.f32 %v2882_v48  ;;  %v2627_v40 = vmul.f32 0.044715, %v6986_v19 }
 0x278   : > { %v4920_v16 = vpop.eup %4919  ;;  %3202 = vadd.xlane.f32.xlu1 %v3201_v44  ;;  %v7005_v51 = vadd.f32 %v2406_v6, %v6860_v36  ;;  %v2598_v9 = vmul.f32 0.044715, %v6992_v61  ;;  %4931 = vtanh.f32 %v2881_v27  ;;  %v2788_v58 = vadd.f32 %v2724_v45, %v6933_v8 }
 0x279   : > { %v4922_v35 = vpop.eup %4921  ;;  %v7001_v21 = vmul.f32 %v2976_v37, %v2528_v46  ;;  %v2975_v57 = vadd.f32 1.0, %v4920_v16  ;;  %v2597_v28 = vmul.f32 0.044715, %v6996_v41  ;;  %v2630_v60 = vmul.f32 0.044715, %v6999_v31 }
 0x27a   : > { %v4924_v56 = vpop.eup %4923  ;;  %3199 = vadd.xlane.f32.xlu0 %v3198_v17  ;;  %v3008_v0 = vadd.f32 1.0, %v4922_v35  ;;  %v2629_v7 = vmul.f32 0.044715, %v7005_v51  ;;  %v2852_v49 = vmul.f32 0.7978846, %v2788_v58  ;;  %v2723_v3 = vmul.f32 %v2659_v30, %v6956_v24 }
 0x27b   : > { %v3111_v47 = vsel %vm3101_vm1, %v7001_v21, 0.0  ;;  %v7011_v54 = vmul.f32 %v2975_v57, %v6939_v11  ;;  %v3007_v46 = vadd.f32 1.0, %v4924_v56  ;;  %v2691_v32 = vmul.f32 %v2627_v40, %v6986_v19 }
 0x27c   : > { %3112 = vadd.xlane.f32.xlu1 %v3111_v47  ;;  %v4531_v29 = vpop.f32.mrf.mxu0  ;;  %v7015_v63 = vmul.f32 %v3008_v0, %v6942_v59  ;;  %v7036_v10 = vmul.f32 0.5, %v6933_v8  ;;  %v2662_v38 = vmul.f32 %v2598_v9, %v6992_v61  ;;  %4933 = vtanh.f32 %v2852_v49 }
 0x27d   : > { %v3108_v39 = vsel %vm3101_vm1, %v7011_v54, 0.0  ;;  %v4579_v11 = vpop.f32.mrf.mxu1  ;;  %v7023_v14 = vmul.f32 %v3007_v46, %v6945_v62  ;;  %v7031_v25 = vadd.f32 %v4531_v29, %v6860_v36  ;;  %v2787_v44 = vadd.f32 %v2723_v3, %v6956_v24 }
 0x27e   : > { %3109 = vadd.xlane.f32.xlu0 %v3108_v39  ;;  %v2256_v52 = vpop.f32.mrf.mxu0  ;;  %v3207_v59 = vsel %vm3101_vm1, %v7015_v63, 0.0  ;;  %v4926_v18 = vpop.eup %4925  ;;  %v7040_v42 = vadd.f32 %v4579_v11, %v6860_v36  ;;  %v2694_v26 = vmul.f32 %v2630_v60, %v6999_v31  ;;  %v2756_v5 = vmul.f32 %v2692_v20, %v6949_v4 }
 0x27f   : > { %v2416_v43 = vpop.f32.mrf.mxu1  ;;  %v3204_v62 = vsel %vm3101_vm1, %v7023_v14, 0.0  ;;  %v7045_v34 = vadd.f32 %v2256_v52, %v6860_v36  ;;  %v2978_v55 = vadd.f32 1.0, %v4926_v18  ;;  %v2661_v8 = vmul.f32 %v2597_v28, %v6996_v41 }
 0x280   : > { %3208 = vadd.xlane.f32.xlu1 %v3207_v59  ;;  %v7050_v33 = vmul.f32 %v2629_v7, %v7005_v51  ;;  %v7053_v6 = vadd.f32 %v2416_v43, %v6860_v36  ;;  %v2851_v17 = vmul.f32 0.7978846, %v2787_v44  ;;  %v2600_v48 = vmul.f32 0.044715, %v7031_v25 }
 0x281   : > { %v4928_v37 = vpop.eup %4927  ;;  %v7057_v16 = vmul.f32 %v2978_v55, %v6960_v23  ;;  %v2820_v27 = vadd.f32 %v2756_v5, %v6949_v4  ;;  %v2755_v20 = vmul.f32 %v2691_v32, %v6986_v19  ;;  %v2632_v45 = vmul.f32 0.044715, %v7040_v42 }
 0x282   : > { %3205 = vadd.xlane.f32.xlu0 %v3204_v62  ;;  %v2977_v57 = vadd.f32 1.0, %v4928_v37  ;;  %v7063_v56 = vmul.f32 0.5, %v6956_v24  ;;  %4935 = vtanh.f32 %v2851_v17  ;;  %v2599_v30 = vmul.f32 0.044715, %v7045_v34 }
 0x283   : > { %v3117_v0 = vsel %vm3101_vm1, %v7057_v16, 0.0  ;;  %v2884_v23 = vmul.f32 0.7978846, %v2820_v27  ;;  %v2819_v47 = vadd.f32 %v2755_v20, %v6986_v19  ;;  %v2631_v46 = vmul.f32 0.044715, %v7053_v6 }
 0x284   : > { %v4534_v35 = vpop.f32.mrf.mxu0  ;;  %3118 = vadd.xlane.f32.xlu1 %v3117_v0  ;;  %v7071_v9 = vmul.f32 %v2977_v57, %v6966_v22  ;;  %v7074_v29 = vmul.f32 0.5, %v6949_v4  ;;  %v2726_v24 = vmul.f32 %v2662_v38, %v6992_v61  ;;  %v4930_v58 = vpop.eup %4929  ;;  %v7078_v28 = vmul.f32 %v2600_v48, %v7031_v25 }
 0x285   : > { %v4582_v40 = vpop.f32.mrf.mxu1  ;;  %v7081_v60 = vadd.f32 %v4534_v35, %v6860_v36  ;;  %4937 = vtanh.f32 %v2884_v23  ;;  %v2883_v11 = vmul.f32 0.7978846, %v2819_v47  ;;  %v7084_v7 = vmul.f32 %v2632_v45, %v7040_v42  ;;  %v4932_v59 = vpop.eup %4931 }
 0x286   : > { %v2266_v39 = vpop.f32.mrf.mxu0  ;;  %v3114_v22 = vsel %vm3101_vm1, %v7071_v9, 0.0  ;;  %v3010_v4 = vadd.f32 1.0, %v4930_v58  ;;  %v7089_v52 = vmul.f32 0.5, %v6986_v19  ;;  %v7092_v49 = vmul.f32 %v2599_v30, %v7045_v34 }
 0x287   : > { %3115 = vadd.xlane.f32.xlu0 %v3114_v22  ;;  %v7095_v3 = vadd.f32 %v4582_v40, %v6860_v36  ;;  %v2426_v32 = vpop.f32.mrf.mxu1  ;;  %4939 = vtanh.f32 %v2883_v11  ;;  %v2790_v43 = vadd.f32 %v2726_v24, %v6992_v61  ;;  %v7099_v62 = vmul.f32 %v2631_v46, %v7053_v6 }
 0x288   : > { %v7102_v18 = vadd.f32 %v2266_v39, %v6860_v36  ;;  %v7105_v19 = vmul.f32 %v3010_v4, %v6980_v50  ;;  %v3009_v38 = vadd.f32 1.0, %v4932_v59  ;;  %v2602_v44 = vmul.f32 0.044715, %v7081_v60 }
 0x289   : > { %v7109_v55 = vmul.f32 0.5, %v6992_v61  ;;  %v2854_v5 = vmul.f32 0.7978846, %v2790_v43  ;;  %v2725_v17 = vmul.f32 %v2661_v8, %v6996_v41  ;;  %v7115_v48 = vadd.f32 %v2426_v32, %v6860_v36  ;;  %v4934_v45 = vpop.eup %4933 }
 0x28a   : > { %v3213_v37 = vsel %vm3101_vm1, %v7105_v19, 0.0  ;;  %v7118_v27 = vmul.f32 %v3009_v38, %v6983_v13  ;;  %v2758_v20 = vmul.f32 %v2694_v26, %v6999_v31  ;;  %v2634_v35 = vmul.f32 0.044715, %v7095_v3 }
 0x28b   : > { %3214 = vadd.xlane.f32.xlu1 %v3213_v37  ;;  %4941 = vtanh.f32 %v2854_v5  ;;  %v7123_v8 = vmul.f32 0.5, %v6996_v41  ;;  %v2789_v57 = vadd.f32 %v2725_v17, %v6996_v41  ;;  %v2601_v30 = vmul.f32 0.044715, %v7102_v18 }
 0x28c   : > { %8832 = vst [vmem:[#allocation26_spill] sm:$0xff] %v7118_v27  ;;  %v4537_v50 = vpop.f32.mrf.mxu0  ;;  %v3210_v13 = vsel %vm3101_vm1, %v7118_v27, 0.0  ;;  %v2980_v0 = vadd.f32 1.0, %v4934_v45  ;;  %v2822_v26 = vadd.f32 %v2758_v20, %v6999_v31  ;;  %v7131_v23 = vmul.f32 %v2602_v44, %v7081_v60 }
 0x28d   : > { %v4585_v61 = vpop.f32.mrf.mxu1  ;;  %3211 = vadd.xlane.f32.xlu0 %v3210_v13  ;;  %v7134_v47 = vadd.f32 %v4537_v50, %v6860_v36  ;;  %v2853_v24 = vmul.f32 0.7978846, %v2789_v57  ;;  %v2757_v41 = vmul.f32 %v7050_v33, %v7005_v51  ;;  %v2633_v58 = vmul.f32 0.044715, %v7115_v48 }
 0x28e   : > { %v2276_v40 = vpop.f32.mrf.mxu0  ;;  %v7140_v39 = vmul.f32 %v2980_v0, %v7036_v10  ;;  %v7143_v11 = vadd.f32 %v4585_v61, %v6860_v36  ;;  %v2886_v22 = vmul.f32 0.7978846, %v2822_v26  ;;  %v7146_v59 = vmul.f32 %v2634_v35, %v7095_v3 }
 0x28f   : > { %v2436_v46 = vpop.f32.mrf.mxu1  ;;  %v4936_v4 = vpop.eup %4935  ;;  %v7149_v32 = vadd.f32 %v2276_v40, %v6860_v36  ;;  %4943 = vtanh.f32 %v2853_v24  ;;  %v2821_v43 = vadd.f32 %v2757_v41, %v7005_v51  ;;  %v7153_v33 = vmul.f32 %v2601_v30, %v7102_v18 }
 0x290   : > { %8833 = vst [vmem:[#allocation27_spill] sm:$0xff] %v7140_v39  ;;  %v3123_v10 = vsel %vm3101_vm1, %v7140_v39, 0.0  ;;  %v2979_v38 = vadd.f32 1.0, %v4936_v4  ;;  %v7158_v44 = vadd.f32 %v2436_v46, %v6860_v36  ;;  %v2604_v5 = vmul.f32 0.044715, %v7134_v47 }
 0x291   : > { %3124 = vadd.xlane.f32.xlu1 %v3123_v10  ;;  %v7162_v17 = vmul.f32 0.5, %v6999_v31  ;;  %4945 = vtanh.f32 %v2886_v22  ;;  %v2885_v37 = vmul.f32 0.7978846, %v2821_v43  ;;  %v7165_v20 = vmul.f32 %v2633_v58, %v7115_v48 }
 0x292   : > { %v4938_v50 = vpop.eup %4937  ;;  %v7168_v45 = vmul.f32 %v2979_v38, %v7063_v56  ;;  %v2636_v35 = vmul.f32 0.044715, %v7143_v11  ;;  %v2728_v57 = vmul.f32 %v7078_v28, %v7031_v25  ;;  %v2603_v30 = vmul.f32 0.044715, %v7149_v32 }
 0x293   : > { %v3012_v13 = vadd.f32 1.0, %v4938_v50  ;;  %4947 = vtanh.f32 %v2885_v37  ;;  %v2727_v0 = vmul.f32 %v7092_v49, %v7045_v34  ;;  %v2635_v56 = vmul.f32 0.044715, %v7158_v44 }
 0x294   : > { %8834 = vst [vmem:[#allocation28_spill] sm:$0xff] %v7168_v45  ;;  %v4540_v61 = vpop.f32.mrf.mxu0  ;;  %v4940_v40 = vpop.eup %4939  ;;  %v3120_v26 = vsel %vm3101_vm1, %v7168_v45, 0.0  ;;  %v7180_v46 = vmul.f32 0.5, %v7005_v51  ;;  %v2792_v24 = vadd.f32 %v2728_v57, %v7031_v25  ;;  %v7184_v28 = vmul.f32 %v2604_v5, %v7134_v47 }
 0x295   : > { %v4588_v31 = vpop.f32.mrf.mxu1  ;;  %3121 = vadd.xlane.f32.xlu0 %v3120_v26  ;;  %v7187_v41 = vmul.f32 %v3012_v13, %v7074_v29  ;;  %v3011_v58 = vadd.f32 1.0, %v4940_v40  ;;  %v7190_v49 = vadd.f32 %v4540_v61, %v6860_v36  ;;  %v7193_v4 = vmul.f32 %v2636_v35, %v7143_v11 }
 0x296   : > { %v2286_v22 = vpop.f32.mrf.mxu0  ;;  %v7196_v51 = vadd.f32 %v4588_v31, %v6860_v36  ;;  %v2856_v43 = vmul.f32 0.7978846, %v2792_v24  ;;  %v2791_v10 = vadd.f32 %v2727_v0, %v7045_v34  ;;  %v7200_v38 = vmul.f32 %v2603_v30, %v7149_v32 }
 0x297   : > { %8835 = vst [vmem:[#allocation29_spill] sm:$0xff] %v7187_v41  ;;  %v3219_v29 = vsel %vm3101_vm1, %v7187_v41, 0.0  ;;  %v7205_v5 = vmul.f32 %v3011_v58, %v7089_v52  ;;  %v2446_v37 = vpop.f32.mrf.mxu1  ;;  %v7208_v50 = vmul.f32 0.5, %v7031_v25  ;;  %v7211_v61 = vmul.f32 %v2635_v56, %v7158_v44 }
 0x298   : > { %v4942_v35 = vpop.eup %4941  ;;  %3220 = vadd.xlane.f32.xlu1 %v3219_v29  ;;  %v7214_v57 = vadd.f32 %v2286_v22, %v6860_v36  ;;  %4949 = vtanh.f32 %v2856_v43  ;;  %v2855_v30 = vmul.f32 0.7978846, %v2791_v10  ;;  %v2606_v52 = vmul.f32 0.044715, %v7190_v49 }
 0x299   : > { %8836 = vst [vmem:[#allocation30_spill] sm:$0xff] %v7205_v5  ;;  %v3216_v13 = vsel %vm3101_vm1, %v7205_v5, 0.0  ;;  %v2982_v31 = vadd.f32 1.0, %v4942_v35  ;;  %v2760_v25 = vmul.f32 %v7084_v7, %v7040_v42  ;;  %v2638_v0 = vmul.f32 0.044715, %v7196_v51 }
 0x29a   : > { %3217 = vadd.xlane.f32.xlu0 %v3216_v13  ;;  %v7223_v40 = vadd.f32 %v2446_v37, %v6860_v36  ;;  %4951 = vtanh.f32 %v2855_v30  ;;  %v2759_v26 = vmul.f32 %v7099_v62, %v7053_v6  ;;  %v7231_v58 = vmul.f32 0.5, %v7045_v34 }
 0x29b   : > { %v7228_v56 = vmul.f32 %v2982_v31, %v7109_v55  ;;  %v2824_v7 = vadd.f32 %v2760_v25, %v7040_v42  ;;  %v2730_v43 = vmul.f32 %v7131_v23, %v7081_v60  ;;  %v2605_v29 = vmul.f32 0.044715, %v7214_v57 }
 0x29c   : > { %v4944_v10 = vpop.eup %4943  ;;  %v7241_v62 = vmul.f32 0.5, %v7040_v42  ;;  %v2823_v55 = vadd.f32 %v2759_v26, %v7053_v6  ;;  %v7247_v35 = vmul.f32 %v2606_v52, %v7190_v49  ;;  %v2637_v42 = vmul.f32 0.044715, %v7223_v40 }
 0x29d   : > { %8837 = vst [vmem:[#allocation31_spill] sm:$0xff] %v7228_v56  ;;  %v4543_v24 = vpop.f32.mrf.mxu0  ;;  %v4591_v22 = vpop.f32.mrf.mxu1  ;;  %v3129_v34 = vsel %vm3101_vm1, %v7228_v56, 0.0  ;;  %v2981_v30 = vadd.f32 1.0, %v4944_v10  ;;  %v2888_v23 = vmul.f32 0.7978846, %v2824_v7  ;;  %v2794_v26 = vadd.f32 %v2730_v43, %v7081_v60 }
 0x29e   : > { %v7238_v37 = vadd.f32 %v4543_v24, %v6860_v36  ;;  %v4946_v25 = vpop.eup %4945  ;;  %3130 = vadd.xlane.f32.xlu1 %v3129_v34  ;;  %v7250_v24 = vmul.f32 %v2638_v0, %v7196_v51  ;;  %v7254_v15 = vadd.f32 %v4591_v22, %v6860_v36  ;;  %v2887_v10 = vmul.f32 0.7978846, %v2823_v55 }
 0x29f   : > { %v2296_v13 = vpop.f32.mrf.mxu0  ;;  %v2456_v31 = vpop.f32.mrf.mxu1  ;;  %v7258_v56 = vmul.f32 %v2981_v30, %v7123_v8  ;;  %v3014_v52 = vadd.f32 1.0, %v4946_v25  ;;  %4953 = vtanh.f32 %v2888_v23  ;;  %v7261_v5 = vmul.f32 %v2605_v29, %v7214_v57 }
 0x2a0   : > { %v4948_v7 = vpop.eup %4947  ;;  %v2608_v0 = vmul.f32 0.044715, %v7238_v37  ;;  %v7265_v34 = vadd.f32 %v2296_v13, %v6860_v36  ;;  %v7268_v22 = vadd.f32 %v2456_v31, %v6860_v36  ;;  %4955 = vtanh.f32 %v2887_v10 }
 0x2a1   : > { %8838 = vst [vmem:[#allocation6_spill] sm:$0xff] %v7258_v56  ;;  %v3126_v43 = vsel %vm3101_vm1, %v7258_v56, 0.0  ;;  %v7273_v8 = vmul.f32 %v3014_v52, %v7162_v17  ;;  %v3013_v30 = vadd.f32 1.0, %v4948_v7  ;;  %v7276_v29 = vmul.f32 %v2637_v42, %v7223_v40 }
 0x2a2   : > { %3127 = vadd.xlane.f32.xlu0 %v3126_v43  ;;  %v7279_v55 = vmul.f32 0.5, %v7053_v6  ;;  %v2858_v13 = vmul.f32 0.7978846, %v2794_v26  ;;  %v2729_v31 = vmul.f32 %v7153_v33, %v7102_v18  ;;  %v2640_v52 = vmul.f32 0.044715, %v7254_v15 }
 0x2a3   : > { %8839 = vst [vmem:[#allocation7_spill] sm:$0xff] %v7273_v8  ;;  %v3225_v25 = vsel %vm3101_vm1, %v7273_v8, 0.0  ;;  %v7286_v17 = vmul.f32 %v3013_v30, %v7180_v46  ;;  %v7290_v10 = vmul.f32 0.5, %v7081_v60  ;;  %v2607_v6 = vmul.f32 0.044715, %v7265_v34 }
 0x2a4   : > { %v4546_v23 = vpop.f32.mrf.mxu0  ;;  %3226 = vadd.xlane.f32.xlu1 %v3225_v25  ;;  %4957 = vtanh.f32 %v2858_v13  ;;  %v2793_v26 = vadd.f32 %v2729_v31, %v7102_v18  ;;  %v2762_v33 = vmul.f32 %v7146_v59, %v7095_v3  ;;  %v7299_v30 = vmul.f32 %v2608_v0, %v7238_v37 }
 0x2a5   : > { %8840 = vst [vmem:[#allocation8_spill] sm:$0xff] %v7286_v17  ;;  %v4594_v42 = vpop.f32.mrf.mxu1  ;;  %v4950_v43 = vpop.eup %4949  ;;  %v3222_v46 = vsel %vm3101_vm1, %v7286_v17, 0.0  ;;  %v2639_v60 = vmul.f32 0.044715, %v7268_v22  ;;  %v7303_v25 = vmul.f32 0.5, %v7102_v18  ;;  %v7306_v31 = vadd.f32 %v4546_v23, %v6860_v36 }
 0x2a6   : > { %v2306_v7 = vpop.f32.mrf.mxu0  ;;  %3223 = vadd.xlane.f32.xlu0 %v3222_v46  ;;  %v2984_v13 = vadd.f32 1.0, %v4950_v43  ;;  %v2857_v8 = vmul.f32 0.7978846, %v2793_v26  ;;  %v2826_v59 = vadd.f32 %v2762_v33, %v7095_v3  ;;  %v7310_v17 = vmul.f32 %v2640_v52, %v7254_v15 }
 0x2a7   : > { %v2466_v56 = vpop.f32.mrf.mxu1  ;;  %v4952_v41 = vpop.eup %4951  ;;  %v7313_v0 = vadd.f32 %v2306_v7, %v6860_v36  ;;  %v7316_v45 = vadd.f32 %v4594_v42, %v6860_v36  ;;  %v2761_v18 = vmul.f32 %v7165_v20, %v7115_v48  ;;  %v7324_v33 = vmul.f32 %v2607_v6, %v7265_v34 }
 0x2a8   : > { %v7321_v23 = vmul.f32 %v2984_v13, %v7208_v50  ;;  %v2983_v26 = vadd.f32 1.0, %v4952_v41  ;;  %4959 = vtanh.f32 %v2857_v8  ;;  %v7327_v52 = vmul.f32 %v2639_v60, %v7268_v22 }
 0x2a9   : > { %v2890_v43 = vmul.f32 0.7978846, %v2826_v59  ;;  %v7330_v7 = vadd.f32 %v2466_v56, %v6860_v36  ;;  %v2825_v42 = vadd.f32 %v2761_v18, %v7115_v48  ;;  %v2610_v41 = vmul.f32 0.044715, %v7306_v31 }
 0x2aa   : > { %8841 = vst [vmem:[#allocation9_spill] sm:$0xff] %v7321_v23  ;;  %v3135_v20 = vsel %vm3101_vm1, %v7321_v23, 0.0  ;;  %v7336_v50 = vmul.f32 %v2983_v26, %v7231_v58  ;;  %v2732_v8 = vmul.f32 %v7184_v28, %v7134_v47  ;;  %v2609_v46 = vmul.f32 0.044715, %v7313_v0 }
 0x2ab   : > { %3136 = vadd.xlane.f32.xlu1 %v3135_v20  ;;  %v2642_v56 = vmul.f32 0.044715, %v7316_v45  ;;  %4961 = vtanh.f32 %v2890_v43  ;;  %v2889_v60 = vmul.f32 0.7978846, %v2825_v42  ;;  %v7346_v58 = vmul.f32 0.5, %v7095_v3 }
 0x2ac   : > { %8842 = vst [vmem:[#allocation10_spill] sm:$0xff] %v7336_v50  ;;  %v4549_v6 = vpop.f32.mrf.mxu0  ;;  %v4954_v13 = vpop.eup %4953  ;;  %v3132_v59 = vsel %vm3101_vm1, %v7336_v50, 0.0  ;;  %v2796_v18 = vadd.f32 %v2732_v8, %v7134_v47  ;;  %v2731_v28 = vmul.f32 %v7200_v38, %v7149_v32  ;;  %v2641_v20 = vmul.f32 0.044715, %v7330_v7 }
 0x2ad   : > { %3133 = vadd.xlane.f32.xlu0 %v3132_v59  ;;  %v3016_v26 = vadd.f32 1.0, %v4954_v13  ;;  %4963 = vtanh.f32 %v2889_v60  ;;  %v7353_v43 = vadd.f32 %v4549_v6, %v6860_v36  ;;  %v4956_v23 = vpop.eup %4955  ;;  %v7356_v50 = vmul.f32 %v2610_v41, %v7306_v31 }
 0x2ae   : > { %v4597_v42 = vpop.f32.mrf.mxu1  ;;  %v7359_v3 = vmul.f32 0.5, %v7115_v48  ;;  %v2860_v8 = vmul.f32 0.7978846, %v2796_v18  ;;  %v2795_v39 = vadd.f32 %v2731_v28, %v7149_v32  ;;  %v3015_v13 = vadd.f32 1.0, %v4956_v23  ;;  %v2316_v48 = vpop.f32.mrf.mxu0 }
 0x2af   : > { %v7363_v38 = vmul.f32 %v3016_v26, %v7241_v62  ;;  %v7366_v60 = vmul.f32 %v2609_v46, %v7313_v0  ;;  %v7369_v6 = vmul.f32 %v2642_v56, %v7316_v45  ;;  %v7372_v59 = vmul.f32 0.5, %v7134_v47 }
 0x2b0   : > { %4965 = vtanh.f32 %v2860_v8  ;;  %v2859_v41 = vmul.f32 0.7978846, %v2795_v39  ;;  %v2764_v18 = vmul.f32 %v7193_v4, %v7143_v11  ;;  %v7379_v23 = vmul.f32 %v3015_v13, %v7279_v55  ;;  %v2476_v47 = vpop.f32.mrf.mxu1 }
 0x2b1   : > { %8843 = vst [vmem:[#allocation11_spill] sm:$0xff] %v7363_v38  ;;  %v4958_v28 = vpop.eup %4957  ;;  %v3231_v62 = vsel %vm3101_vm1, %v7363_v38, 0.0  ;;  %v7382_v46 = vmul.f32 %v2641_v20, %v7330_v7  ;;  %v2612_v56 = vmul.f32 0.044715, %v7353_v43  ;;  %v7386_v39 = vmul.f32 0.5, %v7149_v32 }
 0x2b2   : > { %8844 = vst [vmem:[#allocation12_spill] sm:$0xff] %v7379_v23  ;;  %3232 = vadd.xlane.f32.xlu1 %v3231_v62  ;;  %v2986_v26 = vadd.f32 1.0, %v4958_v28  ;;  %4967 = vtanh.f32 %v2859_v41  ;;  %v2828_v4 = vadd.f32 %v2764_v18, %v7143_v11  ;;  %v3228_v8 = vsel %vm3101_vm1, %v7379_v23, 0.0 }
 0x2b3   : > { %v7392_v55 = vadd.f32 %v2316_v48, %v6860_v36  ;;  %v7395_v20 = vadd.f32 %v4597_v42, %v6860_v36  ;;  %v2763_v13 = vmul.f32 %v7211_v61, %v7158_v44  ;;  %3229 = vadd.xlane.f32.xlu0 %v3228_v8  ;;  %v7403_v41 = vadd.f32 %v2476_v47, %v6860_v36 }
 0x2b4   : > { %v7400_v28 = vmul.f32 %v2986_v26, %v7290_v10  ;;  %v2892_v32 = vmul.f32 0.7978846, %v2828_v4  ;;  %v2734_v18 = vmul.f32 %v7247_v35, %v7190_v49  ;;  %v7408_v48 = vmul.f32 %v2612_v56, %v7353_v43 }
 0x2b5   : > { %v4960_v62 = vpop.eup %4959  ;;  %v7411_v42 = vmul.f32 0.5, %v7143_v11  ;;  %v2827_v61 = vadd.f32 %v2763_v13, %v7158_v44  ;;  %v2733_v10 = vmul.f32 %v7261_v5, %v7214_v57  ;;  %v2611_v35 = vmul.f32 0.044715, %v7392_v55 }
 0x2b6   : > { %8845 = vst [vmem:[#allocation13_spill] sm:$0xff] %v7400_v28  ;;  %v3141_v26 = vsel %vm3101_vm1, %v7400_v28, 0.0  ;;  %v2985_v47 = vadd.f32 1.0, %v4960_v62  ;;  %4969 = vtanh.f32 %v2892_v32  ;;  %v2798_v4 = vadd.f32 %v2734_v18, %v7190_v49 }
 0x2b7   : > { %3142 = vadd.xlane.f32.xlu1 %v3141_v26  ;;  %v2891_v56 = vmul.f32 0.7978846, %v2827_v61  ;;  %v2797_v8 = vadd.f32 %v2733_v10, %v7214_v57  ;;  %v2766_v11 = vmul.f32 %v7250_v24, %v7196_v51  ;;  %v2644_v5 = vmul.f32 0.044715, %v7395_v20 }
 0x2b8   : > { %v4962_v13 = vpop.eup %4961  ;;  %v7424_v23 = vmul.f32 %v2985_v47, %v7303_v25  ;;  %v2643_v62 = vmul.f32 0.044715, %v7403_v41  ;;  %v2862_v32 = vmul.f32 0.7978846, %v2798_v4  ;;  %v2765_v61 = vmul.f32 %v7276_v29, %v7223_v40 }
 0x2b9   : > { %v3018_v18 = vadd.f32 1.0, %v4962_v13  ;;  %4971 = vtanh.f32 %v2891_v56  ;;  %v2861_v26 = vmul.f32 0.7978846, %v2797_v8  ;;  %v2830_v47 = vadd.f32 %v2766_v11, %v7196_v51 }
 0x2ba   : > { %8846 = vst [vmem:[#allocation14_spill] sm:$0xff] %v7424_v23  ;;  %v4552_v28 = vpop.f32.mrf.mxu0  ;;  %v4964_v10 = vpop.eup %4963  ;;  %v3138_v24 = vsel %vm3101_vm1, %v7424_v23, 0.0  ;;  %4973 = vtanh.f32 %v2862_v32  ;;  %v7443_v29 = vmul.f32 %v2611_v35, %v7392_v55  ;;  %v7446_v13 = vmul.f32 %v2644_v5, %v7395_v20 }
 0x2bb   : > { %v4600_v38 = vpop.f32.mrf.mxu1  ;;  %v7433_v25 = vadd.f32 %v4552_v28, %v6860_v36  ;;  %3139 = vadd.xlane.f32.xlu0 %v3138_v24  ;;  %v7437_v4 = vmul.f32 %v3018_v18, %v7346_v58  ;;  %v3017_v56 = vadd.f32 1.0, %v4964_v10  ;;  %4975 = vtanh.f32 %v2861_v26 }
 0x2bc   : > { %v7440_v8 = vadd.f32 %v4600_v38, %v6860_v36  ;;  %v7449_v28 = vmul.f32 0.5, %v7158_v44  ;;  %v2326_v32 = vpop.f32.mrf.mxu0  ;;  %v2894_v11 = vmul.f32 0.7978846, %v2830_v47  ;;  %v7457_v38 = vmul.f32 0.5, %v7190_v49 }
 0x2bd   : > { %8847 = vst [vmem:[#allocation15_spill] sm:$0xff] %v7437_v4  ;;  %v4966_v24 = vpop.eup %4965  ;;  %v3237_v58 = vsel %vm3101_vm1, %v7437_v4, 0.0  ;;  %v7454_v18 = vmul.f32 %v3017_v56, %v7359_v3  ;;  %v2829_v35 = vadd.f32 %v2765_v61, %v7223_v40  ;;  %v7461_v26 = vmul.f32 %v2643_v62, %v7403_v41  ;;  %v2486_v10 = vpop.f32.mrf.mxu1 }
 0x2be   : > { %3238 = vadd.xlane.f32.xlu1 %v3237_v58  ;;  %v2988_v5 = vadd.f32 1.0, %v4966_v24  ;;  %v2614_v44 = vmul.f32 0.044715, %v7433_v25  ;;  %4977 = vtanh.f32 %v2894_v11  ;;  %v7467_v3 = vadd.f32 %v2326_v32, %v6860_v36 }
 0x2bf   : > { %8848 = vst [vmem:[#allocation16_spill] sm:$0xff] %v7454_v18  ;;  %v4968_v47 = vpop.eup %4967  ;;  %v3234_v4 = vsel %vm3101_vm1, %v7454_v18, 0.0  ;;  %v2646_v49 = vmul.f32 0.044715, %v7440_v8  ;;  %v2893_v56 = vmul.f32 0.7978846, %v2829_v35  ;;  %v2736_v11 = vmul.f32 %v7299_v30, %v7238_v37 }
 0x2c0   : > { %3235 = vadd.xlane.f32.xlu0 %v3234_v4  ;;  %v7471_v61 = vmul.f32 %v2988_v5, %v7372_v59  ;;  %v2987_v62 = vadd.f32 1.0, %v4968_v47  ;;  %v2541_v24 = vmul.f32 0.5, %v7214_v57  ;;  %v7477_v23 = vmul.f32 0.5, %v7196_v51 }
 0x2c1   : > { %v7480_v32 = vadd.f32 %v2486_v10, %v6860_v36  ;;  %v7483_v18 = vmul.f32 0.5, %v7223_v40  ;;  %4979 = vtanh.f32 %v2893_v56  ;;  %v2800_v57 = vadd.f32 %v2736_v11, %v7238_v37 }
 0x2c2   : > { %8849 = vst [vmem:[#allocation17_spill] sm:$0xff] %v7471_v61  ;;  %v4555_v58 = vpop.f32.mrf.mxu0  ;;  %v3147_v59 = vsel %vm3101_vm1, %v7471_v61, 0.0  ;;  %v7488_v4 = vmul.f32 %v2987_v62, %v7386_v39  ;;  %v2735_v30 = vmul.f32 %v7324_v33, %v7265_v34  ;;  %v7494_v35 = vmul.f32 %v2614_v44, %v7433_v25 }
 0x2c3   : > { %v4970_v51 = vpop.eup %4969  ;;  %3148 = vadd.xlane.f32.xlu1 %v3147_v59  ;;  %v2613_v40 = vmul.f32 0.044715, %v7467_v3  ;;  %v7498_v5 = vmul.f32 %v2646_v49, %v7440_v8  ;;  %v2768_v10 = vmul.f32 %v7310_v17, %v7254_v15  ;;  %v2864_v56 = vmul.f32 0.7978846, %v2800_v57 }
 0x2c4   : > { %8850 = vst [vmem:[#allocation18_spill] sm:$0xff] %v7488_v4  ;;  %v3144_v39 = vsel %vm3101_vm1, %v7488_v4, 0.0  ;;  %v3020_v47 = vadd.f32 1.0, %v4970_v51  ;;  %v2799_v33 = vadd.f32 %v2735_v30, %v7265_v34  ;;  %v2336_v62 = vpop.f32.mrf.mxu0  ;;  %v2645_v44 = vmul.f32 0.044715, %v7480_v32 }
 0x2c5   : > { %3145 = vadd.xlane.f32.xlu0 %v3144_v39  ;;  %v7507_v11 = vmul.f32 0.5, %v7238_v37  ;;  %v7510_v49 = vadd.f32 %v4555_v58, %v6860_v36  ;;  %v2832_v59 = vadd.f32 %v2768_v10, %v7254_v15  ;;  %4981 = vtanh.f32 %v2864_v56 }
 0x2c6   : > { %v4972_v17 = vpop.eup %4971  ;;  %v7514_v61 = vmul.f32 %v3020_v47, %v7411_v42  ;;  %v2863_v57 = vmul.f32 0.7978846, %v2799_v33  ;;  %v2767_v30 = vmul.f32 %v7327_v52, %v7268_v22  ;;  %v7519_v37 = vmul.f32 %v2613_v40, %v7467_v3 }
 0x2c7   : > { %v4974_v39 = vpop.eup %4973  ;;  %v3019_v4 = vadd.f32 1.0, %v4972_v17  ;;  %v7522_v58 = vadd.f32 %v2336_v62, %v6860_v36  ;;  %v2896_v27 = vmul.f32 0.7978846, %v2832_v59  ;;  %v7531_v40 = vmul.f32 %v2645_v44, %v7480_v32 }
 0x2c8   : > { %v4603_v51 = vpop.f32.mrf.mxu1  ;;  %v4976_v10 = vpop.eup %4975  ;;  %v3243_v42 = vsel %vm3101_vm1, %v7514_v61, 0.0  ;;  %v2990_v47 = vadd.f32 1.0, %v4974_v39  ;;  %4983 = vtanh.f32 %v2863_v57  ;;  %v2831_v56 = vadd.f32 %v2767_v30, %v7268_v22 }
 0x2c9   : > { %3244 = vadd.xlane.f32.xlu1 %v3243_v42  ;;  %v7528_v52 = vmul.f32 %v3019_v4, %v7449_v28  ;;  %v2989_v33 = vadd.f32 1.0, %v4976_v10  ;;  %4985 = vtanh.f32 %v2896_v27  ;;  %v2616_v17 = vmul.f32 0.044715, %v7510_v49 }
 0x2ca   : > { %v2496_v62 = vpop.f32.mrf.mxu1  ;;  %v7534_v59 = vmul.f32 %v2990_v47, %v7457_v38  ;;  %v7538_v39 = vadd.f32 %v4603_v51, %v6860_v36  ;;  %v2895_v57 = vmul.f32 0.7978846, %v2831_v56  ;;  %v2615_v44 = vmul.f32 0.044715, %v7522_v58 }
 0x2cb   : > { %8851 = vst [vmem:[#allocation19_spill] sm:$0xff] %v7528_v52  ;;  %v4978_v30 = vpop.eup %4977  ;;  %v3240_v28 = vsel %vm3101_vm1, %v7528_v52, 0.0  ;;  %v7542_v4 = vmul.f32 %v2989_v33, %v2541_v24  ;;  %v2738_v27 = vmul.f32 %v7356_v50, %v7306_v31  ;;  %v7550_v51 = vadd.f32 %v2496_v62, %v6860_v36 }
 0x2cc   : > { %8852 = vst [vmem:[#allocation20_spill] sm:$0xff] %v7534_v59  ;;  %3241 = vadd.xlane.f32.xlu0 %v3240_v28  ;;  %v3153_v38 = vsel %vm3101_vm1, %v7534_v59, 0.0  ;;  %v3022_v10 = vadd.f32 1.0, %v4978_v30  ;;  %4987 = vtanh.f32 %v2895_v57  ;;  %v2543_v24 = vmul.f32 0.5, %v7265_v34 }
 0x2cd   : > { %8853 = vst [vmem:[#allocation21_spill] sm:$0xff] %v7542_v4  ;;  %3154 = vadd.xlane.f32.xlu1 %v3153_v38  ;;  %v3150_v42 = vsel %vm3101_vm1, %v7542_v4, 0.0  ;;  %v2802_v47 = vadd.f32 %v2738_v27, %v7306_v31  ;;  %v2737_v50 = vmul.f32 %v7366_v60, %v7313_v0  ;;  %v7562_v62 = vmul.f32 %v2616_v17, %v7510_v49 }
 0x2ce   : > { %v4980_v33 = vpop.eup %4979  ;;  %v7559_v28 = vmul.f32 %v3022_v10, %v7477_v23  ;;  %v2648_v57 = vmul.f32 0.044715, %v7538_v39  ;;  %v2576_v30 = vmul.f32 0.5, %v7254_v15  ;;  %v2770_v27 = vmul.f32 %v7369_v6, %v7316_v45 }
 0x2cf   : > { %v4558_v56 = vpop.f32.mrf.mxu0  ;;  %v3021_v38 = vadd.f32 1.0, %v4980_v33  ;;  %v2866_v4 = vmul.f32 0.7978846, %v2802_v47  ;;  %v2801_v34 = vadd.f32 %v2737_v50, %v7313_v0  ;;  %v7572_v23 = vmul.f32 %v2615_v44, %v7522_v58 }
 0x2d0   : > { %8854 = vst [vmem:[#allocation22_spill] sm:$0xff] %v7559_v28  ;;  %3151 = vadd.xlane.f32.xlu0 %v3150_v42  ;;  %v3249_v60 = vsel %vm3101_vm1, %v7559_v28, 0.0  ;;  %v2647_v17 = vmul.f32 0.044715, %v7550_v51  ;;  %v2575_v10 = vmul.f32 0.5, %v7268_v22  ;;  %v7580_v50 = vmul.f32 0.5, %v7306_v31 }
 0x2d1   : > { %v2346_v59 = vpop.f32.mrf.mxu0  ;;  %3250 = vadd.xlane.f32.xlu1 %v3249_v60  ;;  %v7577_v47 = vmul.f32 %v3021_v38, %v7483_v18  ;;  %4989 = vtanh.f32 %v2866_v4  ;;  %v2865_v6 = vmul.f32 0.7978846, %v2801_v34  ;;  %v7583_v42 = vmul.f32 %v2648_v57, %v7538_v39 }
 0x2d2   : > { %v4606_v15 = vpop.f32.mrf.mxu1  ;;  %v7586_v44 = vmul.f32 0.5, %v7313_v0  ;;  %v2834_v33 = vadd.f32 %v2770_v27, %v7316_v45  ;;  %v2769_v60 = vmul.f32 %v7382_v46, %v7330_v7  ;;  %v4982_v28 = vpop.eup %4981  ;;  %v7594_v31 = vadd.f32 %v4558_v56, %v6860_v36 }
 0x2d3   : > { %8855 = vst [vmem:[#allocation23_spill] sm:$0xff] %v7577_v47  ;;  %v3246_v18 = vsel %vm3101_vm1, %v7577_v47, 0.0  ;;  %4991 = vtanh.f32 %v2865_v6  ;;  %v7597_v4 = vadd.f32 %v2346_v59, %v6860_v36  ;;  %v2992_v0 = vadd.f32 1.0, %v4982_v28 }
 0x2d4   : > { %v2506_v22 = vpop.f32.mrf.mxu1  ;;  %3247 = vadd.xlane.f32.xlu0 %v3246_v18  ;;  %v7600_v57 = vmul.f32 %v2647_v17, %v7550_v51  ;;  %v2898_v38 = vmul.f32 0.7978846, %v2834_v33  ;;  %v2833_v34 = vadd.f32 %v2769_v60, %v7330_v7  ;;  %v7604_v27 = vadd.f32 %v4606_v15, %v6860_v36 }
 0x2d5   : > { %v4984_v46 = vpop.eup %4983  ;;  %v7607_v47 = vmul.f32 0.5, %v7316_v45  ;;  %v7610_v56 = vadd.f32 %v2506_v22, %v6860_v36  ;;  %v2740_v59 = vmul.f32 %v7408_v48, %v7353_v43  ;;  %v7615_v17 = vmul.f32 %v2992_v0, %v7507_v11 }
 0x2d6   : > { %v4986_v28 = vpop.eup %4985  ;;  %v2991_v6 = vadd.f32 1.0, %v4984_v46  ;;  %4993 = vtanh.f32 %v2898_v38  ;;  %v2897_v33 = vmul.f32 0.7978846, %v2833_v34  ;;  %v2618_v15 = vmul.f32 0.044715, %v7594_v31 }
 0x2d7   : > { %v3024_v60 = vadd.f32 1.0, %v4986_v28  ;;  %v2617_v18 = vmul.f32 0.044715, %v7597_v4  ;;  %v2804_v45 = vadd.f32 %v2740_v59, %v7353_v43  ;;  %v3159_v22 = vsel %vm3101_vm1, %v7615_v17, 0.0 }
 0x2d8   : > { %v7622_v52 = vmul.f32 %v2991_v6, %v2543_v24  ;;  %4995 = vtanh.f32 %v2897_v33  ;;  %v2739_v48 = vmul.f32 %v7443_v29, %v7392_v55  ;;  %3160 = vadd.xlane.f32.xlu1 %v3159_v22  ;;  %v2650_v38 = vmul.f32 0.044715, %v7604_v27 }
 0x2d9   : > { %v4988_v11 = vpop.eup %4987  ;;  %v7626_v0 = vmul.f32 %v3024_v60, %v2576_v30  ;;  %v2868_v34 = vmul.f32 0.7978846, %v2804_v45  ;;  %v2772_v46 = vmul.f32 %v7446_v13, %v7395_v20  ;;  %v2649_v24 = vmul.f32 0.044715, %v7610_v56 }
 0x2da   : > { %v3156_v59 = vsel %vm3101_vm1, %v7622_v52, 0.0  ;;  %v3023_v28 = vadd.f32 1.0, %v4988_v11  ;;  %v2803_v6 = vadd.f32 %v2739_v48, %v7392_v55  ;;  %v2771_v60 = vmul.f32 %v7461_v26, %v7403_v41 }
 0x2db   : > { %8856 = vst [vmem:[#allocation24_spill] sm:$0xff] %v7626_v0  ;;  %3157 = vadd.xlane.f32.xlu0 %v3156_v59  ;;  %v3255_v29 = vsel %vm3101_vm1, %v7626_v0, 0.0  ;;  %4997 = vtanh.f32 %v2868_v34  ;;  %v2836_v33 = vadd.f32 %v2772_v46, %v7395_v20  ;;  %v7643_v45 = vmul.f32 %v2618_v15, %v7594_v31 }
 0x2dc   : > { %v7640_v13 = vmul.f32 %v3023_v28, %v2575_v10  ;;  %v2577_v22 = vmul.f32 0.5, %v7330_v7  ;;  %v2867_v11 = vmul.f32 0.7978846, %v2803_v6  ;;  %3256 = vadd.xlane.f32.xlu1 %v3255_v29  ;;  %v7647_v48 = vmul.f32 %v2617_v18, %v7597_v4 }
 0x2dd   : > { %v4561_v30 = vpop.f32.mrf.mxu0  ;;  %v2900_v34 = vmul.f32 0.7978846, %v2836_v33  ;;  %v2835_v0 = vadd.f32 %v2771_v60, %v7403_v41  ;;  %v2742_v46 = vmul.f32 %v7494_v35, %v7433_v25  ;;  %v7655_v15 = vmul.f32 %v2650_v38, %v7604_v27 }
 0x2de   : > { %v4609_v59 = vpop.f32.mrf.mxu1  ;;  %v4990_v26 = vpop.eup %4989  ;;  %v3252_v10 = vsel %vm3101_vm1, %v7640_v13, 0.0  ;;  %v7658_v7 = vadd.f32 %v4561_v30, %v6860_v36  ;;  %4999 = vtanh.f32 %v2867_v11  ;;  %v7661_v28 = vmul.f32 %v2649_v24, %v7610_v56 }
 0x2df   : > { %3253 = vadd.xlane.f32.xlu0 %v3252_v10  ;;  %v2994_v18 = vadd.f32 1.0, %v4990_v26  ;;  %v2548_v6 = vmul.f32 0.5, %v7353_v43  ;;  %5001 = vtanh.f32 %v2900_v34  ;;  %v7665_v29 = vmul.f32 0.5, %v7392_v55  ;;  %v2356_v33 = vpop.f32.mrf.mxu0 }
 0x2e0   : > { %v4992_v35 = vpop.eup %4991  ;;  %v7668_v38 = vadd.f32 %v4609_v59, %v6860_v36  ;;  %v2899_v60 = vmul.f32 0.7978846, %v2835_v0  ;;  %v2806_v30 = vadd.f32 %v2742_v46, %v7433_v25  ;;  %v7675_v24 = vmul.f32 0.5, %v7395_v20  ;;  %v2516_v34 = vpop.f32.mrf.mxu1 }
 0x2e1   : > { %v7672_v11 = vmul.f32 %v2994_v18, %v7580_v50  ;;  %v2993_v26 = vadd.f32 1.0, %v4992_v35  ;;  %v7678_v43 = vmul.f32 0.5, %v7403_v41  ;;  %v2620_v55 = vmul.f32 0.044715, %v7658_v7 }
 0x2e2   : > { %5003 = vtanh.f32 %v2899_v60  ;;  %v7682_v59 = vmul.f32 0.5, %v7433_v25  ;;  %v2870_v0 = vmul.f32 0.7978846, %v2806_v30  ;;  %v7690_v20 = vadd.f32 %v2356_v33, %v6860_v36 }
 0x2e3   : > { %v4994_v10 = vpop.eup %4993  ;;  %v3165_v50 = vsel %vm3101_vm1, %v7672_v11, 0.0  ;;  %v7687_v46 = vmul.f32 %v2993_v26, %v7586_v44  ;;  %v2741_v41 = vmul.f32 %v7519_v37, %v7467_v3  ;;  %v2652_v35 = vmul.f32 0.044715, %v7668_v38 }
 0x2e4   : > { %3166 = vadd.xlane.f32.xlu1 %v3165_v50  ;;  %v3026_v18 = vadd.f32 1.0, %v4994_v10  ;;  %5005 = vtanh.f32 %v2870_v0  ;;  %v2774_v25 = vmul.f32 %v7498_v5, %v7440_v8  ;;  %v7700_v44 = vadd.f32 %v2516_v34, %v6860_v36 }
 0x2e5   : > { %8857 = vst [vmem:[#allocation25_spill] sm:$0xff] %v7687_v46  ;;  %v4996_v60 = vpop.eup %4995  ;;  %v3162_v30 = vsel %vm3101_vm1, %v7687_v46, 0.0  ;;  %v2805_v33 = vadd.f32 %v2741_v41, %v7467_v3  ;;  %v2773_v37 = vmul.f32 %v7531_v40, %v7480_v32  ;;  %v7709_v10 = vmul.f32 %v2620_v55, %v7658_v7 }
 0x2e6   : > { %3163 = vadd.xlane.f32.xlu0 %v3162_v30  ;;  %v7706_v26 = vmul.f32 %v3026_v18, %v7607_v47  ;;  %v3025_v0 = vadd.f32 1.0, %v4996_v60  ;;  %v2838_v5 = vadd.f32 %v2774_v25, %v7440_v8  ;;  %v2619_v50 = vmul.f32 0.044715, %v7690_v20 }
 0x2e7   : > { %v2869_v46 = vmul.f32 0.7978846, %v2805_v33  ;;  %v2837_v36 = vadd.f32 %v2773_v37, %v7480_v32  ;;  %v2744_v34 = vmul.f32 %v7562_v62, %v7510_v49  ;;  %v2743_v55 = vmul.f32 %v7572_v23, %v7522_v58 }
 0x2e8   : > { %v4998_v41 = vpop.eup %4997  ;;  %v3261_v40 = vsel %vm3101_vm1, %v7706_v26, 0.0  ;;  %v7718_v47 = vmul.f32 %v3025_v0, %v2577_v22  ;;  %v2902_v18 = vmul.f32 0.7978846, %v2838_v5  ;;  %v7726_v62 = vmul.f32 %v2652_v35, %v7668_v38 }
 0x2e9   : > { %3262 = vadd.xlane.f32.xlu1 %v3261_v40  ;;  %v2996_v25 = vadd.f32 1.0, %v4998_v41  ;;  %5007 = vtanh.f32 %v2869_v46  ;;  %v2901_v60 = vmul.f32 0.7978846, %v2837_v36  ;;  %v2808_v30 = vadd.f32 %v2744_v34, %v7510_v49 }
 0x2ea   : > { %v3258_v33 = vsel %vm3101_vm1, %v7718_v47, 0.0  ;;  %5009 = vtanh.f32 %v2902_v18  ;;  %v2807_v22 = vadd.f32 %v2743_v55, %v7522_v58  ;;  %v2776_v46 = vmul.f32 %v7583_v42, %v7538_v39 }
 0x2eb   : > { %v5000_v37 = vpop.eup %4999  ;;  %3259 = vadd.xlane.f32.xlu0 %v3258_v33  ;;  %v7729_v0 = vmul.f32 %v2996_v25, %v2548_v6  ;;  %5011 = vtanh.f32 %v2901_v60  ;;  %v2872_v23 = vmul.f32 0.7978846, %v2808_v30  ;;  %v2651_v34 = vmul.f32 0.044715, %v7700_v44 }
 0x2ec   : > { %v5002_v5 = vpop.eup %5001  ;;  %v2995_v36 = vadd.f32 1.0, %v5000_v37  ;;  %v2871_v41 = vmul.f32 0.7978846, %v2807_v22  ;;  %v2775_v35 = vmul.f32 %v7600_v57, %v7550_v51  ;;  %v2840_v6 = vadd.f32 %v2776_v46, %v7538_v39 }
 0x2ed   : > { %v3171_v40 = vsel %vm3101_vm1, %v7729_v0, 0.0  ;;  %v3028_v18 = vadd.f32 1.0, %v5002_v5  ;;  %5013 = vtanh.f32 %v2872_v23  ;;  %v2683_v42 = vmul.f32 %v2619_v50, %v7690_v20 }
 0x2ee   : > { %3172 = vadd.xlane.f32.xlu1 %v3171_v40  ;;  %v7740_v55 = vmul.f32 %v2995_v36, %v7665_v29  ;;  %5015 = vtanh.f32 %v2871_v41  ;;  %v2839_v25 = vadd.f32 %v2775_v35, %v7550_v51  ;;  %v2549_v57 = vmul.f32 0.5, %v7467_v3 }
 0x2ef   : > { %v5004_v60 = vpop.eup %5003  ;;  %v7745_v30 = vmul.f32 %v3028_v18, %v7675_v24  ;;  %v2904_v33 = vmul.f32 0.7978846, %v2840_v6  ;;  %v2746_v22 = vmul.f32 %v7643_v45, %v7594_v31  ;;  %v2745_v50 = vmul.f32 %v7647_v48, %v7597_v4 }
 0x2f0   : > { %v3168_v37 = vsel %vm3101_vm1, %v7740_v55, 0.0  ;;  %v3027_v29 = vadd.f32 1.0, %v5004_v60  ;;  %v2903_v23 = vmul.f32 0.7978846, %v2839_v25  ;;  %v2715_v5 = vmul.f32 %v2651_v34, %v7700_v44 }
 0x2f1   : > { %v5006_v46 = vpop.eup %5005  ;;  %3169 = vadd.xlane.f32.xlu0 %v3168_v37  ;;  %v3267_v24 = vsel %vm3101_vm1, %v7745_v30, 0.0  ;;  %5017 = vtanh.f32 %v2904_v33  ;;  %v2810_v3 = vadd.f32 %v2746_v22, %v7594_v31  ;;  %v2809_v41 = vadd.f32 %v2745_v50, %v7597_v4 }
 0x2f2   : > { %3268 = vadd.xlane.f32.xlu1 %v3267_v24  ;;  %v7759_v45 = vmul.f32 %v3027_v29, %v7678_v43  ;;  %v2998_v36 = vadd.f32 1.0, %v5006_v46  ;;  %5019 = vtanh.f32 %v2903_v23  ;;  %v2582_v48 = vmul.f32 0.5, %v7440_v8 }
 0x2f3   : > { %v2874_v35 = vmul.f32 0.7978846, %v2810_v3  ;;  %v2778_v40 = vmul.f32 %v7655_v15, %v7604_v27  ;;  %v2777_v34 = vmul.f32 %v7661_v28, %v7610_v56  ;;  %v2581_v43 = vmul.f32 0.5, %v7480_v32 }
 0x2f4   : > { %v3264_v18 = vsel %vm3101_vm1, %v7759_v45, 0.0  ;;  %v7770_v6 = vmul.f32 %v2998_v36, %v7682_v59  ;;  %v2873_v25 = vmul.f32 0.7978846, %v2809_v41  ;;  %v2748_v15 = vmul.f32 %v7709_v10, %v7658_v7 }
 0x2f5   : > { %3265 = vadd.xlane.f32.xlu0 %v3264_v18  ;;  %5021 = vtanh.f32 %v2874_v35  ;;  %v2842_v8 = vadd.f32 %v2778_v40, %v7604_v27  ;;  %v2841_v60 = vadd.f32 %v2777_v34, %v7610_v56  ;;  %v2552_v22 = vmul.f32 0.5, %v7510_v49 }
 0x2f6   : > { %v5008_v33 = vpop.eup %5007  ;;  %v3177_v28 = vsel %vm3101_vm1, %v7770_v6, 0.0  ;;  %5023 = vtanh.f32 %v2873_v25  ;;  %v2747_v59 = vmul.f32 %v2683_v42, %v7690_v20  ;;  %v2812_v50 = vadd.f32 %v2748_v15, %v7658_v7 }
 0x2f7   : > { %v5010_v32 = vpop.eup %5009  ;;  %3178 = vadd.xlane.f32.xlu1 %v3177_v28  ;;  %v2997_v37 = vadd.f32 1.0, %v5008_v33  ;;  %v2906_v29 = vmul.f32 0.7978846, %v2842_v8  ;;  %v2905_v23 = vmul.f32 0.7978846, %v2841_v60  ;;  %v2551_v10 = vmul.f32 0.5, %v7522_v58 }
 0x2f8   : > { %v5012_v46 = vpop.eup %5011  ;;  %v3030_v24 = vadd.f32 1.0, %v5010_v32  ;;  %v2811_v3 = vadd.f32 %v2747_v59, %v7690_v20  ;;  %v2780_v36 = vmul.f32 %v7726_v62, %v7668_v38  ;;  %v2876_v42 = vmul.f32 0.7978846, %v2812_v50 }
 0x2f9   : > { %v7786_v49 = vmul.f32 %v2997_v37, %v2549_v57  ;;  %v3029_v41 = vadd.f32 1.0, %v5012_v46  ;;  %5025 = vtanh.f32 %v2906_v29  ;;  %v2779_v59 = vmul.f32 %v2715_v5, %v7700_v44 }
 0x2fa   : > { %v5014_v35 = vpop.eup %5013  ;;  %v7788_v40 = vmul.f32 %v3030_v24, %v2582_v48  ;;  %5027 = vtanh.f32 %v2905_v23  ;;  %v2875_v34 = vmul.f32 0.7978846, %v2811_v3  ;;  %v2844_v18 = vadd.f32 %v2780_v36, %v7668_v38 }
 0x2fb   : > { %v5016_v25 = vpop.eup %5015  ;;  %v3174_v58 = vsel %vm3101_vm1, %v7786_v49, 0.0  ;;  %v7793_v8 = vmul.f32 %v3029_v41, %v2581_v43  ;;  %v3000_v60 = vadd.f32 1.0, %v5014_v35  ;;  %5029 = vtanh.f32 %v2876_v42 }
 0x2fc   : > { %3175 = vadd.xlane.f32.xlu0 %v3174_v58  ;;  %v3273_v57 = vsel %vm3101_vm1, %v7788_v40, 0.0  ;;  %v2999_v15 = vadd.f32 1.0, %v5016_v25  ;;  %5031 = vtanh.f32 %v2875_v34  ;;  %v2908_v48 = vmul.f32 0.7978846, %v2844_v18 }
 0x2fd   : > { %v3107_v62 = vpop.xlane.xlu1 %3106  ;;  %3274 = vadd.xlane.f32.xlu1 %v3273_v57  ;;  %v3270_v33 = vsel %vm3101_vm1, %v7793_v8, 0.0  ;;  %v7799_v28 = vmul.f32 %v3000_v60, %v2552_v22  ;;  %v2584_v50 = vmul.f32 0.5, %v7538_v39  ;;  %v2843_v24 = vadd.f32 %v2779_v59, %v7700_v44 }
 0x2fe   : > { %v5018_v32 = vpop.eup %5017  ;;  %v7804_v37 = vmul.f32 %v2999_v15, %v2551_v10  ;;  %5033 = vtanh.f32 %v2908_v48  ;;  %v2583_v22 = vmul.f32 0.5, %v7550_v51  ;;  %v2554_v25 = vmul.f32 0.5, %v7594_v31 }
 0x2ff   : > { %v7802_v43 = vpop.xlane.xlu0 %3103  ;;  %v5020_v29 = vpop.eup %5019  ;;  %v3183_v23 = vsel %vm3101_vm1, %v7799_v28, 0.0  ;;  %v3032_v46 = vadd.f32 1.0, %v5018_v32  ;;  %v2907_v41 = vmul.f32 0.7978846, %v2843_v24  ;;  %v2553_v60 = vmul.f32 0.5, %v7597_v4 }
 0x300   : > { %3271 = vadd.xlane.f32.xlu0 %v3270_v33  ;;  %v3031_v5 = vadd.f32 1.0, %v5020_v29  ;;  %v3180_v10 = vsel %vm3101_vm1, %v7804_v37, 0.0  ;;  %v2586_v29 = vmul.f32 0.5, %v7604_v27  ;;  %v2585_v4 = vmul.f32 0.5, %v7610_v56 }
 0x301   : > { %v3203_v3 = vpop.xlane.xlu1 %3202  ;;  %3184 = vadd.xlane.f32.xlu1 %v3183_v23  ;;  %v7813_v36 = vmul.f32 %v3032_v46, %v2584_v50  ;;  %5035 = vtanh.f32 %v2907_v41  ;;  %v2556_v41 = vmul.f32 0.5, %v7658_v7 }
 0x302   : > { %v5022_v35 = vpop.eup %5021  ;;  %v7815_v34 = vmul.f32 %v3031_v5, %v2583_v22 }
 0x303   : > { %v3200_v42 = vpop.xlane.xlu0 %3199  ;;  %v5024_v39 = vpop.eup %5023  ;;  %v3279_v18 = vsel %vm3101_vm1, %v7813_v36, 0.0  ;;  %v3002_v58 = vadd.f32 1.0, %v5022_v35 }
 0x304   : > { %3181 = vadd.xlane.f32.xlu0 %v3180_v10  ;;  %v3001_v57 = vadd.f32 1.0, %v5024_v39  ;;  %v3276_v15 = vsel %vm3101_vm1, %v7815_v34, 0.0 }
 0x305   : > { %v3113_v51 = vpop.xlane.xlu1 %3112  ;;  %3280 = vadd.xlane.f32.xlu1 %v3279_v18  ;;  %v7823_v48 = vmul.f32 %v3002_v58, %v2554_v25  ;;  %v3296_v25 = vmul.f32 0.0625, %v3107_v62  ;;  %v3295_v62 = vmul.f32 0.0625, %v7802_v43 }
 0x306   : > { %v5026_v33 = vpop.eup %5025  ;;  %v7825_v59 = vmul.f32 %v3001_v57, %v2553_v60  ;;  %v2555_v57 = vmul.f32 0.5, %v7690_v20 }
 0x307   : > { %v5028_v32 = vpop.eup %5027  ;;  %v3189_v31 = vsel %vm3101_vm1, %v7823_v48, 0.0  ;;  %v3034_v23 = vadd.f32 1.0, %v5026_v33  ;;  %v3110_v50 = vpop.xlane.xlu0 %3109  ;;  %v7854_v20 = vsub.f32 %v6951_v1, %v3296_v25 }
 0x308   : > { %v5030_v46 = vpop.eup %5029  ;;  %3277 = vadd.xlane.f32.xlu0 %v3276_v15  ;;  %v3033_v24 = vadd.f32 1.0, %v5028_v32  ;;  %v3186_v5 = vsel %vm3101_vm1, %v7825_v59, 0.0  ;;  %v2588_v15 = vmul.f32 0.5, %v7668_v38 }
 0x309   : > { %v5032_v22 = vpop.eup %5031  ;;  %3190 = vadd.xlane.f32.xlu1 %v3189_v31  ;;  %v7833_v10 = vmul.f32 %v3034_v23, %v2586_v29  ;;  %v3004_v35 = vadd.f32 1.0, %v5030_v46  ;;  %v3209_v39 = vpop.xlane.xlu1 %3208  ;;  %v3328_v46 = vmul.f32 0.0625, %v3203_v3  ;;  %v3298_v3 = vmul.f32 0.0625, %v3113_v51 }
 0x30a   : > { %v7836_v18 = vmul.f32 %v3033_v24, %v2585_v4  ;;  %v3003_v27 = vadd.f32 1.0, %v5032_v22  ;;  %v2587_v24 = vmul.f32 0.5, %v7700_v44 }
 0x30b   : > { %v5034_v58 = vpop.eup %5033  ;;  %v3285_v56 = vsel %vm3101_vm1, %v7833_v10, 0.0  ;;  %v7840_v60 = vmul.f32 %v3004_v35, %v2556_v41  ;;  %v3206_v31 = vpop.xlane.xlu0 %3205  ;;  %v3327_v41 = vmul.f32 0.0625, %v3200_v42  ;;  %v7865_v1 = vsub.f32 %v6958_v2, %v3328_v46 }
 0x30c   : > { %3187 = vadd.xlane.f32.xlu0 %v3186_v5  ;;  %v3036_v33 = vadd.f32 1.0, %v5034_v58  ;;  %v3282_v7 = vsel %vm3101_vm1, %v7836_v18, 0.0  ;;  %v7846_v32 = vmul.f32 %v3003_v27, %v2555_v57  ;;  %v7860_v5 = vsub.f32 %v6964_v53, %v3295_v62 }
 0x30d   : > { %3286 = vadd.xlane.f32.xlu1 %v3285_v56  ;;  %v3195_v29 = vsel %vm3101_vm1, %v7840_v60, 0.0  ;;  %v3119_v38 = vpop.xlane.xlu1 %3118  ;;  %v3424_v27 = vmul.f32 %v7854_v20, %v7854_v20  ;;  %v7874_v42 = vsub.f32 %v6970_v12, %v3327_v41  ;;  %v3297_v2 = vmul.f32 0.0625, %v3110_v50 }
 0x30e   : > { %v7851_v23 = vmul.f32 %v3036_v33, %v2588_v15  ;;  %v5036_v4 = vpop.eup %5035  ;;  %v3192_v22 = vsel %vm3101_vm1, %v7846_v32, 0.0  ;;  %v3423_v58 = vmul.f32 %v7860_v5, %v7860_v5  ;;  %v7879_v51 = vsub.f32 %v7001_v21, %v3298_v3 }
 0x30f   : > { %v3035_v43 = vadd.f32 1.0, %v5036_v4  ;;  %v3490_v57 = vsel %vm3101_vm1, %v3424_v27, 0.0  ;;  %v3330_v15 = vmul.f32 0.0625, %v3209_v39  ;;  %v3456_v33 = vmul.f32 %v7865_v1, %v7865_v1 }
 0x310   : > { %3283 = vadd.xlane.f32.xlu0 %v3282_v7  ;;  %v3291_v35 = vsel %vm3101_vm1, %v7851_v23, 0.0  ;;  %v3116_v25 = vpop.xlane.xlu0 %3115  ;;  %v3487_v7 = vsel %vm3101_vm1, %v3423_v58, 0.0  ;;  %v7886_v12 = vsub.f32 %v7011_v54, %v3297_v2  ;;  %v3455_v50 = vmul.f32 %v7874_v42, %v7874_v42 }
 0x311   : > { %3196 = vadd.xlane.f32.xlu1 %v3195_v29  ;;  %v7869_v44 = vmul.f32 %v3035_v43, %v2587_v24  ;;  %v3329_v62 = vmul.f32 0.0625, %v3206_v31  ;;  %v7891_v21 = vsub.f32 %v7015_v63, %v3330_v15  ;;  %v3586_v39 = vsel %vm3101_vm1, %v3456_v33, 0.0 }
 0x312   : > { %v3300_v46 = vmul.f32 0.0625, %v3119_v38  ;;  %v3426_v4 = vmul.f32 %v7879_v51, %v7879_v51  ;;  %v3583_v54 = vsel %vm3101_vm1, %v3455_v50, 0.0  ;;  %v3425_v31 = vmul.f32 %v7886_v12, %v7886_v12 }
 0x313   : > { %v3288_v53 = vsel %vm3101_vm1, %v7869_v44, 0.0  ;;  %v3299_v43 = vmul.f32 0.0625, %v3116_v25 }
 0x314   : > { %3193 = vadd.xlane.f32.xlu0 %v3192_v22  ;;  %v3215_v56 = vpop.xlane.xlu1 %3214  ;;  %v7898_v22 = vsub.f32 %v7023_v14, %v3329_v62  ;;  %v7903_v63 = vsub.f32 %v7057_v16, %v3300_v46  ;;  %v3496_v38 = vsel %vm3101_vm1, %v3426_v4, 0.0  ;;  %v3493_v27 = vsel %vm3101_vm1, %v3425_v31, 0.0  ;;  %v8860_v31 = vld [vmem:[#allocation28_spill] sm:$0xff] }
 0x315   : > { %3292 = vadd.xlane.f32.xlu1 %v3291_v35  ;;  %v3332_v41 = vmul.f32 0.0625, %v3215_v56  ;;  %v3458_v35 = vmul.f32 %v7891_v21, %v7891_v21  ;;  %v7910_v14 = vsub.f32 %v7071_v9, %v3299_v43  ;;  %v8858_v9 = vld [vmem:[#allocation26_spill] sm:$0xff] }
 0x316   : > { %v3212_v29 = vpop.xlane.xlu0 %3211  ;;  %v3457_v25 = vmul.f32 %v7898_v22, %v7898_v22 }
 0x317   : > { %v7915_v58 = vsub.f32 %v7105_v19, %v3332_v41  ;;  %v3592_v2 = vsel %vm3101_vm1, %v3458_v35, 0.0  ;;  %v8859_v19 = vld [vmem:[#allocation27_spill] sm:$0xff]  ;;  %v8861_v35 = vld [vmem:[#allocation29_spill] sm:$0xff] }
 0x318   : > { %3289 = vadd.xlane.f32.xlu0 %v3288_v53  ;;  %v3331_v53 = vmul.f32 0.0625, %v3212_v29  ;;  %v3589_v15 = vsel %vm3101_vm1, %v3457_v25, 0.0 }
 0x319   : > { %3491 = vadd.xlane.f32.xlu1 %v3490_v57  ;;  %v3428_v57 = vmul.f32 %v7903_v63, %v7903_v63  ;;  %v3460_v4 = vmul.f32 %v7915_v58, %v7915_v58 }
 0x31a   : > { %v3125_v24 = vpop.xlane.xlu1 %3124  ;;  %v7922_v33 = vsub.f32 %v8858_v9, %v3331_v53 }
 0x31b   : > { %v3302_v56 = vmul.f32 0.0625, %v3125_v24 }
 0x31c   : > { %3488 = vadd.xlane.f32.xlu0 %v3487_v7  ;;  %v3427_v7 = vmul.f32 %v7910_v14, %v7910_v14 }
 0x31d   : > { %3587 = vadd.xlane.f32.xlu1 %v3586_v39  ;;  %v7927_v29 = vsub.f32 %v8859_v19, %v3302_v56  ;;  %v3502_v39 = vsel %vm3101_vm1, %v3428_v57, 0.0  ;;  %v8862_v56 = vld [vmem:[#allocation30_spill] sm:$0xff] }
 0x31e   : > { %v3122_v3 = vpop.xlane.xlu0 %3121 }
 0x31f   : > { %v3301_v50 = vmul.f32 0.0625, %v3122_v3  ;;  %v3430_v53 = vmul.f32 %v7927_v29, %v7927_v29 }
 0x320   : > { %3584 = vadd.xlane.f32.xlu0 %v3583_v54  ;;  %v3499_v54 = vsel %vm3101_vm1, %v3427_v7, 0.0 }
 0x321   : > { %3497 = vadd.xlane.f32.xlu1 %v3496_v38  ;;  %v3221_v16 = vpop.xlane.xlu1 %3220  ;;  %v7934_v43 = vsub.f32 %v8860_v31, %v3301_v50  ;;  %v3459_v38 = vmul.f32 %v7922_v33, %v7922_v33  ;;  %v8863_v50 = vld [vmem:[#allocation31_spill] sm:$0xff]  ;;  %v3508_v19 = vsel %vm3101_vm1, %v3430_v53, 0.0 }
 0x322   : > { %v3334_v46 = vmul.f32 0.0625, %v3221_v16 }
 0x323   : > { %v3218_v62 = vpop.xlane.xlu0 %3217 }
 0x324   : > { %3494 = vadd.xlane.f32.xlu0 %v3493_v27  ;;  %v3333_v41 = vmul.f32 0.0625, %v3218_v62  ;;  %v7939_v3 = vsub.f32 %v8861_v35, %v3334_v46  ;;  %v3598_v27 = vsel %vm3101_vm1, %v3460_v4, 0.0  ;;  %v8865_v35 = vld [vmem:[#allocation7_spill] sm:$0xff] }
 0x325   : > { %3593 = vadd.xlane.f32.xlu1 %v3592_v2  ;;  %v3595_v2 = vsel %vm3101_vm1, %v3459_v38, 0.0 }
 0x326   : > { %v7946_v57 = vsub.f32 %v8862_v56, %v3333_v41  ;;  %v3462_v46 = vmul.f32 %v7939_v3, %v7939_v3  ;;  %v8866_v56 = vld [vmem:[#allocation8_spill] sm:$0xff] }
 0x327   : > { %v3131_v24 = vpop.xlane.xlu1 %3130 }
 0x328   : > { %3590 = vadd.xlane.f32.xlu0 %v3589_v15  ;;  %v3304_v25 = vmul.f32 0.0625, %v3131_v24  ;;  %v3429_v15 = vmul.f32 %v7934_v43, %v7934_v43  ;;  %v3461_v38 = vmul.f32 %v7946_v57, %v7946_v57 }
 0x329   : > { %3503 = vadd.xlane.f32.xlu1 %v3502_v39 }
 0x32a   : > { %v7951_v62 = vsub.f32 %v8863_v50, %v3304_v25  ;;  %v3505_v24 = vsel %vm3101_vm1, %v3429_v15, 0.0  ;;  %v3604_v25 = vsel %vm3101_vm1, %v3462_v46, 0.0  ;;  %v8867_v46 = vld [vmem:[#allocation9_spill] sm:$0xff] }
 0x32b   : > { %v3128_v16 = vpop.xlane.xlu0 %3127 }
 0x32c   : > { %3500 = vadd.xlane.f32.xlu0 %v3499_v54  ;;  %v3303_v9 = vmul.f32 0.0625, %v3128_v16  ;;  %v8864_v54 = vld [vmem:[#allocation6_spill] sm:$0xff]  ;;  %v3432_v53 = vmul.f32 %v7951_v62, %v7951_v62 }
 0x32d   : > { %3599 = vadd.xlane.f32.xlu1 %v3598_v27  ;;  %v3227_v7 = vpop.xlane.xlu1 %3226 }
 0x32e   : > { %v3336_v39 = vmul.f32 0.0625, %v3227_v7  ;;  %v7958_v31 = vsub.f32 %v8864_v54, %v3303_v9  ;;  %v3514_v50 = vsel %vm3101_vm1, %v3432_v53, 0.0 }
 0x32f   : > { %v3224_v4 = vpop.xlane.xlu0 %3223 }
 0x330   : > { %3596 = vadd.xlane.f32.xlu0 %v3595_v2  ;;  %v3335_v41 = vmul.f32 0.0625, %v3224_v4  ;;  %v7963_v27 = vsub.f32 %v8865_v35, %v3336_v39  ;;  %v3601_v2 = vsel %vm3101_vm1, %v3461_v38, 0.0  ;;  %v3431_v7 = vmul.f32 %v7958_v31, %v7958_v31  ;;  %v8869_v38 = vld [vmem:[#allocation10_spill] sm:$0xff] }
 0x331   : > { %3509 = vadd.xlane.f32.xlu1 %v3508_v19 }
 0x332   : > { %v7970_v15 = vsub.f32 %v8866_v56, %v3335_v41  ;;  %v3464_v39 = vmul.f32 %v7963_v27, %v7963_v27  ;;  %v3511_v54 = vsel %vm3101_vm1, %v3431_v7, 0.0 }
 0x334   : > { %3506 = vadd.xlane.f32.xlu0 %v3505_v24  ;;  %v3137_v16 = vpop.xlane.xlu1 %3136  ;;  %v3463_v35 = vmul.f32 %v7970_v15, %v7970_v15 }
 0x335   : > { %3605 = vadd.xlane.f32.xlu1 %v3604_v25  ;;  %v3306_v9 = vmul.f32 0.0625, %v3137_v16  ;;  %v3610_v25 = vsel %vm3101_vm1, %v3464_v39, 0.0  ;;  %v8872_v39 = vld [vmem:[#allocation12_spill] sm:$0xff] }
 0x336   : > { %v3134_v19 = vpop.xlane.xlu0 %3133 }
 0x337   : > { %v7978_v4 = vsub.f32 %v8867_v46, %v3306_v9  ;;  %v3305_v24 = vmul.f32 0.0625, %v3134_v19 }
 0x338   : > { %3602 = vadd.xlane.f32.xlu0 %v3601_v2  ;;  %v3607_v2 = vsel %vm3101_vm1, %v3463_v35, 0.0 }
 0x339   : > { %8868 = vst [vmem:[#allocation26_spill] sm:$0xff] %v7978_v4  ;;  %3515 = vadd.xlane.f32.xlu1 %v3514_v50  ;;  %v7982_v41 = vsub.f32 %v8869_v38, %v3305_v24  ;;  %v3434_v53 = vmul.f32 %v7978_v4, %v7978_v4  ;;  %v8870_v50 = vld [vmem:[#allocation11_spill] sm:$0xff] }
 0x33b   : > { %v3233_v16 = vpop.xlane.xlu1 %3232  ;;  %v3433_v7 = vmul.f32 %v7982_v41, %v7982_v41  ;;  %v3520_v24 = vsel %vm3101_vm1, %v3434_v53, 0.0 }
 0x33c   : > { %3512 = vadd.xlane.f32.xlu0 %v3511_v54  ;;  %v3338_v56 = vmul.f32 0.0625, %v3233_v16  ;;  %v3230_v9 = vpop.xlane.xlu0 %3229 }
 0x33d   : > { %3611 = vadd.xlane.f32.xlu1 %v3610_v25  ;;  %v3337_v46 = vmul.f32 0.0625, %v3230_v9  ;;  %v3517_v35 = vsel %vm3101_vm1, %v3433_v7, 0.0  ;;  %v8874_v9 = vld [vmem:[#allocation13_spill] sm:$0xff] }
 0x33e   : > { %v7993_v19 = vsub.f32 %v8870_v50, %v3338_v56 }
 0x33f   : > { %v7997_v38 = vsub.f32 %v8872_v39, %v3337_v46 }
 0x340   : > { %8871 = vst [vmem:[#allocation27_spill] sm:$0xff] %v7993_v19  ;;  %3608 = vadd.xlane.f32.xlu0 %v3607_v2  ;;  %v3143_v4 = vpop.xlane.xlu1 %3142  ;;  %v3466_v54 = vmul.f32 %v7993_v19, %v7993_v19 }
 0x341   : > { %8873 = vst [vmem:[#allocation28_spill] sm:$0xff] %v7997_v38  ;;  %v3308_v25 = vmul.f32 0.0625, %v3143_v4  ;;  %3521 = vadd.xlane.f32.xlu1 %v3520_v24  ;;  %v3465_v56 = vmul.f32 %v7997_v38, %v7997_v38  ;;  %v8876_v24 = vld [vmem:[#allocation14_spill] sm:$0xff] }
 0x342   : > { %v3616_v16 = vsel %vm3101_vm1, %v3466_v54, 0.0 }
 0x343   : > { %v8006_v50 = vsub.f32 %v8874_v9, %v3308_v25  ;;  %v3613_v46 = vsel %vm3101_vm1, %v3465_v56, 0.0 }
 0x344   : > { %3518 = vadd.xlane.f32.xlu0 %v3517_v35  ;;  %v3140_v53 = vpop.xlane.xlu0 %3139  ;;  %v8877_v35 = vld [vmem:[#allocation15_spill] sm:$0xff] }
 0x345   : > { %8875 = vst [vmem:[#allocation29_spill] sm:$0xff] %v8006_v50  ;;  %v3307_v2 = vmul.f32 0.0625, %v3140_v53  ;;  %3617 = vadd.xlane.f32.xlu1 %v3616_v16  ;;  %v3436_v4 = vmul.f32 %v8006_v50, %v8006_v50  ;;  %v8879_v53 = vld [vmem:[#allocation16_spill] sm:$0xff] }
 0x347   : > { %v8012_v39 = vsub.f32 %v8876_v24, %v3307_v2  ;;  %v3239_v7 = vpop.xlane.xlu1 %3238  ;;  %v3526_v54 = vsel %vm3101_vm1, %v3436_v4, 0.0 }
 0x348   : > { %v3340_v19 = vmul.f32 0.0625, %v3239_v7  ;;  %3614 = vadd.xlane.f32.xlu0 %v3613_v46 }
 0x349   : > { %v3236_v38 = vpop.xlane.xlu0 %3235  ;;  %3527 = vadd.xlane.f32.xlu1 %v3526_v54  ;;  %v3435_v25 = vmul.f32 %v8012_v39, %v8012_v39 }
 0x34a   : > { %v8018_v16 = vsub.f32 %v8877_v35, %v3340_v19  ;;  %v3339_v56 = vmul.f32 0.0625, %v3236_v38  ;;  %v8881_v19 = vld [vmem:[#allocation17_spill] sm:$0xff] }
 0x34b   : > { %v3523_v9 = vsel %vm3101_vm1, %v3435_v25, 0.0 }
 0x34c   : > { %8878 = vst [vmem:[#allocation30_spill] sm:$0xff] %v8018_v16  ;;  %v8022_v50 = vsub.f32 %v8879_v53, %v3339_v56  ;;  %v3149_v2 = vpop.xlane.xlu1 %3148  ;;  %3524 = vadd.xlane.f32.xlu0 %v3523_v9  ;;  %v3468_v4 = vmul.f32 %v8018_v16, %v8018_v16  ;;  %v8883_v56 = vld [vmem:[#allocation18_spill] sm:$0xff] }
 0x34d   : > { %v3310_v46 = vmul.f32 0.0625, %v3149_v2 }
 0x34e   : > { %8880 = vst [vmem:[#allocation31_spill] sm:$0xff] %v8022_v50  ;;  %v3146_v24 = vpop.xlane.xlu0 %3145  ;;  %v3622_v7 = vsel %vm3101_vm1, %v3468_v4, 0.0  ;;  %v3467_v54 = vmul.f32 %v8022_v50, %v8022_v50 }
 0x34f   : > { %v8030_v35 = vsub.f32 %v8881_v19, %v3310_v46  ;;  %v3309_v38 = vmul.f32 0.0625, %v3146_v24  ;;  %3623 = vadd.xlane.f32.xlu1 %v3622_v7 }
 0x350   : > { %v3619_v25 = vsel %vm3101_vm1, %v3467_v54, 0.0 }
 0x351   : > { %8882 = vst [vmem:[#allocation6_spill] sm:$0xff] %v8030_v35  ;;  %v8034_v53 = vsub.f32 %v8883_v56, %v3309_v38  ;;  %3620 = vadd.xlane.f32.xlu0 %v3619_v25  ;;  %v3438_v9 = vmul.f32 %v8030_v35, %v8030_v35  ;;  %v8886_v56 = vld [vmem:[#allocation19_spill] sm:$0xff] }
 0x352   : > { %v3245_v2 = vpop.xlane.xlu1 %3244 }
 0x353   : > { %8884 = vst [vmem:[#allocation7_spill] sm:$0xff] %v8034_v53  ;;  %v3342_v16 = vmul.f32 0.0625, %v3245_v2  ;;  %v3532_v4 = vsel %vm3101_vm1, %v3438_v9, 0.0  ;;  %v3437_v50 = vmul.f32 %v8034_v53, %v8034_v53  ;;  %v8887_v9 = vld [vmem:[#allocation20_spill] sm:$0xff] }
 0x354   : > { %3533 = vadd.xlane.f32.xlu1 %v3532_v4 }
 0x355   : > { %v8042_v46 = vsub.f32 %v7514_v61, %v3342_v16  ;;  %v3242_v24 = vpop.xlane.xlu0 %3241  ;;  %v3529_v7 = vsel %vm3101_vm1, %v3437_v50, 0.0 }
 0x356   : > { %v3341_v54 = vmul.f32 0.0625, %v3242_v24  ;;  %v3155_v19 = vpop.xlane.xlu1 %3154  ;;  %3530 = vadd.xlane.f32.xlu0 %v3529_v7 }
 0x357   : > { %8885 = vst [vmem:[#allocation8_spill] sm:$0xff] %v8042_v46  ;;  %v3312_v38 = vmul.f32 0.0625, %v3155_v19  ;;  %v3470_v25 = vmul.f32 %v8042_v46, %v8042_v46  ;;  %v8889_v19 = vld [vmem:[#allocation21_spill] sm:$0xff] }
 0x358   : > { %v8048_v2 = vsub.f32 %v8886_v56, %v3341_v54 }
 0x359   : > { %v8051_v35 = vsub.f32 %v8887_v9, %v3312_v38  ;;  %v3152_v4 = vpop.xlane.xlu0 %3151  ;;  %v3628_v61 = vsel %vm3101_vm1, %v3470_v25, 0.0  ;;  %v8890_v38 = vld [vmem:[#allocation22_spill] sm:$0xff] }
 0x35a   : > { %v3311_v16 = vmul.f32 0.0625, %v3152_v4  ;;  %v3251_v53 = vpop.xlane.xlu1 %3250  ;;  %3629 = vadd.xlane.f32.xlu1 %v3628_v61  ;;  %v3469_v50 = vmul.f32 %v8048_v2, %v8048_v2 }
 0x35b   : > { %8888 = vst [vmem:[#allocation9_spill] sm:$0xff] %v8051_v35  ;;  %v3344_v24 = vmul.f32 0.0625, %v3251_v53  ;;  %v3440_v7 = vmul.f32 %v8051_v35, %v8051_v35  ;;  %v8892_v35 = vld [vmem:[#allocation23_spill] sm:$0xff] }
 0x35c   : > { %v8059_v46 = vsub.f32 %v8889_v19, %v3311_v16  ;;  %v3625_v54 = vsel %vm3101_vm1, %v3469_v50, 0.0 }
 0x35d   : > { %v8063_v56 = vsub.f32 %v8890_v38, %v3344_v24  ;;  %3626 = vadd.xlane.f32.xlu0 %v3625_v54  ;;  %v3248_v25 = vpop.xlane.xlu0 %3247  ;;  %v3538_v9 = vsel %vm3101_vm1, %v3440_v7, 0.0 }
 0x35e   : > { %v3343_v4 = vmul.f32 0.0625, %v3248_v25  ;;  %3539 = vadd.xlane.f32.xlu1 %v3538_v9  ;;  %v3439_v53 = vmul.f32 %v8059_v46, %v8059_v46 }
 0x35f   : > { %8891 = vst [vmem:[#allocation10_spill] sm:$0xff] %v8063_v56  ;;  %v3472_v61 = vmul.f32 %v8063_v56, %v8063_v56 }
 0x360   : > { %v8071_v16 = vsub.f32 %v8892_v35, %v3343_v4  ;;  %v3535_v50 = vsel %vm3101_vm1, %v3439_v53, 0.0 }
 0x361   : > { %3536 = vadd.xlane.f32.xlu0 %v3535_v50  ;;  %v3634_v24 = vsel %vm3101_vm1, %v3472_v61, 0.0  ;;  %v3161_v19 = vpop.xlane.xlu1 %3160 }
 0x362   : > { %8893 = vst [vmem:[#allocation11_spill] sm:$0xff] %v8071_v16  ;;  %3635 = vadd.xlane.f32.xlu1 %v3634_v24  ;;  %v3471_v7 = vmul.f32 %v8071_v16, %v8071_v16  ;;  %v3314_v54 = vmul.f32 0.0625, %v3161_v19  ;;  %v8894_v24 = vld [vmem:[#allocation24_spill] sm:$0xff] }
 0x364   : > { %v3158_v38 = vpop.xlane.xlu0 %3157  ;;  %v3631_v25 = vsel %vm3101_vm1, %v3471_v7, 0.0  ;;  %v8079_v9 = vsub.f32 %v7615_v17, %v3314_v54 }
 0x365   : > { %v3313_v56 = vmul.f32 0.0625, %v3158_v38  ;;  %3632 = vadd.xlane.f32.xlu0 %v3631_v25  ;;  %v3257_v35 = vpop.xlane.xlu1 %3256 }
 0x366   : > { %v3346_v53 = vmul.f32 0.0625, %v3257_v35  ;;  %v3442_v61 = vmul.f32 %v8079_v9, %v8079_v9 }
 0x367   : > { %v8082_v4 = vsub.f32 %v7622_v52, %v3313_v56 }
 0x368   : > { %v3254_v50 = vpop.xlane.xlu0 %3253  ;;  %v8087_v16 = vsub.f32 %v8894_v24, %v3346_v53  ;;  %v3544_v7 = vsel %vm3101_vm1, %v3442_v61, 0.0 }
 0x369   : > { %v3345_v19 = vmul.f32 0.0625, %v3254_v50  ;;  %v3441_v17 = vmul.f32 %v8082_v4, %v8082_v4  ;;  %3545 = vadd.xlane.f32.xlu1 %v3544_v7 }
 0x36a   : > { %8895 = vst [vmem:[#allocation12_spill] sm:$0xff] %v8087_v16  ;;  %v3474_v56 = vmul.f32 %v8087_v16, %v8087_v16 }
 0x36b   : > { %v8093_v54 = vsub.f32 %v7640_v13, %v3345_v19  ;;  %v3541_v52 = vsel %vm3101_vm1, %v3441_v17, 0.0  ;;  %v8896_v19 = vld [vmem:[#allocation25_spill] sm:$0xff] }
 0x36c   : > { %3542 = vadd.xlane.f32.xlu0 %v3541_v52  ;;  %v3640_v25 = vsel %vm3101_vm1, %v3474_v56, 0.0 }
 0x36d   : > { %v3167_v38 = vpop.xlane.xlu1 %3166  ;;  %v3473_v35 = vmul.f32 %v8093_v54, %v8093_v54  ;;  %3641 = vadd.xlane.f32.xlu1 %v3640_v25 }
 0x36e   : > { %v3316_v53 = vmul.f32 0.0625, %v3167_v38 }
 0x36f   : > { %v3164_v61 = vpop.xlane.xlu0 %3163  ;;  %v3637_v50 = vsel %vm3101_vm1, %v3473_v35, 0.0 }
 0x370   : > { %v8103_v13 = vsub.f32 %v7672_v11, %v3316_v53  ;;  %v3315_v24 = vmul.f32 0.0625, %v3164_v61  ;;  %3638 = vadd.xlane.f32.xlu0 %v3637_v50 }
 0x372   : > { %v8106_v7 = vsub.f32 %v8896_v19, %v3315_v24  ;;  %v3263_v17 = vpop.xlane.xlu1 %3262  ;;  %v3444_v52 = vmul.f32 %v8103_v13, %v8103_v13 }
 0x373   : > { %v3348_v56 = vmul.f32 0.0625, %v3263_v17 }
 0x374   : > { %v3260_v16 = vpop.xlane.xlu0 %3259  ;;  %v3550_v38 = vsel %vm3101_vm1, %v3444_v52, 0.0  ;;  %v3443_v25 = vmul.f32 %v8106_v7, %v8106_v7 }
 0x375   : > { %v8114_v35 = vsub.f32 %v7706_v26, %v3348_v56  ;;  %v3347_v11 = vmul.f32 0.0625, %v3260_v16  ;;  %3551 = vadd.xlane.f32.xlu1 %v3550_v38 }
 0x376   : > { %v3547_v53 = vsel %vm3101_vm1, %v3443_v25, 0.0 }
 0x377   : > { %v8118_v61 = vsub.f32 %v7718_v47, %v3347_v11  ;;  %v3173_v50 = vpop.xlane.xlu1 %3172  ;;  %3548 = vadd.xlane.f32.xlu0 %v3547_v53  ;;  %v3476_v24 = vmul.f32 %v8114_v35, %v8114_v35 }
 0x378   : > { %v3318_v19 = vmul.f32 0.0625, %v3173_v50 }
 0x379   : > { %v3646_v17 = vsel %vm3101_vm1, %v3476_v24, 0.0  ;;  %v3475_v52 = vmul.f32 %v8118_v61, %v8118_v61 }
 0x37a   : > { %v8126_v26 = vsub.f32 %v7729_v0, %v3318_v19  ;;  %v3170_v16 = vpop.xlane.xlu0 %3169  ;;  %3647 = vadd.xlane.f32.xlu1 %v3646_v17 }
 0x37b   : > { %v3317_v56 = vmul.f32 0.0625, %v3170_v16  ;;  %v3269_v38 = vpop.xlane.xlu1 %3268  ;;  %v3643_v47 = vsel %vm3101_vm1, %v3475_v52, 0.0 }
 0x37c   : > { %v3350_v25 = vmul.f32 0.0625, %v3269_v38  ;;  %3644 = vadd.xlane.f32.xlu0 %v3643_v47  ;;  %v3446_v11 = vmul.f32 %v8126_v26, %v8126_v26 }
 0x37d   : > { %v8132_v53 = vsub.f32 %v7740_v55, %v3317_v56 }
 0x37e   : > { %v8135_v50 = vsub.f32 %v7745_v30, %v3350_v25  ;;  %v3266_v24 = vpop.xlane.xlu0 %3265  ;;  %v3556_v0 = vsel %vm3101_vm1, %v3446_v11, 0.0 }
 0x37f   : > { %v3349_v19 = vmul.f32 0.0625, %v3266_v24  ;;  %3557 = vadd.xlane.f32.xlu1 %v3556_v0  ;;  %v3445_v17 = vmul.f32 %v8132_v53, %v8132_v53 }
 0x380   : > { %v3179_v52 = vpop.xlane.xlu1 %3178  ;;  %v3478_v16 = vmul.f32 %v8135_v50, %v8135_v50 }
 0x381   : > { %v8143_v38 = vsub.f32 %v7759_v45, %v3349_v19  ;;  %v3320_v55 = vmul.f32 0.0625, %v3179_v52  ;;  %v3553_v56 = vsel %vm3101_vm1, %v3445_v17, 0.0 }
 0x382   : > { %3554 = vadd.xlane.f32.xlu0 %v3553_v56  ;;  %v3652_v30 = vsel %vm3101_vm1, %v3478_v16, 0.0 }
 0x383   : > { %v8148_v47 = vsub.f32 %v7770_v6, %v3320_v55  ;;  %3653 = vadd.xlane.f32.xlu1 %v3652_v30  ;;  %v3477_v25 = vmul.f32 %v8143_v38, %v8143_v38 }
 0x385   : > { %8897 = vst [vmem:[#allocation13_spill] sm:$0xff] %v8148_v47  ;;  %v3176_v11 = vpop.xlane.xlu0 %3175  ;;  %v3649_v24 = vsel %vm3101_vm1, %v3477_v25, 0.0  ;;  %v3448_v45 = vmul.f32 %v8148_v47, %v8148_v47 }
 0x386   : > { %v3319_v0 = vmul.f32 0.0625, %v3176_v11  ;;  %v3275_v19 = vpop.xlane.xlu1 %3274  ;;  %3650 = vadd.xlane.f32.xlu0 %v3649_v24 }
 0x387   : > { %v3352_v17 = vmul.f32 0.0625, %v3275_v19  ;;  %v3562_v52 = vsel %vm3101_vm1, %v3448_v45, 0.0 }
 0x388   : > { %v8157_v16 = vsub.f32 %v7786_v49, %v3319_v0  ;;  %3563 = vadd.xlane.f32.xlu1 %v3562_v52 }
 0x389   : > { %v8160_v6 = vsub.f32 %v7788_v40, %v3352_v17  ;;  %v3272_v55 = vpop.xlane.xlu0 %3271 }
 0x38a   : > { %v3351_v56 = vmul.f32 0.0625, %v3272_v55  ;;  %v3185_v30 = vpop.xlane.xlu1 %3184  ;;  %v3447_v25 = vmul.f32 %v8157_v16, %v8157_v16 }
 0x38b   : > { %v3322_v47 = vmul.f32 0.0625, %v3185_v30  ;;  %v3480_v11 = vmul.f32 %v8160_v6, %v8160_v6 }
 0x38c   : > { %v8167_v24 = vsub.f32 %v7793_v8, %v3351_v56  ;;  %v3559_v49 = vsel %vm3101_vm1, %v3447_v25, 0.0 }
 0x38d   : > { %v8171_v45 = vsub.f32 %v7799_v28, %v3322_v47  ;;  %3560 = vadd.xlane.f32.xlu0 %v3559_v49  ;;  %v3182_v40 = vpop.xlane.xlu0 %3181  ;;  %v3658_v0 = vsel %vm3101_vm1, %v3480_v11, 0.0 }
 0x38e   : > { %v3321_v19 = vmul.f32 0.0625, %v3182_v40  ;;  %v3281_v17 = vpop.xlane.xlu1 %3280  ;;  %3659 = vadd.xlane.f32.xlu1 %v3658_v0  ;;  %v3479_v52 = vmul.f32 %v8167_v24, %v8167_v24 }
 0x38f   : > { %v3354_v55 = vmul.f32 0.0625, %v3281_v17  ;;  %v3450_v8 = vmul.f32 %v8171_v45, %v8171_v45 }
 0x390   : > { %v8179_v56 = vsub.f32 %v7804_v37, %v3321_v19  ;;  %v3655_v28 = vsel %vm3101_vm1, %v3479_v52, 0.0 }
 0x391   : > { %v8183_v47 = vsub.f32 %v7813_v36, %v3354_v55  ;;  %3656 = vadd.xlane.f32.xlu0 %v3655_v28  ;;  %v3278_v30 = vpop.xlane.xlu0 %3277  ;;  %v3568_v25 = vsel %vm3101_vm1, %v3450_v8, 0.0 }
 0x392   : > { %v3353_v11 = vmul.f32 0.0625, %v3278_v30  ;;  %v3191_v49 = vpop.xlane.xlu1 %3190  ;;  %3569 = vadd.xlane.f32.xlu1 %v3568_v25  ;;  %v3449_v40 = vmul.f32 %v8179_v56, %v8179_v56 }
 0x393   : > { %v3324_v0 = vmul.f32 0.0625, %v3191_v49  ;;  %v3482_v37 = vmul.f32 %v8183_v47, %v8183_v47 }
 0x394   : > { %v8191_v19 = vsub.f32 %v7815_v34, %v3353_v11  ;;  %v3565_v36 = vsel %vm3101_vm1, %v3449_v40, 0.0 }
 0x395   : > { %v8195_v17 = vsub.f32 %v7823_v48, %v3324_v0  ;;  %3566 = vadd.xlane.f32.xlu0 %v3565_v36  ;;  %v3188_v52 = vpop.xlane.xlu0 %3187  ;;  %v3664_v55 = vsel %vm3101_vm1, %v3482_v37, 0.0 }
 0x396   : > { %v3323_v8 = vmul.f32 0.0625, %v3188_v52  ;;  %v3287_v28 = vpop.xlane.xlu1 %3286  ;;  %3665 = vadd.xlane.f32.xlu1 %v3664_v55  ;;  %v3481_v30 = vmul.f32 %v8191_v19, %v8191_v19 }
 0x397   : > { %v3356_v25 = vmul.f32 0.0625, %v3287_v28  ;;  %v3452_v34 = vmul.f32 %v8195_v17, %v8195_v17 }
 0x398   : > { %v8203_v11 = vsub.f32 %v7825_v59, %v3323_v8  ;;  %v3661_v48 = vsel %vm3101_vm1, %v3481_v30, 0.0 }
 0x399   : > { %v8207_v49 = vsub.f32 %v7833_v10, %v3356_v25  ;;  %3662 = vadd.xlane.f32.xlu0 %v3661_v48  ;;  %v3284_v40 = vpop.xlane.xlu0 %3283  ;;  %v3574_v0 = vsel %vm3101_vm1, %v3452_v34, 0.0 }
 0x39a   : > { %v3355_v37 = vmul.f32 0.0625, %v3284_v40  ;;  %3575 = vadd.xlane.f32.xlu1 %v3574_v0  ;;  %v3197_v36 = vpop.xlane.xlu1 %3196  ;;  %v3451_v52 = vmul.f32 %v8203_v11, %v8203_v11 }
 0x39b   : > { %v3326_v55 = vmul.f32 0.0625, %v3197_v36  ;;  %v3484_v59 = vmul.f32 %v8207_v49, %v8207_v49 }
 0x39c   : > { %v8215_v8 = vsub.f32 %v7836_v18, %v3355_v37  ;;  %v3571_v10 = vsel %vm3101_vm1, %v3451_v52, 0.0 }
 0x39d   : > { %v8219_v28 = vsub.f32 %v7840_v60, %v3326_v55  ;;  %3572 = vadd.xlane.f32.xlu0 %v3571_v10  ;;  %v3194_v30 = vpop.xlane.xlu0 %3193  ;;  %v3670_v25 = vsel %vm3101_vm1, %v3484_v59, 0.0 }
 0x39e   : > { %8898 = vst [vmem:[#allocation14_spill] sm:$0xff] %v8215_v8  ;;  %v3325_v34 = vmul.f32 0.0625, %v3194_v30  ;;  %3671 = vadd.xlane.f32.xlu1 %v3670_v25  ;;  %v3293_v48 = vpop.xlane.xlu1 %3292  ;;  %v3483_v40 = vmul.f32 %v8215_v8, %v8215_v8 }
 0x39f   : > { %8899 = vst [vmem:[#allocation15_spill] sm:$0xff] %v8219_v28  ;;  %v3358_v0 = vmul.f32 0.0625, %v3293_v48  ;;  %v3454_v18 = vmul.f32 %v8219_v28, %v8219_v28 }
 0x3a0   : > { %v8227_v37 = vsub.f32 %v7846_v32, %v3325_v34  ;;  %v3667_v60 = vsel %vm3101_vm1, %v3483_v40, 0.0 }
 0x3a1   : > { %v8231_v36 = vsub.f32 %v7851_v23, %v3358_v0  ;;  %3668 = vadd.xlane.f32.xlu0 %v3667_v60  ;;  %v3290_v52 = vpop.xlane.xlu0 %3289  ;;  %v3580_v55 = vsel %vm3101_vm1, %v3454_v18, 0.0 }
 0x3a2   : > { %8900 = vst [vmem:[#allocation16_spill] sm:$0xff] %v8227_v37  ;;  %v3357_v59 = vmul.f32 0.0625, %v3290_v52  ;;  %3581 = vadd.xlane.f32.xlu1 %v3580_v55  ;;  %v3453_v10 = vmul.f32 %v8227_v37, %v8227_v37  ;;  %v3492_v30 = vpop.xlane.xlu1 %3491 }
 0x3a3   : > { %8901 = vst [vmem:[#allocation17_spill] sm:$0xff] %v8231_v36  ;;  %v3486_v25 = vmul.f32 %v8231_v36, %v8231_v36  ;;  %v3680_v32 = vmul.f32 0.0625, %v3492_v30 }
 0x3a4   : > { %v8239_v34 = vsub.f32 %v7869_v44, %v3357_v59  ;;  %v3577_v23 = vsel %vm3101_vm1, %v3453_v10, 0.0 }
 0x3a5   : > { %3578 = vadd.xlane.f32.xlu0 %v3577_v23  ;;  %v3676_v48 = vsel %vm3101_vm1, %v3486_v25, 0.0  ;;  %v3744_v40 = vadd.f32 1e-05, %v3680_v32  ;;  %v3489_v0 = vpop.xlane.xlu0 %3488 }
 0x3a6   : > { %8902 = vst [vmem:[#allocation18_spill] sm:$0xff] %v8239_v34  ;;  %3677 = vadd.xlane.f32.xlu1 %v3676_v48  ;;  %v3485_v18 = vmul.f32 %v8239_v34, %v8239_v34  ;;  %v3679_v60 = vmul.f32 0.0625, %v3489_v0  ;;  %v3588_v52 = vpop.xlane.xlu1 %3587 }
 0x3a7   : > { %5037 = vrsqrt.f32 %v3744_v40  ;;  %v3712_v55 = vmul.f32 0.0625, %v3588_v52 }
 0x3a8   : > { %v3673_v30 = vsel %vm3101_vm1, %v3485_v18, 0.0  ;;  %v3743_v36 = vadd.f32 1e-05, %v3679_v60 }
 0x3a9   : > { %3674 = vadd.xlane.f32.xlu0 %v3673_v30  ;;  %v3776_v44 = vadd.f32 1e-05, %v3712_v55  ;;  %v3585_v59 = vpop.xlane.xlu0 %3584  ;;  %v5166_v30 = vld [vmem:[%s8636_s3] sm:$0xff] }
 0x3aa   : > { %5039 = vrsqrt.f32 %v3743_v36  ;;  %v3711_v10 = vmul.f32 0.0625, %v3585_v59  ;;  %v3498_v25 = vpop.xlane.xlu1 %3497 }
 0x3ab   : > { %5041 = vrsqrt.f32 %v3776_v44  ;;  %v3682_v32 = vmul.f32 0.0625, %v3498_v25  ;;  %v8903_v44 = vld [vmem:[#allocation5_spill] sm:$0xff] }
 0x3ac   : > { %v3775_v23 = vadd.f32 1e-05, %v3711_v10  ;;  %v8904_v59 = vsub.s32 1, %v8903_v44 }
 0x3ad   : > { %v3746_v48 = vadd.f32 1e-05, %v3682_v32  ;;  %v3495_v37 = vpop.xlane.xlu0 %3494 }
 0x3ae   : > { %5043 = vrsqrt.f32 %v3775_v23  ;;  %v3681_v0 = vmul.f32 0.0625, %v3495_v37  ;;  %v3594_v34 = vpop.xlane.xlu1 %3593  ;;  %v8252_v10 = vrot.slane %v5166_v30, %v8904_v59 }
 0x3af   : > { %5045 = vrsqrt.f32 %v3746_v48  ;;  %v3714_v40 = vmul.f32 0.0625, %v3594_v34  ;;  %v8905_v34 = vsub.s32 2, %v8903_v44 }
 0x3b0   : > { %v3745_v18 = vadd.f32 1e-05, %v3681_v0 }
 0x3b1   : > { %v3778_v60 = vadd.f32 1e-05, %v3714_v40  ;;  %v3591_v52 = vpop.xlane.xlu0 %3590  ;;  %v8256_v23 = vrot.slane %v5166_v30, %v8905_v34 }
 0x3b2   : > { %5047 = vrsqrt.f32 %v3745_v18  ;;  %v3713_v36 = vmul.f32 0.0625, %v3591_v52  ;;  %v3504_v55 = vpop.xlane.xlu1 %3503 }
 0x3b3   : > { %5049 = vrsqrt.f32 %v3778_v60  ;;  %v3684_v37 = vmul.f32 0.0625, %v3504_v55 }
 0x3b4   : > { %v5038_v25 = vpop.eup %5037  ;;  %v3777_v32 = vadd.f32 1e-05, %v3713_v36 }
 0x3b5   : > { %v3872_v48 = vmul.f32 %v5038_v25, %v7854_v20  ;;  %v3748_v0 = vadd.f32 1e-05, %v3684_v37  ;;  %v3501_v40 = vpop.xlane.xlu0 %3500 }
 0x3b6   : > { %5051 = vrsqrt.f32 %v3777_v32  ;;  %v3683_v18 = vmul.f32 0.0625, %v3501_v40  ;;  %v3600_v52 = vpop.xlane.xlu1 %3599 }
 0x3b7   : > { %v5040_v28 = vpop.eup %5039  ;;  %v3940_v59 = vmul.f32 %v8252_v10, %v3872_v48  ;;  %5053 = vrsqrt.f32 %v3748_v0  ;;  %v3716_v60 = vmul.f32 0.0625, %v3600_v52 }
 0x3b8   : > { %v5042_v55 = vpop.eup %5041  ;;  %v3871_v36 = vmul.f32 %v5040_v28, %v7860_v5  ;;  %v3747_v44 = vadd.f32 1e-05, %v3683_v18 }
 0x3b9   : > { %v4008_v30 = vadd.f32 %v8256_v23, %v3940_v59  ;;  %v3904_v34 = vmul.f32 %v5042_v55, %v7865_v1  ;;  %v3780_v8 = vadd.f32 1e-05, %v3716_v60  ;;  %v3597_v20 = vpop.xlane.xlu0 %3596 }
 0x3ba   : > { %v3939_v37 = vmul.f32 %v8252_v10, %v3871_v36  ;;  %5055 = vrsqrt.f32 %v3747_v44  ;;  %v3715_v25 = vmul.f32 0.0625, %v3597_v20  ;;  %v3510_v32 = vpop.xlane.xlu1 %3509 }
 0x3bb   : > { %v5044_v40 = vpop.eup %5043  ;;  %4072 = vst.msk [vmem:[%s8266_s27 + $0x8] sm:$0xff] %vm3101_vm1, %v4008_v30  ;;  %v3972_v5 = vmul.f32 %v8252_v10, %v3904_v34  ;;  %5057 = vrsqrt.f32 %v3780_v8  ;;  %v3686_v28 = vmul.f32 0.0625, %v3510_v32 }
 0x3bc   : > { %v5046_v1 = vpop.eup %5045  ;;  %v4007_v48 = vadd.f32 %v8256_v23, %v3939_v37  ;;  %v3903_v0 = vmul.f32 %v5044_v40, %v7874_v42  ;;  %v3779_v18 = vadd.f32 1e-05, %v3715_v25 }
 0x3bd   : > { %v4040_v52 = vadd.f32 %v8256_v23, %v3972_v5  ;;  %v3874_v59 = vmul.f32 %v5046_v1, %v7879_v51  ;;  %v3750_v60 = vadd.f32 1e-05, %v3686_v28  ;;  %v3507_v55 = vpop.xlane.xlu0 %3506 }
 0x3be   : > { %4071 = vst.msk [vmem:[%s8266_s27] sm:$0xff] %vm3101_vm1, %v4007_v48  ;;  %v3971_v36 = vmul.f32 %v8252_v10, %v3903_v0  ;;  %5059 = vrsqrt.f32 %v3779_v18  ;;  %v3685_v8 = vmul.f32 0.0625, %v3507_v55  ;;  %v3606_v44 = vpop.xlane.xlu1 %3605 }
 0x3bf   : > { %v5048_v30 = vpop.eup %5047  ;;  %4104 = vst.msk [vmem:[%s8266_s27 + $0x108] sm:$0xff] %vm3101_vm1, %v4040_v52  ;;  %v3942_v42 = vmul.f32 %v8252_v10, %v3874_v59  ;;  %5061 = vrsqrt.f32 %v3750_v60  ;;  %v3718_v34 = vmul.f32 0.0625, %v3606_v44 }
 0x3c0   : > { %v5050_v20 = vpop.eup %5049  ;;  %v4039_v51 = vadd.f32 %v8256_v23, %v3971_v36  ;;  %v3873_v37 = vmul.f32 %v5048_v30, %v7886_v12  ;;  %v3749_v25 = vadd.f32 1e-05, %v3685_v8 }
 0x3c1   : > { %v4010_v32 = vadd.f32 %v8256_v23, %v3942_v42  ;;  %v3906_v40 = vmul.f32 %v5050_v20, %v7891_v21  ;;  %v3782_v5 = vadd.f32 1e-05, %v3718_v34  ;;  %v3603_v28 = vpop.xlane.xlu0 %3602 }
 0x3c2   : > { %4103 = vst.msk [vmem:[%s8266_s27 + $0x100] sm:$0xff] %vm3101_vm1, %v4039_v51  ;;  %v3941_v1 = vmul.f32 %v8252_v10, %v3873_v37  ;;  %5063 = vrsqrt.f32 %v3749_v25  ;;  %v3717_v48 = vmul.f32 0.0625, %v3603_v28  ;;  %v3516_v0 = vpop.xlane.xlu1 %3515 }
 0x3c3   : > { %v5052_v18 = vpop.eup %5051  ;;  %4074 = vst.msk [vmem:[%s8266_s27 + $0x18] sm:$0xff] %vm3101_vm1, %v4010_v32  ;;  %v3974_v12 = vmul.f32 %v8252_v10, %v3906_v40  ;;  %5065 = vrsqrt.f32 %v3782_v5  ;;  %v3688_v52 = vmul.f32 0.0625, %v3516_v0 }
 0x3c4   : > { %v5054_v59 = vpop.eup %5053  ;;  %v4009_v21 = vadd.f32 %v8256_v23, %v3941_v1  ;;  %v3905_v60 = vmul.f32 %v5052_v18, %v7898_v22  ;;  %v3781_v55 = vadd.f32 1e-05, %v3717_v48 }
 0x3c5   : > { %v4042_v36 = vadd.f32 %v8256_v23, %v3974_v12  ;;  %v3876_v8 = vmul.f32 %v5054_v59, %v7903_v63  ;;  %v3752_v44 = vadd.f32 1e-05, %v3688_v52  ;;  %v3513_v30 = vpop.xlane.xlu0 %3512 }
 0x3c6   : > { %4073 = vst.msk [vmem:[%s8266_s27 + $0x10] sm:$0xff] %vm3101_vm1, %v4009_v21  ;;  %v3973_v42 = vmul.f32 %v8252_v10, %v3905_v60  ;;  %5067 = vrsqrt.f32 %v3781_v55  ;;  %v3687_v34 = vmul.f32 0.0625, %v3513_v30  ;;  %v3612_v20 = vpop.xlane.xlu1 %3611 }
 0x3c7   : > { %v5056_v51 = vpop.eup %5055  ;;  %4106 = vst.msk [vmem:[%s8266_s27 + $0x118] sm:$0xff] %vm3101_vm1, %v4042_v36  ;;  %v3944_v22 = vmul.f32 %v8252_v10, %v3876_v8  ;;  %5069 = vrsqrt.f32 %v3752_v44  ;;  %v3720_v37 = vmul.f32 0.0625, %v3612_v20 }
 0x3c8   : > { %v5058_v25 = vpop.eup %5057  ;;  %v4041_v63 = vadd.f32 %v8256_v23, %v3973_v42  ;;  %v3875_v32 = vmul.f32 %v5056_v51, %v7910_v14  ;;  %v3751_v40 = vadd.f32 1e-05, %v3687_v34 }
 0x3c9   : > { %v4012_v5 = vadd.f32 %v8256_v23, %v3944_v22  ;;  %v3908_v28 = vmul.f32 %v5058_v25, %v7915_v58  ;;  %v3784_v1 = vadd.f32 1e-05, %v3720_v37  ;;  %v3609_v48 = vpop.xlane.xlu0 %3608 }
 0x3ca   : > { %4105 = vst.msk [vmem:[%s8266_s27 + $0x110] sm:$0xff] %vm3101_vm1, %v4041_v63  ;;  %v3943_v0 = vmul.f32 %v8252_v10, %v3875_v32  ;;  %5071 = vrsqrt.f32 %v3751_v40  ;;  %v3719_v18 = vmul.f32 0.0625, %v3609_v48  ;;  %v3522_v12 = vpop.xlane.xlu1 %3521 }
 0x3cb   : > { %v5060_v52 = vpop.eup %5059  ;;  %4076 = vst.msk [vmem:[%s8266_s27 + $0x28] sm:$0xff] %vm3101_vm1, %v4012_v5  ;;  %v3976_v14 = vmul.f32 %v8252_v10, %v3908_v28  ;;  %5073 = vrsqrt.f32 %v3784_v1  ;;  %v3690_v59 = vmul.f32 0.0625, %v3522_v12 }
 0x3cc   : > { %v5062_v21 = vpop.eup %5061  ;;  %v4011_v58 = vadd.f32 %v8256_v23, %v3943_v0  ;;  %v3907_v60 = vmul.f32 %v5060_v52, %v7922_v33  ;;  %v3783_v55 = vadd.f32 1e-05, %v3719_v18 }
 0x3cd   : > { %v4044_v36 = vadd.f32 %v8256_v23, %v3976_v14  ;;  %v3878_v8 = vmul.f32 %v5062_v21, %v7927_v29  ;;  %v3754_v44 = vadd.f32 1e-05, %v3690_v59  ;;  %v3519_v30 = vpop.xlane.xlu0 %3518 }
 0x3ce   : > { %4075 = vst.msk [vmem:[%s8266_s27 + $0x20] sm:$0xff] %vm3101_vm1, %v4011_v58  ;;  %v3975_v42 = vmul.f32 %v8252_v10, %v3907_v60  ;;  %5075 = vrsqrt.f32 %v3783_v55  ;;  %v3689_v34 = vmul.f32 0.0625, %v3519_v30  ;;  %v3618_v20 = vpop.xlane.xlu1 %3617 }
 0x3cf   : > { %v5064_v51 = vpop.eup %5063  ;;  %4108 = vst.msk [vmem:[%s8266_s27 + $0x128] sm:$0xff] %vm3101_vm1, %v4044_v36  ;;  %v3946_v33 = vmul.f32 %v8252_v10, %v3878_v8  ;;  %5077 = vrsqrt.f32 %v3754_v44  ;;  %v3722_v22 = vmul.f32 0.0625, %v3618_v20 }
 0x3d0   : > { %v5066_v37 = vpop.eup %5065  ;;  %v4043_v29 = vadd.f32 %v8256_v23, %v3975_v42  ;;  %v3877_v25 = vmul.f32 %v5064_v51, %v7934_v43  ;;  %v3753_v63 = vadd.f32 1e-05, %v3689_v34 }
 0x3d1   : > { %v4014_v32 = vadd.f32 %v8256_v23, %v3946_v33  ;;  %v3910_v40 = vmul.f32 %v5066_v37, %v7939_v3  ;;  %v3786_v5 = vadd.f32 1e-05, %v3722_v22  ;;  %v3615_v28 = vpop.xlane.xlu0 %3614 }
 0x3d2   : > { %4107 = vst.msk [vmem:[%s8266_s27 + $0x120] sm:$0xff] %vm3101_vm1, %v4043_v29  ;;  %v3945_v1 = vmul.f32 %v8252_v10, %v3877_v25  ;;  %5079 = vrsqrt.f32 %v3753_v63  ;;  %v3721_v48 = vmul.f32 0.0625, %v3615_v28  ;;  %v3528_v0 = vpop.xlane.xlu1 %3527 }
 0x3d3   : > { %v5068_v18 = vpop.eup %5067  ;;  %4078 = vst.msk [vmem:[%s8266_s27 + $0x38] sm:$0xff] %vm3101_vm1, %v4014_v32  ;;  %v3978_v43 = vmul.f32 %v8252_v10, %v3910_v40  ;;  %5081 = vrsqrt.f32 %v3786_v5  ;;  %v3692_v12 = vmul.f32 0.0625, %v3528_v0 }
 0x3d4   : > { %v5070_v52 = vpop.eup %5069  ;;  %v4013_v3 = vadd.f32 %v8256_v23, %v3945_v1  ;;  %v3909_v14 = vmul.f32 %v5068_v18, %v7946_v57  ;;  %v3785_v59 = vadd.f32 1e-05, %v3721_v48  ;;  %v8906_v1 = vld [vmem:[#allocation26_spill] sm:$0xff] }
 0x3d5   : > { %v4046_v21 = vadd.f32 %v8256_v23, %v3978_v43  ;;  %v3880_v58 = vmul.f32 %v5070_v52, %v7951_v62  ;;  %v3756_v60 = vadd.f32 1e-05, %v3692_v12  ;;  %v3525_v55 = vpop.xlane.xlu0 %3524 }
 0x3d6   : > { %4077 = vst.msk [vmem:[%s8266_s27 + $0x30] sm:$0xff] %vm3101_vm1, %v4013_v3  ;;  %v3977_v36 = vmul.f32 %v8252_v10, %v3909_v14  ;;  %5083 = vrsqrt.f32 %v3785_v59  ;;  %v3691_v8 = vmul.f32 0.0625, %v3525_v55 }
 0x3d7   : > { %v5072_v44 = vpop.eup %5071  ;;  %4110 = vst.msk [vmem:[%s8266_s27 + $0x138] sm:$0xff] %vm3101_vm1, %v4046_v21  ;;  %v3948_v57 = vmul.f32 %v8252_v10, %v3880_v58  ;;  %5085 = vrsqrt.f32 %v3756_v60 }
 0x3d8   : > { %v5074_v30 = vpop.eup %5073  ;;  %v4045_v42 = vadd.f32 %v8256_v23, %v3977_v36  ;;  %v3879_v62 = vmul.f32 %v5072_v44, %v7958_v31  ;;  %v3755_v34 = vadd.f32 1e-05, %v3691_v8  ;;  %v3624_v20 = vpop.xlane.xlu1 %3623  ;;  %v8907_v36 = vld [vmem:[#allocation27_spill] sm:$0xff] }
 0x3d9   : > { %v4016_v51 = vadd.f32 %v8256_v23, %v3948_v57  ;;  %v3912_v33 = vmul.f32 %v5074_v30, %v7963_v27  ;;  %v3724_v22 = vmul.f32 0.0625, %v3624_v20  ;;  %v8908_v20 = vld [vmem:[#allocation28_spill] sm:$0xff] }
 0x3da   : > { %4109 = vst.msk [vmem:[%s8266_s27 + $0x130] sm:$0xff] %vm3101_vm1, %v4045_v42  ;;  %v3947_v37 = vmul.f32 %v8252_v10, %v3879_v62  ;;  %5087 = vrsqrt.f32 %v3755_v34  ;;  %v3621_v29 = vpop.xlane.xlu0 %3620 }
 0x3db   : > { %v5076_v25 = vpop.eup %5075  ;;  %4080 = vst.msk [vmem:[%s8266_s27 + $0x48] sm:$0xff] %vm3101_vm1, %v4016_v51  ;;  %v3980_v31 = vmul.f32 %v8252_v10, %v3912_v33  ;;  %v3788_v63 = vadd.f32 1e-05, %v3724_v22  ;;  %v3723_v32 = vmul.f32 0.0625, %v3621_v29 }
 0x3dc   : > { %v5078_v40 = vpop.eup %5077  ;;  %v4015_v5 = vadd.f32 %v8256_v23, %v3947_v37  ;;  %v3911_v27 = vmul.f32 %v5076_v25, %v7970_v15  ;;  %v8909_v37 = vld [vmem:[#allocation29_spill] sm:$0xff] }
 0x3dd   : > { %v4048_v28 = vadd.f32 %v8256_v23, %v3980_v31  ;;  %v3882_v48 = vmul.f32 %v5078_v40, %v8906_v1  ;;  %5089 = vrsqrt.f32 %v3788_v63  ;;  %v3787_v0 = vadd.f32 1e-05, %v3723_v32  ;;  %v3534_v18 = vpop.xlane.xlu1 %3533 }
 0x3de   : > { %4079 = vst.msk [vmem:[%s8266_s27 + $0x40] sm:$0xff] %vm3101_vm1, %v4015_v5  ;;  %v3979_v43 = vmul.f32 %v8252_v10, %v3911_v27  ;;  %v3694_v12 = vmul.f32 0.0625, %v3534_v18 }
 0x3df   : > { %v5080_v52 = vpop.eup %5079  ;;  %4112 = vst.msk [vmem:[%s8266_s27 + $0x148] sm:$0xff] %vm3101_vm1, %v4048_v28  ;;  %v3950_v3 = vmul.f32 %v8252_v10, %v3882_v48  ;;  %5091 = vrsqrt.f32 %v3787_v0  ;;  %v3531_v15 = vpop.xlane.xlu0 %3530 }
 0x3e0   : > { %v5082_v14 = vpop.eup %5081  ;;  %v4047_v59 = vadd.f32 %v8256_v23, %v3979_v43  ;;  %v3881_v21 = vmul.f32 %v5080_v52, %v7982_v41  ;;  %v3758_v58 = vadd.f32 1e-05, %v3694_v12  ;;  %v3693_v60 = vmul.f32 0.0625, %v3531_v15  ;;  %v8910_v15 = vld [vmem:[#allocation30_spill] sm:$0xff] }
 0x3e1   : > { %v4018_v55 = vadd.f32 %v8256_v23, %v3950_v3  ;;  %v3914_v8 = vmul.f32 %v5082_v14, %v8907_v36  ;;  %v8911_v36 = vld [vmem:[#allocation31_spill] sm:$0xff] }
 0x3e2   : > { %4111 = vst.msk [vmem:[%s8266_s27 + $0x140] sm:$0xff] %vm3101_vm1, %v4047_v59  ;;  %v3949_v44 = vmul.f32 %v8252_v10, %v3881_v21  ;;  %5093 = vrsqrt.f32 %v3758_v58  ;;  %v3757_v57 = vadd.f32 1e-05, %v3693_v60 }
 0x3e3   : > { %v5084_v30 = vpop.eup %5083  ;;  %4082 = vst.msk [vmem:[%s8266_s27 + $0x58] sm:$0xff] %vm3101_vm1, %v4018_v55  ;;  %v3982_v42 = vmul.f32 %v8252_v10, %v3914_v8  ;;  %v3630_v41 = vpop.xlane.xlu1 %3629 }
 0x3e4   : > { %v5086_v62 = vpop.eup %5085  ;;  %v4017_v34 = vadd.f32 %v8256_v23, %v3949_v44  ;;  %v3913_v51 = vmul.f32 %v5084_v30, %v8908_v20  ;;  %5095 = vrsqrt.f32 %v3757_v57  ;;  %v3726_v33 = vmul.f32 0.0625, %v3630_v41  ;;  %v8912_v20 = vld [vmem:[#allocation6_spill] sm:$0xff] }
 0x3e5   : > { %v4050_v22 = vadd.f32 %v8256_v23, %v3982_v42  ;;  %v3884_v29 = vmul.f32 %v5086_v62, %v8909_v37 }
 0x3e6   : > { %4081 = vst.msk [vmem:[%s8266_s27 + $0x50] sm:$0xff] %vm3101_vm1, %v4017_v34  ;;  %v3981_v25 = vmul.f32 %v8252_v10, %v3913_v51  ;;  %v3790_v31 = vadd.f32 1e-05, %v3726_v33  ;;  %v3627_v63 = vpop.xlane.xlu0 %3626 }
 0x3e7   : > { %v5088_v32 = vpop.eup %5087  ;;  %4114 = vst.msk [vmem:[%s8266_s27 + $0x158] sm:$0xff] %vm3101_vm1, %v4050_v22  ;;  %v3952_v40 = vmul.f32 %v8252_v10, %v3884_v29  ;;  %v3725_v5 = vmul.f32 0.0625, %v3627_v63  ;;  %v3540_v27 = vpop.xlane.xlu1 %3539 }
 0x3e8   : > { %v4049_v28 = vadd.f32 %v8256_v23, %v3981_v25  ;;  %v3883_v1 = vmul.f32 %v5088_v32, %v8012_v39  ;;  %5097 = vrsqrt.f32 %v3790_v31  ;;  %v3696_v48 = vmul.f32 0.0625, %v3540_v27  ;;  %v8913_v25 = vld [vmem:[#allocation7_spill] sm:$0xff] }
 0x3e9   : > { %v4020_v0 = vadd.f32 %v8256_v23, %v3952_v40  ;;  %v3789_v18 = vadd.f32 1e-05, %v3725_v5 }
 0x3ea   : > { %v5090_v43 = vpop.eup %5089  ;;  %4113 = vst.msk [vmem:[%s8266_s27 + $0x150] sm:$0xff] %vm3101_vm1, %v4049_v28  ;;  %v3951_v12 = vmul.f32 %v8252_v10, %v3883_v1  ;;  %v3760_v52 = vadd.f32 1e-05, %v3696_v48  ;;  %v3537_v3 = vpop.xlane.xlu0 %3536  ;;  %v8914_v48 = vld [vmem:[#allocation8_spill] sm:$0xff] }
 0x3eb   : > { %4084 = vst.msk [vmem:[%s8266_s27 + $0x68] sm:$0xff] %vm3101_vm1, %v4020_v0  ;;  %v3916_v14 = vmul.f32 %v5090_v43, %v8910_v15  ;;  %5099 = vrsqrt.f32 %v3789_v18  ;;  %v3695_v59 = vmul.f32 0.0625, %v3537_v3  ;;  %v3636_v39 = vpop.xlane.xlu1 %3635 }
 0x3ec   : > { %v5092_v21 = vpop.eup %5091  ;;  %v4019_v58 = vadd.f32 %v8256_v23, %v3951_v12  ;;  %5101 = vrsqrt.f32 %v3760_v52  ;;  %v3728_v60 = vmul.f32 0.0625, %v3636_v39 }
 0x3ed   : > { %v3984_v55 = vmul.f32 %v8252_v10, %v3916_v14  ;;  %v3915_v8 = vmul.f32 %v5092_v21, %v8911_v36  ;;  %v3759_v44 = vadd.f32 1e-05, %v3695_v59 }
 0x3ee   : > { %4083 = vst.msk [vmem:[%s8266_s27 + $0x60] sm:$0xff] %vm3101_vm1, %v4019_v58  ;;  %v3792_v57 = vadd.f32 1e-05, %v3728_v60  ;;  %v3633_v30 = vpop.xlane.xlu0 %3632  ;;  %v8915_v60 = vld [vmem:[#allocation9_spill] sm:$0xff] }
 0x3ef   : > { %v5094_v42 = vpop.eup %5093  ;;  %v4052_v41 = vadd.f32 %v8256_v23, %v3984_v55  ;;  %v3983_v62 = vmul.f32 %v8252_v10, %v3915_v8  ;;  %5103 = vrsqrt.f32 %v3759_v44  ;;  %v3727_v34 = vmul.f32 0.0625, %v3633_v30 }
 0x3f0   : > { %v3886_v51 = vmul.f32 %v5094_v42, %v8912_v20  ;;  %5105 = vrsqrt.f32 %v3792_v57  ;;  %v8916_v20 = vld [vmem:[#allocation10_spill] sm:$0xff] }
 0x3f1   : > { %v5096_v33 = vpop.eup %5095  ;;  %4116 = vst.msk [vmem:[%s8266_s27 + $0x168] sm:$0xff] %vm3101_vm1, %v4052_v41  ;;  %v4051_v22 = vadd.f32 %v8256_v23, %v3983_v62  ;;  %v3791_v37 = vadd.f32 1e-05, %v3727_v34 }
 0x3f2   : > { %v3954_v29 = vmul.f32 %v8252_v10, %v3886_v51  ;;  %v3885_v31 = vmul.f32 %v5096_v33, %v8913_v25  ;;  %v3546_v63 = vpop.xlane.xlu1 %3545 }
 0x3f3   : > { %4115 = vst.msk [vmem:[%s8266_s27 + $0x160] sm:$0xff] %vm3101_vm1, %v4051_v22  ;;  %5107 = vrsqrt.f32 %v3791_v37  ;;  %v3698_v5 = vmul.f32 0.0625, %v3546_v63  ;;  %v8917_v63 = vld [vmem:[#allocation11_spill] sm:$0xff] }
 0x3f4   : > { %v4022_v32 = vadd.f32 %v8256_v23, %v3954_v29  ;;  %v3953_v40 = vmul.f32 %v8252_v10, %v3885_v31 }
 0x3f5   : > { %v5098_v27 = vpop.eup %5097  ;;  %v3543_v28 = vpop.xlane.xlu0 %3542  ;;  %v3762_v18 = vadd.f32 1e-05, %v3698_v5 }
 0x3f6   : > { %4086 = vst.msk [vmem:[%s8266_s27 + $0x78] sm:$0xff] %vm3101_vm1, %v4022_v32  ;;  %v4021_v1 = vadd.f32 %v8256_v23, %v3953_v40  ;;  %v3918_v0 = vmul.f32 %v5098_v27, %v8914_v48  ;;  %v3697_v43 = vmul.f32 0.0625, %v3543_v28  ;;  %v3642_v12 = vpop.xlane.xlu1 %3641 }
 0x3f7   : > { %5109 = vrsqrt.f32 %v3762_v18  ;;  %v3730_v14 = vmul.f32 0.0625, %v3642_v12 }
 0x3f8   : > { %v5100_v52 = vpop.eup %5099  ;;  %4085 = vst.msk [vmem:[%s8266_s27 + $0x70] sm:$0xff] %vm3101_vm1, %v4021_v1  ;;  %v3986_v3 = vmul.f32 %v8252_v10, %v3918_v0  ;;  %v3761_v15 = vadd.f32 1e-05, %v3697_v43 }
 0x3f9   : > { %v5102_v59 = vpop.eup %5101  ;;  %v3917_v39 = vmul.f32 %v5100_v52, %v8048_v2  ;;  %v3639_v21 = vpop.xlane.xlu0 %3638  ;;  %v3794_v36 = vadd.f32 1e-05, %v3730_v14 }
 0x3fa   : > { %v4054_v58 = vadd.f32 %v8256_v23, %v3986_v3  ;;  %v3888_v55 = vmul.f32 %v5102_v59, %v8915_v60  ;;  %5111 = vrsqrt.f32 %v3761_v15  ;;  %v3729_v44 = vmul.f32 0.0625, %v3639_v21 }
 0x3fb   : > { %v3985_v8 = vmul.f32 %v8252_v10, %v3917_v39  ;;  %5113 = vrsqrt.f32 %v3794_v36 }
 0x3fc   : > { %v5104_v57 = vpop.eup %5103  ;;  %4118 = vst.msk [vmem:[%s8266_s27 + $0x178] sm:$0xff] %vm3101_vm1, %v4054_v58  ;;  %v3956_v30 = vmul.f32 %v8252_v10, %v3888_v55  ;;  %v3793_v62 = vadd.f32 1e-05, %v3729_v44 }
 0x3fd   : > { %v5106_v42 = vpop.eup %5105  ;;  %v4053_v2 = vadd.f32 %v8256_v23, %v3985_v8  ;;  %v3887_v41 = vmul.f32 %v5104_v57, %v8059_v46  ;;  %v8918_v8 = vld [vmem:[#allocation12_spill] sm:$0xff] }
 0x3fe   : > { %v4024_v34 = vadd.f32 %v8256_v23, %v3956_v30  ;;  %v3920_v51 = vmul.f32 %v5106_v42, %v8916_v20  ;;  %v3552_v33 = vpop.xlane.xlu1 %3551  ;;  %5115 = vrsqrt.f32 %v3793_v62 }
 0x3ff   : > { %4117 = vst.msk [vmem:[%s8266_s27 + $0x170] sm:$0xff] %vm3101_vm1, %v4053_v2  ;;  %v3955_v22 = vmul.f32 %v8252_v10, %v3887_v41  ;;  %v3700_v37 = vmul.f32 0.0625, %v3552_v33 }
 0x400   : > { %v5108_v29 = vpop.eup %5107  ;;  %4088 = vst.msk [vmem:[%s8266_s27 + $0x88] sm:$0xff] %vm3101_vm1, %v4024_v34  ;;  %v3988_v25 = vmul.f32 %v8252_v10, %v3920_v51  ;;  %v3549_v46 = vpop.xlane.xlu0 %3548 }
 0x401   : > { %v4023_v31 = vadd.f32 %v8256_v23, %v3955_v22  ;;  %v3919_v32 = vmul.f32 %v5108_v29, %v8917_v63  ;;  %v3764_v40 = vadd.f32 1e-05, %v3700_v37  ;;  %v3699_v5 = vmul.f32 0.0625, %v3549_v46 }
 0x402   : > { %v4056_v27 = vadd.f32 %v8256_v23, %v3988_v25 }
 0x403   : > { %4087 = vst.msk [vmem:[%s8266_s27 + $0x80] sm:$0xff] %vm3101_vm1, %v4023_v31  ;;  %v3987_v28 = vmul.f32 %v8252_v10, %v3919_v32  ;;  %5117 = vrsqrt.f32 %v3764_v40  ;;  %v3763_v1 = vadd.f32 1e-05, %v3699_v5  ;;  %v3648_v48 = vpop.xlane.xlu1 %3647 }
 0x404   : > { %4120 = vst.msk [vmem:[%s8266_s27 + $0x188] sm:$0xff] %vm3101_vm1, %v4056_v27  ;;  %v3732_v0 = vmul.f32 0.0625, %v3648_v48  ;;  %v5110_v18 = vpop.eup %5109 }
 0x405   : > { %v4055_v43 = vadd.f32 %v8256_v23, %v3987_v28  ;;  %5119 = vrsqrt.f32 %v3763_v1  ;;  %v3645_v12 = vpop.xlane.xlu0 %3644  ;;  %v3890_v52 = vmul.f32 %v5110_v18, %v8079_v9 }
 0x406   : > { %v3796_v3 = vadd.f32 1e-05, %v3732_v0  ;;  %v3731_v15 = vmul.f32 0.0625, %v3645_v12 }
 0x407   : > { %v5112_v14 = vpop.eup %5111  ;;  %4119 = vst.msk [vmem:[%s8266_s27 + $0x180] sm:$0xff] %vm3101_vm1, %v4055_v43  ;;  %v3958_v59 = vmul.f32 %v8252_v10, %v3890_v52 }
 0x408   : > { %v3889_v39 = vmul.f32 %v5112_v14, %v8082_v4  ;;  %5121 = vrsqrt.f32 %v3796_v3  ;;  %v3795_v21 = vadd.f32 1e-05, %v3731_v15  ;;  %v3558_v58 = vpop.xlane.xlu1 %3557  ;;  %v5114_v60 = vpop.eup %5113 }
 0x409   : > { %v3702_v55 = vmul.f32 0.0625, %v3558_v58  ;;  %v4026_v36 = vadd.f32 %v8256_v23, %v3958_v59  ;;  %v3922_v44 = vmul.f32 %v5114_v60, %v8918_v8 }
 0x40a   : > { %v3957_v9 = vmul.f32 %v8252_v10, %v3889_v39  ;;  %5123 = vrsqrt.f32 %v3795_v21 }
 0x40b   : > { %v3766_v57 = vadd.f32 1e-05, %v3702_v55  ;;  %v3555_v30 = vpop.xlane.xlu0 %3554  ;;  %v5116_v42 = vpop.eup %5115  ;;  %4090 = vst.msk [vmem:[%s8266_s27 + $0x98] sm:$0xff] %vm3101_vm1, %v4026_v36  ;;  %v3990_v2 = vmul.f32 %v8252_v10, %v3922_v44 }
 0x40c   : > { %v4025_v4 = vadd.f32 %v8256_v23, %v3957_v9  ;;  %v3701_v41 = vmul.f32 0.0625, %v3555_v30  ;;  %v3654_v62 = vpop.xlane.xlu1 %3653  ;;  %v3921_v34 = vmul.f32 %v5116_v42, %v8093_v54 }
 0x40d   : > { %5125 = vrsqrt.f32 %v3766_v57  ;;  %v3734_v20 = vmul.f32 0.0625, %v3654_v62  ;;  %v4058_v51 = vadd.f32 %v8256_v23, %v3990_v2 }
 0x40e   : > { %4089 = vst.msk [vmem:[%s8266_s27 + $0x90] sm:$0xff] %vm3101_vm1, %v4025_v4  ;;  %v3765_v33 = vadd.f32 1e-05, %v3701_v41  ;;  %v3989_v22 = vmul.f32 %v8252_v10, %v3921_v34 }
 0x40f   : > { %v3798_v37 = vadd.f32 1e-05, %v3734_v20  ;;  %v3651_v29 = vpop.xlane.xlu0 %3650  ;;  %4122 = vst.msk [vmem:[%s8266_s27 + $0x198] sm:$0xff] %vm3101_vm1, %v4058_v51 }
 0x410   : > { %v5118_v25 = vpop.eup %5117  ;;  %5127 = vrsqrt.f32 %v3765_v33  ;;  %v3733_v46 = vmul.f32 0.0625, %v3651_v29  ;;  %v4057_v31 = vadd.f32 %v8256_v23, %v3989_v22 }
 0x411   : > { %v3892_v54 = vmul.f32 %v5118_v25, %v8103_v13  ;;  %5129 = vrsqrt.f32 %v3798_v37  ;;  %v3564_v63 = vpop.xlane.xlu1 %3563 }
 0x412   : > { %v5120_v32 = vpop.eup %5119  ;;  %v3797_v40 = vadd.f32 1e-05, %v3733_v46  ;;  %v3704_v5 = vmul.f32 0.0625, %v3564_v63  ;;  %4121 = vst.msk [vmem:[%s8266_s27 + $0x190] sm:$0xff] %vm3101_vm1, %v4057_v31 }
 0x413   : > { %v3960_v27 = vmul.f32 %v8252_v10, %v3892_v54  ;;  %v3891_v28 = vmul.f32 %v5120_v32, %v8106_v7 }
 0x414   : > { %5131 = vrsqrt.f32 %v3797_v40  ;;  %v3768_v1 = vadd.f32 1e-05, %v3704_v5 }
 0x415   : > { %v5122_v48 = vpop.eup %5121  ;;  %v4028_v0 = vadd.f32 %v8256_v23, %v3960_v27  ;;  %v3959_v13 = vmul.f32 %v8252_v10, %v3891_v28  ;;  %v8919_v27 = vld [vmem:[#allocation13_spill] sm:$0xff] }
 0x416   : > { %v3924_v18 = vmul.f32 %v5122_v48, %v8114_v35  ;;  %5133 = vrsqrt.f32 %v3768_v1  ;;  %v3561_v43 = vpop.xlane.xlu0 %3560 }
 0x417   : > { %v5124_v12 = vpop.eup %5123  ;;  %4092 = vst.msk [vmem:[%s8266_s27 + $0xa8] sm:$0xff] %vm3101_vm1, %v4028_v0  ;;  %v4027_v52 = vadd.f32 %v8256_v23, %v3959_v13  ;;  %v3703_v3 = vmul.f32 0.0625, %v3561_v43  ;;  %v3660_v7 = vpop.xlane.xlu1 %3659 }
 0x418   : > { %v3992_v15 = vmul.f32 %v8252_v10, %v3924_v18  ;;  %v3923_v14 = vmul.f32 %v5124_v12, %v8118_v61  ;;  %v3736_v59 = vmul.f32 0.0625, %v3660_v7 }
 0x419   : > { %4091 = vst.msk [vmem:[%s8266_s27 + $0xa0] sm:$0xff] %vm3101_vm1, %v4027_v52  ;;  %v3767_v39 = vadd.f32 1e-05, %v3703_v3 }
 0x41a   : > { %v5126_v21 = vpop.eup %5125  ;;  %v4060_v35 = vadd.f32 %v8256_v23, %v3992_v15  ;;  %v3991_v58 = vmul.f32 %v8252_v10, %v3923_v14  ;;  %v3800_v60 = vadd.f32 1e-05, %v3736_v59  ;;  %v3657_v55 = vpop.xlane.xlu0 %3656 }
 0x41b   : > { %v3894_v36 = vmul.f32 %v5126_v21, %v8126_v26  ;;  %5135 = vrsqrt.f32 %v3767_v39  ;;  %v3735_v9 = vmul.f32 0.0625, %v3657_v55  ;;  %v3570_v8 = vpop.xlane.xlu1 %3569 }
 0x41c   : > { %4124 = vst.msk [vmem:[%s8266_s27 + $0x1a8] sm:$0xff] %vm3101_vm1, %v4060_v35  ;;  %v4059_v61 = vadd.f32 %v8256_v23, %v3991_v58  ;;  %5137 = vrsqrt.f32 %v3800_v60  ;;  %v3706_v44 = vmul.f32 0.0625, %v3570_v8 }
 0x41d   : > { %v5128_v57 = vpop.eup %5127  ;;  %v3962_v30 = vmul.f32 %v8252_v10, %v3894_v36  ;;  %v3799_v42 = vadd.f32 1e-05, %v3735_v9 }
 0x41e   : > { %v5130_v4 = vpop.eup %5129  ;;  %4123 = vst.msk [vmem:[%s8266_s27 + $0x1a0] sm:$0xff] %vm3101_vm1, %v4059_v61  ;;  %v3893_v2 = vmul.f32 %v5128_v57, %v8132_v53  ;;  %v3770_v26 = vadd.f32 1e-05, %v3706_v44  ;;  %v3567_v41 = vpop.xlane.xlu0 %3566 }
 0x41f   : > { %v4030_v62 = vadd.f32 %v8256_v23, %v3962_v30  ;;  %v3926_v34 = vmul.f32 %v5130_v4, %v8135_v50  ;;  %5139 = vrsqrt.f32 %v3799_v42  ;;  %v3705_v20 = vmul.f32 0.0625, %v3567_v41  ;;  %v3666_v51 = vpop.xlane.xlu1 %3665 }
 0x420   : > { %v3961_v33 = vmul.f32 %v8252_v10, %v3893_v2  ;;  %5141 = vrsqrt.f32 %v3770_v26  ;;  %v3738_v22 = vmul.f32 0.0625, %v3666_v51 }
 0x421   : > { %v5132_v37 = vpop.eup %5131  ;;  %4094 = vst.msk [vmem:[%s8266_s27 + $0xb8] sm:$0xff] %vm3101_vm1, %v4030_v62  ;;  %v3994_v29 = vmul.f32 %v8252_v10, %v3926_v34  ;;  %v3769_v53 = vadd.f32 1e-05, %v3705_v20 }
 0x422   : > { %v4029_v25 = vadd.f32 %v8256_v23, %v3961_v33  ;;  %v3925_v46 = vmul.f32 %v5132_v37, %v8143_v38  ;;  %v3802_v50 = vadd.f32 1e-05, %v3738_v22  ;;  %v3663_v31 = vpop.xlane.xlu0 %3662 }
 0x423   : > { %v5134_v54 = vpop.eup %5133  ;;  %v4062_v63 = vadd.f32 %v8256_v23, %v3994_v29  ;;  %5143 = vrsqrt.f32 %v3769_v53  ;;  %v3737_v32 = vmul.f32 0.0625, %v3663_v31  ;;  %v3576_v40 = vpop.xlane.xlu1 %3575 }
 0x424   : > { %4093 = vst.msk [vmem:[%s8266_s27 + $0xb0] sm:$0xff] %vm3101_vm1, %v4029_v25  ;;  %v3993_v5 = vmul.f32 %v8252_v10, %v3925_v46  ;;  %v3896_v28 = vmul.f32 %v5134_v54, %v8919_v27  ;;  %5145 = vrsqrt.f32 %v3802_v50  ;;  %v3708_v1 = vmul.f32 0.0625, %v3576_v40 }
 0x425   : > { %4126 = vst.msk [vmem:[%s8266_s27 + $0x1b8] sm:$0xff] %vm3101_vm1, %v4062_v63  ;;  %v3801_v38 = vadd.f32 1e-05, %v3737_v32 }
 0x426   : > { %v4061_v48 = vadd.f32 %v8256_v23, %v3993_v5  ;;  %v3964_v0 = vmul.f32 %v8252_v10, %v3896_v28  ;;  %v3772_v13 = vadd.f32 1e-05, %v3708_v1  ;;  %v3573_v18 = vpop.xlane.xlu0 %3572 }
 0x427   : > { %5147 = vrsqrt.f32 %v3801_v38  ;;  %v3707_v43 = vmul.f32 0.0625, %v3573_v18  ;;  %v3672_v12 = vpop.xlane.xlu1 %3671 }
 0x428   : > { %v5136_v52 = vpop.eup %5135  ;;  %4125 = vst.msk [vmem:[%s8266_s27 + $0x1b0] sm:$0xff] %vm3101_vm1, %v4061_v48  ;;  %v4032_v3 = vadd.f32 %v8256_v23, %v3964_v0  ;;  %5149 = vrsqrt.f32 %v3772_v13  ;;  %v3740_v7 = vmul.f32 0.0625, %v3672_v12 }
 0x429   : > { %v5138_v15 = vpop.eup %5137  ;;  %v3895_v14 = vmul.f32 %v5136_v52, %v8157_v16  ;;  %v3771_v59 = vadd.f32 1e-05, %v3707_v43  ;;  %v8920_v52 = vld [vmem:[#allocation14_spill] sm:$0xff] }
 0x42a   : > { %4096 = vst.msk [vmem:[%s8266_s27 + $0xc8] sm:$0xff] %vm3101_vm1, %v4032_v3  ;;  %v3928_v39 = vmul.f32 %v5138_v15, %v8160_v6  ;;  %v3804_v21 = vadd.f32 1e-05, %v3740_v7  ;;  %v3669_v35 = vpop.xlane.xlu0 %3668  ;;  %v8921_v7 = vld [vmem:[#allocation15_spill] sm:$0xff] }
 0x42b   : > { %v3963_v58 = vmul.f32 %v8252_v10, %v3895_v14  ;;  %5151 = vrsqrt.f32 %v3771_v59  ;;  %v3739_v60 = vmul.f32 0.0625, %v3669_v35  ;;  %v3582_v55 = vpop.xlane.xlu1 %3581  ;;  %v8922_v35 = vld [vmem:[#allocation16_spill] sm:$0xff] }
 0x42c   : > { %v5140_v36 = vpop.eup %5139  ;;  %v3996_v9 = vmul.f32 %v8252_v10, %v3928_v39  ;;  %5153 = vrsqrt.f32 %v3804_v21  ;;  %v3710_v8 = vmul.f32 0.0625, %v3582_v55  ;;  %v8923_v55 = vld [vmem:[#allocation17_spill] sm:$0xff] }
 0x42d   : > { %v5142_v16 = vpop.eup %5141  ;;  %v4031_v61 = vadd.f32 %v8256_v23, %v3963_v58  ;;  %v3927_v44 = vmul.f32 %v5140_v36, %v8167_v24  ;;  %v3803_v6 = vadd.f32 1e-05, %v3739_v60 }
 0x42e   : > { %v4064_v57 = vadd.f32 %v8256_v23, %v3996_v9  ;;  %v3898_v30 = vmul.f32 %v5142_v16, %v8171_v45  ;;  %v3774_v42 = vadd.f32 1e-05, %v3710_v8  ;;  %v3579_v4 = vpop.xlane.xlu0 %3578 }
 0x42f   : > { %4095 = vst.msk [vmem:[%s8266_s27 + $0xc0] sm:$0xff] %vm3101_vm1, %v4031_v61  ;;  %v3995_v2 = vmul.f32 %v8252_v10, %v3927_v44  ;;  %5155 = vrsqrt.f32 %v3803_v6  ;;  %v3709_v26 = vmul.f32 0.0625, %v3579_v4  ;;  %v3678_v41 = vpop.xlane.xlu1 %3677  ;;  %v8924_v44 = vld [vmem:[#allocation18_spill] sm:$0xff] }
 0x430   : > { %v5144_v62 = vpop.eup %5143  ;;  %4128 = vst.msk [vmem:[%s8266_s27 + $0x1c8] sm:$0xff] %vm3101_vm1, %v4064_v57  ;;  %v3966_v24 = vmul.f32 %v8252_v10, %v3898_v30  ;;  %5157 = vrsqrt.f32 %v3774_v42  ;;  %v3742_v34 = vmul.f32 0.0625, %v3678_v41 }
 0x431   : > { %v5146_v20 = vpop.eup %5145  ;;  %v4063_v45 = vadd.f32 %v8256_v23, %v3995_v2  ;;  %v3897_v51 = vmul.f32 %v5144_v62, %v8179_v56  ;;  %v3773_v33 = vadd.f32 1e-05, %v3709_v26 }
 0x432   : > { %v4034_v22 = vadd.f32 %v8256_v23, %v3966_v24  ;;  %v3930_v37 = vmul.f32 %v5146_v20, %v8183_v47  ;;  %v3806_v29 = vadd.f32 1e-05, %v3742_v34  ;;  %v3675_v53 = vpop.xlane.xlu0 %3674 }
 0x433   : > { %4127 = vst.msk [vmem:[%s8266_s27 + $0x1c0] sm:$0xff] %vm3101_vm1, %v4063_v45  ;;  %v3965_v25 = vmul.f32 %v8252_v10, %v3897_v51  ;;  %5159 = vrsqrt.f32 %v3773_v33  ;;  %v3741_v46 = vmul.f32 0.0625, %v3675_v53 }
 0x434   : > { %v5148_v50 = vpop.eup %5147  ;;  %4098 = vst.msk [vmem:[%s8266_s27 + $0xd8] sm:$0xff] %vm3101_vm1, %v4034_v22  ;;  %v3998_v56 = vmul.f32 %v8252_v10, %v3930_v37  ;;  %5161 = vrsqrt.f32 %v3806_v29 }
 0x435   : > { %v5150_v31 = vpop.eup %5149  ;;  %v4033_v54 = vadd.f32 %v8256_v23, %v3965_v25  ;;  %v3929_v47 = vmul.f32 %v5148_v50, %v8191_v19  ;;  %v3805_v63 = vadd.f32 1e-05, %v3741_v46 }
 0x436   : > { %v4066_v32 = vadd.f32 %v8256_v23, %v3998_v56  ;;  %v3900_v40 = vmul.f32 %v5150_v31, %v8195_v17 }
 0x437   : > { %4097 = vst.msk [vmem:[%s8266_s27 + $0xd0] sm:$0xff] %vm3101_vm1, %v4033_v54  ;;  %v3997_v5 = vmul.f32 %v8252_v10, %v3929_v47  ;;  %5163 = vrsqrt.f32 %v3805_v63 }
 0x438   : > { %v5152_v27 = vpop.eup %5151  ;;  %4130 = vst.msk [vmem:[%s8266_s27 + $0x1d8] sm:$0xff] %vm3101_vm1, %v4066_v32  ;;  %v3968_v28 = vmul.f32 %v8252_v10, %v3900_v40 }
 0x439   : > { %v5154_v1 = vpop.eup %5153  ;;  %v4065_v19 = vadd.f32 %v8256_v23, %v3997_v5  ;;  %v3899_v38 = vmul.f32 %v5152_v27, %v8203_v11 }
 0x43a   : > { %v4036_v48 = vadd.f32 %v8256_v23, %v3968_v28  ;;  %v3932_v17 = vmul.f32 %v5154_v1, %v8207_v49 }
 0x43b   : > { %4129 = vst.msk [vmem:[%s8266_s27 + $0x1d0] sm:$0xff] %vm3101_vm1, %v4065_v19  ;;  %v3967_v0 = vmul.f32 %v8252_v10, %v3899_v38 }
 0x43c   : > { %v5156_v13 = vpop.eup %5155  ;;  %4100 = vst.msk [vmem:[%s8266_s27 + $0xe8] sm:$0xff] %vm3101_vm1, %v4036_v48  ;;  %v4000_v18 = vmul.f32 %v8252_v10, %v3932_v17 }
 0x43d   : > { %v5158_v43 = vpop.eup %5157  ;;  %v4035_v12 = vadd.f32 %v8256_v23, %v3967_v0  ;;  %v3931_v11 = vmul.f32 %v5156_v13, %v8920_v52 }
 0x43e   : > { %v4068_v3 = vadd.f32 %v8256_v23, %v4000_v18  ;;  %v3902_v49 = vmul.f32 %v5158_v43, %v8921_v7 }
 0x43f   : > { %4099 = vst.msk [vmem:[%s8266_s27 + $0xe0] sm:$0xff] %vm3101_vm1, %v4035_v12  ;;  %v3999_v15 = vmul.f32 %v8252_v10, %v3931_v11 }
 0x440   : > { %v5160_v14 = vpop.eup %5159  ;;  %4132 = vst.msk [vmem:[%s8266_s27 + $0x1e8] sm:$0xff] %vm3101_vm1, %v4068_v3  ;;  %v3970_v59 = vmul.f32 %v8252_v10, %v3902_v49 }
 0x441   : > { %v5162_v39 = vpop.eup %5161  ;;  %v4067_v21 = vadd.f32 %v8256_v23, %v3999_v15  ;;  %v3901_v58 = vmul.f32 %v5160_v14, %v8922_v35 }
 0x442   : > { %v4038_v60 = vadd.f32 %v8256_v23, %v3970_v59  ;;  %v3934_v36 = vmul.f32 %v5162_v39, %v8923_v55 }
 0x443   : > { %4131 = vst.msk [vmem:[%s8266_s27 + $0x1e0] sm:$0xff] %vm3101_vm1, %v4067_v21  ;;  %v3969_v9 = vmul.f32 %v8252_v10, %v3901_v58 }
 0x444   : > { %v5164_v8 = vpop.eup %5163  ;;  %4102 = vst.msk [vmem:[%s8266_s27 + $0xf8] sm:$0xff] %vm3101_vm1, %v4038_v60  ;;  %v4002_v16 = vmul.f32 %v8252_v10, %v3934_v36 }
 0x445   : > { %v4037_v61 = vadd.f32 %v8256_v23, %v3969_v9  ;;  %v3933_v6 = vmul.f32 %v5164_v8, %v8924_v44 }
 0x446   : > { %v4070_v57 = vadd.f32 %v8256_v23, %v4002_v16 }
 0x447   : > { %4101 = vst.msk [vmem:[%s8266_s27 + $0xf0] sm:$0xff] %vm3101_vm1, %v4037_v61  ;;  %v4001_v30 = vmul.f32 %v8252_v10, %v3933_v6 }
 0x448   : > { %4134 = vst.msk [vmem:[%s8266_s27 + $0x1f8] sm:$0xff] %vm3101_vm1, %v4070_v57 }
 0x449   : > { %v4069_v42 = vadd.f32 %v8256_v23, %v4001_v30 }
 0x44b   : > { %4133 = vst.msk [vmem:[%s8266_s27 + $0x1f0] sm:$0xff] %vm3101_vm1, %v4069_v42 }
 0x44c   : > { %5180 = shalt.err (!%p5177_p3)
}
 0x44d   : > { %s5181_s11 = scalar_lea.hbm %s8584_s6, 8192  ;;  %s5185_s14 = scalar_lea.hbm %s8637_s4, 16384 }
 0x44e   : > { %p5182_p4 = scmp.ne.s32.totalorder %s8584_s6, %s5181_s11  ;;  %p5186_p9 = scmp.lt.s32.totalorder %s8584_s6, %s8637_s4 }
 0x44f   : > { %p5187_p10 = scmp.lt.s32.totalorder %s5185_s14, %s5181_s11 }
 0x450   : > { %p5183_p7 = pnand %p5182_p4, %p5295_p5 }
 0x451   : > { %p5188_p11 = por %p5187_p10, %p5186_p9 }
 0x452   : > { %p5184_p8 = pneg %p5183_p7 }
 0x454   : > { %p5189_p12 = pnand %p5188_p11, %p5184_p8 }
 0x456   : > { %5192 = shalt.err (!%p5189_p12)
}
 0x457   : > { %s5230_s23 = smov 128   ;;  %s5231_s27 = smov 8  }
 0x458   : > { %4612 = dma.vmem_to_hbm [thread:$0]  (%p5295_p5), %s8586_s29, 8192, %s8584_s6, %s8593_s19, %s5230_s23, %s5230_s23, %s5231_s27  }
 0x459 PF: > { %p4618_p13 = scmp.ge.s32.totalorder %s5227_s18, 2  ;;  %s4164_s28 = sand.u32 1, %s5215_s15  }
 0x45a   : > { %s4165_s30 = scalar_lea.sflag [#allocation3], %s4164_s28 }
 0x45b   : > { %p4615_p0 = pnand %p4618_p13, %p5299_p6 }
 0x45d   : > { %p4616_p1 = pneg %p4615_p0 }
 0x45f   : > { %5210 = dma.done.wait (%p4616_p1), %s4165_s30, 8192  }
 0x460   : > { %5212 = vsyncadd (%p4616_p1), %s4165_s30, 4294959104  ;;  %p14_p2 = scmp.ge.s32.totalorder %s5282_s21, 4   ;;  %s8925_s15 = smov %s5219_s16 }
 0x461   : > { %s8926_s16 = smov %s5223_s17  ;;  %s8927_s17 = smov %s5293_s24 }
 0x462   : > { %s8928_s18 = smov %s5282_s21  ;;  %16 = sbr.rel (!%p14_p2) target bundleno = 3 (0x3), region = 71 }
 0x467   :  { %4170 = vsyncpa [#allocation3], 1 }
 0x468   :  { %4172 = vsyncpa [#allocation3 + $0x1], 1 }

</bundles_post_ra>
